<compile_context>
chip_gen: v5e
topology: v5e:2x2
jax: 0.10.0
libtpu: 0.0.40
codegen_flags: <defaults>
</compile_context>

<pallas_src>
import functools

import numpy as np
import jax
import jax.numpy as jnp
from jax.experimental import pallas as pl
from jax.experimental.pallas import tpu as pltpu


# ----------------------------------------------------------------------------
# Fused kernel: one batch element per grid step.
# ----------------------------------------------------------------------------
def _hapnet_kernel(x_ref,
                   wqkva_ref, bqkva_ref,
                   wg1_ref, bg1_ref, wg2_ref, bg2_ref,
                   w17_ref, b17_ref, w71_ref, b71_ref, w33_ref, b33_ref,
                   out_ref,
                   xpad_ref, pad71_ref,
                   *, H, W, C, mm_dtype, exact_recip):
    """x_ref   : (1, H, W, C)  un-padded channels-last input block, f32.
    out_ref : (1, C, H*W)    fused result, lane-dense (N on lanes), f32.
    xpad_ref: (H+6, W+6, C)  f32 scratch, zero-padded copy of the input.
    pad71_ref:(H+6, W, C)    f32 scratch, H-padded (7,1)-conv input.
    Packed weights (built in the wrapper, mm_dtype):
      qkva 1x1 -> (C, 4C); gate 1x1 -> (C, C//8) / (C//8, C);
      (1,7)/(7,1) -> (7C, C); 3x3 -> (9C, C) (tap-major rows). Biases f32 (1,X).
    """
    N = H * W
    f32 = jnp.float32

    def mm(a, w_ref):
        # Feed the MXU in mm_dtype (one cast per packed LHS), accumulate in f32.
        return jax.lax.dot_general(
            a.astype(mm_dtype), w_ref[...],
            (((1,), (0,)), ((), ())), preferred_element_type=f32)

    # ---- in-kernel zero-pad: halos re-zeroed every step (required for
    #      correctness under megacore grid sharding), interior overwritten.
    x = x_ref[0]                                          # (H, W, C) f32
    xpad_ref[0:3, :, :] = jnp.zeros((3, W + 6, C), f32)
    xpad_ref[3 + H:H + 6, :, :] = jnp.zeros((3, W + 6, C), f32)
    xpad_ref[3:3 + H, 0:3, :] = jnp.zeros((H, 3, C), f32)
    xpad_ref[3:3 + H, 3 + W:W + 6, :] = jnp.zeros((H, 3, C), f32)
    xpad_ref[3:3 + H, 3:3 + W, :] = x

    x_flat = x.reshape(N, C)                              # (N, C) f32

    # ---- global branch: avgpool(1) -> 1x1 -> relu -> 1x1 -> sigmoid --------
    mean = jnp.mean(x_flat, axis=0, keepdims=True)                 # (1, C)
    g1 = jnp.maximum(mm(mean, wg1_ref) + bg1_ref[...], 0.0)        # (1, C//8)
    gate = jax.nn.sigmoid(mm(g1, wg2_ref) + bg2_ref[...])          # (1, C)

    # ---- anchored self-attention: fused QKVA 1x1 projection (one matmul) ---
    qkva = mm(x_flat, wqkva_ref) + bqkva_ref[...]                  # (N, 4C) f32
    q = qkva[:, 0 * C:1 * C]
    k = qkva[:, 1 * C:2 * C]
    v = qkva[:, 2 * C:3 * C]
    anchor = qkva[:, 3 * C:4 * C]

    # TODO(synk): for N >~ 2048 add a query-tile grid axis with online softmax
    # (flash-style m/l/acc scratch) so the (N, N) scores stay inside VMEM
    # (v7x: 64 MiB) and both v7x TensorCores stay busy at B=1.
    s = jax.lax.dot_general(q.astype(mm_dtype), k.astype(mm_dtype),
                            (((1,), (1,)), ((), ())),
                            preferred_element_type=f32)            # (N, N)
    s = s - jnp.max(s, axis=-1, keepdims=True)
    p = jnp.exp(s)
    l = jnp.sum(p, axis=-1, keepdims=True)                         # (N, 1)
    pv = jax.lax.dot_general(p.astype(mm_dtype), v.astype(mm_dtype),
                             (((1,), (0,)), ((), ())),
                             preferred_element_type=f32)           # (N, C)
    if exact_recip:
        attended = pv / l                     # exact divide for the f32 check
    else:
        attended = pv * pl.reciprocal(l, approx=True)   # EUP, folded in (N, C)

    # ---- spectral branch: (1,7) conv -> relu -> (7,1) conv -> sigmoid ------
    # Taps are static Ref slices of the pad scratch (no materialized padded
    # value); lane-concatenated so each conv is ONE matmul of depth 7C.
    # TODO(synk): keep the pad scratches in bf16 (halves concat/relayout bytes)
    # once unaligned packed-sublane ref stores are verified on all target gens.
    lhs17 = jnp.concatenate(
        [xpad_ref[3:3 + H, t:t + W, :] for t in range(7)],
        axis=-1).reshape(N, 7 * C)
    t1 = jnp.maximum(mm(lhs17, w17_ref) + b17_ref[...], 0.0)       # (N, C)

    pad71_ref[0:3, :, :] = jnp.zeros((3, W, C), f32)
    pad71_ref[3 + H:H + 6, :, :] = jnp.zeros((3, W, C), f32)
    pad71_ref[3:3 + H, :, :] = t1.reshape(H, W, C)
    lhs71 = jnp.concatenate(
        [pad71_ref[t:t + H, :, :] for t in range(7)],
        axis=-1).reshape(N, 7 * C)
    spectral = jax.nn.sigmoid(mm(lhs71, w71_ref) + b71_ref[...])   # (N, C)

    # ---- local branch: 3x3 conv -> relu (9 taps packed, depth 9C) ----------
    # TODO(synk): on v5e, 9C just above a 128 multiple wastes an MXU K-slab;
    # consider an 8-tap packed matmul + one rank-C update for such C.
    lhs33 = jnp.concatenate(
        [xpad_ref[2 + kh:2 + kh + H, 2 + kw:2 + kw + W, :]
         for kh in range(3) for kw in range(3)],
        axis=-1).reshape(N, 9 * C)
    loc = jnp.maximum(mm(lhs33, w33_ref) + b33_ref[...], 0.0)      # (N, C)

    # ---- fused combine, factored: x*(g + s + 1) + local + attended + anchor
    out_nc = x_flat * (gate + spectral + 1.0) + loc + attended + anchor

    # ---- lane-dense store: (N, C) -> (C, N) so the last (lane) dim is N
    # (unmasked vst) and the wrapper NHWC->NCHW HBM round trip disappears.
    # The transpose rides the MXU via a CxC identity (contraction over the
    # small C axis, cost C*N*C MACs -- negligible); an XLU transpose would
    # also work but this form is guaranteed to lower on every generation.
    rows = jax.lax.broadcasted_iota(jnp.int32, (C, C), 0)
    cols = jax.lax.broadcasted_iota(jnp.int32, (C, C), 1)
    eye_c = (rows == cols).astype(f32)
    out_ref[0] = jax.lax.dot_general(eye_c, out_nc,
                                     (((1,), (1,)), ((), ())),
                                     preferred_element_type=f32)   # (C, N)


# ----------------------------------------------------------------------------
# Wrapper: NCHW in / NCHW out, matching HierarchicalAttentionModule.forward.
# ----------------------------------------------------------------------------
def hierarchical_attention_forward(x_nchw, p, *, mm_dtype=jnp.bfloat16):
    B, C, H, W = x_nchw.shape
    N = H * W
    Cr = p['wg1'].shape[0]            # C // 8
    f32 = jnp.float32
    exact_recip = np.dtype(mm_dtype) == np.dtype(np.float32)

    # TODO(synk): fold this NCHW->NHWC transpose into the kernel too (the
    # output-side transpose is already in-kernel); needs an in-kernel relayout
    # of a (C, H*W) input block into (H*W, C).
    x_nhwc = jnp.transpose(x_nchw, (0, 2, 3, 1)).astype(f32)      # (B, H, W, C)

    def w1x1(w):                      # (O, I, 1, 1) -> (I, O)
        return jnp.transpose(w[:, :, 0, 0], (1, 0)).astype(mm_dtype)

    def b_row(b):                     # (O,) -> (1, O), kept in f32
        return b.reshape(1, -1).astype(f32)

    # Fused QKVA projection: (C, 4C) / (1, 4C), lane-order [q | k | v | anchor].
    w_qkva = jnp.concatenate(
        [w1x1(p['wq']), w1x1(p['wk']), w1x1(p['wv']), w1x1(p['wa'])], axis=1)
    b_qkva = jnp.concatenate(
        [b_row(p['bq']), b_row(p['bk']), b_row(p['bv']), b_row(p['ba'])], axis=1)

    # Packed conv weights: rows tap-major / input-channel-minor to line up with
    # the lane-concatenated shifted views built inside the kernel.
    w17_p = jnp.transpose(p['w17'][:, :, 0, :], (2, 1, 0)).reshape(7 * C, C).astype(mm_dtype)
    w71_p = jnp.transpose(p['w71'][:, :, :, 0], (2, 1, 0)).reshape(7 * C, C).astype(mm_dtype)
    w33_p = jnp.transpose(p['w33'], (2, 3, 1, 0)).reshape(9 * C, C).astype(mm_dtype)

    def full(shape):                  # whole-array block, constant index map
        n = len(shape)
        return pl.BlockSpec(shape, lambda b, _n=n: (0,) * _n)
    # TODO(synk): at production C, single-buffer these constant weight blocks
    # (pipeline_mode=pl.Buffered(1)) to halve their VMEM footprint on v7x.

    out_cn = pl.pallas_call(
        functools.partial(_hapnet_kernel, H=H, W=W, C=C,
                          mm_dtype=mm_dtype, exact_recip=exact_recip),
        out_shape=jax.ShapeDtypeStruct((B, C, N), f32),
        grid_spec=pltpu.PrefetchScalarGridSpec(
            num_scalar_prefetch=0,
            grid=(B,),
            in_specs=[
                pl.BlockSpec((1, H, W, C), lambda b: (b, 0, 0, 0)),
                full((C, 4 * C)), full((1, 4 * C)),   # fused q|k|v|anchor
                full((C, Cr)), full((1, Cr)),         # gate fc1
                full((Cr, C)), full((1, C)),          # gate fc2
                full((7 * C, C)), full((1, C)),       # (1,7) conv (packed)
                full((7 * C, C)), full((1, C)),       # (7,1) conv (packed)
                full((9 * C, C)), full((1, C)),       # 3x3 conv (packed)
            ],
            out_specs=pl.BlockSpec((1, C, N), lambda b: (b, 0, 0)),
            scratch_shapes=[pltpu.VMEM((H + 6, W + 6, C), f32),
                            pltpu.VMEM((H + 6, W, C), f32)],
        ),
        compiler_params=pltpu.CompilerParams(
            dimension_semantics=("parallel",),
            # 48 MiB: above the 32 MiB scoped default on v5e/v6e (128 MiB
            # physical), still under v7x's 64 MiB physical VMEM.
            vmem_limit_bytes=48 * 1024 * 1024),
    )(x_nhwc,
      w_qkva, b_qkva,
      w1x1(p['wg1']), b_row(p['bg1']), w1x1(p['wg2']), b_row(p['bg2']),
      w17_p, b_row(p['b17']), w71_p, b_row(p['b71']), w33_p, b_row(p['b33']))

    # Lane-dense (B, C, N) -> NCHW is a free reshape (no transpose round trip).
    return out_cn.reshape(B, C, H, W)


# ----------------------------------------------------------------------------
# Pure-JAX reference (mirrors PyTorch semantics, NCHW / OIHW, f32)
# ----------------------------------------------------------------------------
def ref_forward(x, p):
    B, C, H, W = x.shape
    N = H * W
    dn = ('NCHW', 'OIHW', 'NCHW')
    hi = jax.lax.Precision.HIGHEST

    def conv(inp, w, b, pad):
        y = jax.lax.conv_general_dilated(inp, w, (1, 1), pad,
                                         dimension_numbers=dn, precision=hi)
        return y + b.reshape(1, -1, 1, 1)

    g = jnp.mean(x, axis=(2, 3), keepdims=True)
    g = jax.nn.relu(conv(g, p['wg1'], p['bg1'], ((0, 0), (0, 0))))
    g = jax.nn.sigmoid(conv(g, p['wg2'], p['bg2'], ((0, 0), (0, 0))))

    s = jax.nn.relu(conv(x, p['w17'], p['b17'], ((0, 0), (3, 3))))
    s = jax.nn.sigmoid(conv(s, p['w71'], p['b71'], ((3, 3), (0, 0))))

    l = jax.nn.relu(conv(x, p['w33'], p['b33'], ((1, 1), (1, 1))))

    q = conv(x, p['wq'], p['bq'], ((0, 0), (0, 0))).reshape(B, C, N)
    k = conv(x, p['wk'], p['bk'], ((0, 0), (0, 0))).reshape(B, C, N)
    v = conv(x, p['wv'], p['bv'], ((0, 0), (0, 0))).reshape(B, C, N)
    a = conv(x, p['wa'], p['ba'], ((0, 0), (0, 0)))
    attw = jax.nn.softmax(jnp.einsum('bcn,bcm->bnm', q, k, precision=hi), axis=-1)
    attended = jnp.einsum('bnm,bcm->bnc', attw, v, precision=hi)
    attended = jnp.transpose(attended, (0, 2, 1)).reshape(B, C, H, W)
    asa = x + attended + a

    return x * g + x * s + l + asa


if __name__ == "__main__":
    B, C, H, W = 2, 16, 16, 16          # C must be >= 8 so that C // 8 >= 1
    key = jax.random.PRNGKey(0)
    ks = jax.random.split(key, 20)

    def conv_params(kw, kb, shape):
        return (0.1 * jax.random.normal(kw, shape, jnp.float32),
                0.05 * jax.random.normal(kb, (shape[0],), jnp.float32))

    p = {}
    p['wq'], p['bq'] = conv_params(ks[0], ks[1], (C, C, 1, 1))
    p['wk'], p['bk'] = conv_params(ks[2], ks[3], (C, C, 1, 1))
    p['wv'], p['bv'] = conv_params(ks[4], ks[5], (C, C, 1, 1))
    p['wa'], p['ba'] = conv_params(ks[6], ks[7], (C, C, 1, 1))
    p['wg1'], p['bg1'] = conv_params(ks[8], ks[9], (C // 8, C, 1, 1))
    p['wg2'], p['bg2'] = conv_params(ks[10], ks[11], (C, C // 8, 1, 1))
    p['w17'], p['b17'] = conv_params(ks[12], ks[13], (C, C, 1, 7))
    p['w71'], p['b71'] = conv_params(ks[14], ks[15], (C, C, 7, 1))
    p['w33'], p['b33'] = conv_params(ks[16], ks[17], (C, C, 3, 3))

    x = jax.random.normal(ks[18], (B, C, H, W), jnp.float32)

    ref = jax.block_until_ready(ref_forward(x, p))

    # f32 MXU-operand path (exact softmax divide): tight check of fused math.
    out_f32 = jax.block_until_ready(
        hierarchical_attention_forward(x, p, mm_dtype=jnp.float32))
    assert out_f32.shape == x.shape
    err_f32 = float(jnp.max(jnp.abs(out_f32 - ref)))
    assert err_f32 < 2e-2, err_f32

    # bf16 MXU-operand fast path: looser tolerance for bf16 input rounding.
    out_bf16 = jax.block_until_ready(hierarchical_attention_forward(x, p))
    assert out_bf16.shape == x.shape
    err_bf16 = float(jnp.max(jnp.abs(out_bf16 - ref)))
    assert err_bf16 < 6e-2, err_bf16

    print("KERNEL_OK")
</pallas_src>

<mosaic_0001>
module attributes {stable_mosaic.version = 11 : i64} {
  func.func @_hapnet_kernel(%arg0: i32, %arg1: memref<1x16x16x16xf32, #tpu.memory_space<vmem>>, %arg2: memref<16x64xf32, #tpu.memory_space<vmem>>, %arg3: memref<1x64xf32, #tpu.memory_space<vmem>>, %arg4: memref<16x2xf32, #tpu.memory_space<vmem>>, %arg5: memref<1x2xf32, #tpu.memory_space<vmem>>, %arg6: memref<2x16xf32, #tpu.memory_space<vmem>>, %arg7: memref<1x16xf32, #tpu.memory_space<vmem>>, %arg8: memref<112x16xf32, #tpu.memory_space<vmem>>, %arg9: memref<1x16xf32, #tpu.memory_space<vmem>>, %arg10: memref<112x16xf32, #tpu.memory_space<vmem>>, %arg11: memref<1x16xf32, #tpu.memory_space<vmem>>, %arg12: memref<144x16xf32, #tpu.memory_space<vmem>>, %arg13: memref<1x16xf32, #tpu.memory_space<vmem>>, %arg14: memref<1x16x256xf32, #tpu.memory_space<vmem>>, %arg15: memref<22x22x16xf32, #tpu.memory_space<vmem>>, %arg16: memref<22x16x16xf32, #tpu.memory_space<vmem>>) attributes {dimension_semantics = [#tpu.dimension_semantics<parallel>], iteration_bounds = array<i64: 2>, scalar_prefetch = 0 : i64, scratch_operands = 2 : i64, tpu.core_type = #tpu.core_type<tc>, window_params = [{transform_indices = @transform_0, window_bounds = array<i64: 1, 16, 16, 16>}, {pipeline_mode = #tpu.pipeline_mode<synchronous>, transform_indices = @transform_1, window_bounds = array<i64: 16, 64>}, {pipeline_mode = #tpu.pipeline_mode<synchronous>, transform_indices = @transform_2, window_bounds = array<i64: 1, 64>}, {pipeline_mode = #tpu.pipeline_mode<synchronous>, transform_indices = @transform_3, window_bounds = array<i64: 16, 2>}, {pipeline_mode = #tpu.pipeline_mode<synchronous>, transform_indices = @transform_4, window_bounds = array<i64: 1, 2>}, {pipeline_mode = #tpu.pipeline_mode<synchronous>, transform_indices = @transform_5, window_bounds = array<i64: 2, 16>}, {pipeline_mode = #tpu.pipeline_mode<synchronous>, transform_indices = @transform_6, window_bounds = array<i64: 1, 16>}, {pipeline_mode = #tpu.pipeline_mode<synchronous>, transform_indices = @transform_7, window_bounds = array<i64: 112, 16>}, {pipeline_mode = #tpu.pipeline_mode<synchronous>, transform_indices = @transform_8, window_bounds = array<i64: 1, 16>}, {pipeline_mode = #tpu.pipeline_mode<synchronous>, transform_indices = @transform_9, window_bounds = array<i64: 112, 16>}, {pipeline_mode = #tpu.pipeline_mode<synchronous>, transform_indices = @transform_10, window_bounds = array<i64: 1, 16>}, {pipeline_mode = #tpu.pipeline_mode<synchronous>, transform_indices = @transform_11, window_bounds = array<i64: 144, 16>}, {pipeline_mode = #tpu.pipeline_mode<synchronous>, transform_indices = @transform_12, window_bounds = array<i64: 1, 16>}, {transform_indices = @transform_13, window_bounds = array<i64: 1, 16, 256>}]} {
    %c0 = arith.constant 0 : index
    %c0_0 = arith.constant 0 : index
    %c0_1 = arith.constant 0 : index
    %c0_2 = arith.constant 0 : index
    %0 = vector.load %arg1[%c0, %c0_0, %c0_1, %c0_2] : memref<1x16x16x16xf32, #tpu.memory_space<vmem>>, vector<1x16x16x16xf32>
    %1 = vector.shape_cast %0 : vector<1x16x16x16xf32> to vector<16x16x16xf32>
    %cst = arith.constant 0.000000e+00 : f32
    %2 = vector.broadcast %cst : f32 to vector<3x22x16xf32>
    %c0_3 = arith.constant 0 : index
    %c0_4 = arith.constant 0 : index
    %c0_5 = arith.constant 0 : index
    %3 = vector.load %arg15[%c0_3, %c0_4, %c0_5] : memref<22x22x16xf32, #tpu.memory_space<vmem>>, vector<3x22x16xf32>
    tpu.vector_store %arg15[%c0_3, %c0_4, %c0_5], %2 {strides = array<i32>} : memref<22x22x16xf32, #tpu.memory_space<vmem>>, vector<3x22x16xf32>,
    %cst_6 = arith.constant 0.000000e+00 : f32
    %4 = vector.broadcast %cst_6 : f32 to vector<3x22x16xf32>
    %c19 = arith.constant 19 : index
    %c0_7 = arith.constant 0 : index
    %c0_8 = arith.constant 0 : index
    %5 = vector.load %arg15[%c19, %c0_7, %c0_8] : memref<22x22x16xf32, #tpu.memory_space<vmem>>, vector<3x22x16xf32>
    tpu.vector_store %arg15[%c19, %c0_7, %c0_8], %4 {strides = array<i32>} : memref<22x22x16xf32, #tpu.memory_space<vmem>>, vector<3x22x16xf32>,
    %cst_9 = arith.constant 0.000000e+00 : f32
    %6 = vector.broadcast %cst_9 : f32 to vector<16x3x16xf32>
    %c3 = arith.constant 3 : index
    %c0_10 = arith.constant 0 : index
    %c0_11 = arith.constant 0 : index
    %7 = vector.load %arg15[%c3, %c0_10, %c0_11] : memref<22x22x16xf32, #tpu.memory_space<vmem>>, vector<16x3x16xf32>
    tpu.vector_store %arg15[%c3, %c0_10, %c0_11], %6 {strides = array<i32>} : memref<22x22x16xf32, #tpu.memory_space<vmem>>, vector<16x3x16xf32>,
    %cst_12 = arith.constant 0.000000e+00 : f32
    %8 = vector.broadcast %cst_12 : f32 to vector<16x3x16xf32>
    %c3_13 = arith.constant 3 : index
    %c19_14 = arith.constant 19 : index
    %c0_15 = arith.constant 0 : index
    %9 = vector.load %arg15[%c3_13, %c19_14, %c0_15] : memref<22x22x16xf32, #tpu.memory_space<vmem>>, vector<16x3x16xf32>
    tpu.vector_store %arg15[%c3_13, %c19_14, %c0_15], %8 {strides = array<i32>} : memref<22x22x16xf32, #tpu.memory_space<vmem>>, vector<16x3x16xf32>,
    %c3_16 = arith.constant 3 : index
    %c3_17 = arith.constant 3 : index
    %c0_18 = arith.constant 0 : index
    %10 = vector.load %arg15[%c3_16, %c3_17, %c0_18] : memref<22x22x16xf32, #tpu.memory_space<vmem>>, vector<16x16x16xf32>
    tpu.vector_store %arg15[%c3_16, %c3_17, %c0_18], %1 {strides = array<i32>} : memref<22x22x16xf32, #tpu.memory_space<vmem>>, vector<16x16x16xf32>,
    %11 = vector.shape_cast %1 : vector<16x16x16xf32> to vector<256x16xf32>
    %cst_19 = arith.constant dense<0.000000e+00> : vector<16xf32>
    %12 = vector.multi_reduction <add>, %11, %cst_19 [0] : vector<256x16xf32> to vector<16xf32>
    %13 = vector.shape_cast %12 : vector<16xf32> to vector<1x16xf32>
    %cst_20 = arith.constant 2.560000e+02 : f32
    %14 = vector.broadcast %cst_20 : f32 to vector<1x16xf32>
    %15 = arith.divf %13, %14 : vector<1x16xf32>
    %c0_21 = arith.constant 0 : index
    %c0_22 = arith.constant 0 : index
    %16 = vector.load %arg4[%c0_21, %c0_22] : memref<16x2xf32, #tpu.memory_space<vmem>>, vector<16x2xf32>
    %cst_23 = arith.constant dense<0.000000e+00> : vector<1x2xf32>
    %17 = tpu.matmul %15, %16, %cst_23 {dimension_numbers = #tpu.dot_dimension_numbers<[1], [0], [0], [1], [0, 0, 1, 1], [], []>} : vector<1x16xf32>, vector<16x2xf32>, vector<1x2xf32> -> vector<1x2xf32>
    %c0_24 = arith.constant 0 : index
    %c0_25 = arith.constant 0 : index
    %18 = vector.load %arg5[%c0_24, %c0_25] : memref<1x2xf32, #tpu.memory_space<vmem>>, vector<1x2xf32>
    %19 = arith.addf %17, %18 : vector<1x2xf32>
    %cst_26 = arith.constant 0.000000e+00 : f32
    %20 = vector.broadcast %cst_26 : f32 to vector<1x2xf32>
    %21 = arith.maximumf %19, %20 : vector<1x2xf32>
    %c0_27 = arith.constant 0 : index
    %c0_28 = arith.constant 0 : index
    %22 = vector.load %arg6[%c0_27, %c0_28] : memref<2x16xf32, #tpu.memory_space<vmem>>, vector<2x16xf32>
    %cst_29 = arith.constant dense<0.000000e+00> : vector<1x16xf32>
    %23 = tpu.matmul %21, %22, %cst_29 {dimension_numbers = #tpu.dot_dimension_numbers<[1], [0], [0], [1], [0, 0, 1, 1], [], []>} : vector<1x2xf32>, vector<2x16xf32>, vector<1x16xf32> -> vector<1x16xf32>
    %c0_30 = arith.constant 0 : index
    %c0_31 = arith.constant 0 : index
    %24 = vector.load %arg7[%c0_30, %c0_31] : memref<1x16xf32, #tpu.memory_space<vmem>>, vector<1x16xf32>
    %25 = arith.addf %23, %24 : vector<1x16xf32>
    %26 = arith.negf %25 : vector<1x16xf32>
    %27 = math.exp %26 : vector<1x16xf32>
    %cst_32 = arith.constant 1.000000e+00 : f32
    %28 = vector.broadcast %cst_32 : f32 to vector<1x16xf32>
    %29 = arith.addf %28, %27 : vector<1x16xf32>
    %30 = arith.divf %28, %29 : vector<1x16xf32>
    %c0_33 = arith.constant 0 : index
    %c0_34 = arith.constant 0 : index
    %31 = vector.load %arg2[%c0_33, %c0_34] : memref<16x64xf32, #tpu.memory_space<vmem>>, vector<16x64xf32>
    %cst_35 = arith.constant dense<0.000000e+00> : vector<256x64xf32>
    %32 = tpu.matmul %11, %31, %cst_35 {dimension_numbers = #tpu.dot_dimension_numbers<[1], [0], [0], [1], [0, 0, 1, 1], [], []>} : vector<256x16xf32>, vector<16x64xf32>, vector<256x64xf32> -> vector<256x64xf32>
    %c0_36 = arith.constant 0 : index
    %c0_37 = arith.constant 0 : index
    %33 = vector.load %arg3[%c0_36, %c0_37] : memref<1x64xf32, #tpu.memory_space<vmem>>, vector<1x64xf32>
    %34 = vector.broadcast %33 : vector<1x64xf32> to vector<256x64xf32>
    %35 = arith.addf %32, %34 : vector<256x64xf32>
    %36 = vector.extract_strided_slice %35 {offsets = [0, 0], sizes = [256, 16], strides = [1, 1]} : vector<256x64xf32> to vector<256x16xf32>
    %37 = vector.extract_strided_slice %35 {offsets = [0, 16], sizes = [256, 16], strides = [1, 1]} : vector<256x64xf32> to vector<256x16xf32>
    %38 = vector.extract_strided_slice %35 {offsets = [0, 32], sizes = [256, 16], strides = [1, 1]} : vector<256x64xf32> to vector<256x16xf32>
    %39 = vector.extract_strided_slice %35 {offsets = [0, 48], sizes = [256, 16], strides = [1, 1]} : vector<256x64xf32> to vector<256x16xf32>
    %cst_38 = arith.constant dense<0.000000e+00> : vector<256x256xf32>
    %40 = tpu.matmul %36, %37, %cst_38 {dimension_numbers = #tpu.dot_dimension_numbers<[1], [1], [0], [0], [0, 0, 1, 0], [], []>} : vector<256x16xf32>, vector<256x16xf32>, vector<256x256xf32> -> vector<256x256xf32>
    %cst_39 = arith.constant dense<0xFF800000> : vector<256xf32>
    %41 = vector.multi_reduction <maximumf>, %40, %cst_39 [1] : vector<256x256xf32> to vector<256xf32>
    %42 = vector.shape_cast %41 : vector<256xf32> to vector<256x1xf32>
    %43 = vector.broadcast %42 : vector<256x1xf32> to vector<256x256xf32>
    %44 = arith.subf %40, %43 : vector<256x256xf32>
    %45 = math.exp %44 : vector<256x256xf32>
    %cst_40 = arith.constant dense<0.000000e+00> : vector<256xf32>
    %46 = vector.multi_reduction <add>, %45, %cst_40 [1] : vector<256x256xf32> to vector<256xf32>
    %47 = vector.shape_cast %46 : vector<256xf32> to vector<256x1xf32>
    %cst_41 = arith.constant dense<0.000000e+00> : vector<256x16xf32>
    %48 = tpu.matmul %45, %38, %cst_41 {dimension_numbers = #tpu.dot_dimension_numbers<[1], [0], [0], [1], [0, 0, 1, 1], [], []>} : vector<256x256xf32>, vector<256x16xf32>, vector<256x16xf32> -> vector<256x16xf32>
    %49 = vector.broadcast %47 : vector<256x1xf32> to vector<256x16xf32>
    %50 = arith.divf %48, %49 : vector<256x16xf32>
    %c3_42 = arith.constant 3 : index
    %c0_43 = arith.constant 0 : index
    %c0_44 = arith.constant 0 : index
    %51 = vector.load %arg15[%c3_42, %c0_43, %c0_44] : memref<22x22x16xf32, #tpu.memory_space<vmem>>, vector<16x16x16xf32>
    %c3_45 = arith.constant 3 : index
    %c1 = arith.constant 1 : index
    %c0_46 = arith.constant 0 : index
    %52 = vector.load %arg15[%c3_45, %c1, %c0_46] : memref<22x22x16xf32, #tpu.memory_space<vmem>>, vector<16x16x16xf32>
    %c3_47 = arith.constant 3 : index
    %c2 = arith.constant 2 : index
    %c0_48 = arith.constant 0 : index
    %53 = vector.load %arg15[%c3_47, %c2, %c0_48] : memref<22x22x16xf32, #tpu.memory_space<vmem>>, vector<16x16x16xf32>
    %c3_49 = arith.constant 3 : index
    %c3_50 = arith.constant 3 : index
    %c0_51 = arith.constant 0 : index
    %54 = vector.load %arg15[%c3_49, %c3_50, %c0_51] : memref<22x22x16xf32, #tpu.memory_space<vmem>>, vector<16x16x16xf32>
    %c3_52 = arith.constant 3 : index
    %c4 = arith.constant 4 : index
    %c0_53 = arith.constant 0 : index
    %55 = vector.load %arg15[%c3_52, %c4, %c0_53] : memref<22x22x16xf32, #tpu.memory_space<vmem>>, vector<16x16x16xf32>
    %c3_54 = arith.constant 3 : index
    %c5 = arith.constant 5 : index
    %c0_55 = arith.constant 0 : index
    %56 = vector.load %arg15[%c3_54, %c5, %c0_55] : memref<22x22x16xf32, #tpu.memory_space<vmem>>, vector<16x16x16xf32>
    %c3_56 = arith.constant 3 : index
    %c6 = arith.constant 6 : index
    %c0_57 = arith.constant 0 : index
    %57 = vector.load %arg15[%c3_56, %c6, %c0_57] : memref<22x22x16xf32, #tpu.memory_space<vmem>>, vector<16x16x16xf32>
    %58 = tpu.concatenate %51, %52, %53, %54, %55, %56, %57 in 2 : vector<16x16x16xf32>, vector<16x16x16xf32>, vector<16x16x16xf32>, vector<16x16x16xf32>, vector<16x16x16xf32>, vector<16x16x16xf32>, vector<16x16x16xf32> -> vector<16x16x112xf32>
    %59 = vector.shape_cast %58 : vector<16x16x112xf32> to vector<256x112xf32>
    %c0_58 = arith.constant 0 : index
    %c0_59 = arith.constant 0 : index
    %60 = vector.load %arg8[%c0_58, %c0_59] : memref<112x16xf32, #tpu.memory_space<vmem>>, vector<112x16xf32>
    %cst_60 = arith.constant dense<0.000000e+00> : vector<256x16xf32>
    %61 = tpu.matmul %59, %60, %cst_60 {dimension_numbers = #tpu.dot_dimension_numbers<[1], [0], [0], [1], [0, 0, 1, 1], [], []>} : vector<256x112xf32>, vector<112x16xf32>, vector<256x16xf32> -> vector<256x16xf32>
    %c0_61 = arith.constant 0 : index
    %c0_62 = arith.constant 0 : index
    %62 = vector.load %arg9[%c0_61, %c0_62] : memref<1x16xf32, #tpu.memory_space<vmem>>, vector<1x16xf32>
    %63 = vector.broadcast %62 : vector<1x16xf32> to vector<256x16xf32>
    %64 = arith.addf %61, %63 : vector<256x16xf32>
    %cst_63 = arith.constant 0.000000e+00 : f32
    %65 = vector.broadcast %cst_63 : f32 to vector<256x16xf32>
    %66 = arith.maximumf %64, %65 : vector<256x16xf32>
    %cst_64 = arith.constant 0.000000e+00 : f32
    %67 = vector.broadcast %cst_64 : f32 to vector<3x16x16xf32>
    %c0_65 = arith.constant 0 : index
    %c0_66 = arith.constant 0 : index
    %c0_67 = arith.constant 0 : index
    %68 = vector.load %arg16[%c0_65, %c0_66, %c0_67] : memref<22x16x16xf32, #tpu.memory_space<vmem>>, vector<3x16x16xf32>
    tpu.vector_store %arg16[%c0_65, %c0_66, %c0_67], %67 {strides = array<i32>} : memref<22x16x16xf32, #tpu.memory_space<vmem>>, vector<3x16x16xf32>,
    %cst_68 = arith.constant 0.000000e+00 : f32
    %69 = vector.broadcast %cst_68 : f32 to vector<3x16x16xf32>
    %c19_69 = arith.constant 19 : index
    %c0_70 = arith.constant 0 : index
    %c0_71 = arith.constant 0 : index
    %70 = vector.load %arg16[%c19_69, %c0_70, %c0_71] : memref<22x16x16xf32, #tpu.memory_space<vmem>>, vector<3x16x16xf32>
    tpu.vector_store %arg16[%c19_69, %c0_70, %c0_71], %69 {strides = array<i32>} : memref<22x16x16xf32, #tpu.memory_space<vmem>>, vector<3x16x16xf32>,
    %71 = vector.shape_cast %66 : vector<256x16xf32> to vector<16x16x16xf32>
    %c3_72 = arith.constant 3 : index
    %c0_73 = arith.constant 0 : index
    %c0_74 = arith.constant 0 : index
    %72 = vector.load %arg16[%c3_72, %c0_73, %c0_74] : memref<22x16x16xf32, #tpu.memory_space<vmem>>, vector<16x16x16xf32>
    tpu.vector_store %arg16[%c3_72, %c0_73, %c0_74], %71 {strides = array<i32>} : memref<22x16x16xf32, #tpu.memory_space<vmem>>, vector<16x16x16xf32>,
    %c0_75 = arith.constant 0 : index
    %c0_76 = arith.constant 0 : index
    %c0_77 = arith.constant 0 : index
    %73 = vector.load %arg16[%c0_75, %c0_76, %c0_77] : memref<22x16x16xf32, #tpu.memory_space<vmem>>, vector<16x16x16xf32>
    %c1_78 = arith.constant 1 : index
    %c0_79 = arith.constant 0 : index
    %c0_80 = arith.constant 0 : index
    %74 = vector.load %arg16[%c1_78, %c0_79, %c0_80] : memref<22x16x16xf32, #tpu.memory_space<vmem>>, vector<16x16x16xf32>
    %c2_81 = arith.constant 2 : index
    %c0_82 = arith.constant 0 : index
    %c0_83 = arith.constant 0 : index
    %75 = vector.load %arg16[%c2_81, %c0_82, %c0_83] : memref<22x16x16xf32, #tpu.memory_space<vmem>>, vector<16x16x16xf32>
    %c3_84 = arith.constant 3 : index
    %c0_85 = arith.constant 0 : index
    %c0_86 = arith.constant 0 : index
    %76 = vector.load %arg16[%c3_84, %c0_85, %c0_86] : memref<22x16x16xf32, #tpu.memory_space<vmem>>, vector<16x16x16xf32>
    %c4_87 = arith.constant 4 : index
    %c0_88 = arith.constant 0 : index
    %c0_89 = arith.constant 0 : index
    %77 = vector.load %arg16[%c4_87, %c0_88, %c0_89] : memref<22x16x16xf32, #tpu.memory_space<vmem>>, vector<16x16x16xf32>
    %c5_90 = arith.constant 5 : index
    %c0_91 = arith.constant 0 : index
    %c0_92 = arith.constant 0 : index
    %78 = vector.load %arg16[%c5_90, %c0_91, %c0_92] : memref<22x16x16xf32, #tpu.memory_space<vmem>>, vector<16x16x16xf32>
    %c6_93 = arith.constant 6 : index
    %c0_94 = arith.constant 0 : index
    %c0_95 = arith.constant 0 : index
    %79 = vector.load %arg16[%c6_93, %c0_94, %c0_95] : memref<22x16x16xf32, #tpu.memory_space<vmem>>, vector<16x16x16xf32>
    %80 = tpu.concatenate %73, %74, %75, %76, %77, %78, %79 in 2 : vector<16x16x16xf32>, vector<16x16x16xf32>, vector<16x16x16xf32>, vector<16x16x16xf32>, vector<16x16x16xf32>, vector<16x16x16xf32>, vector<16x16x16xf32> -> vector<16x16x112xf32>
    %81 = vector.shape_cast %80 : vector<16x16x112xf32> to vector<256x112xf32>
    %c0_96 = arith.constant 0 : index
    %c0_97 = arith.constant 0 : index
    %82 = vector.load %arg10[%c0_96, %c0_97] : memref<112x16xf32, #tpu.memory_space<vmem>>, vector<112x16xf32>
    %cst_98 = arith.constant dense<0.000000e+00> : vector<256x16xf32>
    %83 = tpu.matmul %81, %82, %cst_98 {dimension_numbers = #tpu.dot_dimension_numbers<[1], [0], [0], [1], [0, 0, 1, 1], [], []>} : vector<256x112xf32>, vector<112x16xf32>, vector<256x16xf32> -> vector<256x16xf32>
    %c0_99 = arith.constant 0 : index
    %c0_100 = arith.constant 0 : index
    %84 = vector.load %arg11[%c0_99, %c0_100] : memref<1x16xf32, #tpu.memory_space<vmem>>, vector<1x16xf32>
    %85 = vector.broadcast %84 : vector<1x16xf32> to vector<256x16xf32>
    %86 = arith.addf %83, %85 : vector<256x16xf32>
    %87 = arith.negf %86 : vector<256x16xf32>
    %88 = math.exp %87 : vector<256x16xf32>
    %cst_101 = arith.constant 1.000000e+00 : f32
    %89 = vector.broadcast %cst_101 : f32 to vector<256x16xf32>
    %90 = arith.addf %89, %88 : vector<256x16xf32>
    %91 = arith.divf %89, %90 : vector<256x16xf32>
    %c2_102 = arith.constant 2 : index
    %c2_103 = arith.constant 2 : index
    %c0_104 = arith.constant 0 : index
    %92 = vector.load %arg15[%c2_102, %c2_103, %c0_104] : memref<22x22x16xf32, #tpu.memory_space<vmem>>, vector<16x16x16xf32>
    %c2_105 = arith.constant 2 : index
    %c3_106 = arith.constant 3 : index
    %c0_107 = arith.constant 0 : index
    %93 = vector.load %arg15[%c2_105, %c3_106, %c0_107] : memref<22x22x16xf32, #tpu.memory_space<vmem>>, vector<16x16x16xf32>
    %c2_108 = arith.constant 2 : index
    %c4_109 = arith.constant 4 : index
    %c0_110 = arith.constant 0 : index
    %94 = vector.load %arg15[%c2_108, %c4_109, %c0_110] : memref<22x22x16xf32, #tpu.memory_space<vmem>>, vector<16x16x16xf32>
    %c3_111 = arith.constant 3 : index
    %c2_112 = arith.constant 2 : index
    %c0_113 = arith.constant 0 : index
    %95 = vector.load %arg15[%c3_111, %c2_112, %c0_113] : memref<22x22x16xf32, #tpu.memory_space<vmem>>, vector<16x16x16xf32>
    %c3_114 = arith.constant 3 : index
    %c3_115 = arith.constant 3 : index
    %c0_116 = arith.constant 0 : index
    %96 = vector.load %arg15[%c3_114, %c3_115, %c0_116] : memref<22x22x16xf32, #tpu.memory_space<vmem>>, vector<16x16x16xf32>
    %c3_117 = arith.constant 3 : index
    %c4_118 = arith.constant 4 : index
    %c0_119 = arith.constant 0 : index
    %97 = vector.load %arg15[%c3_117, %c4_118, %c0_119] : memref<22x22x16xf32, #tpu.memory_space<vmem>>, vector<16x16x16xf32>
    %c4_120 = arith.constant 4 : index
    %c2_121 = arith.constant 2 : index
    %c0_122 = arith.constant 0 : index
    %98 = vector.load %arg15[%c4_120, %c2_121, %c0_122] : memref<22x22x16xf32, #tpu.memory_space<vmem>>, vector<16x16x16xf32>
    %c4_123 = arith.constant 4 : index
    %c3_124 = arith.constant 3 : index
    %c0_125 = arith.constant 0 : index
    %99 = vector.load %arg15[%c4_123, %c3_124, %c0_125] : memref<22x22x16xf32, #tpu.memory_space<vmem>>, vector<16x16x16xf32>
    %c4_126 = arith.constant 4 : index
    %c4_127 = arith.constant 4 : index
    %c0_128 = arith.constant 0 : index
    %100 = vector.load %arg15[%c4_126, %c4_127, %c0_128] : memref<22x22x16xf32, #tpu.memory_space<vmem>>, vector<16x16x16xf32>
    %101 = tpu.concatenate %92, %93, %94, %95, %96, %97, %98, %99, %100 in 2 : vector<16x16x16xf32>, vector<16x16x16xf32>, vector<16x16x16xf32>, vector<16x16x16xf32>, vector<16x16x16xf32>, vector<16x16x16xf32>, vector<16x16x16xf32>, vector<16x16x16xf32>, vector<16x16x16xf32> -> vector<16x16x144xf32>
    %102 = vector.shape_cast %101 : vector<16x16x144xf32> to vector<256x144xf32>
    %c0_129 = arith.constant 0 : index
    %c0_130 = arith.constant 0 : index
    %103 = vector.load %arg12[%c0_129, %c0_130] : memref<144x16xf32, #tpu.memory_space<vmem>>, vector<144x16xf32>
    %cst_131 = arith.constant dense<0.000000e+00> : vector<256x16xf32>
    %104 = tpu.matmul %102, %103, %cst_131 {dimension_numbers = #tpu.dot_dimension_numbers<[1], [0], [0], [1], [0, 0, 1, 1], [], []>} : vector<256x144xf32>, vector<144x16xf32>, vector<256x16xf32> -> vector<256x16xf32>
    %c0_132 = arith.constant 0 : index
    %c0_133 = arith.constant 0 : index
    %105 = vector.load %arg13[%c0_132, %c0_133] : memref<1x16xf32, #tpu.memory_space<vmem>>, vector<1x16xf32>
    %106 = vector.broadcast %105 : vector<1x16xf32> to vector<256x16xf32>
    %107 = arith.addf %104, %106 : vector<256x16xf32>
    %cst_134 = arith.constant 0.000000e+00 : f32
    %108 = vector.broadcast %cst_134 : f32 to vector<256x16xf32>
    %109 = arith.maximumf %107, %108 : vector<256x16xf32>
    %110 = vector.broadcast %30 : vector<1x16xf32> to vector<256x16xf32>
    %111 = arith.addf %110, %91 : vector<256x16xf32>
    %cst_135 = arith.constant 1.000000e+00 : f32
    %112 = vector.broadcast %cst_135 : f32 to vector<256x16xf32>
    %113 = arith.addf %111, %112 : vector<256x16xf32>
    %114 = arith.mulf %11, %113 : vector<256x16xf32>
    %115 = arith.addf %114, %109 : vector<256x16xf32>
    %116 = arith.addf %115, %50 : vector<256x16xf32>
    %117 = arith.addf %116, %39 : vector<256x16xf32>
    %118 = tpu.iota {dimensions = array<i32: 0>} : vector<16x16xi32>
    %119 = tpu.iota {dimensions = array<i32: 1>} : vector<16x16xi32>
    %120 = arith.cmpi eq, %118, %119 : vector<16x16xi32>
    %121 = arith.extui %120 : vector<16x16xi1> to vector<16x16xi32>
    %122 = arith.sitofp %121 : vector<16x16xi32> to vector<16x16xf32>
    %cst_136 = arith.constant dense<0.000000e+00> : vector<16x256xf32>
    %123 = tpu.matmul %122, %117, %cst_136 {dimension_numbers = #tpu.dot_dimension_numbers<[1], [1], [0], [0], [0, 0, 1, 0], [], []>} : vector<16x16xf32>, vector<256x16xf32>, vector<16x256xf32> -> vector<16x256xf32>
    %c0_137 = arith.constant 0 : index
    %c0_138 = arith.constant 0 : index
    %c0_139 = arith.constant 0 : index
    %124 = vector.load %arg14[%c0_137, %c0_138, %c0_139] : memref<1x16x256xf32, #tpu.memory_space<vmem>>, vector<1x16x256xf32>
    %125 = vector.shape_cast %124 : vector<1x16x256xf32> to vector<16x256xf32>
    %126 = vector.shape_cast %123 : vector<16x256xf32> to vector<1x16x256xf32>
    tpu.vector_store %arg14[%c0_137, %c0_138, %c0_139], %126 {strides = array<i32>} : memref<1x16x256xf32, #tpu.memory_space<vmem>>, vector<1x16x256xf32>,
    return
  }
  func.func @transform_0(%arg0: i32) -> (i32, i32, i32, i32) {
    %c0_i32 = arith.constant 0 : i32
    %c0_i32_0 = arith.constant 0 : i32
    %c0_i32_1 = arith.constant 0 : i32
    %c0_i32_2 = arith.constant 0 : i32
    return %arg0, %c0_i32, %c0_i32_0, %c0_i32_1 : i32, i32, i32, i32
  }
  func.func @transform_1(%arg0: i32) -> (i32, i32) {
    %c0_i32 = arith.constant 0 : i32
    %c0_i32_0 = arith.constant 0 : i32
    %c0_i32_1 = arith.constant 0 : i32
    return %c0_i32, %c0_i32_0 : i32, i32
  }
  func.func @transform_2(%arg0: i32) -> (i32, i32) {
    %c0_i32 = arith.constant 0 : i32
    %c0_i32_0 = arith.constant 0 : i32
    %c0_i32_1 = arith.constant 0 : i32
    return %c0_i32, %c0_i32_0 : i32, i32
  }
  func.func @transform_3(%arg0: i32) -> (i32, i32) {
    %c0_i32 = arith.constant 0 : i32
    %c0_i32_0 = arith.constant 0 : i32
    %c0_i32_1 = arith.constant 0 : i32
    return %c0_i32, %c0_i32_0 : i32, i32
  }
  func.func @transform_4(%arg0: i32) -> (i32, i32) {
    %c0_i32 = arith.constant 0 : i32
    %c0_i32_0 = arith.constant 0 : i32
    %c0_i32_1 = arith.constant 0 : i32
    return %c0_i32, %c0_i32_0 : i32, i32
  }
  func.func @transform_5(%arg0: i32) -> (i32, i32) {
    %c0_i32 = arith.constant 0 : i32
    %c0_i32_0 = arith.constant 0 : i32
    %c0_i32_1 = arith.constant 0 : i32
    return %c0_i32, %c0_i32_0 : i32, i32
  }
  func.func @transform_6(%arg0: i32) -> (i32, i32) {
    %c0_i32 = arith.constant 0 : i32
    %c0_i32_0 = arith.constant 0 : i32
    %c0_i32_1 = arith.constant 0 : i32
    return %c0_i32, %c0_i32_0 : i32, i32
  }
  func.func @transform_7(%arg0: i32) -> (i32, i32) {
    %c0_i32 = arith.constant 0 : i32
    %c0_i32_0 = arith.constant 0 : i32
    %c0_i32_1 = arith.constant 0 : i32
    return %c0_i32, %c0_i32_0 : i32, i32
  }
  func.func @transform_8(%arg0: i32) -> (i32, i32) {
    %c0_i32 = arith.constant 0 : i32
    %c0_i32_0 = arith.constant 0 : i32
    %c0_i32_1 = arith.constant 0 : i32
    return %c0_i32, %c0_i32_0 : i32, i32
  }
  func.func @transform_9(%arg0: i32) -> (i32, i32) {
    %c0_i32 = arith.constant 0 : i32
    %c0_i32_0 = arith.constant 0 : i32
    %c0_i32_1 = arith.constant 0 : i32
    return %c0_i32, %c0_i32_0 : i32, i32
  }
  func.func @transform_10(%arg0: i32) -> (i32, i32) {
    %c0_i32 = arith.constant 0 : i32
    %c0_i32_0 = arith.constant 0 : i32
    %c0_i32_1 = arith.constant 0 : i32
    return %c0_i32, %c0_i32_0 : i32, i32
  }
  func.func @transform_11(%arg0: i32) -> (i32, i32) {
    %c0_i32 = arith.constant 0 : i32
    %c0_i32_0 = arith.constant 0 : i32
    %c0_i32_1 = arith.constant 0 : i32
    return %c0_i32, %c0_i32_0 : i32, i32
  }
  func.func @transform_12(%arg0: i32) -> (i32, i32) {
    %c0_i32 = arith.constant 0 : i32
    %c0_i32_0 = arith.constant 0 : i32
    %c0_i32_1 = arith.constant 0 : i32
    return %c0_i32, %c0_i32_0 : i32, i32
  }
  func.func @transform_13(%arg0: i32) -> (i32, i32, i32) {
    %c0_i32 = arith.constant 0 : i32
    %c0_i32_0 = arith.constant 0 : i32
    %c0_i32_1 = arith.constant 0 : i32
    return %arg0, %c0_i32, %c0_i32_0 : i32, i32, i32
  }
}

</mosaic_0001>

<bundles_post_ra>
// kernel: tpu_custom_call.1
= control target key start
LH: loop header
LB: loop body
LE: loop exit
PB: predicated region body
PF: predicated region fallthrough
CT: control target
= control target key end

     0   :  { %s17336_s0 = inlined_call_operand.hbm [shape: f32[2,16,16,16], index: 0, kind: input, shape index: {}]   ;;  %s17337_s1 = inlined_call_operand.vmem [shape: f32[16,64], index: 1, kind: input, shape index: {}]   ;;  %s17338_s2 = inlined_call_operand.vmem [shape: f32[1,64], index: 2, kind: input, shape index: {}]   ;;  %s17339_s3 = inlined_call_operand.vmem [shape: f32[16,2], index: 3, kind: input, shape index: {}]   ;;  %s17340_s4 = inlined_call_operand.vmem [shape: f32[1,2], index: 4, kind: input, shape index: {}]   ;;  %s17341_s5 = inlined_call_operand.vmem [shape: f32[2,16], index: 5, kind: input, shape index: {}]   ;;  %s17342_s6 = inlined_call_operand.vmem [shape: f32[1,16], index: 6, kind: input, shape index: {}]   ;;  %s17343_s7 = inlined_call_operand.vmem [shape: f32[112,16], index: 7, kind: input, shape index: {}]   ;;  %s17344_s8 = inlined_call_operand.vmem [shape: f32[1,16], index: 8, kind: input, shape index: {}]   ;;  %s17345_s9 = inlined_call_operand.vmem [shape: f32[112,16], index: 9, kind: input, shape index: {}]   ;;  %s17346_s10 = inlined_call_operand.vmem [shape: f32[1,16], index: 10, kind: input, shape index: {}]   ;;  %s17347_s11 = inlined_call_operand.vmem [shape: f32[144,16], index: 11, kind: input, shape index: {}]   ;;  %s17348_s12 = inlined_call_operand.vmem [shape: f32[1,16], index: 12, kind: input, shape index: {}]   ;;  %s17349_s13 = inlined_call_operand.hbm [shape: f32[2,16,256], index: 13, kind: output, shape index: {}]  }
   0x1   :  { %17510 = sst [smem:[#allocation336_spill]] %s17336_s0 }
   0x2   :  { %17511 = sst [smem:[#allocation337_spill]] %s17349_s13 }
   0x3   :  { %18 = vsyncpa [#allocation5], 0 }
   0x4   :  { %20 = vsyncpa [#allocation5 + $0x1], 0 }
   0x5   :  { %21 = vsyncpa [#allocation6], 0 }
   0x6   :  { %23 = vsyncpa [#allocation6 + $0x1], 0  ;;  %s9969_s25 = smov 0   ;;  %s9971_s26 = smov 0  }
   0x7   :  { %s9973_s27 = smov 0   ;;  %s9975_s28 = smov 0  }
   0x8 LB: > { %17512 = sst [smem:[#allocation10_spill]] %s9873_s25  ;;  %s9990_s29 = sadd.s32 4294967295, %s9885_s28   ;;  %s9885_s28 = sphi %s9975_s28, %s18813_s28   ;;  %s9881_s27 = sphi %s9973_s27, %s18815_s27   ;;  %s9877_s26 = sphi %s9971_s26, %s18817_s26   ;;  %s9873_s25 = sphi %s9969_s25, %s18816_s25  }
   0x9   : > { %17513 = sst [smem:[#allocation11_spill]] %s9881_s27  ;;  %s8430_s30 = sadd.s32 4294967294, %s9885_s28  }
   0xa   : > { %s9994_s14 = sadd.s32 1, %s9885_s28   ;;  %s36_s15 = sadd.s32 1, %s9881_s27 }
   0xb   : > { %17514 = sst [smem:[#allocation12_spill]] %s9994_s14  ;;  %s33_s16 = ssub.s32 %s9885_s28, %s9994_s14 }
   0xc   : > { %p43_p0 = scmp.ne.s32.totalorder %s9881_s27, %s9877_s26  ;;  %p34_p1 = scmp.eq.s32.totalorder %s33_s16, 0 }
   0xd   : > { %p44_p2 = scmp.eq.s32.totalorder %s9885_s28, 0  ;;  %p49_p3 = scmp.ne.s32.totalorder %s9877_s26, %s9873_s25 }
   0xe   : > { %p50_p4 = scmp.eq.s32.totalorder %s9990_s29, 0  ;;  %p325_p7 = scmp.eq.s32.totalorder %s9990_s29, 1 }
   0xf   : > { %s10006_s17 = scalar_select %p34_p1, %s9881_s27, %s36_s15  }
  0x10   : > { %p10008_p5 = por %p44_p2, %p43_p0  ;;  %p10012_p6 = por %p50_p4, %p49_p3 }
  0x11   : > { %17515 = sst [smem:[#allocation13_spill]] %s10006_s17  ;;  %p331_p8 = scmp.eq.s32.totalorder %s8430_s30, 1 }
  0x12   : > { %p8762_p10 = scmp.lt.s32.totalorder %s9885_s28, 2  ;;  %p10019_p11 = por %p325_p7, %p43_p0 }
  0x13   : > { %p10023_p12 = por %p331_p8, %p49_p3  ;;  %s387_s22 = sand.u32 1, %s9881_s27  }
  0x14   : > { %s17518_s20 = scalar_select %p10019_p11, 1, 0 }
  0x15   : > { %s17520_s21 = scalar_select %p10023_p12, 1, 0 }
  0x16   : > { %17519 = sst [smem:[#allocation14_spill]] %s17518_s20  ;;  %s8742_s23 = sshll.u32 %s9885_s28, 8 }
  0x17   : > { %17521 = sst [smem:[#allocation15_spill]] %s17520_s21  ;;  %s8433_s24 = sshll.u32 %s387_s22, 8 }
  0x18   : > { %s17522_s0 = sld [smem:[#allocation336_spill]]  ;;  %s391_s30 = scalar_lea.vmem [#allocation4], %s8433_s24 }
  0x19   : > { %s399_s25 = sshll.u32 %s391_s30, 4  ;;  %p10034_p13 = pnand %p8762_p10, %p10008_p5  ;;  %s400_s25 = int_to_ptr.vmem [resolvable:$true] %s399_s25 }
  0x1a   : > { %p8436_p0 = scmp.ge.s32.totalorder %s9885_s28, 1  ;;  %p407_p1 = scmp.lt.s32.totalorder %s9885_s28, 3 }
  0x1b   : > { %s388_s27 = scalar_lea.sflag [#allocation5], %s387_s22  ;;  %p9793_p3 = pneg %p10034_p13 }
  0x1e   : > { %s396_s17 = scalar_lea.hbm %s17522_s0, %s8742_s23  ;;  %s9796_s18 = scalar_lea.hbm %s17522_s0, 512 }
  0x1f   : > { %s397_s14 = sshll.u32 %s396_s17, 4  ;;  %s398_s14 = int_to_ptr.hbm [resolvable:$true] %s397_s14 }
  0x20   : > { %s9789_s21 = sshra.s32 %s398_s14, 4  ;;  %s9790_s21 = int_to_ptr.hbm [resolvable:$true] %s9789_s21 }
  0x21   : > { %s9791_s20 = scalar_lea.hbm %s9790_s21, 256  ;;  %p9797_p5 = scmp.lt.s32.totalorder %s9790_s21, %s17522_s0 }
  0x22   : > { %p9792_p2 = scmp.ne.s32.totalorder %s9790_s21, %s9791_s20  ;;  %p9798_p8 = scmp.lt.s32.totalorder %s9796_s18, %s9791_s20 }
  0x24   : > { %p9794_p4 = pnand %p9793_p3, %p9792_p2  ;;  %p9799_p10 = por %p9798_p8, %p9797_p5 }
  0x26   : > { %p9795_p7 = pneg %p9794_p4 }
  0x28   : > { %p9800_p9 = pnand %p9799_p10, %p9795_p7 }
  0x2a   : > { %9803 = shalt.err (!%p9800_p9)
}
  0x2b   : > { %s9887_s22 = smov 128   ;;  %s9888_s16 = smov 8  }
  0x2c   : > { %8757 = dma.hbm_to_vmem [thread:$0]  (!%p10034_p13), %s398_s14, 4096, %s400_s25, %s388_s27, %s9887_s22, %s9887_s22, %s9888_s16  }
  0x2d   : > { %p408_p2 = pnand %p8436_p0, %p407_p1 }
  0x2f   : > { %411 = sbr.rel (%p408_p2) target bundleno = 2974 (0xb9e), region = 72 }
  0x34   : > { %s10055_s30 = sand.u32 1, %s9877_s26  }
  0x35   : > { %s8437_s20 = sshll.u32 %s10055_s30, 8  ;;  %s414_s21 = scalar_lea.sflag [#allocation5], %s10055_s30 }
  0x36   : > { %s10059_s17 = scalar_lea.vmem [#allocation4], %s8437_s20 }
  0x37   : > { %9864 = dma.done.wait (%p10012_p6), %s414_s21, 4096  }
  0x38   : > { %9866 = vsyncadd (%p10012_p6), %s414_s21, 4294963200  ;;  %vm17494_vm0 = vcmask 130048   ;;  %v10068_v0 = vld [vmem:[%s17337_s1 + $0x8] sm:$0xff]  ;;  %v10073_v1 = vld [vmem:[%s17337_s1] sm:$0xff]  ;;  %v17358_v7 = vmov 0.0   ;;  %vm515_vm1 = vcmask 124928  }
  0x39   : > { %v10076_v2 = vld [vmem:[%s10059_s17] sm:$0xff]  ;;  %8745 = vmatpush.msra.mxu2 %v10068_v0  ;;  %8746 = vmatpush.msra.mxu3 %v10068_v0  ;;  %v10081_v3 = vld [vmem:[%s10059_s17 + $0x8] sm:$0xff]  ;;  %v10084_v4 = vld [vmem:[%s10059_s17 + $0x10] sm:$0xff]  ;;  %501 = vst.msk [vmem:[#allocation2 + $0x30] sm:$0xff] %vm17494_vm0, %v17358_v7  ;;  %s17509_s19 = smov 16   ;;  %s17446_s22 = smov 32  }
  0x3a   : > { %17524 = vst [vmem:[#allocation16_spill] sm:$0xff] %v10076_v2  ;;  %v10087_v5 = vld [vmem:[%s10059_s17 + $0x18] sm:$0xff]  ;;  %v580_v6 = vsel %vm17494_vm0, %v10076_v2, 0.0  ;;  %v581_v8 = vsel %vm17494_vm0, %v10081_v3, 0.0  ;;  %v583_v9 = vsel %vm17494_vm0, %v10084_v4, 0.0  ;;  %v10102_v10 = vld [vmem:[%s10059_s17 + $0x20] sm:$0xff] }
  0x3b   : > { %17525 = vst [vmem:[#allocation17_spill] sm:$0xff] %v10081_v3  ;;  %8748 = vmatpush.msra.mxu2 %v10073_v1  ;;  %8749 = vmatpush.msra.mxu3 %v10073_v1  ;;  %v582_v11 = vadd.f32 %v581_v8, %v580_v6  ;;  %v585_v12 = vsel %vm17494_vm0, %v10087_v5, 0.0  ;;  %v10111_v13 = vld [vmem:[%s10059_s17 + $0x28] sm:$0xff]  ;;  %v10114_v14 = vld [vmem:[%s10059_s17 + $0x70] sm:$0xff]  ;;  %v587_v16 = vsel %vm17494_vm0, %v10102_v10, 0.0  ;;  %v10123_v17 = vld [vmem:[%s10059_s17 + $0xb8] sm:$0xff] }
  0x3c   : > { %17526 = vst [vmem:[#allocation18_spill] sm:$0xff] %v10084_v4  ;;  %8457 = vmatmul.msk.f32.vlgmr.msra.gmra.mxu2 %vm17494_vm0, %v10114_v14  ;;  %v10128_v18 = vld [vmem:[%s10059_s17 + $0x30] sm:$0xff]  ;;  %8466 = vmatmul.msk.f32.vlgmr.msra.gmra.mxu3 %vm17494_vm0, %v10123_v17  ;;  %v589_v20 = vsel %vm17494_vm0, %v10111_v13, 0.0  ;;  %v10139_v21 = vld [vmem:[%s10059_s17 + $0x38] sm:$0xff]  ;;  %v10148_v24 = vld [vmem:[%s10059_s17 + $0x40] sm:$0xff]  ;;  %v607_v49 = vsel %vm17494_vm0, %v10114_v14, 0.0 }
  0x3d   : > { %17527 = vst [vmem:[#allocation19_spill] sm:$0xff] %v10087_v5  ;;  %v584_v15 = vadd.f32 %v583_v9, %v582_v11  ;;  %v591_v23 = vsel %vm17494_vm0, %v10128_v18, 0.0  ;;  %v593_v26 = vsel %vm17494_vm0, %v10139_v21, 0.0  ;;  %v10157_v27 = vld [vmem:[%s10059_s17 + $0x48] sm:$0xff]  ;;  %v10160_v29 = vld [vmem:[%s10059_s17 + $0x78] sm:$0xff]  ;;  %v10163_v30 = vld [vmem:[%s10059_s17 + $0xc0] sm:$0xff] }
  0x3e   : > { %502 = vst.msk [vmem:[#allocation2 + $0x38] sm:$0xff] %vm17494_vm0, %v17358_v7  ;;  %v595_v31 = vsel %vm17494_vm0, %v10148_v24, 0.0  ;;  %v10174_v32 = vld [vmem:[%s10059_s17 + $0x50] sm:$0xff]  ;;  %v597_v34 = vsel %vm17494_vm0, %v10157_v27, 0.0  ;;  %v10185_v35 = vld [vmem:[%s10059_s17 + $0x58] sm:$0xff]  ;;  %v10192_v38 = vld [vmem:[%s10059_s17 + $0x60] sm:$0xff] }
  0x3f   : > { %17528 = vst [vmem:[#allocation20_spill] sm:$0xff] %v10102_v10  ;;  %v586_v19 = vadd.f32 %v585_v12, %v584_v15  ;;  %v599_v37 = vsel %vm17494_vm0, %v10174_v32, 0.0  ;;  %v601_v40 = vsel %vm17494_vm0, %v10185_v35, 0.0  ;;  %v10201_v41 = vld [vmem:[%s10059_s17 + $0x68] sm:$0xff]  ;;  %v10206_v43 = vld [vmem:[%s10059_s17 + $0x80] sm:$0xff]  ;;  %v603_v45 = vsel %vm17494_vm0, %v10192_v38, 0.0 }
  0x40   : > { %505 = vst.msk [vmem:[#allocation2 + $0x1c8] sm:$0xff] %vm17494_vm0, %v17358_v7  ;;  %v10209_v44 = vld [vmem:[%s10059_s17 + $0xc8] sm:$0xff]  ;;  %v605_v47 = vsel %vm17494_vm0, %v10201_v41, 0.0  ;;  %v10241_v53 = vld [vmem:[%s10059_s17 + $0xd0] sm:$0xff]  ;;  %v609_v54 = vsel %vm17494_vm0, %v10160_v29, 0.0  ;;  %v611_v56 = vsel %vm17494_vm0, %v10206_v43, 0.0 }
  0x41   : > { %506 = vst.msk [vmem:[#allocation2 + $0x1d0] sm:$0xff] %vm17494_vm0, %v17358_v7  ;;  %v588_v22 = vadd.f32 %v587_v16, %v586_v19  ;;  %v10238_v52 = vld [vmem:[%s10059_s17 + $0x88] sm:$0xff]  ;;  %v10269_v61 = vld [vmem:[%s10059_s17 + $0x90] sm:$0xff]  ;;  %v10276_v63 = vld [vmem:[%s10059_s17 + $0xd8] sm:$0xff]  ;;  %s17451_s21 = smov 112   ;;  %vm690_vm3 = vcmask 1041408  }
  0x42   : > { %17529 = vst [vmem:[#allocation21_spill] sm:$0xff] %v10111_v13  ;;  %v613_v59 = vsel %vm17494_vm0, %v10238_v52, 0.0  ;;  %v615_v62 = vsel %vm17494_vm0, %v10269_v61, 0.0  ;;  %v10283_v8 = vld [vmem:[%s10059_s17 + $0x98] sm:$0xff]  ;;  %v10294_v12 = vld [vmem:[%s10059_s17 + $0xa0] sm:$0xff]  ;;  %vm686_vm4 = vcmask 15360  }
  0x43   : > { %17530 = vst [vmem:[#allocation22_spill] sm:$0xff] %v10114_v14  ;;  %v590_v25 = vadd.f32 %v589_v20, %v588_v22  ;;  %v617_v9 = vsel %vm17494_vm0, %v10283_v8, 0.0  ;;  %v619_v16 = vsel %vm17494_vm0, %v10294_v12, 0.0  ;;  %v10304_v22 = vld [vmem:[%s10059_s17 + $0xa8] sm:$0xff]  ;;  %s9895_s23 = smov 48   ;;  %s9896_s18 = smov 64  }
  0x44   : > { %4033 = vst.msk [vmem:[#allocation3] sm:$0xff] %vm17494_vm0, %v17358_v7  ;;  %8458 = vmatmul.msk.f32.gmra.mxu2 %vm17494_vm0, %v10160_v29  ;;  %8467 = vmatmul.msk.f32.gmra.mxu3 %vm17494_vm0, %v10163_v30  ;;  %s9897_s24 = smov 80   ;;  %vm496_vm5 = vcmask 128000   ;;  %vm3608_vm6 = vcmask 261120   ;;  %vm3641_vm7 = vcmask 392192   ;;  %vm17499_vm8 = vcmask 523264  }
  0x45   : > { %17531 = vst [vmem:[#allocation23_spill] sm:$0xff] %v10123_v17  ;;  %v592_v28 = vadd.f32 %v591_v23, %v590_v25  ;;  %v621_v25 = vsel %vm17494_vm0, %v10304_v22, 0.0  ;;  %vm17497_vm9 = vcmask 654336   ;;  %vm3791_vm10 = vcmask 916480   ;;  %s17972_s14 = smov 32   ;;  %s8743_s16 = sshll.u32 %s9990_s29, 5 }
  0x46   : > { %4034 = vst.msk [vmem:[#allocation3 + $0x8] sm:$0xff] %vm17494_vm0, %v17358_v7  ;;  %vm17498_vm11 = vcmask 785408   ;;  %s8342_s13 = scalar_lea.sflag [#allocation6], %s10055_s30 }
  0x47   : > { %17532 = vst [vmem:[#allocation24_spill] sm:$0xff] %v10128_v18  ;;  %v594_v33 = vadd.f32 %v593_v26, %v592_v28  ;;  %v10315_v26 = vld [vmem:[%s10059_s17 + $0xe0] sm:$0xff]  ;;  %v10318_v28 = vld [vmem:[%s10059_s17 + $0xb0] sm:$0xff] }
  0x48   : > { %4035 = vst.msk [vmem:[#allocation3 + $0x10] sm:$0xff] %vm17494_vm0, %v17358_v7 }
  0x49   : > { %4036 = vst.msk [vmem:[#allocation3 + $0x18] sm:$0xff] %vm17494_vm0, %v17358_v7  ;;  %v596_v36 = vadd.f32 %v595_v31, %v594_v33  ;;  %v625_v33 = vsel %vm17494_vm0, %v10123_v17, 0.0 }
  0x4a   : > { %17533 = vst [vmem:[#allocation25_spill] sm:$0xff] %v10139_v21 }
  0x4b   : > { %4037 = vst.msk [vmem:[#allocation3 + $0x20] sm:$0xff] %vm17494_vm0, %v17358_v7  ;;  %v598_v39 = vadd.f32 %v597_v34, %v596_v36  ;;  %v623_v34 = vsel %vm17494_vm0, %v10318_v28, 0.0 }
  0x4c   : > { %4038 = vst.msk [vmem:[#allocation3 + $0x28] sm:$0xff] %vm17494_vm0, %v17358_v7  ;;  %8459 = vmatmul.msk.f32.gmra.mxu2 %vm17494_vm0, %v10206_v43  ;;  %8468 = vmatmul.msk.f32.gmra.mxu3 %vm17494_vm0, %v10209_v44 }
  0x4d   : > { %17534 = vst [vmem:[#allocation26_spill] sm:$0xff] %v10148_v24  ;;  %v600_v42 = vadd.f32 %v599_v37, %v598_v39  ;;  %v627_v37 = vsel %vm17494_vm0, %v10163_v30, 0.0 }
  0x4e   : > { %4040 = vst.msk [vmem:[#allocation3 + $0x130] sm:$0xff] %vm17494_vm0, %v17358_v7 }
  0x4f   : > { %4041 = vst.msk [vmem:[#allocation3 + $0x138] sm:$0xff] %vm17494_vm0, %v17358_v7  ;;  %v602_v46 = vadd.f32 %v601_v40, %v600_v42 }
  0x50   : > { %17535 = vst [vmem:[#allocation27_spill] sm:$0xff] %v10157_v27 }
  0x51   : > { %17536 = vst [vmem:[#allocation28_spill] sm:$0xff] %v10160_v29  ;;  %v604_v48 = vadd.f32 %v603_v45, %v602_v46  ;;  %v629_v45 = vsel %vm17494_vm0, %v10209_v44, 0.0 }
  0x52   : > { %17537 = vst [vmem:[#allocation29_spill] sm:$0xff] %v10163_v30 }
  0x53   : > { %4042 = vst.msk [vmem:[#allocation3 + $0x140] sm:$0xff] %vm17494_vm0, %v17358_v7  ;;  %v606_v50 = vadd.f32 %v605_v47, %v604_v48  ;;  %v631_v48 = vsel %vm17494_vm0, %v10241_v53, 0.0 }
  0x54   : > { %4043 = vst.msk [vmem:[#allocation3 + $0x148] sm:$0xff] %vm17494_vm0, %v17358_v7  ;;  %8460 = vmatmul.msk.f32.gmra.mxu2 %vm17494_vm0, %v10238_v52  ;;  %8469 = vmatmul.msk.f32.gmra.mxu3 %vm17494_vm0, %v10241_v53 }
  0x55   : > { %17538 = vst [vmem:[#allocation30_spill] sm:$0xff] %v10174_v32  ;;  %v608_v51 = vadd.f32 %v607_v49, %v606_v50  ;;  %v10354_v49 = vld [vmem:[%s10059_s17 + $0xe8] sm:$0xff] }
  0x56   : > { %4044 = vst.msk [vmem:[#allocation3 + $0x150] sm:$0xff] %vm17494_vm0, %v17358_v7 }
  0x57   : > { %4045 = vst.msk [vmem:[#allocation3 + $0x158] sm:$0xff] %vm17494_vm0, %v17358_v7  ;;  %v610_v55 = vadd.f32 %v609_v54, %v608_v51  ;;  %v633_v51 = vsel %vm17494_vm0, %v10276_v63, 0.0 }
  0x58   : > { %17539 = vst [vmem:[#allocation31_spill] sm:$0xff] %v10185_v35 }
  0x59   : > { %554 = vst.msk [vmem:[#allocation2 + $0x93] sm:$0xff] %vm17494_vm0, %v10128_v18  ;;  %v612_v57 = vadd.f32 %v611_v56, %v610_v55  ;;  %v635_v56 = vsel %vm17494_vm0, %v10315_v26, 0.0 }
  0x5a   : > { %17540 = vst [vmem:[#allocation32_spill] sm:$0xff] %v10192_v38 }
  0x5b   : > { %555 = vst.msk [vmem:[#allocation2 + $0x9b] sm:$0xff] %vm17494_vm0, %v10139_v21  ;;  %v614_v60 = vadd.f32 %v613_v59, %v612_v57 }
  0x5c   : > { %556 = vst.msk [vmem:[#allocation2 + $0xab] sm:$0xff] %vm17494_vm0, %v10148_v24  ;;  %8461 = vmatmul.msk.f32.gmra.mxu2 %vm17494_vm0, %v10269_v61  ;;  %8470 = vmatmul.msk.f32.gmra.mxu3 %vm17494_vm0, %v10276_v63 }
  0x5d   : > { %17541 = vst [vmem:[#allocation33_spill] sm:$0xff] %v10201_v41  ;;  %v616_v6 = vadd.f32 %v615_v62, %v614_v60  ;;  %v637_v60 = vsel %vm17494_vm0, %v10354_v49, 0.0 }
  0x5e   : > { %557 = vst.msk [vmem:[#allocation2 + $0xb3] sm:$0xff] %vm17494_vm0, %v10157_v27 }
  0x5f   : > { %17542 = vst [vmem:[#allocation34_spill] sm:$0xff] %v10206_v43  ;;  %v618_v11 = vadd.f32 %v617_v9, %v616_v6  ;;  %v10383_v6 = vld [vmem:[%s10059_s17 + $0xf0] sm:$0xff] }
  0x60   : > { %17543 = vst [vmem:[#allocation35_spill] sm:$0xff] %v10209_v44 }
  0x61   : > { %558 = vst.msk [vmem:[#allocation2 + $0xc3] sm:$0xff] %vm17494_vm0, %v10174_v32  ;;  %v620_v20 = vadd.f32 %v619_v16, %v618_v11  ;;  %v639_v11 = vsel %vm17494_vm0, %v10383_v6, 0.0  ;;  %v10397_v16 = vld [vmem:[%s10059_s17 + $0xf8] sm:$0xff]  ;;  %s17453_s17 = smov 96  }
  0x62   : > { %559 = vst.msk [vmem:[#allocation2 + $0xcb] sm:$0xff] %vm17494_vm0, %v10185_v35  ;;  %v2623_v46 = vld [vmem:[#allocation2 + $0x99] sm:$0xff] }
  0x63   : > { %560 = vst.msk [vmem:[#allocation2 + $0xdb] sm:$0xff] %vm17494_vm0, %v10192_v38  ;;  %v622_v31 = vadd.f32 %v621_v25, %v620_v20 }
  0x64   : > { %561 = vst.msk [vmem:[#allocation2 + $0xe3] sm:$0xff] %vm17494_vm0, %v10201_v41  ;;  %8462 = vmatmul.msk.f32.gmra.mxu2 %vm17494_vm0, %v10283_v8  ;;  %8471 = vmatmul.msk.f32.gmra.mxu3 %vm17494_vm0, %v10315_v26 }
  0x65   : > { %562 = vst.msk [vmem:[#allocation2 + $0xf3] sm:$0xff] %vm17494_vm0, %v10114_v14  ;;  %v624_v36 = vadd.f32 %v623_v34, %v622_v31  ;;  %v2625_v25 = vld [vmem:[#allocation2 + $0xb1] sm:$0xff] }
  0x66   : > { %548 = vst.msk [vmem:[#allocation2 + $0x4b] sm:$0xff] %vm17494_vm0, %v10076_v2 }
  0x67   : > { %549 = vst.msk [vmem:[#allocation2 + $0x53] sm:$0xff] %vm17494_vm0, %v10081_v3  ;;  %v626_v42 = vadd.f32 %v625_v33, %v624_v36 }
  0x68   : > { %550 = vst.msk [vmem:[#allocation2 + $0x63] sm:$0xff] %vm17494_vm0, %v10084_v4 }
  0x69   : > { %17544 = vst [vmem:[#allocation36_spill] sm:$0xff] %v10238_v52  ;;  %v628_v47 = vadd.f32 %v627_v37, %v626_v42  ;;  %v2627_v20 = vld [vmem:[#allocation2 + $0xc9] sm:$0xff] }
  0x6a   : > { %17545 = vst [vmem:[#allocation37_spill] sm:$0xff] %v10241_v53 }
  0x6b   : > { %551 = vst.msk [vmem:[#allocation2 + $0x6b] sm:$0xff] %vm17494_vm0, %v10087_v5  ;;  %v630_v50 = vadd.f32 %v629_v45, %v628_v47  ;;  %v2629_v33 = vld [vmem:[#allocation2 + $0xe1] sm:$0xff] }
  0x6c   : > { %552 = vst.msk [vmem:[#allocation2 + $0x7b] sm:$0xff] %vm17494_vm0, %v10102_v10  ;;  %8463 = vmatmul.msk.f32.gmra.mxu2 %vm17494_vm0, %v10294_v12  ;;  %8472 = vmatmul.msk.f32.gmra.mxu3 %vm17494_vm0, %v10354_v49 }
  0x6d   : > { %553 = vst.msk [vmem:[#allocation2 + $0x83] sm:$0xff] %vm17494_vm0, %v10111_v13  ;;  %v632_v54 = vadd.f32 %v631_v48, %v630_v50 }
  0x6e   : > { %571 = vst.msk [vmem:[#allocation2 + $0x15b] sm:$0xff] %vm17494_vm0, %v10123_v17  ;;  %v2617_v58 = vld [vmem:[#allocation2 + $0x51] sm:$0xff] }
  0x6f   : > { %517 = vst.msk [vmem:[#allocation2 + $0x60] sm:$0x7] %vm515_vm1, %v17358_v7  ;;  %2842 = vrot.lane.b32.xlu1 %v2617_v58, %s17509_s19  ;;  %v634_v58 = vadd.f32 %v633_v51, %v632_v54  ;;  %v658_v54 = vld [vmem:[%s17339_s3 + $0x8] sm:$0xff] }
  0x70   : > { %516 = vst.msk [vmem:[#allocation2 + $0x48] sm:$0x7] %vm515_vm1, %v17358_v7  ;;  %677 = vmatpush.msra.mxu0 %v658_v54 }
  0x71   : > { %518 = vst.msk [vmem:[#allocation2 + $0x78] sm:$0x7] %vm515_vm1, %v17358_v7  ;;  %v636_v62 = vadd.f32 %v635_v56, %v634_v58 }
  0x72   : > { %17546 = vst [vmem:[#allocation38_spill] sm:$0xff] %v10269_v61  ;;  %v2619_v40 = vld [vmem:[#allocation2 + $0x69] sm:$0xff] }
  0x73   : > { %519 = vst.msk [vmem:[#allocation2 + $0x90] sm:$0x7] %vm515_vm1, %v17358_v7  ;;  %v638_v9 = vadd.f32 %v637_v60, %v636_v62 }
  0x74   : > { %17547 = vst [vmem:[#allocation39_spill] sm:$0xff] %v10276_v63  ;;  %v2621_v39 = vld [vmem:[#allocation2 + $0x81] sm:$0xff]  ;;  %8464 = vmatmul.msk.f32.gmra.mxu2 %vm17494_vm0, %v10304_v22  ;;  %8473 = vmatmul.msk.f32.gmra.mxu3 %vm17494_vm0, %v10383_v6 }
  0x75   : > { %520 = vst.msk [vmem:[#allocation2 + $0xa8] sm:$0x7] %vm515_vm1, %v17358_v7 }
  0x76   : > { %17548 = vst [vmem:[#allocation40_spill] sm:$0xff] %v10283_v8  ;;  %v2618_v15 = vld [vmem:[#allocation2 + $0x61] sm:$0xff] }
  0x77   : > { %521 = vst.msk [vmem:[#allocation2 + $0xc0] sm:$0x7] %vm515_vm1, %v17358_v7  ;;  %2844 = vrot.lane.b32.xlu0 %v2618_v15, %s17509_s19  ;;  %v2616_v19 = vld [vmem:[#allocation2 + $0x49] sm:$0xff]  ;;  %v640_v15 = vadd.f32 %v639_v11, %v638_v9 }
  0x78   : > { %522 = vst.msk [vmem:[#allocation2 + $0xd8] sm:$0x7] %vm515_vm1, %v17358_v7  ;;  %2840 = vrot.lane.b32.xlu2 %v2616_v19, %s17509_s19  ;;  %v2620_v23 = vld [vmem:[#allocation2 + $0x79] sm:$0xff]  ;;  %v9891_v19 = vmov 256.0  }
  0x79   : > { %17549 = vst [vmem:[#allocation41_spill] sm:$0xff] %v10294_v12  ;;  %2848 = vrot.lane.b32.xlu1 %v2620_v23, %s17509_s19  ;;  %9437 = vrcp.f32 %v9891_v19  ;;  %v641_v23 = vsel %vm17494_vm0, %v10397_v16, 0.0  ;;  %v2652_v54 = vld [vmem:[#allocation2 + $0x7a] sm:$0xff] }
  0x7a   : > { %523 = vst.msk [vmem:[#allocation2 + $0xf0] sm:$0x7] %vm515_vm1, %v17358_v7  ;;  %v2622_v57 = vld [vmem:[#allocation2 + $0x91] sm:$0xff]  ;;  %v642_v31 = vadd.f32 %v641_v23, %v640_v15 }
  0x7b   : > { %524 = vst.msk [vmem:[#allocation2 + $0x108] sm:$0x7] %vm515_vm1, %v17358_v7 }
  0x7c   : > { %17550 = vst [vmem:[#allocation42_spill] sm:$0xff] %v10304_v22  ;;  %v2624_v55 = vld [vmem:[#allocation2 + $0xa9] sm:$0xff]  ;;  %v643_v34 = vrot.slane %v642_v31, 4  ;;  %8465 = vmatmul.msk.f32.gmra.mxu2 %vm17494_vm0, %v10318_v28  ;;  %8474 = vmatmul.msk.f32.gmra.mxu3 %vm17494_vm0, %v10397_v16 }
  0x7d   : > { %525 = vst.msk [vmem:[#allocation2 + $0x120] sm:$0x7] %vm515_vm1, %v17358_v7 }
  0x7e   : > { %526 = vst.msk [vmem:[#allocation2 + $0x138] sm:$0x7] %vm515_vm1, %v17358_v7  ;;  %v2626_v59 = vld [vmem:[#allocation2 + $0xc1] sm:$0xff]  ;;  %v644_v37 = vadd.f32 %v643_v34, %v642_v31 }
  0x7f   : > { %17551 = vst [vmem:[#allocation43_spill] sm:$0xff] %v10315_v26  ;;  %2850 = vrot.lane.b32.xlu0 %v2621_v39, %s17509_s19  ;;  %v9438_v36 = vpop.eup %9437 }
  0x80   : > { %17552 = vst [vmem:[#allocation44_spill] sm:$0xff] %v10318_v28  ;;  %2846 = vrot.lane.b32.xlu2 %v2619_v40, %s17509_s19  ;;  %v650_v39 = vmul.f32 256.0, %v9438_v36  ;;  %v645_v40 = vrot.slane %v644_v37, 2  ;;  %vm654_vm2 = vweird.f32 %v9438_v36 }
  0x81   : > { %527 = vst.msk [vmem:[#allocation2 + $0x150] sm:$0x7] %vm515_vm1, %v17358_v7  ;;  %2854 = vrot.lane.b32.xlu1 %v2623_v46, %s17509_s19  ;;  %v2630_v42 = vld [vmem:[#allocation2 + $0xf1] sm:$0xff]  ;;  %v2628_v46 = vld [vmem:[#allocation2 + $0xd9] sm:$0xff] }
  0x82   : > { %528 = vst.msk [vmem:[#allocation2 + $0x168] sm:$0x7] %vm515_vm1, %v17358_v7  ;;  %v651_v45 = vsub.f32 1.0, %v650_v39  ;;  %v646_v47 = vadd.f32 %v645_v40, %v644_v37  ;;  %v2648_v40 = vld [vmem:[#allocation2 + $0x4a] sm:$0xff] }
  0x83   : > { %529 = vst.msk [vmem:[#allocation2 + $0x180] sm:$0x7] %vm515_vm1, %v17358_v7 }
  0x84   : > { %530 = vst.msk [vmem:[#allocation2 + $0x198] sm:$0x7] %vm515_vm1, %v17358_v7  ;;  %v652_v48 = vmul.f32 %v9438_v36, %v651_v45  ;;  %v647_v50 = vrot.slane %v646_v47, 1  ;;  %v2650_v45 = vld [vmem:[#allocation2 + $0x62] sm:$0xff] }
  0x85   : > { %531 = vst.msk [vmem:[#allocation2 + $0x1b0] sm:$0x7] %vm515_vm1, %v17358_v7 }
  0x86   : > { %532 = vst.msk [vmem:[#allocation2 + $0x5b] sm:$0x7] %vm515_vm1, %v17358_v7  ;;  %v653_v56 = vadd.f32 %v9438_v36, %v652_v48  ;;  %v2653_v48 = vld [vmem:[#allocation2 + $0x82] sm:$0xff] }
  0x87   : > { %533 = vst.msk [vmem:[#allocation2 + $0x73] sm:$0x7] %vm515_vm1, %v17358_v7  ;;  %2856 = vrot.lane.b32.xlu0 %v2624_v55, %s17509_s19  ;;  %v657_v55 = vld [vmem:[%s17339_s3] sm:$0xff] }
  0x88   : > { %534 = vst.msk [vmem:[#allocation2 + $0x8b] sm:$0x7] %vm515_vm1, %v17358_v7  ;;  %2852 = vrot.lane.b32.xlu2 %v2622_v57, %s17509_s19  ;;  %v648_v57 = vadd.f32 %v647_v50, %v646_v47  ;;  %v655_v58 = vsel %vm654_vm2, %v9438_v36, %v653_v56  ;;  %678 = vmatpush.msra.mxu0 %v657_v55  ;;  %v2649_v47 = vld [vmem:[#allocation2 + $0x52] sm:$0xff]  ;;  %v2656_v55 = vld [vmem:[#allocation2 + $0xaa] sm:$0xff] }
  0x89   : > { %17553 = vst [vmem:[#allocation45_spill] sm:$0xff] %v10354_v49  ;;  %2860 = vrot.lane.b32.xlu1 %v2626_v59, %s17509_s19 }
  0x8a   : > { %535 = vst.msk [vmem:[#allocation2 + $0xa3] sm:$0x7] %vm515_vm1, %v17358_v7  ;;  %v656_v59 = vmul.f32 %v655_v58, %v648_v57  ;;  %849 = vmatpush.msrb.mxu0 %v10068_v0 }
  0x8b   : > { %536 = vst.msk [vmem:[#allocation2 + $0xbb] sm:$0x7] %vm515_vm1, %v17358_v7 }
  0x8c   : > { %537 = vst.msk [vmem:[#allocation2 + $0xd3] sm:$0x7] %vm515_vm1, %v17358_v7  ;;  %8439 = vmatmul.msk.f32.vlgmr.msra.gmra.mxu0 %vm17494_vm0, %v656_v59  ;;  %v2657_v59 = vld [vmem:[#allocation2 + $0xb2] sm:$0xff] }
  0x8d   : > { %538 = vst.msk [vmem:[#allocation2 + $0xeb] sm:$0x7] %vm515_vm1, %v17358_v7  ;;  %850 = vmatpush.msrb.mxu0 %v10073_v1 }
  0x8e   : > { %539 = vst.msk [vmem:[#allocation2 + $0x103] sm:$0x7] %vm515_vm1, %v17358_v7 }
  0x8f   : > { %540 = vst.msk [vmem:[#allocation2 + $0x11b] sm:$0x7] %vm515_vm1, %v17358_v7  ;;  %2862 = vrot.lane.b32.xlu0 %v2627_v20, %s17509_s19 }
  0x90   : > { %541 = vst.msk [vmem:[#allocation2 + $0x133] sm:$0x7] %vm515_vm1, %v17358_v7  ;;  %2858 = vrot.lane.b32.xlu2 %v2625_v25, %s17509_s19 }
  0x91   : > { %17554 = vst [vmem:[#allocation46_spill] sm:$0xff] %v10383_v6  ;;  %2866 = vrot.lane.b32.xlu1 %v2629_v33, %s17509_s19 }
  0x92   : > { %542 = vst.msk [vmem:[#allocation2 + $0x14b] sm:$0x7] %vm515_vm1, %v17358_v7 }
  0x93   : > { %543 = vst.msk [vmem:[#allocation2 + $0x163] sm:$0x7] %vm515_vm1, %v17358_v7 }
  0x94   : > { %544 = vst.msk [vmem:[#allocation2 + $0x17b] sm:$0x7] %vm515_vm1, %v17358_v7  ;;  %8443 = vmatmul.msk.f32.vlgmr.msrb.gmra.mxu0 %vm17494_vm0, %v10076_v2 }
  0x95   : > { %17555 = vst [vmem:[#allocation47_spill] sm:$0xff] %v10397_v16 }
  0x96   : > { %545 = vst.msk [vmem:[#allocation2 + $0x193] sm:$0x7] %vm515_vm1, %v17358_v7 }
  0x97   : > { %546 = vst.msk [vmem:[#allocation2 + $0x1ab] sm:$0x7] %vm515_vm1, %v17358_v7  ;;  %2868 = vrot.lane.b32.xlu0 %v2630_v42, %s17509_s19 }
  0x98   : > { %547 = vst.msk [vmem:[#allocation2 + $0x1c3] sm:$0x7] %vm515_vm1, %v17358_v7  ;;  %2864 = vrot.lane.b32.xlu2 %v2628_v46, %s17509_s19  ;;  %v2651_v46 = vld [vmem:[#allocation2 + $0x6a] sm:$0xff] }
  0x99   : > { %563 = vst.msk [vmem:[#allocation2 + $0xfb] sm:$0xff] %vm17494_vm0, %v10160_v29 }
  0x9a   : > { %572 = vst.msk [vmem:[#allocation2 + $0x16b] sm:$0xff] %vm17494_vm0, %v10163_v30 }
  0x9b   : > { %564 = vst.msk [vmem:[#allocation2 + $0x10b] sm:$0xff] %vm17494_vm0, %v10206_v43 }
  0x9c   : > { %573 = vst.msk [vmem:[#allocation2 + $0x173] sm:$0xff] %vm17494_vm0, %v10209_v44  ;;  %8444 = vmatmul.msk.f32.gmra.mxu0 %vm17494_vm0, %v10081_v3 }
  0x9d   : > { %565 = vst.msk [vmem:[#allocation2 + $0x113] sm:$0xff] %vm17494_vm0, %v10238_v52 }
  0x9e   : > { %574 = vst.msk [vmem:[#allocation2 + $0x183] sm:$0xff] %vm17494_vm0, %v10241_v53 }
  0x9f   : > { %566 = vst.msk [vmem:[#allocation2 + $0x123] sm:$0xff] %vm17494_vm0, %v10269_v61  ;;  %v684_v61 = vld [vmem:[%s17341_s5] sm:$0x3] }
  0xa0   : > { %575 = vst.msk [vmem:[#allocation2 + $0x18b] sm:$0xff] %vm17494_vm0, %v10276_v63  ;;  %v2631_v62 = vld [vmem:[#allocation2 + $0xf9] sm:$0xff]  ;;  %8440 = vmatpush.msk.msra.mxu1 %vm690_vm3, %v684_v61 }
  0xa1   : > { %567 = vst.msk [vmem:[#allocation2 + $0x12b] sm:$0xff] %vm17494_vm0, %v10283_v8  ;;  %2870 = vrot.lane.b32.xlu2 %v2631_v62, %s17509_s19  ;;  %v2640_v33 = vld [vmem:[#allocation2 + $0x169] sm:$0xff] }
  0xa2   : > { %576 = vst.msk [vmem:[#allocation2 + $0x19b] sm:$0xff] %vm17494_vm0, %v10315_v26  ;;  %v2632_v51 = vld [vmem:[#allocation2 + $0x109] sm:$0xff]  ;;  %8744 = vmatpush.msrb.mxu1 %v10068_v0 }
  0xa3   : > { %2872 = vrot.lane.b32.xlu1 %v2632_v51, %s17509_s19  ;;  %568 = vst.msk [vmem:[#allocation2 + $0x13b] sm:$0xff] %vm17494_vm0, %v10294_v12  ;;  %v2641_v25 = vld [vmem:[#allocation2 + $0x171] sm:$0xff] }
  0xa4   : > { %577 = vst.msk [vmem:[#allocation2 + $0x1a3] sm:$0xff] %vm17494_vm0, %v10354_v49  ;;  %v2633_v60 = vld [vmem:[#allocation2 + $0x111] sm:$0xff]  ;;  %8445 = vmatmul.msk.f32.gmra.mxu0 %vm17494_vm0, %v10084_v4  ;;  %8747 = vmatpush.msrb.mxu1 %v10073_v1 }
  0xa5   : > { %569 = vst.msk [vmem:[#allocation2 + $0x143] sm:$0xff] %vm17494_vm0, %v10304_v22  ;;  %2874 = vrot.lane.b32.xlu0 %v2633_v60, %s17509_s19  ;;  %v2642_v31 = vld [vmem:[#allocation2 + $0x181] sm:$0xff]  ;;  %v2654_v51 = vld [vmem:[#allocation2 + $0x92] sm:$0xff]  ;;  %v2659_v62 = vld [vmem:[#allocation2 + $0xca] sm:$0xff] }
  0xa6   : > { %570 = vst.msk [vmem:[#allocation2 + $0x153] sm:$0xff] %vm17494_vm0, %v10318_v28  ;;  %v2634_v15 = vld [vmem:[#allocation2 + $0x121] sm:$0xff] }
  0xa7   : > { %578 = vst.msk [vmem:[#allocation2 + $0x1b3] sm:$0xff] %vm17494_vm0, %v10383_v6  ;;  %v2643_v37 = vld [vmem:[#allocation2 + $0x189] sm:$0xff]  ;;  %v2655_v60 = vld [vmem:[#allocation2 + $0x9a] sm:$0xff] }
  0xa8   : > { %v2635_v9 = vld [vmem:[#allocation2 + $0x129] sm:$0xff]  ;;  %579 = vst.msk [vmem:[#allocation2 + $0x1bb] sm:$0xff] %vm17494_vm0, %v10397_v16 }
  0xa9   : > { %2876 = vrot.lane.b32.xlu2 %v2634_v15, %s17509_s19  ;;  %v2644_v34 = vld [vmem:[#allocation2 + $0x199] sm:$0xff] }
  0xaa   : > { %v2636_v11 = vld [vmem:[#allocation2 + $0x139] sm:$0xff] }
  0xab   : > { %2878 = vrot.lane.b32.xlu1 %v2635_v9, %s17509_s19  ;;  %v2645_v36 = vld [vmem:[#allocation2 + $0x1a1] sm:$0xff] }
  0xac   : > { %v2637_v23 = vld [vmem:[#allocation2 + $0x141] sm:$0xff]  ;;  %8446 = vmatmul.msk.f32.gmra.mxu0 %vm17494_vm0, %v10087_v5 }
  0xad   : > { %v2638_v19 = vld [vmem:[#allocation2 + $0x151] sm:$0xff]  ;;  %2880 = vrot.lane.b32.xlu0 %v2636_v11, %s17509_s19  ;;  %v2639_v20 = vld [vmem:[#allocation2 + $0x159] sm:$0xff] }
  0xae   : > { %v2646_v42 = vld [vmem:[#allocation2 + $0x1b1] sm:$0xff] }
  0xaf   : > { %v2647_v39 = vld [vmem:[#allocation2 + $0x1b9] sm:$0xff] }
  0xb1   : > { %2882 = vrot.lane.b32.xlu2 %v2637_v23, %s17509_s19  ;;  %v2658_v23 = vld [vmem:[#allocation2 + $0xc2] sm:$0xff] }
  0xb3   : > { %2884 = vrot.lane.b32.xlu1 %v2638_v19, %s17509_s19 }
  0xb5   : > { %2886 = vrot.lane.b32.xlu0 %v2639_v20, %s17509_s19  ;;  %v2660_v20 = vld [vmem:[#allocation2 + $0xda] sm:$0xff] }
  0xb9   : > { %2888 = vrot.lane.b32.xlu2 %v2640_v33, %s17509_s19 }
  0xbb   : > { %2890 = vrot.lane.b32.xlu1 %v2641_v25, %s17509_s19  ;;  %v2662_v25 = vld [vmem:[#allocation2 + $0xf2] sm:$0xff] }
  0xbd   : > { %2892 = vrot.lane.b32.xlu0 %v2642_v31, %s17509_s19 }
  0xbf   : > { %v894_v56 = vpop.f32.mrf.mxu2  ;;  %v921_v57 = vpop.f32.mrf.mxu3 }
  0xc1   : > { %2894 = vrot.lane.b32.xlu2 %v2643_v37, %s17509_s19 }
  0xc3   : > { %2896 = vrot.lane.b32.xlu1 %v2644_v34, %s17509_s19 }
  0xc5   : > { %2898 = vrot.lane.b32.xlu0 %v2645_v36, %s17509_s19 }
  0xc7   : > { %v897_v9 = vpop.f32.mrf.mxu2  ;;  %v924_v11 = vpop.f32.mrf.mxu3 }
  0xc9   : > { %2900 = vrot.lane.b32.xlu2 %v2646_v42, %s17509_s19  ;;  %v2661_v42 = vld [vmem:[#allocation2 + $0xe2] sm:$0xff] }
  0xcb   : > { %2902 = vrot.lane.b32.xlu1 %v2647_v39, %s17509_s19  ;;  %v10515_v39 = vld [vmem:[%s17338_s2] ss:$0 sm:$0xff] }
  0xcd   : > { %2968 = vrot.lane.b32.xlu0 %v2648_v40, %s17446_s22  ;;  %v2663_v40 = vld [vmem:[#allocation2 + $0xfa] sm:$0xff] }
  0xcf   : > { %v900_v31 = vpop.f32.mrf.mxu2  ;;  %v927_v33 = vpop.f32.mrf.mxu3 }
  0xd1   : > { %2970 = vrot.lane.b32.xlu2 %v2649_v47, %s17446_s22 }
  0xd2   : > { %v10489_v50 = vpop.permute.xlu2 %2840 }
  0xd3   : > { %2972 = vrot.lane.b32.xlu1 %v2650_v45, %s17446_s22  ;;  %v10518_v45 = vadd.f32 %v10515_v39, %v900_v31  ;;  %v10555_v31 = vadd.f32 %v10515_v39, %v924_v11 }
  0xd5   : > { %2974 = vrot.lane.b32.xlu0 %v2651_v46, %s17446_s22  ;;  %17562 = vst [vmem:[#allocation54_spill] sm:$0xff] %v10518_v45 }
  0xd6   : > { %17573 = vst [vmem:[#allocation65_spill] sm:$0xff] %v10555_v31 }
  0xd7   : > { %v903_v46 = vpop.f32.mrf.mxu2  ;;  %v930_v47 = vpop.f32.mrf.mxu3 }
  0xd9   : > { %2976 = vrot.lane.b32.xlu2 %v2652_v54, %s17446_s22 }
  0xda   : > { %v10494_v58 = vpop.permute.xlu2 %2846 }
  0xdb   : > { %2978 = vrot.lane.b32.xlu1 %v2653_v48, %s17446_s22  ;;  %17556 = vst [vmem:[#allocation48_spill] sm:$0xff] %v10494_v58  ;;  %v2751_v58 = vld [vmem:[#allocation2 + $0x9d] sm:$0xff] }
  0xdd   : > { %2980 = vrot.lane.b32.xlu0 %v2654_v51, %s17446_s22 }
  0xe1   : > { %2982 = vrot.lane.b32.xlu2 %v2655_v60, %s17446_s22  ;;  %v10501_v19 = vpop.permute.xlu1 %2842  ;;  %v906_v60 = vpop.f32.mrf.mxu2 }
  0xe2   : > { %v10499_v15 = vpop.permute.xlu2 %2852  ;;  %17558 = vst [vmem:[#allocation50_spill] sm:$0xff] %v10501_v19  ;;  %v2769_v19 = vld [vmem:[#allocation2 + $0x175] sm:$0xff] }
  0xe3   : > { %2984 = vrot.lane.b32.xlu1 %v2656_v55, %s17446_s22  ;;  %17557 = vst [vmem:[#allocation49_spill] sm:$0xff] %v10499_v15  ;;  %v10531_v55 = vadd.f32 %v10515_v39, %v897_v9  ;;  %v2698_v15 = vld [vmem:[#allocation2 + $0x123] sm:$0xff] }
  0xe5   : > { %2986 = vrot.lane.b32.xlu0 %v2657_v59, %s17446_s22  ;;  %17566 = vst [vmem:[#allocation58_spill] sm:$0xff] %v10531_v55  ;;  %v10534_v59 = vadd.f32 %v10515_v39, %v894_v56 }
  0xe7   : > { %17567 = vst [vmem:[#allocation59_spill] sm:$0xff] %v10534_v59  ;;  %v8808_v26 = vpack.i.bf16 %v10531_v55, %v10534_v59 }
  0xe9   : > { %2988 = vrot.lane.b32.xlu2 %v2658_v23, %s17446_s22  ;;  %v10505_v34 = vpop.permute.xlu0 %2844  ;;  %v933_v23 = vpop.f32.mrf.mxu3 }
  0xea   : > { %17559 = vst [vmem:[#allocation51_spill] sm:$0xff] %v10505_v34  ;;  %v10508_v36 = vpop.permute.xlu2 %2858  ;;  %v10612_v17 = vadd.f32 %v10515_v39, %v933_v23  ;;  %v2754_v34 = vld [vmem:[#allocation2 + $0xc5] sm:$0xff] }
  0xeb   : > { %2990 = vrot.lane.b32.xlu1 %v2659_v62, %s17446_s22  ;;  %17560 = vst [vmem:[#allocation52_spill] sm:$0xff] %v10508_v36  ;;  %v10510_v37 = vpop.permute.xlu1 %2848  ;;  %v10539_v62 = vadd.f32 %v10515_v39, %v927_v33  ;;  %v10558_v33 = vadd.f32 %v10515_v39, %v921_v57  ;;  %v2692_v36 = vld [vmem:[#allocation2 + $0xdb] sm:$0xff] }
  0xec   : > { %17561 = vst [vmem:[#allocation53_spill] sm:$0xff] %v10510_v37 }
  0xed   : > { %2992 = vrot.lane.b32.xlu0 %v2660_v20, %s17446_s22  ;;  %17568 = vst [vmem:[#allocation60_spill] sm:$0xff] %v10539_v62  ;;  %v8813_v53 = vpack.i.bf16 %v10539_v62, %v10555_v31 }
  0xee   : > { %17574 = vst [vmem:[#allocation66_spill] sm:$0xff] %v10558_v33 }
  0xef   : > { %17588 = vst [vmem:[#allocation80_spill] sm:$0xff] %v10612_v17 }
  0xf1   : > { %2994 = vrot.lane.b32.xlu2 %v2661_v42, %s17446_s22  ;;  %v10522_v48 = vpop.permute.xlu0 %2850  ;;  %v936_v57 = vpop.f32.mrf.mxu3 }
  0xf2   : > { %17563 = vst [vmem:[#allocation55_spill] sm:$0xff] %v10522_v48  ;;  %v10526_v51 = vpop.permute.xlu2 %2864 }
  0xf3   : > { %2996 = vrot.lane.b32.xlu1 %v2662_v25, %s17446_s22  ;;  %17564 = vst [vmem:[#allocation56_spill] sm:$0xff] %v10526_v51  ;;  %v10528_v54 = vpop.permute.xlu1 %2854  ;;  %v10552_v25 = vadd.f32 %v10515_v39, %v903_v46 }
  0xf4   : > { %17565 = vst [vmem:[#allocation57_spill] sm:$0xff] %v10528_v54  ;;  %v2693_v54 = vld [vmem:[#allocation2 + $0xe3] sm:$0xff] }
  0xf5   : > { %2998 = vrot.lane.b32.xlu0 %v2663_v40, %s17446_s22  ;;  %17572 = vst [vmem:[#allocation64_spill] sm:$0xff] %v10552_v25  ;;  %v909_v40 = vpop.f32.mrf.mxu2  ;;  %v8818_v42 = vpack.i.bf16 %v10552_v25, %v10518_v45 }
  0xf6   : > { %v10576_v63 = vadd.f32 %v10515_v39, %v909_v40  ;;  %v10591_v40 = vadd.f32 %v10515_v39, %v906_v60 }
  0xf8   : > { %17578 = vst [vmem:[#allocation70_spill] sm:$0xff] %v10576_v63  ;;  %v8828_v52 = vpack.i.bf16 %v10576_v63, %v10591_v40 }
  0xf9   : > { %1008 = vrot.lane.b32.xlu2 %v10534_v59, %s17451_s21  ;;  %v10543_v20 = vpop.permute.xlu0 %2856  ;;  %17582 = vst [vmem:[#allocation74_spill] sm:$0xff] %v10591_v40  ;;  %v939_v44 = vpop.f32.mrf.mxu3 }
  0xfa   : > { %17569 = vst [vmem:[#allocation61_spill] sm:$0xff] %v10543_v20  ;;  %v10609_v3 = vadd.f32 %v10515_v39, %v939_v44  ;;  %v659_v44 = vld [vmem:[%s17340_s4] sm:$0x1]  ;;  %v2694_v20 = vld [vmem:[#allocation2 + $0xf3] sm:$0xff] }
  0xfb   : > { %1012 = vrot.lane.b32.xlu1 %v10518_v45, %s17451_s21  ;;  %v10547_v9 = vpop.permute.xlu2 %2870  ;;  %v10549_v56 = vpop.permute.xlu1 %2860 }
  0xfc   : > { %17570 = vst [vmem:[#allocation62_spill] sm:$0xff] %v10547_v9 }
  0xfd   : > { %1010 = vrot.lane.b32.xlu0 %v10531_v55, %s17451_s21  ;;  %17571 = vst [vmem:[#allocation63_spill] sm:$0xff] %v10549_v56  ;;  %v912_v49 = vpop.f32.mrf.mxu2 }
  0xfe   : > { %17587 = vst [vmem:[#allocation79_spill] sm:$0xff] %v10609_v3 }
 0x101   : > { %1026 = vrot.lane.b32.xlu2 %v10558_v33, %s17451_s21  ;;  %v10566_v7 = vpop.permute.xlu0 %2862  ;;  %v942_v28 = vpop.f32.mrf.mxu3 }
 0x102   : > { %17575 = vst [vmem:[#allocation67_spill] sm:$0xff] %v10566_v7  ;;  %v2689_v7 = vld [vmem:[#allocation2 + $0xb3] sm:$0xff] }
 0x103   : > { %1030 = vrot.lane.b32.xlu1 %v10539_v62, %s17451_s21  ;;  %v10569_v11 = vpop.permute.xlu2 %2876  ;;  %v10571_v46 = vpop.permute.xlu1 %2866 }
 0x104   : > { %17576 = vst [vmem:[#allocation68_spill] sm:$0xff] %v10569_v11 }
 0x105   : > { %1028 = vrot.lane.b32.xlu0 %v10555_v31, %s17451_s21  ;;  %17577 = vst [vmem:[#allocation69_spill] sm:$0xff] %v10571_v46  ;;  %v2676_v46 = vld [vmem:[#allocation2 + $0x19a] sm:$0xff] }
 0x109   : > { %8809 = vrot.lane.b32.xlu2 %v8808_v26, %s17453_s17  ;;  %v915_v26 = vpop.f32.mrf.mxu2  ;;  %v680_v22 = vpop.f32.mrf.mxu0 }
 0x10a   : > { %v681_v8 = vadd.f32 %v680_v22, %v659_v44  ;;  %v10656_v0 = vadd.f32 %v10515_v39, %v915_v26  ;;  %v10659_v44 = vadd.f32 %v10515_v39, %v912_v49  ;;  %v10677_v26 = vadd.f32 %v10515_v39, %v942_v28 }
 0x10b   : > { %8819 = vrot.lane.b32.xlu1 %v8818_v42, %s17453_s17  ;;  %v10582_v42 = vpop.permute.xlu0 %2868  ;;  %v10586_v16 = vpop.permute.xlu2 %2882 }
 0x10c   : > { %17579 = vst [vmem:[#allocation71_spill] sm:$0xff] %v10582_v42 }
 0x10d   : > { %8814 = vrot.lane.b32.xlu0 %v8813_v53, %s17453_s17  ;;  %17580 = vst [vmem:[#allocation72_spill] sm:$0xff] %v10586_v16  ;;  %v10596_v53 = vadd.f32 %v10515_v39, %v936_v57  ;;  %v10615_v57 = vadd.f32 %v10515_v39, %v930_v47  ;;  %v2667_v16 = vld [vmem:[#allocation2 + $0x12a] sm:$0xff] }
 0x10e   : > { %17597 = vst [vmem:[#allocation89_spill] sm:$0xff] %v10656_v0 }
 0x10f   : > { %17583 = vst [vmem:[#allocation75_spill] sm:$0xff] %v10596_v53  ;;  %v8833_v4 = vpack.i.bf16 %v10609_v3, %v10596_v53  ;;  %v8823_v29 = vpack.i.bf16 %v10612_v17, %v10615_v57 }
 0x110   : > { %17589 = vst [vmem:[#allocation81_spill] sm:$0xff] %v10615_v57 }
 0x111   : > { %1014 = vrot.lane.b32.xlu2 %v10552_v25, %s17451_s21  ;;  %v918_v47 = vpop.f32.mrf.mxu2  ;;  %17598 = vst [vmem:[#allocation90_spill] sm:$0xff] %v10659_v44 }
 0x112   : > { %v10639_v43 = vadd.f32 %v10515_v39, %v918_v47  ;;  %17602 = vst [vmem:[#allocation94_spill] sm:$0xff] %v10677_v26 }
 0x113   : > { %1018 = vrot.lane.b32.xlu1 %v10576_v63, %s17451_s21  ;;  %v10604_v2 = vpop.permute.xlu2 %2888 }
 0x114   : > { %17585 = vst [vmem:[#allocation77_spill] sm:$0xff] %v10604_v2  ;;  %v2671_v2 = vld [vmem:[#allocation2 + $0x15a] sm:$0xff] }
 0x115   : > { %v10588_v6 = vpop.permute.xlu1 %2872  ;;  %1016 = vrot.lane.b32.xlu0 %v10591_v40, %s17451_s21  ;;  %17593 = vst [vmem:[#allocation85_spill] sm:$0xff] %v10639_v43 }
 0x116   : > { %17581 = vst [vmem:[#allocation73_spill] sm:$0xff] %v10588_v6  ;;  %v2673_v6 = vld [vmem:[#allocation2 + $0x172] sm:$0xff] }
 0x117   : > { %v10600_v30 = vpop.permute.xlu0 %2874 }
 0x118   : > { %17584 = vst [vmem:[#allocation76_spill] sm:$0xff] %v10600_v30  ;;  %v2670_v30 = vld [vmem:[#allocation2 + $0x152] sm:$0xff] }
 0x119   : > { %1032 = vrot.lane.b32.xlu2 %v10615_v57, %s17451_s21 }
 0x11b   : > { %1036 = vrot.lane.b32.xlu1 %v10596_v53, %s17451_s21  ;;  %v10629_v23 = vpop.permute.xlu2 %2894 }
 0x11c   : > { %17591 = vst [vmem:[#allocation83_spill] sm:$0xff] %v10629_v23  ;;  %v8838_v23 = vpack.i.bf16 %v10656_v0, %v10659_v44 }
 0x11d   : > { %v10606_v60 = vpop.permute.xlu1 %2878  ;;  %1034 = vrot.lane.b32.xlu0 %v10612_v17, %s17451_s21 }
 0x11e   : > { %17586 = vst [vmem:[#allocation78_spill] sm:$0xff] %v10606_v60  ;;  %v2669_v60 = vld [vmem:[#allocation2 + $0x142] sm:$0xff] }
 0x11f   : > { %v10626_v5 = vpop.permute.xlu0 %2880 }
 0x120   : > { %17590 = vst [vmem:[#allocation82_spill] sm:$0xff] %v10626_v5 }
 0x121   : > { %8824 = vrot.lane.b32.xlu2 %v8823_v29, %s17453_s17 }
 0x123   : > { %8834 = vrot.lane.b32.xlu1 %v8833_v4, %s17453_s17  ;;  %v683_v4 = vmax.f32 %v681_v8, 0.0  ;;  %v10651_v22 = vpop.permute.xlu2 %2900 }
 0x124   : > { %17595 = vst [vmem:[#allocation87_spill] sm:$0xff] %v10651_v22 }
 0x125   : > { %v10631_v12 = vpop.permute.xlu1 %2884  ;;  %8829 = vrot.lane.b32.xlu0 %v8828_v52, %s17453_s17  ;;  %8441 = vmatmul.msk.f32.vlgmr.msra.gmra.mxu1 %vm686_vm4, %v683_v4  ;;  %v945_v52 = vpop.f32.mrf.mxu3 }
 0x126   : > { %17592 = vst [vmem:[#allocation84_spill] sm:$0xff] %v10631_v12  ;;  %v10664_v1 = vadd.f32 %v10515_v39, %v945_v52  ;;  %v852_v4 = vpop.f32.mrf.mxu0  ;;  %v8843_v52 = vpack.i.bf16 %v10558_v33, %v10639_v43  ;;  %v2666_v12 = vld [vmem:[#allocation2 + $0x122] sm:$0xff] }
 0x127   : > { %v10647_v61 = vpop.permute.xlu0 %2886 }
 0x128   : > { %17594 = vst [vmem:[#allocation86_spill] sm:$0xff] %v10647_v61  ;;  %v8848_v22 = vpack.i.bf16 %v10664_v1, %v10677_v26 }
 0x129   : > { %17599 = vst [vmem:[#allocation91_spill] sm:$0xff] %v10664_v1  ;;  %1020 = vrot.lane.b32.xlu2 %v10659_v44, %s17451_s21 }
 0x12b   : > { %1024 = vrot.lane.b32.xlu1 %v10639_v43, %s17451_s21  ;;  %v10674_v49 = vpop.permute.xlu2 %2970 }
 0x12c   : > { %17601 = vst [vmem:[#allocation93_spill] sm:$0xff] %v10674_v49  ;;  %v2761_v49 = vld [vmem:[#allocation2 + $0x115] sm:$0xff] }
 0x12d   : > { %v10653_v8 = vpop.permute.xlu1 %2890  ;;  %1022 = vrot.lane.b32.xlu0 %v10656_v0, %s17451_s21  ;;  %8447 = vmatmul.msk.f32.vlgmr.msrb.gmra.mxu1 %vm17494_vm0, %v10102_v10 }
 0x12e   : > { %17596 = vst [vmem:[#allocation88_spill] sm:$0xff] %v10653_v8 }
 0x12f   : > { %v10670_v29 = vpop.permute.xlu0 %2892 }
 0x130   : > { %17600 = vst [vmem:[#allocation92_spill] sm:$0xff] %v10670_v29  ;;  %v2665_v29 = vld [vmem:[#allocation2 + $0x112] sm:$0xff] }
 0x131   : > { %1038 = vrot.lane.b32.xlu2 %v10609_v3, %s17451_s21 }
 0x133   : > { %1042 = vrot.lane.b32.xlu1 %v10664_v1, %s17451_s21  ;;  %v10692_v28 = vpop.permute.xlu2 %2976 }
 0x134   : > { %17605 = vst [vmem:[#allocation97_spill] sm:$0xff] %v10692_v28  ;;  %v2700_v28 = vld [vmem:[#allocation2 + $0x13b] sm:$0xff] }
 0x135   : > { %v10679_v47 = vpop.permute.xlu1 %2896  ;;  %1040 = vrot.lane.b32.xlu0 %v10677_v26, %s17451_s21  ;;  %8448 = vmatmul.msk.f32.gmra.mxu1 %vm17494_vm0, %v10111_v13 }
 0x136   : > { %17603 = vst [vmem:[#allocation95_spill] sm:$0xff] %v10679_v47  ;;  %v855_v47 = vpop.f32.mrf.mxu0 }
 0x137   : > { %v10689_v10 = vpop.permute.xlu0 %2898 }
 0x138   : > { %17604 = vst [vmem:[#allocation96_spill] sm:$0xff] %v10689_v10  ;;  %v10713_v10 = vadd.f32 %v10515_v39, %v852_v4  ;;  %v2664_v4 = vld [vmem:[#allocation2 + $0x10a] sm:$0xff] }
 0x139   : > { %8839 = vrot.lane.b32.xlu2 %v8838_v23, %s17453_s17 }
 0x13a   : > { %17609 = vst [vmem:[#allocation101_spill] sm:$0xff] %v10713_v10 }
 0x13b   : > { %8844 = vrot.lane.b32.xlu1 %v8843_v52, %s17453_s17  ;;  %v10705_v52 = vadd.f32 %v10515_v39, %v855_v47 }
 0x13d   : > { %v10694_v14 = vpop.permute.xlu1 %2902  ;;  %8849 = vrot.lane.b32.xlu0 %v8848_v22, %s17453_s17  ;;  %8449 = vmatmul.msk.f32.gmra.mxu1 %vm17494_vm0, %v10128_v18  ;;  %17607 = vst [vmem:[#allocation99_spill] sm:$0xff] %v10705_v52  ;;  %v8853_v22 = vpack.i.bf16 %v10705_v52, %v10713_v10  ;;  %v2668_v18 = vld [vmem:[#allocation2 + $0x13a] sm:$0xff] }
 0x13e   : > { %17606 = vst [vmem:[#allocation98_spill] sm:$0xff] %v10694_v14  ;;  %v10710_v14 = vpop.permute.xlu2 %2982 }
 0x13f   : > { %v10707_v13 = vpop.permute.xlu0 %2968  ;;  %17608 = vst [vmem:[#allocation100_spill] sm:$0xff] %v10710_v14 }
 0x141   : > { %8854 = vrot.lane.b32.xlu2 %v8853_v22, %s17453_s17 }
 0x143   : > { %3002 = vrot.lane.b32.xlu1 %v2665_v29, %s17446_s22 }
 0x145   : > { %v10715_v8 = vpop.permute.xlu1 %2972  ;;  %980 = vrot.lane.b32.xlu0 %v10713_v10, %s17451_s21  ;;  %8450 = vmatmul.msk.f32.gmra.mxu1 %vm17494_vm0, %v10139_v21 }
 0x146   : > { %17610 = vst [vmem:[#allocation102_spill] sm:$0xff] %v10715_v8  ;;  %v10727_v29 = vpop.permute.xlu2 %2988  ;;  %v2750_v8 = vld [vmem:[#allocation2 + $0x95] sm:$0xff] }
 0x147   : > { %v10724_v23 = vpop.permute.xlu0 %2974  ;;  %17612 = vst [vmem:[#allocation104_spill] sm:$0xff] %v10727_v29 }
 0x148   : > { %17611 = vst [vmem:[#allocation103_spill] sm:$0xff] %v10724_v23 }
 0x149   : > { %3000 = vrot.lane.b32.xlu2 %v2664_v4, %s17446_s22 }
 0x14b   : > { %3008 = vrot.lane.b32.xlu1 %v2668_v18, %s17446_s22  ;;  %v858_v18 = vpop.f32.mrf.mxu0 }
 0x14c   : > { %v10745_v5 = vadd.f32 %v10515_v39, %v858_v18 }
 0x14d   : > { %v10729_v47 = vpop.permute.xlu1 %2978  ;;  %982 = vrot.lane.b32.xlu0 %v10705_v52, %s17451_s21  ;;  %8451 = vmatmul.msk.f32.gmra.mxu1 %vm17494_vm0, %v10148_v24 }
 0x14e   : > { %17613 = vst [vmem:[#allocation105_spill] sm:$0xff] %v10729_v47  ;;  %v10739_v22 = vpop.permute.xlu2 %2994  ;;  %v2696_v47 = vld [vmem:[#allocation2 + $0x10b] sm:$0xff] }
 0x14f   : > { %v10736_v21 = vpop.permute.xlu0 %2980  ;;  %17615 = vst [vmem:[#allocation107_spill] sm:$0xff] %v10739_v22 }
 0x150   : > { %17614 = vst [vmem:[#allocation106_spill] sm:$0xff] %v10736_v21  ;;  %v2697_v21 = vld [vmem:[#allocation2 + $0x113] sm:$0xff] }
 0x151   : > { %17617 = vst [vmem:[#allocation109_spill] sm:$0xff] %v10745_v5  ;;  %3006 = vrot.lane.b32.xlu2 %v2667_v16, %s17446_s22 }
 0x153   : > { %3014 = vrot.lane.b32.xlu1 %v2671_v2, %s17446_s22  ;;  %v861_v11 = vpop.f32.mrf.mxu0 }
 0x155   : > { %v10741_v61 = vpop.permute.xlu1 %2984  ;;  %3004 = vrot.lane.b32.xlu0 %v2666_v12, %s17446_s22  ;;  %8452 = vmatmul.msk.f32.gmra.mxu1 %vm17494_vm0, %v10157_v27  ;;  %v10758_v12 = vadd.f32 %v10515_v39, %v861_v11  ;;  %v2674_v11 = vld [vmem:[#allocation2 + $0x182] sm:$0xff] }
 0x156   : > { %17616 = vst [vmem:[#allocation108_spill] sm:$0xff] %v10741_v61  ;;  %v1009_v2 = vpop.permute.xlu2 %1008 }
 0x157   : > { %v10750_v4 = vpop.permute.xlu0 %2986  ;;  %17620 = vst [vmem:[#allocation112_spill] sm:$0xff] %v10758_v12 }
 0x158   : > { %17618 = vst [vmem:[#allocation110_spill] sm:$0xff] %v10750_v4  ;;  %v2691_v4 = vld [vmem:[#allocation2 + $0xcb] sm:$0xff] }
 0x159   : > { %3012 = vrot.lane.b32.xlu2 %v2670_v30, %s17446_s22 }
 0x15b   : > { %984 = vrot.lane.b32.xlu1 %v10745_v5, %s17451_s21 }
 0x15d   : > { %v10754_v24 = vpop.permute.xlu1 %2990  ;;  %3010 = vrot.lane.b32.xlu0 %v2669_v60, %s17446_s22  ;;  %8453 = vmatmul.msk.f32.gmra.mxu1 %vm17494_vm0, %v10174_v32  ;;  %v8858_v60 = vpack.i.bf16 %v10758_v12, %v10745_v5 }
 0x15e   : > { %17619 = vst [vmem:[#allocation111_spill] sm:$0xff] %v10754_v24  ;;  %v10767_v18 = vpop.permute.xlu2 %1026  ;;  %v2684_v24 = vld [vmem:[#allocation2 + $0x7b] sm:$0xff] }
 0x15f   : > { %v10763_v16 = vpop.permute.xlu0 %2992 }
 0x160   : > { %17621 = vst [vmem:[#allocation113_spill] sm:$0xff] %v10763_v16  ;;  %v2677_v16 = vld [vmem:[#allocation2 + $0x1a2] sm:$0xff] }
 0x161   : > { %3018 = vrot.lane.b32.xlu2 %v2673_v6, %s17446_s22 }
 0x163   : > { %986 = vrot.lane.b32.xlu1 %v10758_v12, %s17451_s21 }
 0x165   : > { %v10769_v27 = vpop.permute.xlu1 %2996  ;;  %8859 = vrot.lane.b32.xlu0 %v8858_v60, %s17453_s17  ;;  %8454 = vmatmul.msk.f32.gmra.mxu1 %vm17494_vm0, %v10185_v35  ;;  %v2685_v35 = vld [vmem:[#allocation2 + $0x83] sm:$0xff] }
 0x166   : > { %17622 = vst [vmem:[#allocation114_spill] sm:$0xff] %v10769_v27  ;;  %v8810_v32 = vpop.permute.xlu2 %8809  ;;  %v2672_v27 = vld [vmem:[#allocation2 + $0x16a] sm:$0xff] }
 0x167   : > { %v10777_v30 = vpop.permute.xlu0 %2998  ;;  %v8812_v9 = vunpack.i.h.bf16 %v8810_v32  ;;  %v8811_v22 = vunpack.i.l.bf16 %v8810_v32  ;;  %v2675_v32 = vld [vmem:[#allocation2 + $0x18a] sm:$0xff] }
 0x168   : > { %17623 = vst [vmem:[#allocation115_spill] sm:$0xff] %v10777_v30  ;;  %v2686_v30 = vld [vmem:[#allocation2 + $0x93] sm:$0xff] }
 0x169   : > { %1878 = vmatpush.msra.mxu0 %v8812_v9  ;;  %3024 = vrot.lane.b32.xlu2 %v2676_v46, %s17446_s22  ;;  %v2679_v9 = vld [vmem:[#allocation2 + $0x1ba] sm:$0xff] }
 0x16b   : > { %3020 = vrot.lane.b32.xlu1 %v2674_v11, %s17446_s22  ;;  %1879 = vmatpush.msra.mxu0 %v8811_v22  ;;  %v2680_v22 = vld [vmem:[#allocation2 + $0x4b] sm:$0xff] }
 0x16d   : > { %v10780_v42 = vpop.permute.xlu1 %1012  ;;  %3016 = vrot.lane.b32.xlu0 %v2672_v27, %s17446_s22  ;;  %8455 = vmatmul.msk.f32.gmra.mxu1 %vm17494_vm0, %v10192_v38  ;;  %v2682_v38 = vld [vmem:[#allocation2 + $0x63] sm:$0xff] }
 0x16e   : > { %v10787_v60 = vpop.permute.xlu2 %1014 }
 0x16f   : > { %v1011_v6 = vpop.permute.xlu0 %1010 }
 0x170   : > { %8475 = vmatpush.xpose.msk.msrb.mxu3 %vm17494_vm0, %v1011_v6  ;;  %v2678_v6 = vld [vmem:[#allocation2 + $0x1b2] sm:$0xff] }
 0x171   : > { %3030 = vrot.lane.b32.xlu2 %v2679_v9, %s17446_s22 }
 0x173   : > { %3026 = vrot.lane.b32.xlu1 %v2677_v16, %s17446_s22 }
 0x174   : > { %8476 = vmatpush.xpose.msk.msrb.mxu3 %vm17494_vm0, %v1009_v2  ;;  %v2683_v2 = vld [vmem:[#allocation2 + $0x6b] sm:$0xff] }
 0x175   : > { %v10790_v11 = vpop.permute.xlu1 %1030  ;;  %3022 = vrot.lane.b32.xlu0 %v2675_v32, %s17446_s22  ;;  %8456 = vmatmul.msk.f32.gmra.mxu1 %vm17494_vm0, %v10201_v41 }
 0x176   : > { %v10800_v46 = vpop.permute.xlu2 %1032 }
 0x177   : > { %v10797_v27 = vpop.permute.xlu0 %1028 }
 0x179   : > { %3100 = vrot.lane.b32.xlu2 %v2682_v38, %s9895_s23 }
 0x17b   : > { %3096 = vrot.lane.b32.xlu1 %v2680_v22, %s9895_s23  ;;  %v2681_v22 = vld [vmem:[#allocation2 + $0x53] sm:$0xff] }
 0x17d   : > { %v10802_v16 = vpop.permute.xlu1 %8819  ;;  %3028 = vrot.lane.b32.xlu0 %v2678_v6, %s17446_s22 }
 0x17e   : > { %v10809_v9 = vpop.permute.xlu2 %8824 }
 0x17f   : > { %v10806_v32 = vpop.permute.xlu0 %8814 }
 0x181   : > { %3106 = vrot.lane.b32.xlu2 %v2685_v35, %s9895_s23  ;;  %v2687_v35 = vld [vmem:[#allocation2 + $0x9b] sm:$0xff] }
 0x183   : > { %3102 = vrot.lane.b32.xlu1 %v2683_v2, %s9895_s23  ;;  %v2688_v2 = vld [vmem:[#allocation2 + $0xab] sm:$0xff] }
 0x185   : > { %v10811_v41 = vpop.permute.xlu1 %1018  ;;  %3098 = vrot.lane.b32.xlu0 %v2681_v22, %s9895_s23 }
 0x186   : > { %v10818_v38 = vpop.permute.xlu2 %1020 }
 0x187   : > { %v10815_v51 = vpop.permute.xlu0 %1016 }
 0x189   : > { %3112 = vrot.lane.b32.xlu2 %v2688_v2, %s9895_s23  ;;  %v2690_v2 = vld [vmem:[#allocation2 + $0xc3] sm:$0xff] }
 0x18b   : > { %3108 = vrot.lane.b32.xlu1 %v2686_v30, %s9895_s23 }
 0x18d   : > { %v1037_v6 = vpop.permute.xlu1 %1036  ;;  %3104 = vrot.lane.b32.xlu0 %v2684_v24, %s9895_s23 }
 0x18e   : > { %v1039_v22 = vpop.permute.xlu2 %1038 }
 0x18f   : > { %v1035_v29 = vpop.permute.xlu0 %1034 }
 0x191   : > { %3118 = vrot.lane.b32.xlu2 %v2691_v4, %s9895_s23 }
 0x193   : > { %3114 = vrot.lane.b32.xlu1 %v2689_v7, %s9895_s23  ;;  %v2695_v7 = vld [vmem:[#allocation2 + $0xfb] sm:$0xff] }
 0x195   : > { %v8835_v56 = vpop.permute.xlu1 %8834  ;;  %3110 = vrot.lane.b32.xlu0 %v2687_v35, %s9895_s23 }
 0x196   : > { %v10828_v61 = vpop.permute.xlu2 %8839  ;;  %v8837_v23 = vunpack.i.h.bf16 %v8835_v56 }
 0x197   : > { %v10825_v30 = vpop.permute.xlu0 %8829 }
 0x199   : > { %3124 = vrot.lane.b32.xlu2 %v2694_v20, %s9895_s23 }
 0x19b   : > { %3120 = vrot.lane.b32.xlu1 %v2692_v36, %s9895_s23 }
 0x19d   : > { %v10830_v24 = vpop.permute.xlu1 %1024  ;;  %3116 = vrot.lane.b32.xlu0 %v2690_v2, %s9895_s23 }
 0x19e   : > { %v10837_v4 = vpop.permute.xlu2 %8854 }
 0x19f   : > { %v10834_v14 = vpop.permute.xlu0 %1022 }
 0x1a1   : > { %3130 = vrot.lane.b32.xlu2 %v2697_v21, %s9895_s23 }
 0x1a2   : > { %v10840_v36 = vpop.f32.mrf.mxu1 }
 0x1a3   : > { %3126 = vrot.lane.b32.xlu1 %v2695_v7, %s9895_s23  ;;  %17624 = vst [vmem:[#allocation116_spill] sm:$0xff] %v10840_v36 }
 0x1a5   : > { %v1043_v35 = vpop.permute.xlu1 %1042  ;;  %3122 = vrot.lane.b32.xlu0 %v2693_v54, %s9895_s23 }
 0x1a6   : > { %8523 = vmatpush.xpose.msk.msra.mxu1 %vm17494_vm0, %v1043_v35  ;;  %v10845_v20 = vpop.permute.xlu2 %3000  ;;  %v2701_v35 = vld [vmem:[#allocation2 + $0x143] sm:$0xff] }
 0x1a7   : > { %v1041_v2 = vpop.permute.xlu0 %1040  ;;  %17625 = vst [vmem:[#allocation117_spill] sm:$0xff] %v10845_v20  ;;  %v2699_v20 = vld [vmem:[#allocation2 + $0x12b] sm:$0xff] }
 0x1a9   : > { %3136 = vrot.lane.b32.xlu2 %v2700_v28, %s9895_s23  ;;  %v2704_v28 = vld [vmem:[#allocation2 + $0x16b] sm:$0xff] }
 0x1aa   : > { %8524 = vmatpush.xpose.msk.msra.mxu1 %vm17494_vm0, %v1041_v2  ;;  %v864_v48 = vpop.f32.mrf.mxu1 }
 0x1ab   : > { %3132 = vrot.lane.b32.xlu1 %v2698_v15, %s9895_s23 }
 0x1ad   : > { %v8845_v7 = vpop.permute.xlu1 %8844  ;;  %3128 = vrot.lane.b32.xlu0 %v2696_v47, %s9895_s23  ;;  %v8836_v47 = vunpack.i.l.bf16 %v8835_v56  ;;  %v2702_v56 = vld [vmem:[#allocation2 + $0x153] sm:$0xff] }
 0x1ae   : > { %8525 = vmatpush.xpose.msk.msra.mxu1 %vm17494_vm0, %v1039_v22  ;;  %v10852_v15 = vpop.permute.xlu2 %3006  ;;  %v2703_v22 = vld [vmem:[#allocation2 + $0x15b] sm:$0xff] }
 0x1af   : > { %v8850_v54 = vpop.permute.xlu0 %8849  ;;  %17626 = vst [vmem:[#allocation118_spill] sm:$0xff] %v10852_v15  ;;  %v2718_v15 = vld [vmem:[#allocation2 + $0x94] sm:$0xff] }
 0x1b0   : > { %v8852_v21 = vunpack.i.h.bf16 %v8850_v54  ;;  %v8851_v36 = vunpack.i.l.bf16 %v8850_v54 }
 0x1b1   : > { %3142 = vrot.lane.b32.xlu2 %v2703_v22, %s9895_s23 }
 0x1b2   : > { %8526 = vmatpush.xpose.msk.msra.mxu1 %vm17494_vm0, %v1037_v6  ;;  %1991 = vmatpush.msrb.mxu2 %v8852_v21  ;;  %v867_v37 = vpop.f32.mrf.mxu1  ;;  %v8827_v6 = vunpack.i.h.bf16 %v10809_v9  ;;  %v2707_v21 = vld [vmem:[#allocation2 + $0x18b] sm:$0xff] }
 0x1b3   : > { %3138 = vrot.lane.b32.xlu1 %v2701_v35, %s9895_s23 }
 0x1b4   : > { %1992 = vmatpush.msrb.mxu2 %v8851_v36  ;;  %v2706_v36 = vld [vmem:[#allocation2 + $0x183] sm:$0xff] }
 0x1b5   : > { %v10855_v2 = vpop.permute.xlu1 %3002  ;;  %3134 = vrot.lane.b32.xlu0 %v2699_v20, %s9895_s23  ;;  %v8817_v20 = vunpack.i.h.bf16 %v10806_v32 }
 0x1b6   : > { %17627 = vst [vmem:[#allocation119_spill] sm:$0xff] %v10855_v2  ;;  %8527 = vmatpush.xpose.msk.msra.mxu1 %vm17494_vm0, %v1035_v29  ;;  %1993 = vmatpush.msrb.mxu2 %v8837_v23  ;;  %v10864_v54 = vpop.permute.xlu2 %3012  ;;  %v8826_v23 = vunpack.i.l.bf16 %v10809_v9  ;;  %v8847_v9 = vunpack.i.h.bf16 %v8845_v7 }
 0x1b7   : > { %v10860_v35 = vpop.permute.xlu0 %980  ;;  %17628 = vst [vmem:[#allocation120_spill] sm:$0xff] %v10864_v54 }
 0x1b8   : > { %1994 = vmatpush.msrb.mxu2 %v8836_v47 }
 0x1b9   : > { %3148 = vrot.lane.b32.xlu2 %v2706_v36, %s9895_s23  ;;  %v8842_v36 = vunpack.i.h.bf16 %v10828_v61 }
 0x1ba   : > { %8528 = vmatpush.xpose.msk.msra.mxu1 %vm17494_vm0, %v10800_v46  ;;  %1995 = vmatpush.msrb.mxu2 %v8827_v6  ;;  %v10874_v22 = vpop.f32.mrf.mxu1  ;;  %v8816_v46 = vunpack.i.l.bf16 %v10806_v32  ;;  %v10890_v6 = vadd.f32 %v10515_v39, %v867_v37  ;;  %v8841_v37 = vunpack.i.l.bf16 %v10828_v61  ;;  %v8831_v61 = vunpack.i.l.bf16 %v10825_v30 }
 0x1bb   : > { %3144 = vrot.lane.b32.xlu1 %v2704_v28, %s9895_s23 }
 0x1bc   : > { %1996 = vmatpush.msrb.mxu2 %v8826_v23  ;;  %17632 = vst [vmem:[#allocation124_spill] sm:$0xff] %v10890_v6  ;;  %v8846_v23 = vunpack.i.l.bf16 %v8845_v7 }
 0x1bd   : > { %v10868_v29 = vpop.permute.xlu1 %3008  ;;  %3140 = vrot.lane.b32.xlu0 %v2702_v56, %s9895_s23  ;;  %v2705_v56 = vld [vmem:[#allocation2 + $0x173] sm:$0xff] }
 0x1be   : > { %17629 = vst [vmem:[#allocation121_spill] sm:$0xff] %v10868_v29  ;;  %8529 = vmatpush.xpose.msk.msra.mxu1 %vm17494_vm0, %v10790_v11  ;;  %1997 = vmatpush.msrb.mxu2 %v8817_v20  ;;  %v10882_v47 = vpop.permute.xlu2 %3018  ;;  %v10887_v11 = vadd.f32 %v10515_v39, %v864_v48  ;;  %v8832_v20 = vunpack.i.h.bf16 %v10825_v30 }
 0x1bf   : > { %v10879_v28 = vpop.permute.xlu0 %982  ;;  %17630 = vst [vmem:[#allocation122_spill] sm:$0xff] %v10882_v47  ;;  %v2715_v47 = vld [vmem:[#allocation2 + $0x6c] sm:$0xff] }
 0x1c0   : > { %1998 = vmatpush.msrb.mxu2 %v8816_v46  ;;  %17631 = vst [vmem:[#allocation123_spill] sm:$0xff] %v10887_v11  ;;  %v8863_v48 = vpack.i.bf16 %v10890_v6, %v10887_v11  ;;  %v2708_v46 = vld [vmem:[#allocation2 + $0x19b] sm:$0xff] }
 0x1c1   : > { %988 = vrot.lane.b32.xlu2 %v10887_v11, %s17451_s21 }
 0x1c2   : > { %8530 = vmatpush.xpose.msk.msra.mxu1 %vm17494_vm0, %v10797_v27  ;;  %1999 = vmatpush.msrb.mxu2 %v8847_v9  ;;  %v873_v27 = vpop.f32.mrf.mxu1  ;;  %v8822_v9 = vunpack.i.h.bf16 %v10802_v16 }
 0x1c3   : > { %3150 = vrot.lane.b32.xlu1 %v2707_v21, %s9895_s23 }
 0x1c4   : > { %2000 = vmatpush.msrb.mxu2 %v8846_v23  ;;  %v2710_v23 = vld [vmem:[#allocation2 + $0x1b3] sm:$0xff] }
 0x1c5   : > { %v10892_v32 = vpop.permute.xlu1 %3014  ;;  %3146 = vrot.lane.b32.xlu0 %v2705_v56, %s9895_s23  ;;  %v8821_v56 = vunpack.i.l.bf16 %v10802_v16  ;;  %v10934_v16 = vadd.f32 %v10515_v39, %v873_v27  ;;  %v2712_v27 = vld [vmem:[#allocation2 + $0x4c] sm:$0xff] }
 0x1c6   : > { %17633 = vst [vmem:[#allocation125_spill] sm:$0xff] %v10892_v32  ;;  %8531 = vmatpush.xpose.msk.msra.mxu1 %vm17494_vm0, %v10767_v18  ;;  %2001 = vmatpush.msrb.mxu2 %v8842_v36  ;;  %v10907_v18 = vpop.permute.xlu2 %3024  ;;  %v2719_v32 = vld [vmem:[#allocation2 + $0x9c] sm:$0xff] }
 0x1c7   : > { %v10903_v7 = vpop.permute.xlu0 %3004  ;;  %17635 = vst [vmem:[#allocation127_spill] sm:$0xff] %v10907_v18 }
 0x1c8   : > { %17634 = vst [vmem:[#allocation126_spill] sm:$0xff] %v10903_v7  ;;  %2002 = vmatpush.msrb.mxu2 %v8841_v37  ;;  %v2709_v37 = vld [vmem:[#allocation2 + $0x1a3] sm:$0xff] }
 0x1c9   : > { %990 = vrot.lane.b32.xlu2 %v10890_v6, %s17451_s21  ;;  %17638 = vst [vmem:[#allocation130_spill] sm:$0xff] %v10934_v16 }
 0x1ca   : > { %8532 = vmatpush.xpose.msk.msra.mxu1 %vm17494_vm0, %v10830_v24  ;;  %2003 = vmatpush.msrb.mxu2 %v8832_v20 }
 0x1cb   : > { %8864 = vrot.lane.b32.xlu1 %v8863_v48, %s17453_s17  ;;  %v2711_v48 = vld [vmem:[#allocation2 + $0x1bb] sm:$0xff] }
 0x1cc   : > { %2004 = vmatpush.msrb.mxu2 %v8831_v61 }
 0x1cd   : > { %v10911_v21 = vpop.permute.xlu1 %984  ;;  %3152 = vrot.lane.b32.xlu0 %v2708_v46, %s9895_s23  ;;  %v10949_v46 = vadd.f32 %v10515_v39, %v10874_v22 }
 0x1ce   : > { %8533 = vmatpush.xpose.msk.msra.mxu1 %vm17494_vm0, %v10834_v14  ;;  %2005 = vmatpush.msrb.mxu2 %v8822_v9  ;;  %v10924_v30 = vpop.permute.xlu2 %3030  ;;  %v876_v14 = vpop.f32.mrf.mxu1  ;;  %v2713_v9 = vld [vmem:[#allocation2 + $0x54] sm:$0xff] }
 0x1cf   : > { %v10921_v24 = vpop.permute.xlu0 %3010  ;;  %17637 = vst [vmem:[#allocation129_spill] sm:$0xff] %v10924_v30  ;;  %v2714_v30 = vld [vmem:[#allocation2 + $0x64] sm:$0xff] }
 0x1d0   : > { %17636 = vst [vmem:[#allocation128_spill] sm:$0xff] %v10921_v24  ;;  %2006 = vmatpush.msrb.mxu2 %v8821_v56  ;;  %v8868_v56 = vpack.i.bf16 %v10934_v16, %v10949_v46  ;;  %v2720_v24 = vld [vmem:[#allocation2 + $0xac] sm:$0xff] }
 0x1d1   : > { %3154 = vrot.lane.b32.xlu2 %v2709_v37, %s9895_s23  ;;  %17641 = vst [vmem:[#allocation133_spill] sm:$0xff] %v10949_v46  ;;  %v2716_v37 = vld [vmem:[#allocation2 + $0x7c] sm:$0xff] }
 0x1d2   : > { %8534 = vmatpush.xpose.msk.msra.mxu1 %vm17494_vm0, %v10818_v38 }
 0x1d3   : > { %3156 = vrot.lane.b32.xlu1 %v2710_v23, %s9895_s23 }
 0x1d5   : > { %v10928_v36 = vpop.permute.xlu1 %986  ;;  %3158 = vrot.lane.b32.xlu0 %v2711_v48, %s9895_s23 }
 0x1d6   : > { %8535 = vmatpush.xpose.msk.msra.mxu1 %vm17494_vm0, %v10811_v41  ;;  %v10941_v38 = vpop.permute.xlu2 %3100  ;;  %v879_v41 = vpop.f32.mrf.mxu1 }
 0x1d7   : > { %v10937_v20 = vpop.permute.xlu0 %8859  ;;  %17639 = vst [vmem:[#allocation131_spill] sm:$0xff] %v10941_v38  ;;  %v2752_v38 = vld [vmem:[#allocation2 + $0xad] sm:$0xff] }
 0x1d9   : > { %3224 = vrot.lane.b32.xlu2 %v2712_v27, %s9896_s18 }
 0x1da   : > { %8536 = vmatpush.xpose.msk.msra.mxu1 %vm17494_vm0, %v10815_v51 }
 0x1db   : > { %994 = vrot.lane.b32.xlu1 %v10934_v16, %s17451_s21 }
 0x1dd   : > { %v10945_v61 = vpop.permute.xlu1 %3020  ;;  %992 = vrot.lane.b32.xlu0 %v10949_v46, %s17451_s21 }
 0x1de   : > { %17640 = vst [vmem:[#allocation132_spill] sm:$0xff] %v10945_v61  ;;  %8537 = vmatpush.xpose.msk.msra.mxu1 %vm17494_vm0, %v10787_v60  ;;  %v10959_v51 = vpop.permute.xlu2 %3106  ;;  %v10966_v60 = vadd.f32 %v10515_v39, %v876_v14  ;;  %v882_v48 = vpop.f32.mrf.mxu1 }
 0x1df   : > { %v10956_v23 = vpop.permute.xlu0 %3016  ;;  %17643 = vst [vmem:[#allocation135_spill] sm:$0xff] %v10959_v51  ;;  %v2746_v51 = vld [vmem:[#allocation2 + $0x65] sm:$0xff] }
 0x1e0   : > { %17642 = vst [vmem:[#allocation134_spill] sm:$0xff] %v10956_v23  ;;  %v2717_v23 = vld [vmem:[#allocation2 + $0x84] sm:$0xff] }
 0x1e1   : > { %17645 = vst [vmem:[#allocation137_spill] sm:$0xff] %v10966_v60  ;;  %996 = vrot.lane.b32.xlu2 %v10966_v60, %s17451_s21 }
 0x1e2   : > { %8538 = vmatpush.xpose.msk.msra.mxu1 %vm17494_vm0, %v10780_v42  ;;  %v10979_v42 = vadd.f32 %v10515_v39, %v879_v41 }
 0x1e3   : > { %3226 = vrot.lane.b32.xlu1 %v2713_v9, %s9896_s18 }
 0x1e4   : > { %17647 = vst [vmem:[#allocation139_spill] sm:$0xff] %v10979_v42 }
 0x1e5   : > { %v10963_v22 = vpop.permute.xlu1 %3026  ;;  %8539 = vmatmul.msk.f32.vlgmr.msra.gmra.mxu1 %vm17494_vm0, %v10713_v10  ;;  %8869 = vrot.lane.b32.xlu0 %v8868_v56, %s17453_s17  ;;  %v8873_v56 = vpack.i.bf16 %v10979_v42, %v10966_v60 }
 0x1e6   : > { %17644 = vst [vmem:[#allocation136_spill] sm:$0xff] %v10963_v22  ;;  %v10981_v14 = vpop.permute.xlu2 %3112  ;;  %v10991_v22 = vadd.f32 %v10515_v39, %v882_v48  ;;  %v885_v41 = vpop.f32.mrf.mxu1 }
 0x1e7   : > { %v10975_v27 = vpop.permute.xlu0 %3022  ;;  %17648 = vst [vmem:[#allocation140_spill] sm:$0xff] %v10981_v14  ;;  %v2737_v14 = vld [vmem:[#allocation2 + $0x174] sm:$0xff] }
 0x1e8   : > { %17646 = vst [vmem:[#allocation138_spill] sm:$0xff] %v10975_v27  ;;  %v11001_v27 = vadd.f32 %v10515_v39, %v885_v41 }
 0x1e9   : > { %17649 = vst [vmem:[#allocation141_spill] sm:$0xff] %v10991_v22  ;;  %8874 = vrot.lane.b32.xlu2 %v8873_v56, %s17453_s17 }
 0x1ea   : > { %17652 = vst [vmem:[#allocation144_spill] sm:$0xff] %v11001_v27 }
 0x1eb   : > { %3232 = vrot.lane.b32.xlu1 %v2716_v37, %s9896_s18 }
 0x1ed   : > { %v10983_v9 = vpop.permute.xlu1 %3096  ;;  %8540 = vmatmul.msk.f32.gmra.mxu1 %vm17494_vm0, %v10705_v52  ;;  %3228 = vrot.lane.b32.xlu0 %v2714_v30, %s9896_s18  ;;  %v8878_v30 = vpack.i.bf16 %v11001_v27, %v10991_v22 }
 0x1ee   : > { %v10998_v18 = vpop.permute.xlu2 %3118  ;;  %v888_v41 = vpop.f32.mrf.mxu1 }
 0x1ef   : > { %v10994_v37 = vpop.permute.xlu0 %3028  ;;  %17651 = vst [vmem:[#allocation143_spill] sm:$0xff] %v10998_v18  ;;  %v2727_v18 = vld [vmem:[#allocation2 + $0xfc] sm:$0xff] }
 0x1f0   : > { %17650 = vst [vmem:[#allocation142_spill] sm:$0xff] %v10994_v37 }
 0x1f1   : > { %3230 = vrot.lane.b32.xlu2 %v2715_v47, %s9896_s18 }
 0x1f3   : > { %1000 = vrot.lane.b32.xlu1 %v10991_v22, %s17451_s21 }
 0x1f5   : > { %v11003_v61 = vpop.permute.xlu1 %3102  ;;  %8541 = vmatmul.msk.f32.gmra.mxu1 %vm17494_vm0, %v10745_v5  ;;  %998 = vrot.lane.b32.xlu0 %v10979_v42, %s17451_s21 }
 0x1f6   : > { %17653 = vst [vmem:[#allocation145_spill] sm:$0xff] %v11003_v61  ;;  %v11015_v56 = vpop.permute.xlu2 %3124  ;;  %v891_v29 = vpop.f32.mrf.mxu1  ;;  %v2749_v61 = vld [vmem:[#allocation2 + $0x85] sm:$0xff] }
 0x1f7   : > { %v11012_v48 = vpop.permute.xlu0 %3098  ;;  %17655 = vst [vmem:[#allocation147_spill] sm:$0xff] %v11015_v56  ;;  %v2721_v56 = vld [vmem:[#allocation2 + $0xb4] sm:$0xff] }
 0x1f8   : > { %17654 = vst [vmem:[#allocation146_spill] sm:$0xff] %v11012_v48 }
 0x1f9   : > { %1002 = vrot.lane.b32.xlu2 %v11001_v27, %s17451_s21 }
 0x1fb   : > { %8879 = vrot.lane.b32.xlu1 %v8878_v30, %s17453_s17 }
 0x1fd   : > { %v11017_v37 = vpop.permute.xlu1 %3108  ;;  %8542 = vmatmul.msk.f32.gmra.mxu1 %vm17494_vm0, %v10758_v12  ;;  %3234 = vrot.lane.b32.xlu0 %v2717_v23, %s9896_s18  ;;  %v11035_v23 = vadd.f32 %v10515_v39, %v891_v29  ;;  %v2722_v29 = vld [vmem:[#allocation2 + $0xc4] sm:$0xff] }
 0x1fe   : > { %17656 = vst [vmem:[#allocation148_spill] sm:$0xff] %v11017_v37  ;;  %v11027_v30 = vpop.permute.xlu2 %3130  ;;  %v2743_v37 = vld [vmem:[#allocation2 + $0x1bc] sm:$0xff] }
 0x1ff   : > { %v11024_v47 = vpop.permute.xlu0 %3104  ;;  %17658 = vst [vmem:[#allocation150_spill] sm:$0xff] %v11027_v30  ;;  %v11045_v30 = vadd.f32 %v10515_v39, %v888_v41 }
 0x200   : > { %17657 = vst [vmem:[#allocation149_spill] sm:$0xff] %v11024_v47  ;;  %v2748_v47 = vld [vmem:[#allocation2 + $0x7d] sm:$0xff] }
 0x201   : > { %17660 = vst [vmem:[#allocation152_spill] sm:$0xff] %v11035_v23  ;;  %3236 = vrot.lane.b32.xlu2 %v2718_v15, %s9896_s18  ;;  %v8883_v41 = vpack.i.bf16 %v11035_v23, %v11045_v30 }
 0x202   : > { %17663 = vst [vmem:[#allocation155_spill] sm:$0xff] %v11045_v30 }
 0x203   : > { %3238 = vrot.lane.b32.xlu1 %v2719_v32, %s9896_s18 }
 0x205   : > { %v11029_v54 = vpop.permute.xlu1 %3114  ;;  %8543 = vmatmul.msk.f32.gmra.mxu1 %vm17494_vm0, %v10887_v11  ;;  %3240 = vrot.lane.b32.xlu0 %v2720_v24, %s9896_s18 }
 0x206   : > { %17659 = vst [vmem:[#allocation151_spill] sm:$0xff] %v11029_v54  ;;  %v11042_v32 = vpop.permute.xlu2 %3136  ;;  %v2734_v54 = vld [vmem:[#allocation2 + $0x154] sm:$0xff] }
 0x207   : > { %v11038_v7 = vpop.permute.xlu0 %3110  ;;  %17662 = vst [vmem:[#allocation154_spill] sm:$0xff] %v11042_v32  ;;  %v2724_v32 = vld [vmem:[#allocation2 + $0xdc] sm:$0xff] }
 0x208   : > { %17661 = vst [vmem:[#allocation153_spill] sm:$0xff] %v11038_v7  ;;  %v2742_v7 = vld [vmem:[#allocation2 + $0x1b4] sm:$0xff] }
 0x209   : > { %3242 = vrot.lane.b32.xlu2 %v2721_v56, %s9896_s18 }
 0x20b   : > { %1006 = vrot.lane.b32.xlu1 %v11035_v23, %s17451_s21 }
 0x20d   : > { %v11047_v2 = vpop.permute.xlu1 %3120  ;;  %8544 = vmatmul.msk.f32.gmra.mxu1 %vm17494_vm0, %v10890_v6  ;;  %1004 = vrot.lane.b32.xlu0 %v11045_v30, %s17451_s21 }
 0x20e   : > { %17664 = vst [vmem:[#allocation156_spill] sm:$0xff] %v11047_v2  ;;  %v11057_v24 = vpop.permute.xlu2 %3142  ;;  %v2725_v2 = vld [vmem:[#allocation2 + $0xe4] sm:$0xff] }
 0x20f   : > { %v11054_v15 = vpop.permute.xlu0 %3116  ;;  %17666 = vst [vmem:[#allocation158_spill] sm:$0xff] %v11057_v24 }
 0x210   : > { %17665 = vst [vmem:[#allocation157_spill] sm:$0xff] %v11054_v15  ;;  %v2728_v15 = vld [vmem:[#allocation2 + $0x10c] sm:$0xff] }
 0x211   : > { %3248 = vrot.lane.b32.xlu2 %v2724_v32, %s9896_s18 }
 0x213   : > { %3244 = vrot.lane.b32.xlu1 %v2722_v29, %s9896_s18 }
 0x215   : > { %v11059_v39 = vpop.permute.xlu1 %3126  ;;  %8545 = vmatmul.msk.f32.gmra.mxu1 %vm17494_vm0, %v10949_v46  ;;  %8884 = vrot.lane.b32.xlu0 %v8883_v41, %s17453_s17 }
 0x216   : > { %17667 = vst [vmem:[#allocation159_spill] sm:$0xff] %v11059_v39  ;;  %v11070_v29 = vpop.permute.xlu2 %3148  ;;  %v2723_v39 = vld [vmem:[#allocation2 + $0xcc] sm:$0xff] }
 0x217   : > { %v11067_v56 = vpop.permute.xlu0 %3122  ;;  %17669 = vst [vmem:[#allocation161_spill] sm:$0xff] %v11070_v29  ;;  %v2726_v29 = vld [vmem:[#allocation2 + $0xf4] sm:$0xff] }
 0x218   : > { %17668 = vst [vmem:[#allocation160_spill] sm:$0xff] %v11067_v56  ;;  %v2731_v56 = vld [vmem:[#allocation2 + $0x12c] sm:$0xff] }
 0x219   : > { %3254 = vrot.lane.b32.xlu2 %v2727_v18, %s9896_s18 }
 0x21b   : > { %3250 = vrot.lane.b32.xlu1 %v2725_v2, %s9896_s18 }
 0x21d   : > { %v11072_v24 = vpop.permute.xlu1 %3132  ;;  %8546 = vmatmul.msk.f32.gmra.mxu1 %vm17494_vm0, %v10934_v16  ;;  %3246 = vrot.lane.b32.xlu0 %v2723_v39, %s9896_s18 }
 0x21e   : > { %17670 = vst [vmem:[#allocation162_spill] sm:$0xff] %v11072_v24  ;;  %v11081_v32 = vpop.permute.xlu2 %988  ;;  %v2730_v24 = vld [vmem:[#allocation2 + $0x124] sm:$0xff] }
 0x21f   : > { %v11078_v41 = vpop.permute.xlu0 %3128 }
 0x220   : > { %17671 = vst [vmem:[#allocation163_spill] sm:$0xff] %v11078_v41  ;;  %v2729_v41 = vld [vmem:[#allocation2 + $0x114] sm:$0xff] }
 0x221   : > { %3260 = vrot.lane.b32.xlu2 %v2730_v24, %s9896_s18 }
 0x223   : > { %3256 = vrot.lane.b32.xlu1 %v2728_v15, %s9896_s18 }
 0x225   : > { %v11083_v2 = vpop.permute.xlu1 %3138  ;;  %8547 = vmatmul.msk.f32.gmra.mxu1 %vm17494_vm0, %v10966_v60  ;;  %3252 = vrot.lane.b32.xlu0 %v2726_v29, %s9896_s18 }
 0x226   : > { %17672 = vst [vmem:[#allocation164_spill] sm:$0xff] %v11083_v2  ;;  %v11092_v18 = vpop.permute.xlu2 %990  ;;  %v2733_v2 = vld [vmem:[#allocation2 + $0x144] sm:$0xff] }
 0x227   : > { %v11089_v39 = vpop.permute.xlu0 %3134 }
 0x228   : > { %17673 = vst [vmem:[#allocation165_spill] sm:$0xff] %v11089_v39  ;;  %v2732_v39 = vld [vmem:[#allocation2 + $0x13c] sm:$0xff] }
 0x229   : > { %3266 = vrot.lane.b32.xlu2 %v2733_v2, %s9896_s18 }
 0x22b   : > { %3262 = vrot.lane.b32.xlu1 %v2731_v56, %s9896_s18 }
 0x22d   : > { %v11094_v15 = vpop.permute.xlu1 %3144  ;;  %8548 = vmatmul.msk.f32.gmra.mxu1 %vm17494_vm0, %v10979_v42  ;;  %3258 = vrot.lane.b32.xlu0 %v2729_v41, %s9896_s18 }
 0x22e   : > { %17674 = vst [vmem:[#allocation166_spill] sm:$0xff] %v11094_v15  ;;  %v11103_v24 = vpop.permute.xlu2 %3154  ;;  %v2736_v15 = vld [vmem:[#allocation2 + $0x16c] sm:$0xff] }
 0x22f   : > { %v11100_v29 = vpop.permute.xlu0 %3140  ;;  %17676 = vst [vmem:[#allocation168_spill] sm:$0xff] %v11103_v24  ;;  %v2735_v24 = vld [vmem:[#allocation2 + $0x15c] sm:$0xff] }
 0x230   : > { %17675 = vst [vmem:[#allocation167_spill] sm:$0xff] %v11100_v29  ;;  %v2740_v29 = vld [vmem:[#allocation2 + $0x19c] sm:$0xff] }
 0x231   : > { %3272 = vrot.lane.b32.xlu2 %v2736_v15, %s9896_s18 }
 0x233   : > { %3268 = vrot.lane.b32.xlu1 %v2734_v54, %s9896_s18 }
 0x235   : > { %v11105_v56 = vpop.permute.xlu1 %3150  ;;  %8549 = vmatmul.msk.f32.gmra.mxu1 %vm17494_vm0, %v10991_v22  ;;  %3264 = vrot.lane.b32.xlu0 %v2732_v39, %s9896_s18 }
 0x236   : > { %17677 = vst [vmem:[#allocation169_spill] sm:$0xff] %v11105_v56  ;;  %v11114_v2 = vpop.permute.xlu2 %3224  ;;  %v2739_v56 = vld [vmem:[#allocation2 + $0x18c] sm:$0xff] }
 0x237   : > { %v11111_v41 = vpop.permute.xlu0 %3146 }
 0x238   : > { %17678 = vst [vmem:[#allocation170_spill] sm:$0xff] %v11111_v41  ;;  %v2738_v41 = vld [vmem:[#allocation2 + $0x184] sm:$0xff] }
 0x239   : > { %3278 = vrot.lane.b32.xlu2 %v2739_v56, %s9896_s18 }
 0x23b   : > { %3274 = vrot.lane.b32.xlu1 %v2737_v14, %s9896_s18 }
 0x23d   : > { %v11116_v54 = vpop.permute.xlu1 %8864  ;;  %8550 = vmatmul.msk.f32.gmra.mxu1 %vm17494_vm0, %v11001_v27  ;;  %3270 = vrot.lane.b32.xlu0 %v2735_v24, %s9896_s18 }
 0x23e   : > { %v11125_v15 = vpop.permute.xlu2 %996 }
 0x23f   : > { %v11122_v39 = vpop.permute.xlu0 %3152 }
 0x240   : > { %17679 = vst [vmem:[#allocation171_spill] sm:$0xff] %v11122_v39  ;;  %v2741_v39 = vld [vmem:[#allocation2 + $0x1a4] sm:$0xff] }
 0x241   : > { %3284 = vrot.lane.b32.xlu2 %v2742_v7, %s9896_s18 }
 0x243   : > { %3280 = vrot.lane.b32.xlu1 %v2740_v29, %s9896_s18 }
 0x245   : > { %v11127_v14 = vpop.permute.xlu1 %3156  ;;  %8551 = vmatmul.msk.f32.gmra.mxu1 %vm17494_vm0, %v11045_v30  ;;  %3276 = vrot.lane.b32.xlu0 %v2738_v41, %s9896_s18 }
 0x246   : > { %17680 = vst [vmem:[#allocation172_spill] sm:$0xff] %v11127_v14  ;;  %v11136_v56 = vpop.permute.xlu2 %8874  ;;  %v2745_v14 = vld [vmem:[#allocation2 + $0x55] sm:$0xff] }
 0x247   : > { %v11133_v24 = vpop.permute.xlu0 %3158 }
 0x248   : > { %17681 = vst [vmem:[#allocation173_spill] sm:$0xff] %v11133_v24  ;;  %v2744_v24 = vld [vmem:[#allocation2 + $0x4d] sm:$0xff] }
 0x249   : > { %3354 = vrot.lane.b32.xlu2 %v2745_v14, %s9897_s24 }
 0x24b   : > { %3286 = vrot.lane.b32.xlu1 %v2743_v37, %s9896_s18 }
 0x24d   : > { %v11138_v29 = vpop.permute.xlu1 %994  ;;  %8552 = vmatmul.msk.f32.gmra.mxu1 %vm17494_vm0, %v11035_v23  ;;  %3282 = vrot.lane.b32.xlu0 %v2741_v39, %s9896_s18 }
 0x24e   : > { %v11147_v37 = vpop.permute.xlu2 %3230 }
 0x24f   : > { %v11144_v7 = vpop.permute.xlu0 %992  ;;  %17682 = vst [vmem:[#allocation174_spill] sm:$0xff] %v11147_v37  ;;  %v2747_v37 = vld [vmem:[#allocation2 + $0x6d] sm:$0xff] }
 0x251   : > { %3360 = vrot.lane.b32.xlu2 %v2748_v47, %s9897_s24 }
 0x253   : > { %3356 = vrot.lane.b32.xlu1 %v2746_v51, %s9897_s24 }
 0x255   : > { %v11149_v41 = vpop.permute.xlu1 %3226  ;;  %8553 = vmatmul.msk.f32.gmra.mxu1 %vm17494_vm0, %v10534_v59  ;;  %3352 = vrot.lane.b32.xlu0 %v2744_v24, %s9897_s24 }
 0x256   : > { %17683 = vst [vmem:[#allocation175_spill] sm:$0xff] %v11149_v41  ;;  %v1003_v14 = vpop.permute.xlu2 %1002  ;;  %v2757_v41 = vld [vmem:[#allocation2 + $0xe5] sm:$0xff] }
 0x257   : > { %v11155_v39 = vpop.permute.xlu0 %8869 }
 0x259   : > { %3366 = vrot.lane.b32.xlu2 %v2751_v58, %s9897_s24 }
 0x25b   : > { %3362 = vrot.lane.b32.xlu1 %v2749_v61, %s9897_s24 }
 0x25d   : > { %v11158_v51 = vpop.permute.xlu1 %3232  ;;  %8554 = vmatmul.msk.f32.gmra.mxu1 %vm17494_vm0, %v10531_v55  ;;  %3358 = vrot.lane.b32.xlu0 %v2747_v37, %s9897_s24 }
 0x25e   : > { %17684 = vst [vmem:[#allocation176_spill] sm:$0xff] %v11158_v51  ;;  %v11167_v47 = vpop.permute.xlu2 %3236  ;;  %v2755_v51 = vld [vmem:[#allocation2 + $0xcd] sm:$0xff] }
 0x25f   : > { %v11164_v24 = vpop.permute.xlu0 %3228  ;;  %17686 = vst [vmem:[#allocation178_spill] sm:$0xff] %v11167_v47  ;;  %v2758_v47 = vld [vmem:[#allocation2 + $0xf5] sm:$0xff] }
 0x260   : > { %17685 = vst [vmem:[#allocation177_spill] sm:$0xff] %v11164_v24 }
 0x261   : > { %3372 = vrot.lane.b32.xlu2 %v2754_v34, %s9897_s24 }
 0x263   : > { %3368 = vrot.lane.b32.xlu1 %v2752_v38, %s9897_s24  ;;  %v2753_v38 = vld [vmem:[#allocation2 + $0xb5] sm:$0xff] }
 0x265   : > { %v1001_v61 = vpop.permute.xlu1 %1000  ;;  %8555 = vmatmul.msk.f32.gmra.mxu1 %vm17494_vm0, %v10518_v45  ;;  %3364 = vrot.lane.b32.xlu0 %v2750_v8, %s9897_s24 }
 0x266   : > { %v11174_v58 = vpop.permute.xlu2 %3242 }
 0x267   : > { %v999_v37 = vpop.permute.xlu0 %998  ;;  %17687 = vst [vmem:[#allocation179_spill] sm:$0xff] %v11174_v58  ;;  %v2760_v58 = vld [vmem:[#allocation2 + $0x10d] sm:$0xff] }
 0x269   : > { %3378 = vrot.lane.b32.xlu2 %v2757_v41, %s9897_s24 }
 0x26b   : > { %3374 = vrot.lane.b32.xlu1 %v2755_v51, %s9897_s24  ;;  %v2756_v51 = vld [vmem:[#allocation2 + $0xdd] sm:$0xff] }
 0x26d   : > { %v8880_v24 = vpop.permute.xlu1 %8879  ;;  %8556 = vmatmul.msk.f32.gmra.mxu1 %vm17494_vm0, %v10552_v25  ;;  %3370 = vrot.lane.b32.xlu0 %v2753_v38, %s9897_s24 }
 0x26e   : > { %v11183_v34 = vpop.permute.xlu2 %3248 }
 0x26f   : > { %v11180_v48 = vpop.permute.xlu0 %3234  ;;  %17689 = vst [vmem:[#allocation181_spill] sm:$0xff] %v11183_v34  ;;  %v2759_v34 = vld [vmem:[#allocation2 + $0xfd] sm:$0xff] }
 0x270   : > { %17688 = vst [vmem:[#allocation180_spill] sm:$0xff] %v11180_v48  ;;  %v2764_v48 = vld [vmem:[#allocation2 + $0x13d] sm:$0xff] }
 0x271   : > { %3384 = vrot.lane.b32.xlu2 %v2760_v58, %s9897_s24 }
 0x273   : > { %3380 = vrot.lane.b32.xlu1 %v2758_v47, %s9897_s24 }
 0x275   : > { %v11185_v8 = vpop.permute.xlu1 %3238  ;;  %8557 = vmatmul.msk.f32.gmra.mxu1 %vm17494_vm0, %v10591_v40  ;;  %3376 = vrot.lane.b32.xlu0 %v2756_v51, %s9897_s24 }
 0x276   : > { %17690 = vst [vmem:[#allocation182_spill] sm:$0xff] %v11185_v8  ;;  %v11194_v41 = vpop.permute.xlu2 %3254  ;;  %v2763_v8 = vld [vmem:[#allocation2 + $0x12d] sm:$0xff] }
 0x277   : > { %v11191_v38 = vpop.permute.xlu0 %3240  ;;  %17692 = vst [vmem:[#allocation184_spill] sm:$0xff] %v11194_v41  ;;  %v2762_v41 = vld [vmem:[#allocation2 + $0x125] sm:$0xff] }
 0x278   : > { %17691 = vst [vmem:[#allocation183_spill] sm:$0xff] %v11191_v38  ;;  %v2767_v38 = vld [vmem:[#allocation2 + $0x15d] sm:$0xff] }
 0x279   : > { %3390 = vrot.lane.b32.xlu2 %v2763_v8, %s9897_s24 }
 0x27b   : > { %3386 = vrot.lane.b32.xlu1 %v2761_v49, %s9897_s24 }
 0x27d   : > { %v1007_v47 = vpop.permute.xlu1 %1006  ;;  %8558 = vmatmul.msk.f32.gmra.mxu1 %vm17494_vm0, %v10576_v63  ;;  %3382 = vrot.lane.b32.xlu0 %v2759_v34, %s9897_s24 }
 0x27e   : > { %8477 = vmatpush.xpose.msk.msrb.mxu3 %vm17494_vm0, %v1007_v47  ;;  %v11202_v51 = vpop.permute.xlu2 %3260  ;;  %v2766_v47 = vld [vmem:[#allocation2 + $0x155] sm:$0xff] }
 0x27f   : > { %v1005_v58 = vpop.permute.xlu0 %1004  ;;  %17693 = vst [vmem:[#allocation185_spill] sm:$0xff] %v11202_v51 }
 0x281   : > { %3396 = vrot.lane.b32.xlu2 %v2766_v47, %s9897_s24  ;;  %v8877_v47 = vunpack.i.h.bf16 %v11136_v56 }
 0x282   : > { %8478 = vmatpush.xpose.msk.msrb.mxu3 %vm17494_vm0, %v1005_v58 }
 0x283   : > { %3392 = vrot.lane.b32.xlu1 %v2764_v48, %s9897_s24 }
 0x285   : > { %v11205_v49 = vpop.permute.xlu1 %3244  ;;  %8559 = vmatmul.msk.f32.gmra.mxu1 %vm17494_vm0, %v10659_v44  ;;  %3388 = vrot.lane.b32.xlu0 %v2762_v41, %s9897_s24  ;;  %v2770_v41 = vld [vmem:[#allocation2 + $0x185] sm:$0xff] }
 0x286   : > { %17694 = vst [vmem:[#allocation186_spill] sm:$0xff] %v11205_v49  ;;  %8479 = vmatpush.xpose.msk.msrb.mxu3 %vm17494_vm0, %v1003_v14  ;;  %v11213_v8 = vpop.permute.xlu2 %3266  ;;  %v2765_v49 = vld [vmem:[#allocation2 + $0x145] sm:$0xff]  ;;  %v8882_v14 = vunpack.i.h.bf16 %v8880_v24 }
 0x287   : > { %v8885_v34 = vpop.permute.xlu0 %8884  ;;  %17695 = vst [vmem:[#allocation187_spill] sm:$0xff] %v11213_v8 }
 0x288   : > { %v8887_v48 = vunpack.i.h.bf16 %v8885_v34  ;;  %v8886_v51 = vunpack.i.l.bf16 %v8885_v34  ;;  %v2772_v34 = vld [vmem:[#allocation2 + $0x19d] sm:$0xff] }
 0x289   : > { %3402 = vrot.lane.b32.xlu2 %v2769_v19, %s9897_s24  ;;  %v8872_v19 = vunpack.i.h.bf16 %v11155_v39 }
 0x28a   : > { %8480 = vmatpush.xpose.msk.msrb.mxu3 %vm17494_vm0, %v1001_v61  ;;  %1880 = vmatpush.msra.mxu0 %v8887_v48  ;;  %v2773_v48 = vld [vmem:[#allocation2 + $0x1a5] sm:$0xff] }
 0x28b   : > { %3398 = vrot.lane.b32.xlu1 %v2767_v38, %s9897_s24  ;;  %v8881_v38 = vunpack.i.l.bf16 %v8880_v24  ;;  %v2768_v24 = vld [vmem:[#allocation2 + $0x16d] sm:$0xff] }
 0x28c   : > { %1881 = vmatpush.msra.mxu0 %v8886_v51 }
 0x28d   : > { %v11216_v58 = vpop.permute.xlu1 %3250  ;;  %8560 = vmatmul.msk.f32.gmra.mxu1 %vm17494_vm0, %v10656_v0  ;;  %3394 = vrot.lane.b32.xlu0 %v2765_v49, %s9897_s24  ;;  %v8876_v49 = vunpack.i.l.bf16 %v11136_v56 }
 0x28e   : > { %17696 = vst [vmem:[#allocation188_spill] sm:$0xff] %v11216_v58  ;;  %8481 = vmatpush.xpose.msk.msrb.mxu3 %vm17494_vm0, %v999_v37  ;;  %1882 = vmatpush.msra.mxu0 %v8882_v14  ;;  %v11229_v51 = vpop.permute.xlu2 %3272  ;;  %v8871_v14 = vunpack.i.l.bf16 %v11155_v39 }
 0x28f   : > { %v11223_v61 = vpop.permute.xlu0 %3246  ;;  %17698 = vst [vmem:[#allocation190_spill] sm:$0xff] %v11229_v51  ;;  %v2795_v51 = vld [vmem:[#allocation2 + $0x12e] sm:$0xff] }
 0x290   : > { %17697 = vst [vmem:[#allocation189_spill] sm:$0xff] %v11223_v61  ;;  %1883 = vmatpush.msra.mxu0 %v8881_v38  ;;  %v8866_v38 = vunpack.i.l.bf16 %v11116_v54 }
 0x291   : > { %3408 = vrot.lane.b32.xlu2 %v2772_v34, %s9897_s24  ;;  %v2776_v34 = vld [vmem:[#allocation2 + $0x4e] sm:$0xff] }
 0x292   : > { %8482 = vmatpush.xpose.msk.msrb.mxu3 %vm17494_vm0, %v11125_v15  ;;  %1884 = vmatpush.msra.mxu0 %v8877_v47  ;;  %v11239_v15 = vpop.f32.mrf.mxu1  ;;  %v2771_v47 = vld [vmem:[#allocation2 + $0x18d] sm:$0xff] }
 0x293   : > { %3404 = vrot.lane.b32.xlu1 %v2770_v41, %s9897_s24  ;;  %v8867_v41 = vunpack.i.h.bf16 %v11116_v54 }
 0x294   : > { %1885 = vmatpush.msra.mxu0 %v8876_v49  ;;  %v2775_v49 = vld [vmem:[#allocation2 + $0x1bd] sm:$0xff] }
 0x295   : > { %v11231_v37 = vpop.permute.xlu1 %3256  ;;  %8561 = vmatmul.msk.f32.gmra.mxu1 %vm17494_vm0, %v10639_v43  ;;  %3400 = vrot.lane.b32.xlu0 %v2768_v24, %s9897_s24  ;;  %v8862_v24 = vunpack.i.h.bf16 %v10937_v20 }
 0x296   : > { %17699 = vst [vmem:[#allocation191_spill] sm:$0xff] %v11231_v37  ;;  %8483 = vmatpush.xpose.msk.msrb.mxu3 %vm17494_vm0, %v11138_v29  ;;  %1886 = vmatpush.msra.mxu0 %v8872_v19  ;;  %v11253_v39 = vpop.permute.xlu2 %3278  ;;  %v4241_v37 = vld [vmem:[#allocation3 + $0x138] sm:$0xff] }
 0x297   : > { %v11244_v56 = vpop.permute.xlu0 %3252  ;;  %17702 = vst [vmem:[#allocation194_spill] sm:$0xff] %v11253_v39 }
 0x298   : > { %17700 = vst [vmem:[#allocation192_spill] sm:$0xff] %v11244_v56  ;;  %1887 = vmatpush.msra.mxu0 %v8871_v14  ;;  %v8856_v14 = vunpack.i.l.bf16 %v10837_v4 }
 0x299   : > { %3414 = vrot.lane.b32.xlu2 %v2775_v49, %s9897_s24 }
 0x29a   : > { %8484 = vmatpush.xpose.msk.msrb.mxu3 %vm17494_vm0, %v11144_v7  ;;  %1888 = vmatpush.msra.mxu0 %v8867_v41  ;;  %v8861_v7 = vunpack.i.l.bf16 %v10937_v20  ;;  %v11263_v54 = vpop.f32.mrf.mxu1  ;;  %v2774_v20 = vld [vmem:[#allocation2 + $0x1b5] sm:$0xff]  ;;  %v2778_v41 = vld [vmem:[#allocation2 + $0x66] sm:$0xff] }
 0x29b   : > { %3410 = vrot.lane.b32.xlu1 %v2773_v48, %s9897_s24  ;;  %v8857_v48 = vunpack.i.h.bf16 %v10837_v4 }
 0x29c   : > { %1889 = vmatpush.msra.mxu0 %v8866_v38  ;;  %v2779_v38 = vld [vmem:[#allocation2 + $0x6e] sm:$0xff] }
 0x29d   : > { %v11250_v29 = vpop.permute.xlu1 %3262  ;;  %8562 = vmatmul.msk.f32.gmra.mxu1 %vm17494_vm0, %v10558_v33  ;;  %3406 = vrot.lane.b32.xlu0 %v2771_v47, %s9897_s24 }
 0x29e   : > { %17701 = vst [vmem:[#allocation193_spill] sm:$0xff] %v11250_v29  ;;  %8485 = vmatpush.xpose.msk.msrb.mxu3 %vm17494_vm0, %v11092_v18  ;;  %1890 = vmatpush.msra.mxu0 %v8862_v24  ;;  %v11279_v47 = vpop.permute.xlu2 %3284  ;;  %v2777_v24 = vld [vmem:[#allocation2 + $0x56] sm:$0xff]  ;;  %v2805_v29 = vld [vmem:[#allocation2 + $0x1a6] sm:$0xff] }
 0x29f   : > { %v11265_v19 = vpop.permute.xlu0 %3258  ;;  %17705 = vst [vmem:[#allocation197_spill] sm:$0xff] %v11279_v47  ;;  %v2790_v47 = vld [vmem:[#allocation2 + $0xf6] sm:$0xff] }
 0x2a0   : > { %17703 = vst [vmem:[#allocation195_spill] sm:$0xff] %v11265_v19  ;;  %1891 = vmatpush.msra.mxu0 %v8861_v7 }
 0x2a1   : > { %3484 = vrot.lane.b32.xlu2 %v2778_v41, %s17453_s17  ;;  %v2785_v41 = vld [vmem:[#allocation2 + $0xb6] sm:$0xff] }
 0x2a2   : > { %8486 = vmatpush.xpose.msk.msrb.mxu3 %vm17494_vm0, %v11081_v32  ;;  %1892 = vmatpush.msra.mxu0 %v8857_v48  ;;  %v11287_v4 = vpop.f32.mrf.mxu1 }
 0x2a3   : > { %3480 = vrot.lane.b32.xlu1 %v2776_v34, %s17453_s17  ;;  %v2782_v34 = vld [vmem:[#allocation2 + $0x96] sm:$0xff] }
 0x2a4   : > { %1893 = vmatpush.msra.mxu0 %v8856_v14  ;;  %v2780_v14 = vld [vmem:[#allocation2 + $0x7e] sm:$0xff] }
 0x2a5   : > { %v11271_v18 = vpop.permute.xlu1 %3268  ;;  %8563 = vmatmul.msk.f32.gmra.mxu1 %vm17494_vm0, %v10555_v31  ;;  %3412 = vrot.lane.b32.xlu0 %v2774_v20, %s9897_s24 }
 0x2a6   : > { %17704 = vst [vmem:[#allocation196_spill] sm:$0xff] %v11271_v18  ;;  %8487 = vmatpush.xpose.msk.msrb.mxu3 %vm17494_vm0, %v10928_v36  ;;  %v2781_v36 = vld [vmem:[#allocation2 + $0x86] sm:$0xff]  ;;  %v11297_v7 = vpop.permute.xlu2 %3354  ;;  %v2798_v18 = vld [vmem:[#allocation2 + $0x156] sm:$0xff] }
 0x2a7   : > { %v11282_v32 = vpop.permute.xlu0 %3264 }
 0x2a8   : > { %17706 = vst [vmem:[#allocation198_spill] sm:$0xff] %v11282_v32  ;;  %v2802_v32 = vld [vmem:[#allocation2 + $0x186] sm:$0xff] }
 0x2a9   : > { %3490 = vrot.lane.b32.xlu2 %v2781_v36, %s17453_s17 }
 0x2aa   : > { %8488 = vmatpush.xpose.msk.msrb.mxu3 %vm17494_vm0, %v10911_v21  ;;  %v11306_v20 = vpop.f32.mrf.mxu1 }
 0x2ab   : > { %3486 = vrot.lane.b32.xlu1 %v2779_v38, %s17453_s17 }
 0x2ad   : > { %v11289_v49 = vpop.permute.xlu1 %3274  ;;  %8564 = vmatmul.msk.f32.gmra.mxu1 %vm17494_vm0, %v10539_v62  ;;  %3482 = vrot.lane.b32.xlu0 %v2777_v24, %s17453_s17  ;;  %v2783_v24 = vld [vmem:[#allocation2 + $0x9e] sm:$0xff] }
 0x2ae   : > { %17707 = vst [vmem:[#allocation199_spill] sm:$0xff] %v11289_v49  ;;  %8489 = vmatpush.xpose.msk.msrb.mxu3 %vm17494_vm0, %v10879_v28  ;;  %v2784_v28 = vld [vmem:[#allocation2 + $0xae] sm:$0xff]  ;;  %v2797_v49 = vld [vmem:[#allocation2 + $0x146] sm:$0xff] }
 0x2af   : > { %v11299_v21 = vpop.permute.xlu0 %3270 }
 0x2b0   : > { %17708 = vst [vmem:[#allocation200_spill] sm:$0xff] %v11299_v21 }
 0x2b1   : > { %3496 = vrot.lane.b32.xlu2 %v2784_v28, %s17453_s17 }
 0x2b2   : > { %8490 = vmatpush.xpose.msk.msrb.mxu3 %vm17494_vm0, %v10860_v35  ;;  %v11317_v35 = vpop.permute.xlu2 %3360 }
 0x2b3   : > { %3492 = vrot.lane.b32.xlu1 %v2782_v34, %s17453_s17  ;;  %17711 = vst [vmem:[#allocation203_spill] sm:$0xff] %v11317_v35  ;;  %v2787_v34 = vld [vmem:[#allocation2 + $0xce] sm:$0xff] }
 0x2b5   : > { %v11304_v48 = vpop.permute.xlu1 %3280  ;;  %8491 = vmatmul.msk.f32.vlgmr.msrb.gmra.mxu3 %vm17494_vm0, %v10713_v10  ;;  %8565 = vmatmul.msk.f32.gmra.mxu1 %vm17494_vm0, %v10615_v57  ;;  %v2788_v10 = vld [vmem:[#allocation2 + $0xde] sm:$0xff] }
 0x2b6   : > { %17709 = vst [vmem:[#allocation201_spill] sm:$0xff] %v11304_v48  ;;  %3488 = vrot.lane.b32.xlu0 %v2780_v14, %s17453_s17  ;;  %v11325_v14 = vpop.f32.mrf.mxu1  ;;  %v2791_v48 = vld [vmem:[#allocation2 + $0xfe] sm:$0xff] }
 0x2b7   : > { %v11314_v38 = vpop.permute.xlu0 %3276 }
 0x2b8   : > { %17710 = vst [vmem:[#allocation202_spill] sm:$0xff] %v11314_v38  ;;  %v2792_v38 = vld [vmem:[#allocation2 + $0x10e] sm:$0xff] }
 0x2b9   : > { %3502 = vrot.lane.b32.xlu2 %v2787_v34, %s17453_s17  ;;  %v2789_v34 = vld [vmem:[#allocation2 + $0xe6] sm:$0xff] }
 0x2bb   : > { %3498 = vrot.lane.b32.xlu1 %v2785_v41, %s17453_s17  ;;  %v2786_v41 = vld [vmem:[#allocation2 + $0xc6] sm:$0xff] }
 0x2bd   : > { %v11319_v36 = vpop.permute.xlu1 %3286  ;;  %8492 = vmatmul.msk.f32.gmra.mxu3 %vm17494_vm0, %v10705_v52  ;;  %8566 = vmatmul.msk.f32.gmra.mxu1 %vm17494_vm0, %v10612_v17 }
 0x2be   : > { %17712 = vst [vmem:[#allocation204_spill] sm:$0xff] %v11319_v36  ;;  %3494 = vrot.lane.b32.xlu0 %v2783_v24, %s17453_s17  ;;  %v11332_v36 = vpop.permute.xlu2 %3366  ;;  %v11342_v24 = vpop.f32.mrf.mxu1 }
 0x2bf   : > { %v11329_v28 = vpop.permute.xlu0 %3282  ;;  %17714 = vst [vmem:[#allocation206_spill] sm:$0xff] %v11332_v36 }
 0x2c0   : > { %17713 = vst [vmem:[#allocation205_spill] sm:$0xff] %v11329_v28  ;;  %v2793_v28 = vld [vmem:[#allocation2 + $0x116] sm:$0xff] }
 0x2c1   : > { %3508 = vrot.lane.b32.xlu2 %v2790_v47, %s17453_s17 }
 0x2c3   : > { %3504 = vrot.lane.b32.xlu1 %v2788_v10, %s17453_s17 }
 0x2c5   : > { %8493 = vmatmul.msk.f32.gmra.mxu3 %vm17494_vm0, %v10745_v5  ;;  %8567 = vmatmul.msk.f32.gmra.mxu1 %vm17494_vm0, %v10596_v53  ;;  %v11338_v52 = vpop.permute.xlu1 %3356  ;;  %v2794_v5 = vld [vmem:[#allocation2 + $0x126] sm:$0xff] }
 0x2c6   : > { %17715 = vst [vmem:[#allocation207_spill] sm:$0xff] %v11338_v52  ;;  %3500 = vrot.lane.b32.xlu0 %v2786_v41, %s17453_s17  ;;  %v11351_v39 = vpop.permute.xlu2 %3372 }
 0x2c7   : > { %v11344_v10 = vpop.permute.xlu0 %3352  ;;  %17716 = vst [vmem:[#allocation208_spill] sm:$0xff] %v11351_v39  ;;  %v6173_v39 = vld [vmem:[#allocation2 + $0x6c] sm:$0xff] }
 0x2c9   : > { %3514 = vrot.lane.b32.xlu2 %v2793_v28, %s17453_s17 }
 0x2cb   : > { %3510 = vrot.lane.b32.xlu1 %v2791_v48, %s17453_s17  ;;  %v11360_v48 = vpop.f32.mrf.mxu1 }
 0x2cd   : > { %8494 = vmatmul.msk.f32.gmra.mxu3 %vm17494_vm0, %v10758_v12  ;;  %8568 = vmatmul.msk.f32.gmra.mxu1 %vm17494_vm0, %v10609_v3  ;;  %v11355_v47 = vpop.permute.xlu1 %3362  ;;  %v2796_v12 = vld [vmem:[#allocation2 + $0x13e] sm:$0xff] }
 0x2ce   : > { %3506 = vrot.lane.b32.xlu0 %v2789_v34, %s17453_s17  ;;  %17717 = vst [vmem:[#allocation209_spill] sm:$0xff] %v11355_v47  ;;  %v11368_v28 = vpop.permute.xlu2 %3378 }
 0x2cf   : > { %v11357_v41 = vpop.permute.xlu0 %3358  ;;  %17719 = vst [vmem:[#allocation211_spill] sm:$0xff] %v11368_v28  ;;  %v4306_v28 = vld [vmem:[#allocation3 + $0x150] sm:$0xff] }
 0x2d0   : > { %17718 = vst [vmem:[#allocation210_spill] sm:$0xff] %v11357_v41 }
 0x2d1   : > { %3520 = vrot.lane.b32.xlu2 %v2796_v12, %s17453_s17 }
 0x2d3   : > { %3516 = vrot.lane.b32.xlu1 %v2794_v5, %s17453_s17  ;;  %v11375_v21 = vpop.f32.mrf.mxu1 }
 0x2d5   : > { %8495 = vmatmul.msk.f32.gmra.mxu3 %vm17494_vm0, %v10887_v11  ;;  %8569 = vmatmul.msk.f32.gmra.mxu1 %vm17494_vm0, %v10677_v26  ;;  %v11373_v5 = vpop.permute.xlu1 %3368  ;;  %v2799_v11 = vld [vmem:[#allocation2 + $0x15e] sm:$0xff] }
 0x2d6   : > { %3512 = vrot.lane.b32.xlu0 %v2792_v38, %s17453_s17  ;;  %17721 = vst [vmem:[#allocation213_spill] sm:$0xff] %v11373_v5  ;;  %v2800_v38 = vld [vmem:[#allocation2 + $0x16e] sm:$0xff] }
 0x2d7   : > { %v11370_v34 = vpop.permute.xlu0 %3364 }
 0x2d8   : > { %17720 = vst [vmem:[#allocation212_spill] sm:$0xff] %v11370_v34 }
 0x2d9   : > { %3526 = vrot.lane.b32.xlu2 %v2799_v11, %s17453_s17  ;;  %v2801_v11 = vld [vmem:[#allocation2 + $0x176] sm:$0xff] }
 0x2db   : > { %3522 = vrot.lane.b32.xlu1 %v2797_v49, %s17453_s17  ;;  %v11386_v49 = vpop.permute.xlu2 %3384 }
 0x2dc   : > { %17723 = vst [vmem:[#allocation215_spill] sm:$0xff] %v11386_v49  ;;  %v2806_v49 = vld [vmem:[#allocation2 + $0x1b6] sm:$0xff] }
 0x2dd   : > { %8496 = vmatmul.msk.f32.gmra.mxu3 %vm17494_vm0, %v10890_v6  ;;  %8570 = vmatmul.msk.f32.gmra.mxu1 %vm17494_vm0, %v10664_v1  ;;  %v11388_v8 = vpop.permute.xlu1 %3374  ;;  %v2803_v6 = vld [vmem:[#allocation2 + $0x18e] sm:$0xff] }
 0x2de   : > { %3518 = vrot.lane.b32.xlu0 %v2795_v51, %s17453_s17  ;;  %17724 = vst [vmem:[#allocation216_spill] sm:$0xff] %v11388_v8 }
 0x2df   : > { %v11383_v12 = vpop.permute.xlu0 %3370 }
 0x2e0   : > { %17722 = vst [vmem:[#allocation214_spill] sm:$0xff] %v11383_v12  ;;  %v6180_v12 = vld [vmem:[#allocation2 + $0xc4] sm:$0xff] }
 0x2e1   : > { %3532 = vrot.lane.b32.xlu2 %v2802_v32, %s17453_s17  ;;  %v2804_v32 = vld [vmem:[#allocation2 + $0x19e] sm:$0xff] }
 0x2e3   : > { %3528 = vrot.lane.b32.xlu1 %v2800_v38, %s17453_s17  ;;  %v11397_v38 = vpop.permute.xlu2 %3390 }
 0x2e4   : > { %17726 = vst [vmem:[#allocation218_spill] sm:$0xff] %v11397_v38 }
 0x2e5   : > { %8497 = vmatmul.msk.f32.gmra.mxu3 %vm17494_vm0, %v10949_v46  ;;  %v11401_v19 = vpop.permute.xlu1 %3380  ;;  %v4113_v46 = vld [vmem:[#allocation3 + $0x18] sm:$0xff] }
 0x2e6   : > { %3524 = vrot.lane.b32.xlu0 %v2798_v18, %s17453_s17  ;;  %17727 = vst [vmem:[#allocation219_spill] sm:$0xff] %v11401_v19 }
 0x2e7   : > { %v11394_v51 = vpop.permute.xlu0 %3376 }
 0x2e8   : > { %17725 = vst [vmem:[#allocation217_spill] sm:$0xff] %v11394_v51  ;;  %v6168_v51 = vld [vmem:[#allocation2 + $0x34] sm:$0xff] }
 0x2e9   : > { %3538 = vrot.lane.b32.xlu2 %v2805_v29, %s17453_s17  ;;  %v2807_v29 = vld [vmem:[#allocation2 + $0x1be] sm:$0xff] }
 0x2eb   : > { %3534 = vrot.lane.b32.xlu1 %v2803_v6, %s17453_s17  ;;  %v4112_v6 = vld [vmem:[#allocation3 + $0x10] sm:$0xff]  ;;  %v11410_v38 = vpop.permute.xlu2 %3396 }
 0x2ec   : > { %17729 = vst [vmem:[#allocation221_spill] sm:$0xff] %v11410_v38  ;;  %v4114_v38 = vld [vmem:[#allocation3 + $0x20] sm:$0xff] }
 0x2ed   : > { %8498 = vmatmul.msk.f32.gmra.mxu3 %vm17494_vm0, %v10934_v16  ;;  %v11413_v16 = vpop.permute.xlu1 %3386 }
 0x2ee   : > { %3530 = vrot.lane.b32.xlu0 %v2801_v11, %s17453_s17  ;;  %17730 = vst [vmem:[#allocation222_spill] sm:$0xff] %v11413_v16 }
 0x2ef   : > { %v11405_v18 = vpop.permute.xlu0 %3382 }
 0x2f0   : > { %17728 = vst [vmem:[#allocation220_spill] sm:$0xff] %v11405_v18 }
 0x2f1   : > { %4340 = vrot.lane.b32.xlu2 %v4112_v6, %s17509_s19 }
 0x2f3   : > { %3540 = vrot.lane.b32.xlu1 %v2806_v49, %s17453_s17  ;;  %v4115_v49 = vld [vmem:[#allocation3 + $0x28] sm:$0xff] }
 0x2f5   : > { %8499 = vmatmul.msk.f32.gmra.mxu3 %vm17494_vm0, %v10966_v60  ;;  %v11423_v60 = vpop.permute.xlu2 %3402  ;;  %v11428_v6 = vpop.permute.xlu1 %3392 }
 0x2f6   : > { %3536 = vrot.lane.b32.xlu0 %v2804_v32, %s17453_s17  ;;  %17732 = vst [vmem:[#allocation224_spill] sm:$0xff] %v11423_v60  ;;  %v4240_v60 = vld [vmem:[#allocation3 + $0x130] sm:$0xff] }
 0x2f7   : > { %v11416_v11 = vpop.permute.xlu0 %3388  ;;  %17734 = vst [vmem:[#allocation226_spill] sm:$0xff] %v11428_v6 }
 0x2f8   : > { %17731 = vst [vmem:[#allocation223_spill] sm:$0xff] %v11416_v11 }
 0x2f9   : > { %4346 = vrot.lane.b32.xlu2 %v4115_v49, %s17509_s19 }
 0x2fb   : > { %4342 = vrot.lane.b32.xlu1 %v4113_v46, %s17509_s19 }
 0x2fd   : > { %8500 = vmatmul.msk.f32.gmra.mxu3 %vm17494_vm0, %v10979_v42  ;;  %v11439_v42 = vpop.permute.xlu1 %3398 }
 0x2fe   : > { %3542 = vrot.lane.b32.xlu0 %v2807_v29, %s17453_s17  ;;  %v11437_v29 = vpop.permute.xlu2 %3408  ;;  %17737 = vst [vmem:[#allocation229_spill] sm:$0xff] %v11439_v42 }
 0x2ff   : > { %v11425_v32 = vpop.permute.xlu0 %3394  ;;  %17736 = vst [vmem:[#allocation228_spill] sm:$0xff] %v11437_v29 }
 0x300   : > { %17733 = vst [vmem:[#allocation225_spill] sm:$0xff] %v11425_v32 }
 0x301   : > { %4470 = vrot.lane.b32.xlu2 %v4115_v49, %s17446_s22  ;;  %v4273_v49 = vld [vmem:[#allocation3 + $0x140] sm:$0xff] }
 0x303   : > { %4786 = vrot.lane.b32.xlu1 %v4241_v37, %s9896_s18 }
 0x305   : > { %8501 = vmatmul.msk.f32.gmra.mxu3 %vm17494_vm0, %v10991_v22  ;;  %v11452_v29 = vpop.permute.xlu1 %3404 }
 0x306   : > { %4344 = vrot.lane.b32.xlu0 %v4114_v38, %s17509_s19  ;;  %v11448_v32 = vpop.permute.xlu2 %3414  ;;  %17740 = vst [vmem:[#allocation232_spill] sm:$0xff] %v11452_v29 }
 0x307   : > { %v11435_v46 = vpop.permute.xlu0 %3400  ;;  %17739 = vst [vmem:[#allocation231_spill] sm:$0xff] %v11448_v32 }
 0x308   : > { %17735 = vst [vmem:[#allocation227_spill] sm:$0xff] %v11435_v46 }
 0x309   : > { %4784 = vrot.lane.b32.xlu2 %v4240_v60, %s9896_s18 }
 0x30b   : > { %4910 = vrot.lane.b32.xlu1 %v4241_v37, %s9897_s24 }
 0x30d   : > { %8502 = vmatmul.msk.f32.gmra.mxu3 %vm17494_vm0, %v11001_v27  ;;  %v11463_v27 = vpop.permute.xlu1 %3410 }
 0x30e   : > { %4468 = vrot.lane.b32.xlu0 %v4114_v38, %s17446_s22  ;;  %17743 = vst [vmem:[#allocation235_spill] sm:$0xff] %v11463_v27 }
 0x30f   : > { %v11446_v22 = vpop.permute.xlu0 %3406 }
 0x310   : > { %17738 = vst [vmem:[#allocation230_spill] sm:$0xff] %v11446_v22 }
 0x311   : > { %4908 = vrot.lane.b32.xlu2 %v4240_v60, %s9897_s24 }
 0x313   : > { %5034 = vrot.lane.b32.xlu1 %v4241_v37, %s17453_s17  ;;  %v11460_v37 = vpop.permute.xlu2 %3484 }
 0x314   : > { %17742 = vst [vmem:[#allocation234_spill] sm:$0xff] %v11460_v37 }
 0x315   : > { %8503 = vmatmul.msk.f32.gmra.mxu3 %vm17494_vm0, %v11045_v30  ;;  %v11471_v22 = vpop.permute.xlu1 %3480 }
 0x316   : > { %4912 = vrot.lane.b32.xlu0 %v4273_v49, %s9897_s24 }
 0x317   : > { %v11458_v38 = vpop.permute.xlu0 %3412 }
 0x318   : > { %17741 = vst [vmem:[#allocation233_spill] sm:$0xff] %v11458_v38 }
 0x31b   : > { %v11469_v32 = vpop.permute.xlu2 %3490 }
 0x31c   : > { %17745 = vst [vmem:[#allocation237_spill] sm:$0xff] %v11469_v32 }
 0x31d   : > { %8504 = vmatmul.msk.f32.gmra.mxu3 %vm17494_vm0, %v11035_v23  ;;  %v11479_v29 = vpop.permute.xlu1 %3486 }
 0x31e   : > { %5036 = vrot.lane.b32.xlu0 %v4273_v49, %s17453_s17  ;;  %17748 = vst [vmem:[#allocation240_spill] sm:$0xff] %v11479_v29 }
 0x31f   : > { %v11467_v30 = vpop.permute.xlu0 %3482 }
 0x320   : > { %17744 = vst [vmem:[#allocation236_spill] sm:$0xff] %v11467_v30 }
 0x323   : > { %v11477_v38 = vpop.permute.xlu2 %3496 }
 0x324   : > { %17747 = vst [vmem:[#allocation239_spill] sm:$0xff] %v11477_v38  ;;  %v6181_v38 = vld [vmem:[#allocation2 + $0xcc] sm:$0xff] }
 0x325   : > { %8505 = vmatmul.msk.f32.gmra.mxu3 %vm17494_vm0, %v10534_v59 }
 0x328   : > { %v11475_v23 = vpop.permute.xlu0 %3488 }
 0x329   : > { %17746 = vst [vmem:[#allocation238_spill] sm:$0xff] %v11475_v23 }
 0x32b   : > { %v11487_v27 = vpop.permute.xlu2 %3502 }
 0x32c   : > { %17750 = vst [vmem:[#allocation242_spill] sm:$0xff] %v11487_v27 }
 0x32d   : > { %8506 = vmatmul.msk.f32.gmra.mxu3 %vm17494_vm0, %v10531_v55  ;;  %v11493_v55 = vpop.permute.xlu1 %3492 }
 0x32e   : > { %17751 = vst [vmem:[#allocation243_spill] sm:$0xff] %v11493_v55 }
 0x330   : > { %v11485_v59 = vpop.permute.xlu0 %3494 }
 0x331   : > { %17749 = vst [vmem:[#allocation241_spill] sm:$0xff] %v11485_v59 }
 0x333   : > { %v11503_v11 = vpop.permute.xlu2 %3508 }
 0x334   : > { %17753 = vst [vmem:[#allocation245_spill] sm:$0xff] %v11503_v11  ;;  %v11521_v11 = vld [vmem:[#allocation3 + $0x148] sm:$0xff] }
 0x335   : > { %8507 = vmatmul.msk.f32.gmra.mxu3 %vm17494_vm0, %v10518_v45  ;;  %v11505_v16 = vpop.permute.xlu1 %3498 }
 0x336   : > { %17754 = vst [vmem:[#allocation246_spill] sm:$0xff] %v11505_v16 }
 0x338   : > { %v11483_v49 = vpop.f32.mrf.mxu3  ;;  %v11501_v6 = vpop.permute.xlu0 %3500 }
 0x339   : > { %v1398_v46 = vmax.f32 %v11483_v49, %v11239_v15  ;;  %17752 = vst [vmem:[#allocation244_spill] sm:$0xff] %v11501_v6  ;;  %v6172_v6 = vld [vmem:[#allocation2 + $0x64] sm:$0xff] }
 0x33a   : > { %v11786_v16 = vpack.i.bf16 %v6173_v39, %v6172_v6 }
 0x33b   : > { %1399 = vmax.xlane.f32.xlu2 %v1398_v46  ;;  %v11515_v19 = vpop.permute.xlu2 %3514 }
 0x33c   : > { %17756 = vst [vmem:[#allocation248_spill] sm:$0xff] %v11515_v19  ;;  %v6140_v19 = vld [vmem:[#allocation2 + $0x63] sm:$0xff] }
 0x33d   : > { %8508 = vmatmul.msk.f32.gmra.mxu3 %vm17494_vm0, %v10552_v25 }
 0x340   : > { %v11495_v42 = vpop.f32.mrf.mxu3  ;;  %v11513_v46 = vpop.permute.xlu0 %3506 }
 0x341   : > { %v1401_v45 = vmax.f32 %v11495_v42, %v11263_v54  ;;  %17755 = vst [vmem:[#allocation247_spill] sm:$0xff] %v11513_v46  ;;  %v6141_v46 = vld [vmem:[#allocation2 + $0x6b] sm:$0xff] }
 0x343   : > { %v11527_v56 = vpop.permute.xlu2 %3520 }
 0x344   : > { %17759 = vst [vmem:[#allocation251_spill] sm:$0xff] %v11527_v56  ;;  %v6138_v56 = vld [vmem:[#allocation2 + $0x4b] sm:$0xff] }
 0x345   : > { %8509 = vmatmul.msk.f32.gmra.mxu3 %vm17494_vm0, %v10591_v40  ;;  %v11517_v40 = vpop.permute.xlu1 %3504 }
 0x346   : > { %17757 = vst [vmem:[#allocation249_spill] sm:$0xff] %v11517_v40 }
 0x348   : > { %v11507_v18 = vpop.f32.mrf.mxu3  ;;  %1402 = vmax.xlane.f32.xlu0 %v1401_v45  ;;  %v11525_v45 = vpop.permute.xlu0 %3512 }
 0x349   : > { %v1404_v25 = vmax.f32 %v11507_v18, %v11287_v4  ;;  %17758 = vst [vmem:[#allocation250_spill] sm:$0xff] %v11525_v45 }
 0x34b   : > { %1405 = vmax.xlane.f32.xlu1 %v1404_v25  ;;  %v4307_v25 = vld [vmem:[#allocation3 + $0x158] sm:$0xff]  ;;  %v11541_v45 = vpop.permute.xlu2 %3526 }
 0x34c   : > { %17762 = vst [vmem:[#allocation254_spill] sm:$0xff] %v11541_v45 }
 0x34d   : > { %8510 = vmatmul.msk.f32.gmra.mxu3 %vm17494_vm0, %v10576_v63  ;;  %v11529_v63 = vpop.permute.xlu1 %3510 }
 0x34e   : > { %17760 = vst [vmem:[#allocation252_spill] sm:$0xff] %v11529_v63 }
 0x350   : > { %v11535_v58 = vpop.permute.xlu0 %3518 }
 0x351   : > { %17761 = vst [vmem:[#allocation253_spill] sm:$0xff] %v11535_v58 }
 0x353   : > { %4914 = vrot.lane.b32.xlu2 %v11521_v11, %s9897_s24 }
 0x355   : > { %8511 = vmatmul.msk.f32.gmra.mxu3 %vm17494_vm0, %v10659_v44  ;;  %v8898_v44 = vpack.i.bf16 %v6141_v46, %v6140_v19  ;;  %v11550_v19 = vpop.permute.xlu2 %3532 }
 0x356   : > { %17765 = vst [vmem:[#allocation257_spill] sm:$0xff] %v11550_v19 }
 0x35b   : > { %5032 = vrot.lane.b32.xlu2 %v4240_v60, %s17453_s17  ;;  %v11548_v60 = vpop.permute.xlu0 %3524 }
 0x35c   : > { %5042 = vrot.lane.b32.xlu0 %v4307_v25, %s17453_s17  ;;  %v6139_v25 = vld [vmem:[#allocation2 + $0x53] sm:$0xff]  ;;  %17764 = vst [vmem:[#allocation256_spill] sm:$0xff] %v11548_v60 }
 0x35d   : > { %8512 = vmatmul.msk.f32.gmra.mxu3 %vm17494_vm0, %v10656_v0  ;;  %v11543_v0 = vpop.permute.xlu1 %3516  ;;  %v8893_v63 = vpack.i.bf16 %v6139_v25, %v6138_v56 }
 0x35e   : > { %17763 = vst [vmem:[#allocation255_spill] sm:$0xff] %v11543_v0 }
 0x363   : > { %v11558_v46 = vpop.permute.xlu0 %3530 }
 0x364   : > { %5040 = vrot.lane.b32.xlu1 %v4306_v28, %s17453_s17  ;;  %8899 = vrot.lane.b32.xlu0 %v8898_v44, %s17509_s19  ;;  %v11554_v28 = vpop.f32.mrf.mxu3  ;;  %17767 = vst [vmem:[#allocation259_spill] sm:$0xff] %v11558_v46 }
 0x365   : > { %8513 = vmatmul.msk.f32.gmra.mxu3 %vm17494_vm0, %v10639_v43  ;;  %v11552_v44 = vpop.permute.xlu1 %3522  ;;  %v11560_v43 = vpop.permute.xlu2 %3538 }
 0x366   : > { %17766 = vst [vmem:[#allocation258_spill] sm:$0xff] %v11552_v44  ;;  %v6145_v44 = vld [vmem:[#allocation2 + $0x9b] sm:$0xff] }
 0x367   : > { %17768 = vst [vmem:[#allocation260_spill] sm:$0xff] %v11560_v43  ;;  %v1407_v43 = vmax.f32 %v11554_v28, %v11306_v20 }
 0x36b   : > { %v11568_v25 = vpop.permute.xlu0 %3536 }
 0x36c   : > { %8894 = vrot.lane.b32.xlu1 %v8893_v63, %s17509_s19  ;;  %v11564_v63 = vpop.f32.mrf.mxu3  ;;  %17770 = vst [vmem:[#allocation262_spill] sm:$0xff] %v11568_v25 }
 0x36d   : > { %8514 = vmatmul.msk.f32.gmra.mxu3 %vm17494_vm0, %v10558_v33  ;;  %v11562_v56 = vpop.permute.xlu1 %3528  ;;  %v11570_v33 = vpop.permute.xlu2 %4340  ;;  %v1410_v25 = vmax.f32 %v11564_v63, %v11325_v14 }
 0x36e   : > { %17769 = vst [vmem:[#allocation261_spill] sm:$0xff] %v11562_v56  ;;  %v17774_v56 = vmov 0.0  }
 0x36f   : > { %17771 = vst [vmem:[#allocation263_spill] sm:$0xff] %v11570_v33 }
 0x370   : > { %503 = vst.msk [vmem:[#allocation2 + $0x40] sm:$0x3f] %vm496_vm5, %v17774_v56 }
 0x371   : > { %507 = vst.msk [vmem:[#allocation2 + $0x1d8] sm:$0x3f] %vm496_vm5, %v17774_v56 }
 0x373   : > { %v11580_v46 = vpop.permute.xlu0 %3542 }
 0x374   : > { %17773 = vst [vmem:[#allocation265_spill] sm:$0xff] %v11580_v46 }
 0x375   : > { %8515 = vmatmul.msk.f32.gmra.mxu3 %vm17494_vm0, %v10555_v31  ;;  %v11572_v19 = vpop.permute.xlu1 %3534  ;;  %v11576_v31 = vpop.f32.mrf.mxu3 }
 0x376   : > { %17772 = vst [vmem:[#allocation264_spill] sm:$0xff] %v11572_v19  ;;  %v11587_v33 = vpop.permute.xlu2 %4346  ;;  %v6147_v19 = vld [vmem:[#allocation2 + $0xb3] sm:$0xff] }
 0x377   : > { %17775 = vst [vmem:[#allocation266_spill] sm:$0xff] %v11587_v33  ;;  %v6169_v27 = vld [vmem:[#allocation2 + $0x3c] sm:$0xff] }
 0x37d   : > { %8516 = vmatmul.msk.f32.gmra.mxu3 %vm17494_vm0, %v10539_v62  ;;  %v1413_v62 = vmax.f32 %v11576_v31, %v11342_v24 }
 0x37e   : > { %v11602_v33 = vpop.permute.xlu2 %4470 }
 0x37f   : > { %17778 = vst [vmem:[#allocation269_spill] sm:$0xff] %v11602_v33 }
 0x384   : > { %1408 = vmax.xlane.f32.xlu2 %v1407_v43  ;;  %v11593_v43 = vpop.f32.mrf.mxu3 }
 0x385   : > { %8517 = vmatmul.msk.f32.gmra.mxu3 %vm17494_vm0, %v10615_v57  ;;  %v11589_v57 = vpop.permute.xlu1 %3540  ;;  %v1416_v46 = vmax.f32 %v11593_v43, %v11360_v48 }
 0x386   : > { %17776 = vst [vmem:[#allocation267_spill] sm:$0xff] %v11589_v57  ;;  %v6146_v57 = vld [vmem:[#allocation2 + $0xab] sm:$0xff]  ;;  %v11612_v60 = vpop.permute.xlu2 %4784 }
 0x387   : > { %v8913_v56 = vpack.i.bf16 %v6147_v19, %v6146_v57  ;;  %17782 = vst [vmem:[#allocation273_spill] sm:$0xff] %v11612_v60  ;;  %v6136_v19 = vld [vmem:[#allocation2 + $0x33] sm:$0xff] }
 0x38c   : > { %1411 = vmax.xlane.f32.xlu2 %v1410_v25  ;;  %v11626_v60 = vpop.f32.mrf.mxu3 }
 0x38d   : > { %8518 = vmatmul.msk.f32.gmra.mxu3 %vm17494_vm0, %v10612_v17  ;;  %v11600_v17 = vpop.permute.xlu0 %4344 }
 0x38e   : > { %1414 = vmax.xlane.f32.xlu0 %v1413_v62  ;;  %17777 = vst [vmem:[#allocation268_spill] sm:$0xff] %v11600_v17  ;;  %v11604_v62 = vpop.permute.xlu1 %4342 }
 0x38f   : > { %17779 = vst [vmem:[#allocation270_spill] sm:$0xff] %v11604_v62  ;;  %v6144_v62 = vld [vmem:[#allocation2 + $0x93] sm:$0xff] }
 0x395   : > { %8519 = vmatmul.msk.f32.gmra.mxu3 %vm17494_vm0, %v10596_v53  ;;  %v11608_v25 = vpop.permute.xlu0 %4468  ;;  %v6152_v53 = vld [vmem:[#allocation2 + $0xf3] sm:$0xff] }
 0x396   : > { %1417 = vmax.xlane.f32.xlu1 %v1416_v46  ;;  %17780 = vst [vmem:[#allocation271_spill] sm:$0xff] %v11608_v25  ;;  %v11610_v45 = vpop.permute.xlu1 %4786  ;;  %v6153_v46 = vld [vmem:[#allocation2 + $0xfb] sm:$0xff] }
 0x397   : > { %17781 = vst [vmem:[#allocation272_spill] sm:$0xff] %v11610_v45  ;;  %v8928_v17 = vpack.i.bf16 %v6153_v46, %v6152_v53  ;;  %v11624_v45 = vpop.permute.xlu2 %4908  ;;  %v6150_v46 = vld [vmem:[#allocation2 + $0xdb] sm:$0xff] }
 0x398   : > { %17785 = vst [vmem:[#allocation276_spill] sm:$0xff] %v11624_v45 }
 0x39d   : > { %8520 = vmatmul.msk.f32.gmra.mxu3 %vm17494_vm0, %v10609_v3  ;;  %v11617_v33 = vpop.permute.xlu0 %4912  ;;  %v6137_v3 = vld [vmem:[#allocation2 + $0x3b] sm:$0xff] }
 0x39e   : > { %17783 = vst [vmem:[#allocation274_spill] sm:$0xff] %v11617_v33  ;;  %v11621_v57 = vpop.permute.xlu1 %4910  ;;  %v8888_v53 = vpack.i.bf16 %v6137_v3, %v6136_v19 }
 0x39f   : > { %17784 = vst [vmem:[#allocation275_spill] sm:$0xff] %v11621_v57 }
 0x3a2   : > { %8914 = vrot.lane.b32.xlu0 %v8913_v56, %s17509_s19  ;;  %v8908_v56 = vpack.i.bf16 %v6145_v44, %v6144_v62 }
 0x3a4   : > { %5038 = vrot.lane.b32.xlu2 %v11521_v11, %s17453_s17 }
 0x3a5   : > { %8521 = vmatmul.msk.f32.gmra.mxu3 %vm17494_vm0, %v10677_v26  ;;  %v6151_v26 = vld [vmem:[#allocation2 + $0xe3] sm:$0xff]  ;;  %v11632_v11 = vpop.permute.xlu0 %5036 }
 0x3a6   : > { %17786 = vst [vmem:[#allocation277_spill] sm:$0xff] %v11632_v11  ;;  %v11634_v57 = vpop.permute.xlu1 %5034 }
 0x3a7   : > { %17787 = vst [vmem:[#allocation278_spill] sm:$0xff] %v11634_v57 }
 0x3aa   : > { %8929 = vrot.lane.b32.xlu0 %v8928_v17, %s17509_s19  ;;  %v8923_v17 = vpack.i.bf16 %v6151_v26, %v6150_v46 }
 0x3ac   : > { %8889 = vrot.lane.b32.xlu2 %v8888_v53, %s17509_s19 }
 0x3ad   : > { %8522 = vmatmul.msk.f32.gmra.mxu3 %vm17494_vm0, %v10664_v1 }
 0x3ae   : > { %v1400_v33 = vpop.xlane.xlu2 %1399 }
 0x3af   : > { %8909 = vrot.lane.b32.xlu1 %v8908_v56, %s17509_s19  ;;  %v1494_v44 = vsub.f32 %v11483_v49, %v1400_v33  ;;  %v1495_v62 = vsub.f32 %v11239_v15, %v1400_v33 }
 0x3b1   : > { %v1558_v45 = vmul.f32 1.442695, %v1494_v44  ;;  %v1560_v25 = vmul.f32 1.442695, %v1495_v62  ;;  %v11649_v62 = vpop.f32.mrf.mxu3 }
 0x3b3   : > { %9439 = vpow2.f32 %v1558_v45 }
 0x3b4   : > { %9441 = vpow2.f32 %v1560_v25 }
 0x3b7   : > { %8924 = vrot.lane.b32.xlu1 %v8923_v17, %s17509_s19 }
 0x3b9   : > { %v9440_v26 = vpop.eup %9439 }
 0x3ba   : > { %v9442_v33 = vpop.eup %9441  ;;  %1894 = vmatmul.f32.vlgmr.msra.gmra.mxu0 %v9440_v26 }
 0x3bb   : > { %v1403_v3 = vpop.xlane.xlu0 %1402  ;;  %2007 = vmatmul.f32.vlgmr.msrb.gmra.mxu2 %v9442_v33  ;;  %v11643_v25 = vadd.f32 %v9442_v33, %v9440_v26  ;;  %v6158_v26 = vld [vmem:[#allocation2 + $0x13b] sm:$0xff]  ;;  %v6164_v33 = vld [vmem:[#allocation2 + $0x183] sm:$0xff] }
 0x3bc   : > { %v1496_v19 = vsub.f32 %v11495_v42, %v1403_v3  ;;  %v1497_v56 = vsub.f32 %v11263_v54, %v1403_v3  ;;  %v1419_v3 = vmax.f32 %v11626_v60, %v11375_v21 }
 0x3be   : > { %v1406_v53 = vpop.xlane.xlu1 %1405  ;;  %v1562_v46 = vmul.f32 1.442695, %v1496_v19  ;;  %v1564_v1 = vmul.f32 1.442695, %v1497_v56  ;;  %v11657_v19 = vpop.f32.mrf.mxu3 }
 0x3bf   : > { %v1498_v11 = vsub.f32 %v11507_v18, %v1406_v53  ;;  %v1499_v49 = vsub.f32 %v11287_v4, %v1406_v53 }
 0x3c0   : > { %9443 = vpow2.f32 %v1562_v46  ;;  %v6159_v46 = vld [vmem:[#allocation2 + $0x143] sm:$0xff] }
 0x3c1   : > { %v1566_v15 = vmul.f32 1.442695, %v1498_v11  ;;  %v1568_v45 = vmul.f32 1.442695, %v1499_v49  ;;  %9445 = vpow2.f32 %v1564_v1  ;;  %v11651_v11 = vpop.f32.mrf.mxu1  ;;  %v8943_v49 = vpack.i.bf16 %v6159_v46, %v6158_v26  ;;  %v6148_v26 = vld [vmem:[#allocation2 + $0xc3] sm:$0xff]  ;;  %v6149_v46 = vld [vmem:[#allocation2 + $0xcb] sm:$0xff] }
 0x3c2   : > { %v1422_v1 = vmax.f32 %v11649_v62, %v11651_v11  ;;  %v8918_v58 = vpack.i.bf16 %v6149_v46, %v6148_v26 }
 0x3c3   : > { %9447 = vpow2.f32 %v1566_v15  ;;  %v6165_v15 = vld [vmem:[#allocation2 + $0x18b] sm:$0xff] }
 0x3c4   : > { %9449 = vpow2.f32 %v1568_v45  ;;  %v11664_v45 = vpop.permute.xlu2 %4914 }
 0x3c5   : > { %17788 = vst [vmem:[#allocation279_spill] sm:$0xff] %v11664_v45 }
 0x3c6   : > { %v9444_v42 = vpop.eup %9443 }
 0x3c7   : > { %v9446_v54 = vpop.eup %9445  ;;  %1897 = vmatmul.f32.gmra.mxu0 %v9444_v42 }
 0x3c8   : > { %2010 = vmatmul.f32.gmra.mxu2 %v9446_v54  ;;  %v11645_v44 = vadd.f32 %v9446_v54, %v9444_v42  ;;  %v6142_v42 = vld [vmem:[#allocation2 + $0x7b] sm:$0xff]  ;;  %v6143_v54 = vld [vmem:[#allocation2 + $0x83] sm:$0xff] }
 0x3c9   : > { %v9448_v17 = vpop.eup %9447  ;;  %v11659_v56 = vpop.f32.mrf.mxu1 }
 0x3ca   : > { %v9450_v18 = vpop.eup %9449  ;;  %v1425_v53 = vmax.f32 %v11657_v19, %v11659_v56 }
 0x3cb   : > { %v11647_v4 = vadd.f32 %v9450_v18, %v9448_v17 }
 0x3cf   : > { %1900 = vmatmul.f32.gmra.mxu0 %v9448_v17  ;;  %v8958_v17 = vpack.i.bf16 %v6165_v15, %v6164_v33  ;;  %v6162_v15 = vld [vmem:[#allocation2 + $0x16b] sm:$0xff] }
 0x3d0   : > { %2013 = vmatmul.f32.gmra.mxu2 %v9450_v18  ;;  %v11666_v18 = vpop.permute.xlu0 %5042 }
 0x3d1   : > { %17789 = vst [vmem:[#allocation280_spill] sm:$0xff] %v11666_v18 }
 0x3d4   : > { %1423 = vmax.xlane.f32.xlu0 %v1422_v1  ;;  %v11668_v1 = vpack.i.bf16 %v6143_v54, %v6142_v42  ;;  %v6163_v42 = vld [vmem:[#allocation2 + $0x173] sm:$0xff] }
 0x3d5   : > { %1420 = vmax.xlane.f32.xlu2 %v1419_v3  ;;  %v6156_v3 = vld [vmem:[#allocation2 + $0x123] sm:$0xff]  ;;  %v8953_v0 = vpack.i.bf16 %v6163_v42, %v6162_v15 }
 0x3d6   : > { %v11675_v57 = vpop.permute.xlu1 %5040 }
 0x3d7   : > { %17791 = vst [vmem:[#allocation282_spill] sm:$0xff] %v11675_v57 }
 0x3d8   : > { %v11677_v33 = vpop.permute.xlu0 %8899 }
 0x3de   : > { %v11683_v40 = vpop.permute.xlu1 %8894 }
 0x3e1   : > { %1426 = vmax.xlane.f32.xlu1 %v1425_v53  ;;  %v6157_v53 = vld [vmem:[#allocation2 + $0x12b] sm:$0xff] }
 0x3e2   : > { %v8938_v45 = vpack.i.bf16 %v6157_v53, %v6156_v3 }
 0x3e8   : > { %8944 = vrot.lane.b32.xlu0 %v8943_v49, %s17509_s19  ;;  %v11673_v49 = vpop.permute.xlu2 %5032 }
 0x3e9   : > { %17790 = vst [vmem:[#allocation281_spill] sm:$0xff] %v11673_v49 }
 0x3ed   : > { %8904 = vrot.lane.b32.xlu2 %v11668_v1, %s17509_s19 }
 0x3f0   : > { %8959 = vrot.lane.b32.xlu0 %v8958_v17, %s17509_s19 }
 0x3f5   : > { %8919 = vrot.lane.b32.xlu2 %v8918_v58, %s17509_s19 }
 0x3f7   : > { %v1409_v54 = vpop.xlane.xlu2 %1408 }
 0x3f8   : > { %v1500_v17 = vsub.f32 %v11554_v28, %v1409_v54  ;;  %v1501_v18 = vsub.f32 %v11306_v20, %v1409_v54 }
 0x3fa   : > { %8939 = vrot.lane.b32.xlu1 %v8938_v45, %s17509_s19  ;;  %v1570_v49 = vmul.f32 1.442695, %v1500_v17  ;;  %v1572_v57 = vmul.f32 1.442695, %v1501_v18 }
 0x3fc   : > { %9451 = vpow2.f32 %v1570_v49 }
 0x3fd   : > { %9453 = vpow2.f32 %v1572_v57 }
 0x3ff   : > { %v1412_v46 = vpop.xlane.xlu2 %1411 }
 0x400   : > { %v1502_v28 = vsub.f32 %v11564_v63, %v1412_v46  ;;  %v1503_v20 = vsub.f32 %v11325_v14, %v1412_v46  ;;  %v11694_v63 = vpop.f32.mrf.mxu3 }
 0x401   : > { %v1415_v3 = vpop.xlane.xlu0 %1414 }
 0x402   : > { %8954 = vrot.lane.b32.xlu1 %v8953_v0, %s17509_s19  ;;  %v1504_v45 = vsub.f32 %v11576_v31, %v1415_v3  ;;  %v1505_v58 = vsub.f32 %v11342_v24, %v1415_v3  ;;  %v9452_v15 = vpop.eup %9451  ;;  %v1574_v18 = vmul.f32 1.442695, %v1502_v28  ;;  %v1576_v49 = vmul.f32 1.442695, %v1503_v20 }
 0x403   : > { %v9454_v42 = vpop.eup %9453  ;;  %1903 = vmatmul.f32.gmra.mxu0 %v9452_v15 }
 0x404   : > { %v1578_v53 = vmul.f32 1.442695, %v1504_v45  ;;  %v1580_v26 = vmul.f32 1.442695, %v1505_v58  ;;  %2016 = vmatmul.f32.gmra.mxu2 %v9454_v42  ;;  %v11692_v57 = vadd.f32 %v9454_v42, %v9452_v15  ;;  %v11696_v45 = vpop.f32.mrf.mxu1 }
 0x406   : > { %9455 = vpow2.f32 %v1578_v53 }
 0x407   : > { %9457 = vpow2.f32 %v1580_v26 }
 0x408   : > { %9459 = vpow2.f32 %v1574_v18  ;;  %v11702_v28 = vpop.f32.mrf.mxu3 }
 0x409   : > { %v1418_v0 = vpop.xlane.xlu1 %1417  ;;  %9461 = vpow2.f32 %v1576_v49  ;;  %v1428_v49 = vmax.f32 %v11694_v63, %v11696_v45 }
 0x40a   : > { %v1506_v31 = vsub.f32 %v11593_v43, %v1418_v0  ;;  %v1507_v24 = vsub.f32 %v11360_v48, %v1418_v0  ;;  %v6170_v0 = vld [vmem:[#allocation2 + $0x4c] sm:$0xff] }
 0x40c   : > { %v1582_v14 = vmul.f32 1.442695, %v1506_v31  ;;  %v1584_v54 = vmul.f32 1.442695, %v1507_v24  ;;  %v9456_v17 = vpop.eup %9455  ;;  %v11706_v15 = vpop.f32.mrf.mxu1  ;;  %v6171_v31 = vld [vmem:[#allocation2 + $0x54] sm:$0xff] }
 0x40d   : > { %v9458_v3 = vpop.eup %9457  ;;  %v1431_v18 = vmax.f32 %v11702_v28, %v11706_v15 }
 0x40e   : > { %9463 = vpow2.f32 %v1582_v14  ;;  %v11698_v58 = vadd.f32 %v9458_v3, %v9456_v17  ;;  %v9460_v53 = vpop.eup %9459 }
 0x40f   : > { %9465 = vpow2.f32 %v1584_v54  ;;  %v9462_v26 = vpop.eup %9461  ;;  %1906 = vmatmul.f32.gmra.mxu0 %v9460_v53  ;;  %v11718_v54 = vpack.i.bf16 %v6171_v31, %v6170_v0  ;;  %v6160_v0 = vld [vmem:[#allocation2 + $0x153] sm:$0xff]  ;;  %v6161_v31 = vld [vmem:[#allocation2 + $0x15b] sm:$0xff] }
 0x410   : > { %2019 = vmatmul.f32.gmra.mxu2 %v9462_v26  ;;  %v11700_v48 = vadd.f32 %v9462_v26, %v9460_v53  ;;  %v11712_v42 = vpop.f32.mrf.mxu3  ;;  %v8948_v8 = vpack.i.bf16 %v6161_v31, %v6160_v0 }
 0x414   : > { %v9464_v43 = vpop.eup %9463  ;;  %v11714_v24 = vpop.f32.mrf.mxu1 }
 0x415   : > { %v9466_v46 = vpop.eup %9465  ;;  %v1434_v14 = vmax.f32 %v11712_v42, %v11714_v24  ;;  %v11722_v26 = vpop.permute.xlu0 %8914 }
 0x416   : > { %v11704_v20 = vadd.f32 %v9466_v46, %v9464_v43  ;;  %17792 = vst [vmem:[#allocation283_spill] sm:$0xff] %v11722_v26 }
 0x417   : > { %1909 = vmatmul.f32.gmra.mxu0 %v9456_v17  ;;  %v6176_v17 = vld [vmem:[#allocation2 + $0x94] sm:$0xff] }
 0x418   : > { %2022 = vmatmul.f32.gmra.mxu2 %v9458_v3  ;;  %v6177_v3 = vld [vmem:[#allocation2 + $0x9c] sm:$0xff] }
 0x419   : > { %v8988_v53 = vpack.i.bf16 %v6177_v3, %v6176_v17  ;;  %v8968_v17 = vpack.i.bf16 %v6169_v27, %v6168_v51 }
 0x41a   : > { %1432 = vmax.xlane.f32.xlu0 %v1431_v18 }
 0x41e   : > { %1429 = vmax.xlane.f32.xlu2 %v1428_v49  ;;  %v11725_v49 = vpop.permute.xlu2 %5038 }
 0x41f   : > { %1912 = vmatmul.f32.gmra.mxu0 %v9464_v43  ;;  %v6154_v43 = vld [vmem:[#allocation2 + $0x10b] sm:$0xff]  ;;  %17793 = vst [vmem:[#allocation284_spill] sm:$0xff] %v11725_v49 }
 0x420   : > { %2025 = vmatmul.f32.gmra.mxu2 %v9466_v46  ;;  %v6155_v46 = vld [vmem:[#allocation2 + $0x113] sm:$0xff] }
 0x421   : > { %v8933_v18 = vpack.i.bf16 %v6155_v46, %v6154_v43  ;;  %v11730_v61 = vpop.permute.xlu1 %8909  ;;  %v6175_v43 = vld [vmem:[#allocation2 + $0x84] sm:$0xff] }
 0x422   : > { %17795 = vst [vmem:[#allocation286_spill] sm:$0xff] %v11730_v61  ;;  %v11746_v61 = vpop.f32.mrf.mxu3 }
 0x426   : > { %v11734_v3 = vpop.permute.xlu2 %8889 }
 0x429   : > { %v11740_v26 = vpop.permute.xlu1 %8924 }
 0x42a   : > { %17796 = vst [vmem:[#allocation287_spill] sm:$0xff] %v11740_v26 }
 0x42c   : > { %1435 = vmax.xlane.f32.xlu1 %v1434_v14  ;;  %v11728_v14 = vpop.permute.xlu0 %8929 }
 0x42d   : > { %17794 = vst [vmem:[#allocation285_spill] sm:$0xff] %v11728_v14 }
 0x42e   : > { %8974 = vrot.lane.b32.xlu0 %v11718_v54, %s17446_s22 }
 0x436   : > { %8989 = vrot.lane.b32.xlu0 %v8988_v53, %s17446_s22  ;;  %8934 = vrot.lane.b32.xlu2 %v8933_v18, %s17509_s19  ;;  %v6174_v53 = vld [vmem:[#allocation2 + $0x7c] sm:$0xff] }
 0x437   : > { %v11738_v14 = vpack.i.bf16 %v6175_v43, %v6174_v53  ;;  %v11748_v43 = vpop.f32.mrf.mxu1 }
 0x43e   : > { %8949 = vrot.lane.b32.xlu2 %v8948_v8, %s17509_s19 }
 0x445   : > { %8969 = vrot.lane.b32.xlu1 %v8968_v17, %s17446_s22 }
 0x447   : > { %v1424_v46 = vpop.xlane.xlu0 %1423 }
 0x448   : > { %v1510_v18 = vsub.f32 %v11649_v62, %v1424_v46  ;;  %v1511_v49 = vsub.f32 %v11651_v11, %v1424_v46  ;;  %v1421_v27 = vpop.xlane.xlu2 %1420 }
 0x449   : > { %v1508_v8 = vsub.f32 %v11626_v60, %v1421_v27  ;;  %v1509_v51 = vsub.f32 %v11375_v21, %v1421_v27 }
 0x44a   : > { %v1590_v0 = vmul.f32 1.442695, %v1510_v18  ;;  %v1592_v31 = vmul.f32 1.442695, %v1511_v49 }
 0x44b   : > { %v1586_v17 = vmul.f32 1.442695, %v1508_v8  ;;  %v1588_v62 = vmul.f32 1.442695, %v1509_v51  ;;  %v11756_v51 = vpop.f32.mrf.mxu3 }
 0x44c   : > { %9467 = vpow2.f32 %v1590_v0 }
 0x44d   : > { %8984 = vrot.lane.b32.xlu1 %v11738_v14, %s17446_s22  ;;  %9469 = vpow2.f32 %v1592_v31 }
 0x44e   : > { %9471 = vpow2.f32 %v1586_v17  ;;  %v11758_v17 = vpop.f32.mrf.mxu1 }
 0x44f   : > { %9473 = vpow2.f32 %v1588_v62 }
 0x450   : > { %v11783_v26 = vpop.permute.xlu2 %8904 }
 0x451   : > { %17799 = vst [vmem:[#allocation290_spill] sm:$0xff] %v11783_v26 }
 0x452   : > { %v9468_v11 = vpop.eup %9467 }
 0x453   : > { %v9470_v53 = vpop.eup %9469 }
 0x454   : > { %v1427_v49 = vpop.xlane.xlu1 %1426  ;;  %v11752_v0 = vadd.f32 %v9470_v53, %v9468_v11  ;;  %v9472_v21 = vpop.eup %9471 }
 0x455   : > { %v1512_v46 = vsub.f32 %v11657_v19, %v1427_v49  ;;  %v1513_v18 = vsub.f32 %v11659_v56, %v1427_v49  ;;  %v9474_v27 = vpop.eup %9473  ;;  %1915 = vmatmul.f32.gmra.mxu0 %v9472_v21  ;;  %v1440_v19 = vmax.f32 %v11756_v51, %v11758_v17 }
 0x456   : > { %2028 = vmatmul.f32.gmra.mxu2 %v9474_v27  ;;  %v11754_v8 = vadd.f32 %v9474_v27, %v9472_v21  ;;  %v11772_v21 = vpop.f32.mrf.mxu3  ;;  %v11774_v27 = vpop.f32.mrf.mxu1 }
 0x457   : > { %v1594_v60 = vmul.f32 1.442695, %v1512_v46  ;;  %v1596_v31 = vmul.f32 1.442695, %v1513_v18  ;;  %v1437_v46 = vmax.f32 %v11746_v61, %v11748_v43  ;;  %v11766_v18 = vld [vmem:[#allocation2 + $0x4a] sm:$0xff] }
 0x459   : > { %9475 = vpow2.f32 %v1594_v60  ;;  %v11768_v60 = vld [vmem:[#allocation2 + $0x52] sm:$0xff] }
 0x45a   : > { %9477 = vpow2.f32 %v1596_v31  ;;  %v9003_v31 = vpack.i.bf16 %v11768_v60, %v11766_v18 }
 0x45d   : > { %1918 = vmatmul.f32.gmra.mxu0 %v9468_v11  ;;  %v1443_v11 = vmax.f32 %v11772_v21, %v11774_v27 }
 0x45e   : > { %2031 = vmatmul.f32.gmra.mxu2 %v9470_v53  ;;  %v11779_v53 = vpop.permute.xlu0 %8944 }
 0x45f   : > { %v9476_v62 = vpop.eup %9475  ;;  %17797 = vst [vmem:[#allocation288_spill] sm:$0xff] %v11779_v53 }
 0x460   : > { %v9478_v56 = vpop.eup %9477  ;;  %1441 = vmax.xlane.f32.xlu0 %v1440_v19  ;;  %v6167_v19 = vld [vmem:[#allocation2 + $0x1a3] sm:$0xff] }
 0x461   : > { %v11762_v49 = vadd.f32 %v9478_v56, %v9476_v62 }
 0x465   : > { %1921 = vmatmul.f32.gmra.mxu0 %v9476_v62  ;;  %v6166_v62 = vld [vmem:[#allocation2 + $0x19b] sm:$0xff] }
 0x466   : > { %2034 = vmatmul.f32.gmra.mxu2 %v9478_v56  ;;  %v8963_v56 = vpack.i.bf16 %v6167_v19, %v6166_v62  ;;  %v11792_v62 = vpop.permute.xlu2 %8919 }
 0x467   : > { %1438 = vmax.xlane.f32.xlu2 %v1437_v46  ;;  %v11781_v46 = vpop.permute.xlu0 %8959  ;;  %17801 = vst [vmem:[#allocation292_spill] sm:$0xff] %v11792_v62 }
 0x468   : > { %17798 = vst [vmem:[#allocation289_spill] sm:$0xff] %v11781_v46 }
 0x46c   : > { %v11788_v5 = vpop.permute.xlu1 %8939 }
 0x46d   : > { %17800 = vst [vmem:[#allocation291_spill] sm:$0xff] %v11788_v5 }
 0x474   : > { %9004 = vrot.lane.b32.xlu0 %v9003_v31, %s9895_s23  ;;  %v8998_v31 = vpack.i.bf16 %v6181_v38, %v6180_v12  ;;  %v11797_v6 = vpop.permute.xlu1 %8954  ;;  %v11799_v12 = vpop.f32.mrf.mxu3 }
 0x475   : > { %17802 = vst [vmem:[#allocation293_spill] sm:$0xff] %v11797_v6 }
 0x477   : > { %1444 = vmax.xlane.f32.xlu1 %v1443_v11 }
 0x47f   : > { %8964 = vrot.lane.b32.xlu2 %v8963_v56, %s17509_s19 }
 0x487   : > { %8979 = vrot.lane.b32.xlu2 %v11786_v16, %s17446_s22 }
 0x48d   : > { %v1433_v11 = vpop.xlane.xlu0 %1432 }
 0x48e   : > { %v1516_v19 = vsub.f32 %v11702_v28, %v1433_v11  ;;  %v1517_v46 = vsub.f32 %v11706_v15, %v1433_v11  ;;  %v11803_v28 = vpop.f32.mrf.mxu1 }
 0x490   : > { %8999 = vrot.lane.b32.xlu1 %v8998_v31, %s17446_s22  ;;  %v1602_v56 = vmul.f32 1.442695, %v1516_v19  ;;  %v1604_v39 = vmul.f32 1.442695, %v1517_v46 }
 0x491   : > { %v1430_v5 = vpop.xlane.xlu2 %1429 }
 0x492   : > { %9479 = vpow2.f32 %v1602_v56  ;;  %v1514_v38 = vsub.f32 %v11694_v63, %v1430_v5  ;;  %v1515_v53 = vsub.f32 %v11696_v45, %v1430_v5 }
 0x493   : > { %9481 = vpow2.f32 %v1604_v39  ;;  %v11810_v39 = vpop.f32.mrf.mxu3 }
 0x494   : > { %v1598_v15 = vmul.f32 1.442695, %v1514_v38  ;;  %v1600_v11 = vmul.f32 1.442695, %v1515_v53 }
 0x496   : > { %9483 = vpow2.f32 %v1598_v15  ;;  %v11812_v38 = vpop.f32.mrf.mxu1 }
 0x497   : > { %9485 = vpow2.f32 %v1600_v11  ;;  %v1446_v11 = vmax.f32 %v11799_v12, %v11803_v28 }
 0x498   : > { %v9480_v62 = vpop.eup %9479 }
 0x499   : > { %v9482_v26 = vpop.eup %9481 }
 0x49a   : > { %v11805_v31 = vadd.f32 %v9482_v26, %v9480_v62 }
 0x49c   : > { %v9484_v63 = vpop.eup %9483 }
 0x49d   : > { %v9486_v5 = vpop.eup %9485  ;;  %1924 = vmatmul.f32.gmra.mxu0 %v9484_v63 }
 0x49e   : > { %1687 = vadd.xlane.f32.xlu0 %v11643_v25  ;;  %2037 = vmatmul.f32.gmra.mxu2 %v9486_v5  ;;  %v11814_v53 = vadd.f32 %v9486_v5, %v9484_v63  ;;  %v1449_v25 = vmax.f32 %v11810_v39, %v11812_v38  ;;  %v6178_v5 = vld [vmem:[#allocation2 + $0xac] sm:$0xff] }
 0x49f   : > { %v1436_v46 = vpop.xlane.xlu1 %1435 }
 0x4a0   : > { %v1518_v19 = vsub.f32 %v11712_v42, %v1436_v46  ;;  %v1519_v56 = vsub.f32 %v11714_v24, %v1436_v46  ;;  %v6108_v46 = vld [vmem:[#allocation2 + $0x62] sm:$0xff]  ;;  %v11833_v63 = vpop.permute.xlu0 %8974 }
 0x4a2   : > { %v1606_v45 = vmul.f32 1.442695, %v1518_v19  ;;  %v1608_v6 = vmul.f32 1.442695, %v1519_v56  ;;  %v6109_v19 = vld [vmem:[#allocation2 + $0x6a] sm:$0xff] }
 0x4a3   : > { %v11822_v56 = vpack.i.bf16 %v6109_v19, %v6108_v46 }
 0x4a4   : > { %9487 = vpow2.f32 %v1606_v45  ;;  %v6179_v45 = vld [vmem:[#allocation2 + $0xb4] sm:$0xff] }
 0x4a5   : > { %9489 = vpow2.f32 %v1608_v6  ;;  %1927 = vmatmul.f32.gmra.mxu0 %v9480_v62  ;;  %v11827_v62 = vpop.f32.mrf.mxu3 }
 0x4a6   : > { %1450 = vmax.xlane.f32.xlu0 %v1449_v25  ;;  %2040 = vmatmul.f32.gmra.mxu2 %v9482_v26  ;;  %v11829_v26 = vpop.f32.mrf.mxu1  ;;  %v8993_v25 = vpack.i.bf16 %v6179_v45, %v6178_v5 }
 0x4a7   : > { %v1452_v6 = vmax.f32 %v11827_v62, %v11829_v26 }
 0x4aa   : > { %v9488_v42 = vpop.eup %9487 }
 0x4ab   : > { %v9490_v24 = vpop.eup %9489 }
 0x4ac   : > { %v11818_v15 = vadd.f32 %v9490_v24, %v9488_v42 }
 0x4ad   : > { %1930 = vmatmul.f32.gmra.mxu0 %v9488_v42  ;;  %v11835_v42 = vpop.permute.xlu0 %8989 }
 0x4ae   : > { %2043 = vmatmul.f32.gmra.mxu2 %v9490_v24  ;;  %17803 = vst [vmem:[#allocation294_spill] sm:$0xff] %v11835_v42  ;;  %v11837_v24 = vpop.permute.xlu2 %8934 }
 0x4af   : > { %17804 = vst [vmem:[#allocation295_spill] sm:$0xff] %v11837_v24 }
 0x4b0   : > { %1447 = vmax.xlane.f32.xlu2 %v1446_v11 }
 0x4b6   : > { %v11842_v36 = vpop.permute.xlu2 %8949 }
 0x4b7   : > { %17805 = vst [vmem:[#allocation296_spill] sm:$0xff] %v11842_v36  ;;  %v11844_v55 = vpop.permute.xlu1 %8969 }
 0x4ba   : > { %1690 = vadd.xlane.f32.xlu1 %v11645_v44  ;;  %9019 = vrot.lane.b32.xlu0 %v11822_v56, %s17453_s17 }
 0x4c2   : > { %1453 = vmax.xlane.f32.xlu1 %v1452_v6  ;;  %v11848_v6 = vpop.f32.mrf.mxu3 }
 0x4c8   : > { %8994 = vrot.lane.b32.xlu2 %v8993_v25, %s17446_s22  ;;  %v11850_v25 = vpop.f32.mrf.mxu1 }
 0x4d0   : > { %v11861_v42 = vpop.f32.mrf.mxu1 }
 0x4d3   : > { %v1442_v44 = vpop.xlane.xlu0 %1441 }
 0x4d4   : > { %v1522_v11 = vsub.f32 %v11756_v51, %v1442_v44  ;;  %v1523_v46 = vsub.f32 %v11758_v17, %v1442_v44 }
 0x4d6   : > { %v1614_v19 = vmul.f32 1.442695, %v1522_v11  ;;  %v1616_v59 = vmul.f32 1.442695, %v1523_v46  ;;  %v11856_v46 = vpop.permute.xlu1 %8984 }
 0x4d7   : > { %17806 = vst [vmem:[#allocation297_spill] sm:$0xff] %v11856_v46 }
 0x4d8   : > { %9491 = vpow2.f32 %v1614_v19 }
 0x4d9   : > { %9493 = vpow2.f32 %v1616_v59 }
 0x4da   : > { %v1439_v51 = vpop.xlane.xlu2 %1438 }
 0x4db   : > { %9014 = vrot.lane.b32.xlu1 %v11718_v54, %s9897_s24  ;;  %v1520_v17 = vsub.f32 %v11746_v61, %v1439_v51  ;;  %v1521_v44 = vsub.f32 %v11748_v43, %v1439_v51  ;;  %v11859_v54 = vpop.f32.mrf.mxu3 }
 0x4dc   : > { %v1458_v61 = vmax.f32 %v11859_v54, %v11861_v42 }
 0x4dd   : > { %v1610_v19 = vmul.f32 1.442695, %v1520_v17  ;;  %v1612_v59 = vmul.f32 1.442695, %v1521_v44 }
 0x4de   : > { %v9492_v5 = vpop.eup %9491 }
 0x4df   : > { %v9494_v45 = vpop.eup %9493  ;;  %9495 = vpow2.f32 %v1610_v19 }
 0x4e0   : > { %v11854_v11 = vadd.f32 %v9494_v45, %v9492_v5  ;;  %9497 = vpow2.f32 %v1612_v59 }
 0x4e4   : > { %1696 = vadd.xlane.f32.xlu0 %v11692_v57 }
 0x4e5   : > { %v9496_v24 = vpop.eup %9495 }
 0x4e6   : > { %v9498_v46 = vpop.eup %9497  ;;  %1933 = vmatmul.f32.gmra.mxu0 %v9496_v24 }
 0x4e7   : > { %2046 = vmatmul.f32.gmra.mxu2 %v9498_v46  ;;  %v11867_v44 = vadd.f32 %v9498_v46, %v9496_v24  ;;  %v11879_v24 = vpop.f32.mrf.mxu3  ;;  %v6232_v46 = vld [vmem:[#allocation2 + $0x4b] sm:$0xff] }
 0x4ea   : > { %v1445_v36 = vpop.xlane.xlu1 %1444 }
 0x4eb   : > { %v1524_v43 = vsub.f32 %v11772_v21, %v1445_v36  ;;  %v1525_v51 = vsub.f32 %v11774_v27, %v1445_v36  ;;  %v6234_v21 = vld [vmem:[#allocation2 + $0x63] sm:$0xff]  ;;  %v6235_v36 = vld [vmem:[#allocation2 + $0x6b] sm:$0xff]  ;;  %v1455_v27 = vmax.f32 %v11848_v6, %v11850_v25 }
 0x4ec   : > { %1459 = vmax.xlane.f32.xlu0 %v1458_v61  ;;  %v11874_v61 = vpack.i.bf16 %v6235_v36, %v6234_v21 }
 0x4ed   : > { %v1618_v17 = vmul.f32 1.442695, %v1524_v43  ;;  %v1620_v57 = vmul.f32 1.442695, %v1525_v51  ;;  %v6233_v43 = vld [vmem:[#allocation2 + $0x53] sm:$0xff] }
 0x4ee   : > { %1936 = vmatmul.f32.gmra.mxu0 %v9492_v5  ;;  %v11883_v5 = vpop.permute.xlu0 %9004 }
 0x4ef   : > { %9499 = vpow2.f32 %v1618_v17  ;;  %2049 = vmatmul.f32.gmra.mxu2 %v9494_v45  ;;  %v9008_v17 = vpack.i.bf16 %v6233_v43, %v6232_v46 }
 0x4f0   : > { %9501 = vpow2.f32 %v1620_v57  ;;  %v11889_v57 = vpop.permute.xlu2 %8964 }
 0x4f1   : > { %1693 = vadd.xlane.f32.xlu2 %v11647_v4  ;;  %v11881_v4 = vpop.f32.mrf.mxu1  ;;  %17808 = vst [vmem:[#allocation299_spill] sm:$0xff] %v11889_v57 }
 0x4f2   : > { %v1461_v45 = vmax.f32 %v11879_v24, %v11881_v4 }
 0x4f5   : > { %v9500_v19 = vpop.eup %9499 }
 0x4f6   : > { %v9502_v59 = vpop.eup %9501  ;;  %1939 = vmatmul.f32.gmra.mxu0 %v9500_v19 }
 0x4f7   : > { %v11870_v34 = vadd.f32 %v9502_v59, %v9500_v19  ;;  %2052 = vmatmul.f32.gmra.mxu2 %v9502_v59 }
 0x4f9   : > { %1456 = vmax.xlane.f32.xlu2 %v1455_v27  ;;  %v11894_v27 = vpop.permute.xlu2 %8979  ;;  %v11900_v43 = vpop.f32.mrf.mxu1 }
 0x500   : > { %9034 = vrot.lane.b32.xlu0 %v11874_v61, %s9896_s18 }
 0x505   : > { %1699 = vadd.xlane.f32.xlu1 %v11700_v48 }
 0x50d   : > { %1462 = vmax.xlane.f32.xlu1 %v1461_v45  ;;  %v11896_v45 = vpop.f32.mrf.mxu3 }
 0x511   : > { %v11887_v51 = vpop.xlane.xlu0 %1687  ;;  %9009 = vrot.lane.b32.xlu2 %v9008_v17, %s9896_s18 }
 0x512   : > { %17807 = vst [vmem:[#allocation298_spill] sm:$0xff] %v11887_v51  ;;  %v11898_v51 = vpop.permute.xlu1 %8999 }
 0x513   : > { %17809 = vst [vmem:[#allocation300_spill] sm:$0xff] %v11898_v51  ;;  %v11913_v51 = vpop.f32.mrf.mxu1 }
 0x519   : > { %v1451_v48 = vpop.xlane.xlu0 %1450 }
 0x51a   : > { %v1528_v19 = vsub.f32 %v11810_v39, %v1451_v48  ;;  %v1529_v59 = vsub.f32 %v11812_v38, %v1451_v48 }
 0x51c   : > { %v1626_v21 = vmul.f32 1.442695, %v1528_v19  ;;  %v1628_v36 = vmul.f32 1.442695, %v1529_v59 }
 0x51e   : > { %9503 = vpow2.f32 %v1626_v21 }
 0x51f   : > { %9505 = vpow2.f32 %v1628_v36  ;;  %v11911_v36 = vpop.f32.mrf.mxu3 }
 0x523   : > { %v1448_v38 = vpop.xlane.xlu2 %1447 }
 0x524   : > { %v9504_v32 = vpop.eup %9503  ;;  %v1526_v17 = vsub.f32 %v11799_v12, %v1448_v38  ;;  %v1527_v48 = vsub.f32 %v11803_v28, %v1448_v38 }
 0x525   : > { %v9506_v46 = vpop.eup %9505 }
 0x526   : > { %9029 = vrot.lane.b32.xlu1 %v11822_v56, %s9895_s23  ;;  %v11904_v39 = vadd.f32 %v9506_v46, %v9504_v32  ;;  %v1622_v19 = vmul.f32 1.442695, %v1526_v17  ;;  %v1624_v59 = vmul.f32 1.442695, %v1527_v48  ;;  %v1467_v56 = vmax.f32 %v11911_v36, %v11913_v51 }
 0x528   : > { %9507 = vpow2.f32 %v1622_v19 }
 0x529   : > { %9509 = vpow2.f32 %v1624_v59 }
 0x52a   : > { %1705 = vadd.xlane.f32.xlu0 %v11704_v20 }
 0x52d   : > { %v11909_v21 = vpop.xlane.xlu1 %1690 }
 0x52e   : > { %17810 = vst [vmem:[#allocation301_spill] sm:$0xff] %v11909_v21  ;;  %v9508_v57 = vpop.eup %9507 }
 0x52f   : > { %v9510_v12 = vpop.eup %9509  ;;  %1942 = vmatmul.f32.gmra.mxu0 %v9508_v57 }
 0x530   : > { %2055 = vmatmul.f32.gmra.mxu2 %v9510_v12  ;;  %v11919_v17 = vadd.f32 %v9510_v12, %v9508_v57  ;;  %v11933_v57 = vpop.f32.mrf.mxu1 }
 0x532   : > { %1468 = vmax.xlane.f32.xlu0 %v1467_v56 }
 0x535   : > { %v1454_v28 = vpop.xlane.xlu1 %1453 }
 0x536   : > { %v1530_v20 = vsub.f32 %v11827_v62, %v1454_v28  ;;  %v1531_v38 = vsub.f32 %v11829_v26, %v1454_v28  ;;  %v1464_v62 = vmax.f32 %v11896_v45, %v11900_v43  ;;  %v11928_v26 = vpop.permute.xlu0 %9019 }
 0x537   : > { %1945 = vmatmul.f32.gmra.mxu0 %v9504_v32  ;;  %v11931_v32 = vpop.f32.mrf.mxu3 }
 0x538   : > { %v1630_v48 = vmul.f32 1.442695, %v1530_v20  ;;  %v1632_v19 = vmul.f32 1.442695, %v1531_v38  ;;  %2058 = vmatmul.f32.gmra.mxu2 %v9506_v46  ;;  %v11943_v20 = vpop.permute.xlu2 %8994 }
 0x539   : > { %17812 = vst [vmem:[#allocation303_spill] sm:$0xff] %v11943_v20 }
 0x53a   : > { %9511 = vpow2.f32 %v1630_v48  ;;  %1702 = vadd.xlane.f32.xlu2 %v11698_v58  ;;  %v1470_v58 = vmax.f32 %v11931_v32, %v11933_v57 }
 0x53b   : > { %9513 = vpow2.f32 %v1632_v19 }
 0x53f   : > { %v11945_v48 = vpop.f32.mrf.mxu3 }
 0x540   : > { %v9512_v59 = vpop.eup %9511 }
 0x541   : > { %v9514_v56 = vpop.eup %9513  ;;  %1948 = vmatmul.f32.gmra.mxu0 %v9512_v59 }
 0x542   : > { %v11922_v21 = vadd.f32 %v9514_v56, %v9512_v59  ;;  %2061 = vmatmul.f32.gmra.mxu2 %v9514_v56  ;;  %1465 = vmax.xlane.f32.xlu2 %v1464_v62  ;;  %v11949_v62 = vpop.f32.mrf.mxu1 }
 0x546   : > { %9049 = vrot.lane.b32.xlu0 %v11668_v1, %s17451_s21 }
 0x550   : > { %1708 = vadd.xlane.f32.xlu1 %v11754_v8 }
 0x557   : > { %v11937_v46 = vpop.xlane.xlu0 %1696 }
 0x558   : > { %17811 = vst [vmem:[#allocation302_spill] sm:$0xff] %v11937_v46  ;;  %1471 = vmax.xlane.f32.xlu1 %v1470_v58  ;;  %v6111_v58 = vld [vmem:[#allocation2 + $0x82] sm:$0xff] }
 0x55a   : > { %9024 = vrot.lane.b32.xlu2 %v11874_v61, %s17451_s21  ;;  %v6110_v61 = vld [vmem:[#allocation2 + $0x7a] sm:$0xff] }
 0x55b   : > { %v9043_v46 = vpack.i.bf16 %v6111_v58, %v6110_v61 }
 0x55f   : > { %v1460_v12 = vpop.xlane.xlu0 %1459 }
 0x560   : > { %v1534_v1 = vsub.f32 %v11859_v54, %v1460_v12  ;;  %v1535_v28 = vsub.f32 %v11861_v42, %v1460_v12  ;;  %v11953_v42 = vpop.permute.xlu1 %9014 }
 0x561   : > { %v9016_v37 = vunpack.i.l.bf16 %v11953_v42 }
 0x562   : > { %v1638_v8 = vmul.f32 1.442695, %v1534_v1  ;;  %v1640_v38 = vmul.f32 1.442695, %v1535_v28 }
 0x564   : > { %9515 = vpow2.f32 %v1638_v8  ;;  %v11947_v19 = vpop.xlane.xlu2 %1693  ;;  %v11959_v8 = vpop.f32.mrf.mxu3 }
 0x565   : > { %9517 = vpow2.f32 %v1640_v38  ;;  %17813 = vst [vmem:[#allocation304_spill] sm:$0xff] %v11947_v19  ;;  %v11961_v19 = vpop.f32.mrf.mxu1 }
 0x566   : > { %v1476_v61 = vmax.f32 %v11959_v8, %v11961_v19 }
 0x56a   : > { %v9516_v59 = vpop.eup %9515 }
 0x56b   : > { %v9518_v56 = vpop.eup %9517 }
 0x56c   : > { %v11951_v54 = vadd.f32 %v9518_v56, %v9516_v59  ;;  %v1457_v12 = vpop.xlane.xlu2 %1456 }
 0x56d   : > { %v1532_v1 = vsub.f32 %v11848_v6, %v1457_v12  ;;  %v1533_v28 = vsub.f32 %v11850_v25, %v1457_v12 }
 0x56f   : > { %v1634_v38 = vmul.f32 1.442695, %v1532_v1  ;;  %v1636_v20 = vmul.f32 1.442695, %v1533_v28 }
 0x570   : > { %1714 = vadd.xlane.f32.xlu0 %v11762_v49 }
 0x571   : > { %9044 = vrot.lane.b32.xlu1 %v9043_v46, %s17453_s17  ;;  %9519 = vpow2.f32 %v1634_v38 }
 0x572   : > { %9521 = vpow2.f32 %v1636_v20 }
 0x577   : > { %v9520_v49 = vpop.eup %9519 }
 0x578   : > { %v11965_v58 = vpop.xlane.xlu1 %1699  ;;  %1477 = vmax.xlane.f32.xlu0 %v1476_v61  ;;  %v9522_v46 = vpop.eup %9521  ;;  %1951 = vmatmul.f32.gmra.mxu0 %v9520_v49  ;;  %v7528_v61 = vld [vmem:[%s17347_s11 + $0x78] sm:$0xff] }
 0x579   : > { %17814 = vst [vmem:[#allocation305_spill] sm:$0xff] %v11965_v58  ;;  %2064 = vmatmul.f32.gmra.mxu2 %v9522_v46  ;;  %v11967_v6 = vadd.f32 %v9522_v46, %v9520_v49  ;;  %7631 = vmatpush.msrb.mxu1 %v7528_v61  ;;  %v7523_v49 = vld [vmem:[%s17347_s11 + $0x50] sm:$0xff]  ;;  %v7522_v46 = vld [vmem:[%s17347_s11 + $0x48] sm:$0xff] }
 0x57a   : > { %v7518_v61 = vld [vmem:[%s17347_s11 + $0x28] sm:$0xff] }
 0x580   : > { %v1463_v25 = vpop.xlane.xlu1 %1462  ;;  %1954 = vmatmul.f32.gmra.mxu0 %v9516_v59  ;;  %v7525_v59 = vld [vmem:[%s17347_s11 + $0x60] sm:$0xff] }
 0x581   : > { %v1536_v12 = vsub.f32 %v11879_v24, %v1463_v25  ;;  %v1537_v1 = vsub.f32 %v11881_v4, %v1463_v25  ;;  %2067 = vmatmul.f32.gmra.mxu2 %v9518_v56  ;;  %v7527_v24 = vld [vmem:[%s17347_s11 + $0x70] sm:$0xff]  ;;  %v11993_v56 = vpop.permute.xlu0 %9034  ;;  %v7521_v25 = vld [vmem:[%s17347_s11 + $0x40] sm:$0xff] }
 0x582   : > { %7632 = vmatpush.msrb.mxu1 %v7527_v24  ;;  %v7517_v24 = vld [vmem:[%s17347_s11 + $0x20] sm:$0xff] }
 0x583   : > { %v1642_v28 = vmul.f32 1.442695, %v1536_v12  ;;  %v1644_v47 = vmul.f32 1.442695, %v1537_v1  ;;  %1711 = vadd.xlane.f32.xlu2 %v11752_v0  ;;  %v1473_v0 = vmax.f32 %v11945_v48, %v11949_v62  ;;  %v12005_v12 = vpop.f32.mrf.mxu3 }
 0x585   : > { %9523 = vpow2.f32 %v1642_v28  ;;  %v7520_v28 = vld [vmem:[%s17347_s11 + $0x38] sm:$0xff] }
 0x586   : > { %9525 = vpow2.f32 %v1644_v47  ;;  %v7526_v47 = vld [vmem:[%s17347_s11 + $0x68] sm:$0xff] }
 0x587   : > { %7633 = vmatpush.msrb.mxu1 %v7526_v47 }
 0x589   : > { %7634 = vmatpush.msrb.mxu1 %v7525_v59 }
 0x58b   : > { %v9524_v20 = vpop.eup %9523  ;;  %1474 = vmax.xlane.f32.xlu2 %v1473_v0 }
 0x58c   : > { %v9526_v38 = vpop.eup %9525  ;;  %9064 = vrot.lane.b32.xlu0 %v11738_v14, %s9897_s24  ;;  %1957 = vmatmul.f32.gmra.mxu0 %v9524_v20  ;;  %v7524_v14 = vld [vmem:[%s17347_s11 + $0x58] sm:$0xff] }
 0x58d   : > { %v11980_v4 = vadd.f32 %v9526_v38, %v9524_v20  ;;  %2070 = vmatmul.f32.gmra.mxu2 %v9526_v38  ;;  %7635 = vmatpush.msrb.mxu1 %v7524_v14  ;;  %v12012_v20 = vpop.f32.mrf.mxu1  ;;  %v7519_v38 = vld [vmem:[%s17347_s11 + $0x30] sm:$0xff]  ;;  %v7516_v14 = vld [vmem:[%s17347_s11 + $0x18] sm:$0xff] }
 0x58f   : > { %7636 = vmatpush.msrb.mxu1 %v7523_v49 }
 0x591   : > { %7637 = vmatpush.msrb.mxu1 %v7522_v46 }
 0x593   : > { %7638 = vmatpush.msrb.mxu1 %v7521_v25  ;;  %v7515_v25 = vld [vmem:[%s17347_s11 + $0x10] sm:$0xff] }
 0x595   : > { %7639 = vmatpush.msrb.mxu1 %v7520_v28  ;;  %v12035_v28 = vpop.permute.xlu2 %9009 }
 0x597   : > { %7640 = vmatpush.msrb.mxu1 %v7519_v38 }
 0x599   : > { %7641 = vmatpush.msrb.mxu1 %v7518_v61  ;;  %v12049_v61 = vpop.f32.mrf.mxu1 }
 0x59b   : > { %1717 = vadd.xlane.f32.xlu1 %v11814_v53  ;;  %v1479_v53 = vmax.f32 %v12005_v12, %v12012_v20  ;;  %7642 = vmatpush.msrb.mxu1 %v7517_v24 }
 0x59d   : > { %v12007_v1 = vpop.xlane.xlu0 %1705  ;;  %7643 = vmatpush.msrb.mxu1 %v7516_v14  ;;  %v8891_v14 = vunpack.i.l.bf16 %v11734_v3 }
 0x59e   : > { %17815 = vst [vmem:[#allocation306_spill] sm:$0xff] %v12007_v1  ;;  %v12064_v1 = vpop.permute.xlu1 %9029 }
 0x59f   : > { %7644 = vmatpush.msrb.mxu1 %v7515_v25  ;;  %v8971_v25 = vunpack.i.l.bf16 %v11844_v55 }
 0x5a1   : > { %v12066_v23 = vpop.f32.mrf.mxu1 }
 0x5a3   : > { %1480 = vmax.xlane.f32.xlu1 %v1479_v53  ;;  %9039 = vrot.lane.b32.xlu2 %v11786_v16, %s9897_s24  ;;  %v12043_v16 = vpop.f32.mrf.mxu3 }
 0x5a5   : > { %v1469_v47 = vpop.xlane.xlu0 %1468 }
 0x5a6   : > { %v1540_v0 = vsub.f32 %v11911_v36, %v1469_v47  ;;  %v1541_v59 = vsub.f32 %v11913_v51, %v1469_v47  ;;  %v7514_v51 = vld [vmem:[%s17347_s11 + $0x8] sm:$0xff]  ;;  %v7513_v36 = vld [vmem:[%s17347_s11] sm:$0xff] }
 0x5a7   : > { %7645 = vmatpush.msrb.mxu1 %v7514_v51 }
 0x5a8   : > { %v1650_v49 = vmul.f32 1.442695, %v1540_v0  ;;  %v1652_v46 = vmul.f32 1.442695, %v1541_v59  ;;  %v6236_v0 = vld [vmem:[#allocation2 + $0x7b] sm:$0xff]  ;;  %v6237_v59 = vld [vmem:[#allocation2 + $0x83] sm:$0xff] }
 0x5a9   : > { %7646 = vmatpush.msrb.mxu1 %v7513_v36  ;;  %v9006_v36 = vunpack.i.l.bf16 %v11883_v5 }
 0x5aa   : > { %9527 = vpow2.f32 %v1650_v49  ;;  %v9058_v49 = vpack.i.bf16 %v6237_v59, %v6236_v0 }
 0x5ab   : > { %9529 = vpow2.f32 %v1652_v46  ;;  %v6104_v46 = vld [vmem:[#allocation2 + $0x32] sm:$0xff]  ;;  %v12060_v51 = vpop.f32.mrf.mxu3 }
 0x5ac   : > { %v1485_v59 = vmax.f32 %v12060_v51, %v12066_v23 }
 0x5ad   : > { %v12051_v24 = vpop.xlane.xlu2 %1702 }
 0x5ae   : > { %17816 = vst [vmem:[#allocation307_spill] sm:$0xff] %v12051_v24  ;;  %v9011_v24 = vunpack.i.l.bf16 %v12035_v28 }
 0x5b0   : > { %v12045_v53 = vpop.eup %9527 }
 0x5b1   : > { %v12047_v38 = vpop.eup %9529 }
 0x5b2   : > { %v12055_v47 = vadd.f32 %v12047_v38, %v12045_v53 }
 0x5b5   : > { %v1466_v58 = vpop.xlane.xlu2 %1465 }
 0x5b6   : > { %1723 = vadd.xlane.f32.xlu0 %v11818_v15  ;;  %v7289_v15 = vsel %vm17494_vm0, %v6104_v46, %v8891_v14  ;;  %v1538_v35 = vsub.f32 %v11896_v45, %v1466_v58  ;;  %v1539_v0 = vsub.f32 %v11900_v43, %v1466_v58  ;;  %v8892_v45 = vunpack.i.h.bf16 %v11734_v3  ;;  %v6105_v43 = vld [vmem:[#allocation2 + $0x3a] sm:$0xff] }
 0x5b7   : > { %v7321_v29 = vsel %vm3608_vm6, %v7289_v15, %v8971_v25  ;;  %v8972_v58 = vunpack.i.h.bf16 %v11844_v55  ;;  %v9007_v46 = vunpack.i.h.bf16 %v11883_v5  ;;  %v9017_v5 = vunpack.i.h.bf16 %v11953_v42 }
 0x5b8   : > { %v7353_v41 = vsel %vm3641_vm7, %v7321_v29, %v9006_v36  ;;  %v1646_v52 = vmul.f32 1.442695, %v1538_v35  ;;  %v1648_v30 = vmul.f32 1.442695, %v1539_v0  ;;  %v9012_v35 = vunpack.i.h.bf16 %v12035_v28 }
 0x5b9   : > { %v7385_v14 = vsel %vm17499_vm8, %v7353_v41, %v9011_v24 }
 0x5ba   : > { %9531 = vpow2.f32 %v1646_v52  ;;  %v7417_v29 = vsel %vm17497_vm9, %v7385_v14, %v9016_v37  ;;  %v7290_v52 = vsel %vm17494_vm0, %v6105_v43, %v8892_v45 }
 0x5bb   : > { %9533 = vpow2.f32 %v1648_v30  ;;  %v7322_v24 = vsel %vm3608_vm6, %v7290_v52, %v8972_v58 }
 0x5bc   : > { %9059 = vrot.lane.b32.xlu1 %v9058_v49, %s9896_s18  ;;  %v9021_v49 = vunpack.i.l.bf16 %v11928_v26  ;;  %v7354_v30 = vsel %vm3641_vm7, %v7322_v24, %v9007_v46  ;;  %v6207_v46 = vld [vmem:[#allocation2 + $0x9a] sm:$0xff]  ;;  %v12112_v24 = vpop.f32.mrf.mxu2 }
 0x5bd   : > { %v9025_v25 = vpop.permute.xlu2 %9024  ;;  %v7386_v15 = vsel %vm17499_vm8, %v7354_v30, %v9012_v35  ;;  %17819 = vst [vmem:[#allocation310_spill] sm:$0xff] %v12112_v24  ;;  %v12123_v30 = vpop.f32.mrf.mxu1 }
 0x5be   : > { %1486 = vmax.xlane.f32.xlu0 %v1485_v59  ;;  %v9026_v3 = vunpack.i.l.bf16 %v9025_v25  ;;  %v7449_v55 = vsel %vm17498_vm11, %v7417_v29, %v9021_v49  ;;  %v9022_v59 = vunpack.i.h.bf16 %v11928_v26  ;;  %v9027_v14 = vunpack.i.h.bf16 %v9025_v25  ;;  %v6206_v49 = vld [vmem:[#allocation2 + $0x92] sm:$0xff]  ;;  %v12108_v25 = vpop.f32.mrf.mxu0 }
 0x5bf   : > { %v7418_v45 = vsel %vm17497_vm9, %v7386_v15, %v9017_v5  ;;  %v12102_v26 = vpack.i.bf16 %v6207_v46, %v6206_v49  ;;  %17818 = vst [vmem:[#allocation309_spill] sm:$0xff] %v12108_v25  ;;  %v6204_v5 = vld [vmem:[#allocation2 + $0x7a] sm:$0xff] }
 0x5c0   : > { %v9532_v36 = vpop.eup %9531  ;;  %v7481_v37 = vsel %vm3791_vm10, %v7449_v55, %v9026_v3  ;;  %v7450_v29 = vsel %vm17498_vm11, %v7418_v45, %v9022_v59 }
 0x5c1   : > { %v9534_v28 = vpop.eup %9533  ;;  %1960 = vmatmul.f32.gmra.mxu0 %v9532_v36  ;;  %7647 = vmatmul.f32.vlgmr.msrb.gmra.mxu1 %v7481_v37  ;;  %v7482_v35 = vsel %vm3791_vm10, %v7450_v29, %v9027_v14  ;;  %v6205_v37 = vld [vmem:[#allocation2 + $0x82] sm:$0xff]  ;;  %v6333_v29 = vld [vmem:[#allocation2 + $0x93] sm:$0xff] }
 0x5c2   : > { %2073 = vmatmul.f32.gmra.mxu2 %v9534_v28  ;;  %v12093_v0 = vadd.f32 %v9534_v28, %v9532_v36  ;;  %v12121_v36 = vpop.f32.mrf.mxu3  ;;  %v9053_v45 = vpack.i.bf16 %v6205_v37, %v6204_v5  ;;  %v9031_v5 = vunpack.i.l.bf16 %v12064_v1 }
 0x5c3   : > { %v12084_v41 = vpop.xlane.xlu1 %1708  ;;  %v1488_v28 = vmax.f32 %v12121_v36, %v12123_v30 }
 0x5c4   : > { %17817 = vst [vmem:[#allocation308_spill] sm:$0xff] %v12084_v41 }
 0x5c9   : > { %1963 = vmatmul.f32.gmra.mxu0 %v12045_v53  ;;  %7650 = vmatmul.f32.gmra.mxu1 %v7482_v35  ;;  %v1482_v53 = vmax.f32 %v12043_v16, %v12049_v61 }
 0x5ca   : > { %2076 = vmatmul.f32.gmra.mxu2 %v12047_v38  ;;  %v12116_v38 = vpop.permute.xlu0 %9049 }
 0x5cb   : > { %v1472_v43 = vpop.xlane.xlu1 %1471 }
 0x5cc   : > { %v1542_v58 = vsub.f32 %v11931_v32, %v1472_v43  ;;  %v1543_v42 = vsub.f32 %v11933_v57, %v1472_v43  ;;  %1720 = vadd.xlane.f32.xlu2 %v11805_v31 }
 0x5ce   : > { %v1654_v52 = vmul.f32 1.442695, %v1542_v58  ;;  %v1656_v3 = vmul.f32 1.442695, %v1543_v42 }
 0x5d0   : > { %9535 = vpow2.f32 %v1654_v52 }
 0x5d1   : > { %9537 = vpow2.f32 %v1656_v3  ;;  %v8896_v3 = vunpack.i.l.bf16 %v11683_v40 }
 0x5d2   : > { %9079 = vrot.lane.b32.xlu0 %v12102_v26, %s9895_s23 }
 0x5d4   : > { %1483 = vmax.xlane.f32.xlu2 %v1482_v53  ;;  %v8976_v53 = vunpack.i.l.bf16 %v11833_v63 }
 0x5d6   : > { %v9536_v32 = vpop.eup %9535 }
 0x5d7   : > { %v9538_v57 = vpop.eup %9537  ;;  %1966 = vmatmul.f32.gmra.mxu0 %v9536_v32 }
 0x5d8   : > { %2079 = vmatmul.f32.gmra.mxu2 %v9538_v57  ;;  %v12114_v55 = vadd.f32 %v9538_v57, %v9536_v32 }
 0x5e3   : > { %v12118_v31 = vpop.xlane.xlu0 %1714  ;;  %v9045_v52 = vpop.permute.xlu1 %9044 }
 0x5e4   : > { %17820 = vst [vmem:[#allocation311_spill] sm:$0xff] %v12118_v31 }
 0x5e6   : > { %1726 = vadd.xlane.f32.xlu1 %v11867_v44 }
 0x5eb   : > { %v1478_v15 = vpop.xlane.xlu0 %1477 }
 0x5ec   : > { %v1546_v59 = vsub.f32 %v11959_v8, %v1478_v15  ;;  %v1547_v14 = vsub.f32 %v11961_v19, %v1478_v15  ;;  %9054 = vrot.lane.b32.xlu2 %v9053_v45, %s9895_s23  ;;  %v6334_v8 = vld [vmem:[#allocation2 + $0x9b] sm:$0xff]  ;;  %v7291_v15 = vsel %vm17494_vm0, %v11766_v18, %v8896_v3  ;;  %v6304_v45 = vld [vmem:[#allocation2 + $0xb2] sm:$0xff]  ;;  %v9051_v18 = vunpack.i.l.bf16 %v12116_v38  ;;  %v12155_v3 = vpop.f32.mrf.mxu0 }
 0x5ed   : > { %v12135_v35 = vpack.i.bf16 %v6334_v8, %v6333_v29  ;;  %v9046_v29 = vunpack.i.l.bf16 %v9045_v52 }
 0x5ee   : > { %1489 = vmax.xlane.f32.xlu1 %v1488_v28  ;;  %v1662_v43 = vmul.f32 1.442695, %v1546_v59  ;;  %v1664_v58 = vmul.f32 1.442695, %v1547_v14  ;;  %v8977_v59 = vunpack.i.h.bf16 %v11833_v63  ;;  %v6303_v14 = vld [vmem:[#allocation2 + $0xaa] sm:$0xff] }
 0x5ef   : > { %v9093_v63 = vpack.i.bf16 %v6304_v45, %v6303_v14 }
 0x5f0   : > { %9539 = vpow2.f32 %v1662_v43  ;;  %v9032_v43 = vunpack.i.h.bf16 %v12064_v1 }
 0x5f1   : > { %9541 = vpow2.f32 %v1664_v58 }
 0x5f6   : > { %v9540_v44 = vpop.eup %9539  ;;  %v12132_v46 = vpop.xlane.xlu2 %1711 }
 0x5f7   : > { %v9542_v42 = vpop.eup %9541  ;;  %17821 = vst [vmem:[#allocation312_spill] sm:$0xff] %v12132_v46 }
 0x5f8   : > { %v12130_v49 = vadd.f32 %v9542_v42, %v9540_v44 }
 0x5fc   : > { %1732 = vadd.xlane.f32.xlu0 %v11870_v34  ;;  %v8897_v34 = vunpack.i.h.bf16 %v11683_v40 }
 0x5fe   : > { %v1475_v19 = vpop.xlane.xlu2 %1474  ;;  %v7292_v40 = vsel %vm17494_vm0, %v11768_v60, %v8897_v34 }
 0x5ff   : > { %v1544_v32 = vsub.f32 %v11945_v48, %v1475_v19  ;;  %v1545_v57 = vsub.f32 %v11949_v62, %v1475_v19  ;;  %v7323_v48 = vsel %vm3608_vm6, %v7291_v15, %v8976_v53  ;;  %v9036_v62 = vunpack.i.l.bf16 %v11993_v56 }
 0x600   : > { %v7355_v58 = vsel %vm3641_vm7, %v7323_v48, %v9031_v5 }
 0x601   : > { %v1658_v37 = vmul.f32 1.442695, %v1544_v32  ;;  %v1660_v28 = vmul.f32 1.442695, %v1545_v57  ;;  %v7324_v32 = vsel %vm3608_vm6, %v7292_v40, %v8977_v59  ;;  %v9037_v57 = vunpack.i.h.bf16 %v11993_v56 }
 0x602   : > { %v7387_v53 = vsel %vm17499_vm8, %v7355_v58, %v9036_v62  ;;  %v9047_v62 = vunpack.i.h.bf16 %v9045_v52 }
 0x603   : > { %9543 = vpow2.f32 %v1658_v37  ;;  %v12162_v37 = vpop.f32.mrf.mxu2 }
 0x604   : > { %9545 = vpow2.f32 %v1660_v28  ;;  %v7356_v28 = vsel %vm3641_vm7, %v7324_v32, %v9032_v43  ;;  %v9052_v43 = vunpack.i.h.bf16 %v12116_v38  ;;  %v12183_v38 = vpop.f32.mrf.mxu3 }
 0x605   : > { %v7388_v14 = vsel %vm17499_vm8, %v7356_v28, %v9037_v57 }
 0x606   : > { %v9040_v8 = vpop.permute.xlu2 %9039 }
 0x607   : > { %9074 = vrot.lane.b32.xlu1 %v12135_v35, %s17451_s21  ;;  %v9041_v19 = vunpack.i.l.bf16 %v9040_v8  ;;  %v9042_v60 = vunpack.i.h.bf16 %v9040_v8  ;;  %s18056_s21 = smov 96  }
 0x609   : > { %v9544_v5 = vpop.eup %9543  ;;  %v7419_v34 = vsel %vm17497_vm9, %v7387_v53, %v9041_v19  ;;  %v7420_v45 = vsel %vm17497_vm9, %v7388_v14, %v9042_v60  ;;  %v12177_v19 = vpop.f32.mrf.mxu0 }
 0x60a   : > { %v9546_v15 = vpop.eup %9545  ;;  %1969 = vmatmul.f32.gmra.mxu0 %v9544_v5  ;;  %v7451_v48 = vsel %vm17498_vm11, %v7419_v34, %v9046_v29  ;;  %v7452_v58 = vsel %vm17498_vm11, %v7420_v45, %v9047_v62 }
 0x60b   : > { %2082 = vmatmul.f32.gmra.mxu2 %v9546_v15  ;;  %v7483_v56 = vsel %vm3791_vm10, %v7451_v48, %v9051_v18  ;;  %v12169_v59 = vadd.f32 %v9546_v15, %v9544_v5  ;;  %v12179_v18 = vpop.f32.mrf.mxu2  ;;  %v7484_v52 = vsel %vm3791_vm10, %v7452_v58, %v9052_v43 }
 0x60c   : > { %7653 = vmatmul.f32.gmra.mxu1 %v7483_v56 }
 0x60e   : > { %v12160_v1 = vpop.xlane.xlu1 %1717 }
 0x60f   : > { %17822 = vst [vmem:[#allocation313_spill] sm:$0xff] %v12160_v1 }
 0x610   : > { %9094 = vrot.lane.b32.xlu0 %v9093_v63, %s17453_s17 }
 0x611   : > { %v12191_v53 = vpop.f32.mrf.mxu0 }
 0x612   : > { %1972 = vmatmul.f32.gmra.mxu0 %v9540_v44 }
 0x613   : > { %2085 = vmatmul.f32.gmra.mxu2 %v9542_v42  ;;  %v12193_v5 = vpop.f32.mrf.mxu2 }
 0x614   : > { %7656 = vmatmul.f32.gmra.mxu1 %v7484_v52 }
 0x615   : > { %1729 = vadd.xlane.f32.xlu2 %v11854_v11 }
 0x616   : > { %v1481_v8 = vpop.xlane.xlu1 %1480 }
 0x617   : > { %v1548_v29 = vsub.f32 %v12005_v12, %v1481_v8  ;;  %v1549_v40 = vsub.f32 %v12012_v20, %v1481_v8  ;;  %v12185_v12 = vpop.f32.mrf.mxu1  ;;  %v12187_v20 = vpop.permute.xlu0 %9064 }
 0x618   : > { %v1491_v44 = vmax.f32 %v12183_v38, %v12185_v12 }
 0x619   : > { %v1666_v63 = vmul.f32 1.442695, %v1548_v29  ;;  %v1668_v32 = vmul.f32 1.442695, %v1549_v40  ;;  %v12197_v28 = vpop.f32.mrf.mxu0 }
 0x61b   : > { %9547 = vpow2.f32 %v1666_v63 }
 0x61c   : > { %9549 = vpow2.f32 %v1668_v32 }
 0x61d   : > { %1492 = vmax.xlane.f32.xlu2 %v1491_v44 }
 0x621   : > { %v9548_v57 = vpop.eup %9547  ;;  %v12202_v62 = vpop.f32.mrf.mxu0 }
 0x622   : > { %v9550_v42 = vpop.eup %9549  ;;  %1975 = vmatmul.f32.gmra.mxu0 %v9548_v57  ;;  %17824 = vst [vmem:[#allocation315_spill] sm:$0xff] %v12202_v62 }
 0x623   : > { %2088 = vmatmul.f32.gmra.mxu2 %v9550_v42  ;;  %v1767_v44 = vadd.f32 %v9550_v42, %v9548_v57 }
 0x629   : > { %v12195_v11 = vpop.xlane.xlu0 %1723 }
 0x62a   : > { %17823 = vst [vmem:[#allocation314_spill] sm:$0xff] %v12195_v11 }
 0x62e   : > { %v12229_v52 = vpop.permute.xlu1 %9059 }
 0x631   : > { %1735 = vadd.xlane.f32.xlu1 %v11919_v17  ;;  %v1487_v60 = vpop.xlane.xlu0 %1486  ;;  %v12209_v17 = vpop.f32.mrf.mxu0 }
 0x632   : > { %v1552_v34 = vsub.f32 %v12060_v51, %v1487_v60  ;;  %v1553_v15 = vsub.f32 %v12066_v23, %v1487_v60  ;;  %17825 = vst [vmem:[#allocation316_spill] sm:$0xff] %v12209_v17  ;;  %v12212_v23 = vld [vmem:[#allocation2 + $0x94] sm:$0xff]  ;;  %v12214_v51 = vld [vmem:[#allocation2 + $0x9c] sm:$0xff] }
 0x633   : > { %v9088_v8 = vpack.i.bf16 %v12214_v51, %v12212_v23 }
 0x634   : > { %v1674_v48 = vmul.f32 1.442695, %v1552_v34  ;;  %v1676_v56 = vmul.f32 1.442695, %v1553_v15  ;;  %v12233_v15 = vpop.f32.mrf.mxu2 }
 0x635   : > { %9069 = vrot.lane.b32.xlu2 %v12102_v26, %s17453_s17  ;;  %17829 = vst [vmem:[#allocation320_spill] sm:$0xff] %v12233_v15  ;;  %s18093_s17 = smov 112  }
 0x636   : > { %9551 = vpow2.f32 %v1674_v48 }
 0x637   : > { %9553 = vpow2.f32 %v1676_v56 }
 0x639   : > { %v12223_v26 = vpop.f32.mrf.mxu0 }
 0x63a   : > { %1741 = vadd.xlane.f32.xlu0 %v11922_v21  ;;  %v3786_v21 = vld [vmem:[%s17343_s7 + $0x68] sm:$0xff]  ;;  %17827 = vst [vmem:[#allocation318_spill] sm:$0xff] %v12223_v26 }
 0x63b   : > { %3890 = vmatpush.msrb.mxu0 %v3786_v21 }
 0x63c   : > { %v9552_v14 = vpop.eup %9551  ;;  %v12242_v42 = vpop.f32.mrf.mxu2 }
 0x63d   : > { %v9554_v45 = vpop.eup %9553  ;;  %17832 = vst [vmem:[#allocation323_spill] sm:$0xff] %v12242_v42 }
 0x63e   : > { %v12207_v43 = vadd.f32 %v9554_v45, %v9552_v14 }
 0x63f   : > { %v12216_v58 = vpop.xlane.xlu2 %1720 }
 0x640   : > { %17826 = vst [vmem:[#allocation317_spill] sm:$0xff] %v12216_v58 }
 0x641   : > { %v12231_v60 = vpop.f32.mrf.mxu0 }
 0x642   : > { %1750 = vadd.xlane.f32.xlu0 %v11980_v4  ;;  %17828 = vst [vmem:[#allocation319_spill] sm:$0xff] %v12231_v60  ;;  %v18073_v60 = vld [vmem:[#allocation271_spill] sm:$0xff] }
 0x647   : > { %v1484_v4 = vpop.xlane.xlu2 %1483 }
 0x648   : > { %v1550_v29 = vsub.f32 %v12043_v16, %v1484_v4  ;;  %v1551_v40 = vsub.f32 %v12049_v61, %v1484_v4  ;;  %v3785_v16 = vld [vmem:[%s17343_s7 + $0x60] sm:$0xff] }
 0x649   : > { %v12240_v61 = vpop.f32.mrf.mxu0  ;;  %3891 = vmatpush.msrb.mxu0 %v3785_v16  ;;  %v3780_v16 = vld [vmem:[%s17343_s7 + $0x38] sm:$0xff] }
 0x64a   : > { %9089 = vrot.lane.b32.xlu1 %v9088_v8, %s9897_s24  ;;  %1759 = vadd.xlane.f32.xlu0 %v12114_v55  ;;  %v1670_v63 = vmul.f32 1.442695, %v1550_v29  ;;  %v1672_v32 = vmul.f32 1.442695, %v1551_v40  ;;  %17831 = vst [vmem:[#allocation322_spill] sm:$0xff] %v12240_v61  ;;  %v18072_v61 = vld [vmem:[#allocation263_spill] sm:$0xff] }
 0x64c   : > { %9555 = vpow2.f32 %v1670_v63 }
 0x64d   : > { %9557 = vpow2.f32 %v1672_v32 }
 0x651   : > { %v12247_v29 = vpop.f32.mrf.mxu0 }
 0x652   : > { %1768 = vadd.xlane.f32.xlu0 %v1767_v44  ;;  %v9556_v34 = vpop.eup %9555  ;;  %17833 = vst [vmem:[#allocation324_spill] sm:$0xff] %v12247_v29  ;;  %v3781_v44 = vld [vmem:[%s17343_s7 + $0x40] sm:$0xff] }
 0x653   : > { %v9558_v48 = vpop.eup %9557  ;;  %1978 = vmatmul.f32.gmra.mxu0 %v9556_v34 }
 0x654   : > { %2091 = vmatmul.f32.gmra.mxu2 %v9558_v48 }
 0x659   : > { %v12235_v55 = vpop.xlane.xlu1 %1726 }
 0x65a   : > { %17830 = vst [vmem:[#allocation321_spill] sm:$0xff] %v12235_v55 }
 0x65b   : > { %1981 = vmatmul.f32.gmra.mxu0 %v9552_v14  ;;  %v12249_v14 = vpop.f32.mrf.mxu2 }
 0x65c   : > { %2094 = vmatmul.f32.gmra.mxu2 %v9554_v45  ;;  %17834 = vst [vmem:[#allocation325_spill] sm:$0xff] %v12249_v14  ;;  %v12251_v45 = vpop.f32.mrf.mxu0 }
 0x65d   : > { %17835 = vst [vmem:[#allocation326_spill] sm:$0xff] %v12251_v45 }
 0x65e   : > { %1738 = vadd.xlane.f32.xlu2 %v11904_v39  ;;  %v3784_v39 = vld [vmem:[%s17343_s7 + $0x58] sm:$0xff] }
 0x65f   : > { %3892 = vmatpush.msrb.mxu0 %v3784_v39 }
 0x661   : > { %v1490_v57 = vpop.xlane.xlu1 %1489 }
 0x662   : > { %v1554_v56 = vsub.f32 %v12121_v36, %v1490_v57  ;;  %v1555_v8 = vsub.f32 %v12123_v30, %v1490_v57  ;;  %v3783_v36 = vld [vmem:[%s17343_s7 + $0x50] sm:$0xff] }
 0x663   : > { %3893 = vmatpush.msrb.mxu0 %v3783_v36  ;;  %v3773_v36 = vld [vmem:[%s17343_s7] sm:$0xff]  ;;  %v12319_v25 = vpop.f32.mrf.mxu2 }
 0x664   : > { %v1678_v21 = vmul.f32 1.442695, %v1554_v56  ;;  %v1680_v4 = vmul.f32 1.442695, %v1555_v8  ;;  %v12260_v30 = vpop.f32.mrf.mxu0  ;;  %v3777_v56 = vld [vmem:[%s17343_s7 + $0x20] sm:$0xff]  ;;  %v7530_v8 = vld [vmem:[%s17347_s11 + $0x88] sm:$0xff] }
 0x665   : > { %17836 = vst [vmem:[#allocation327_spill] sm:$0xff] %v12260_v30  ;;  %7758 = vmatpush.msra.mxu2 %v7530_v8  ;;  %v9763_v8 = vld [vmem:[#allocation2 + $0x62] sm:$0xff] }
 0x666   : > { %9559 = vpow2.f32 %v1678_v21  ;;  %v9055_v21 = vpop.permute.xlu2 %9054  ;;  %17841 = vst [vmem:[#allocation332_spill] sm:$0xff] %v12319_v25 }
 0x667   : > { %9561 = vpow2.f32 %v1680_v4  ;;  %v3776_v4 = vld [vmem:[%s17343_s7 + $0x18] sm:$0xff] }
 0x66c   : > { %v9560_v40 = vpop.eup %9559  ;;  %v12277_v57 = vpop.f32.mrf.mxu0 }
 0x66d   : > { %v9562_v63 = vpop.eup %9561  ;;  %1984 = vmatmul.f32.gmra.mxu0 %v9560_v40  ;;  %17837 = vst [vmem:[#allocation328_spill] sm:$0xff] %v12277_v57 }
 0x66e   : > { %2097 = vmatmul.f32.gmra.mxu2 %v9562_v63  ;;  %v1776_v32 = vadd.f32 %v9562_v63, %v9560_v40  ;;  %v7529_v40 = vld [vmem:[%s17347_s11 + $0x80] sm:$0xff]  ;;  %v1770_v63 = vadd.f32 %v9558_v48, %v9556_v34  ;;  %v8981_v34 = vunpack.i.l.bf16 %v11894_v27 }
 0x66f   : > { %7759 = vmatpush.msra.mxu2 %v7529_v40 }
 0x670   : > { %1777 = vadd.xlane.f32.xlu0 %v1776_v32  ;;  %v3774_v32 = vld [vmem:[%s17343_s7 + $0x8] sm:$0xff] }
 0x674   : > { %1744 = vadd.xlane.f32.xlu1 %v11967_v6  ;;  %v3782_v6 = vld [vmem:[%s17343_s7 + $0x48] sm:$0xff]  ;;  %v12301_v39 = vpop.f32.mrf.mxu0 }
 0x675   : > { %3894 = vmatpush.msrb.mxu0 %v3782_v6  ;;  %17838 = vst [vmem:[#allocation329_spill] sm:$0xff] %v12301_v39  ;;  %v5273_v39 = vld [vmem:[%s17345_s9 + $0x28] sm:$0xff] }
 0x676   : > { %9084 = vrot.lane.b32.xlu2 %v12135_v35, %s9896_s18  ;;  %v3779_v35 = vld [vmem:[%s17343_s7 + $0x30] sm:$0xff] }
 0x677   : > { %3895 = vmatpush.msrb.mxu0 %v3781_v44  ;;  %v8901_v44 = vunpack.i.l.bf16 %v11677_v33 }
 0x679   : > { %3896 = vmatpush.msrb.mxu0 %v3780_v16  ;;  %v9056_v16 = vunpack.i.l.bf16 %v9055_v21 }
 0x67b   : > { %3897 = vmatpush.msrb.mxu0 %v3779_v35 }
 0x67c   : > { %1753 = vadd.xlane.f32.xlu1 %v12093_v0  ;;  %v3778_v0 = vld [vmem:[%s17343_s7 + $0x28] sm:$0xff]  ;;  %v12310_v48 = vpop.f32.mrf.mxu0 }
 0x67d   : > { %3898 = vmatpush.msrb.mxu0 %v3778_v0  ;;  %17840 = vst [vmem:[#allocation331_spill] sm:$0xff] %v12310_v48 }
 0x67f   : > { %3899 = vmatpush.msrb.mxu0 %v3777_v56 }
 0x681   : > { %3900 = vmatpush.msrb.mxu0 %v3776_v4  ;;  %v7293_v4 = vsel %vm17494_vm0, %v9763_v8, %v8901_v44 }
 0x682   : > { %v7325_v40 = vsel %vm3608_vm6, %v7293_v4, %v8981_v34  ;;  %v9764_v34 = vld [vmem:[#allocation2 + $0x6a] sm:$0xff]  ;;  %v9062_v4 = vunpack.i.h.bf16 %v12229_v52 }
 0x683   : > { %v7357_v24 = vsel %vm3641_vm7, %v7325_v40, %v9056_v16 }
 0x684   : > { %1762 = vadd.xlane.f32.xlu1 %v12169_v59  ;;  %v3775_v59 = vld [vmem:[%s17343_s7 + $0x10] sm:$0xff] }
 0x685   : > { %3901 = vmatpush.msrb.mxu0 %v3775_v59  ;;  %v9061_v59 = vunpack.i.l.bf16 %v12229_v52 }
 0x687   : > { %3902 = vmatpush.msrb.mxu0 %v3774_v32  ;;  %v7389_v44 = vsel %vm17499_vm8, %v7357_v24, %v9061_v59 }
 0x688   : > { %v12306_v6 = vpop.xlane.xlu2 %1729 }
 0x689   : > { %17839 = vst [vmem:[#allocation330_spill] sm:$0xff] %v12306_v6  ;;  %3903 = vmatpush.msrb.mxu0 %v3773_v36  ;;  %v8902_v36 = vunpack.i.h.bf16 %v11677_v33  ;;  %v8982_v6 = vunpack.i.h.bf16 %v11894_v27 }
 0x68c   : > { %1771 = vadd.xlane.f32.xlu1 %v1770_v63 }
 0x690   : > { %v1493_v35 = vpop.xlane.xlu2 %1492 }
 0x691   : > { %v1556_v0 = vsub.f32 %v12183_v38, %v1493_v35  ;;  %v1557_v56 = vsub.f32 %v12185_v12, %v1493_v35  ;;  %v9075_v38 = vpop.permute.xlu1 %9074  ;;  %v9057_v12 = vunpack.i.h.bf16 %v9055_v21  ;;  %v12322_v35 = vpop.f32.mrf.mxu0 }
 0x692   : > { %17842 = vst [vmem:[#allocation333_spill] sm:$0xff] %v12322_v35  ;;  %v9076_v8 = vunpack.i.l.bf16 %v9075_v38 }
 0x693   : > { %v1682_v63 = vmul.f32 1.442695, %v1556_v0  ;;  %v1684_v32 = vmul.f32 1.442695, %v1557_v56  ;;  %v7294_v0 = vsel %vm17494_vm0, %v9764_v34, %v8902_v36  ;;  %v9066_v56 = vunpack.i.l.bf16 %v12187_v20 }
 0x694   : > { %v7326_v16 = vsel %vm3608_vm6, %v7294_v0, %v8982_v6  ;;  %v12339_v0 = vpop.f32.mrf.mxu2 }
 0x695   : > { %9563 = vpow2.f32 %v1682_v63  ;;  %v7358_v40 = vsel %vm3641_vm7, %v7326_v16, %v9057_v12  ;;  %v7421_v21 = vsel %vm17497_vm9, %v7389_v44, %v9066_v56  ;;  %v9067_v12 = vunpack.i.h.bf16 %v12187_v20  ;;  %17843 = vst [vmem:[#allocation334_spill] sm:$0xff] %v12339_v0 }
 0x696   : > { %9565 = vpow2.f32 %v1684_v32  ;;  %v2584_v32 = vld [vmem:[#allocation2 + $0x48] sm:$0xff]  ;;  %v7390_v34 = vsel %vm17499_vm8, %v7358_v40, %v9062_v4  ;;  %v17846_v40 = vld [vmem:[#allocation93_spill] sm:$0xff] }
 0x697   : > { %v3576_v52 = vsel %vm17494_vm0, %v2584_v32, %v10489_v50  ;;  %v6361_v4 = vld [vmem:[#allocation2 + $0x64] sm:$0xff] }
 0x698   : > { %v9070_v33 = vpop.permute.xlu2 %9069  ;;  %v3609_v44 = vsel %vm3608_vm6, %v3576_v52, %v10707_v13 }
 0x699   : > { %v9071_v27 = vunpack.i.l.bf16 %v9070_v33  ;;  %v9072_v35 = vunpack.i.h.bf16 %v9070_v33  ;;  %v3642_v56 = vsel %vm3641_vm7, %v3609_v44, %v10983_v9  ;;  %v9077_v33 = vunpack.i.h.bf16 %v9075_v38  ;;  %v12347_v50 = vpop.f32.mrf.mxu0  ;;  %v17853_v44 = vld [vmem:[#allocation102_spill] sm:$0xff] }
 0x69a   : > { %v3675_v16 = vsel %vm17499_vm8, %v3642_v56, %v11114_v2  ;;  %17844 = vst [vmem:[#allocation335_spill] sm:$0xff] %v12347_v50  ;;  %v17845_v2 = vld [vmem:[#allocation50_spill] sm:$0xff]  ;;  %v5281_v50 = vld [vmem:[%s17345_s9 + $0x68] sm:$0xff] }
 0x69b   : > { %v9564_v63 = vpop.eup %9563  ;;  %v7453_v24 = vsel %vm17498_vm11, %v7421_v21, %v9071_v27  ;;  %v3708_v13 = vsel %vm17497_vm9, %v3675_v16, %v11344_v10  ;;  %v2585_v27 = vld [vmem:[#allocation2 + $0x50] sm:$0xff]  ;;  %v17847_v10 = vld [vmem:[#allocation146_spill] sm:$0xff]  ;;  %5384 = vmatpush.msra.mxu3 %v5281_v50  ;;  %v5279_v50 = vld [vmem:[%s17345_s9 + $0x58] sm:$0xff] }
 0x69c   : > { %v9566_v59 = vpop.eup %9565  ;;  %1987 = vmatmul.f32.gmra.mxu0 %v9564_v63  ;;  %v7485_v36 = vsel %vm3791_vm10, %v7453_v24, %v9076_v8  ;;  %v7422_v8 = vsel %vm17497_vm9, %v7390_v34, %v9067_v12  ;;  %v3577_v38 = vsel %vm17494_vm0, %v2585_v27, %v17845_v2  ;;  %v12366_v32 = vpop.f32.mrf.mxu2  ;;  %v2586_v34 = vld [vmem:[#allocation2 + $0x60] sm:$0xff] }
 0x69d   : > { %2100 = vmatmul.f32.gmra.mxu2 %v9566_v59  ;;  %7659 = vmatmul.f32.gmra.mxu1 %v7485_v36  ;;  %v1779_v6 = vadd.f32 %v9566_v59, %v9564_v63  ;;  %v7454_v20 = vsel %vm17498_vm11, %v7422_v8, %v9072_v35  ;;  %v3610_v35 = vsel %vm3608_vm6, %v3577_v38, %v17846_v40  ;;  %v17848_v63 = vld [vmem:[#allocation175_spill] sm:$0xff]  ;;  %v17855_v8 = vld [vmem:[#allocation177_spill] sm:$0xff]  ;;  %v17859_v2 = vld [vmem:[#allocation234_spill] sm:$0xff] }
 0x69e   : > { %v7486_v9 = vsel %vm3791_vm10, %v7454_v20, %v9077_v33  ;;  %v3643_v21 = vsel %vm3641_vm7, %v3610_v35, %v17847_v10  ;;  %17849 = vst [vmem:[#allocation50_spill] sm:$0xff] %v12366_v32  ;;  %v6362_v36 = vld [vmem:[#allocation2 + $0x6c] sm:$0xff] }
 0x69f   : > { %1780 = vadd.xlane.f32.xlu1 %v1779_v6  ;;  %1747 = vadd.xlane.f32.xlu2 %v11951_v54  ;;  %v3741_v54 = vsel %vm17498_vm11, %v3708_v13, %v11471_v22  ;;  %v3676_v22 = vsel %vm17499_vm8, %v3643_v21, %v17848_v63  ;;  %v17851_v6 = vld [vmem:[#allocation236_spill] sm:$0xff]  ;;  %v17854_v33 = vld [vmem:[#allocation131_spill] sm:$0xff]  ;;  %v17862_v21 = vld [vmem:[#allocation145_spill] sm:$0xff] }
 0x6a0   : > { %v3709_v59 = vsel %vm17497_vm9, %v3676_v22, %v11297_v7  ;;  %v17861_v35 = vld [vmem:[#allocation103_spill] sm:$0xff]  ;;  %v17863_v22 = vld [vmem:[#allocation174_spill] sm:$0xff] }
 0x6a1   : > { %v12368_v24 = vpop.f32.mrf.mxu0  ;;  %v3742_v52 = vsel %vm17498_vm11, %v3709_v59, %v17851_v6  ;;  %v6364_v6 = vld [vmem:[#allocation2 + $0x84] sm:$0xff] }
 0x6a2   : > { %17850 = vst [vmem:[#allocation93_spill] sm:$0xff] %v12368_v24 }
 0x6a4   : > { %8571 = vmatmul.msk.f32.vlgmr.msrb.gmra.mxu0 %vm3791_vm10, %v3741_v54  ;;  %v12385_v20 = vpop.f32.mrf.mxu2  ;;  %v6363_v54 = vld [vmem:[#allocation2 + $0x7c] sm:$0xff] }
 0x6a5   : > { %8667 = vmatmul.msk.f32.vlgmr.msra.gmra.mxu2 %vm17494_vm0, %v6361_v4  ;;  %7662 = vmatmul.f32.gmra.mxu1 %v7486_v9  ;;  %17856 = vst [vmem:[#allocation146_spill] sm:$0xff] %v12385_v20  ;;  %v17858_v4 = vld [vmem:[#allocation207_spill] sm:$0xff] }
 0x6a6   : > { %v2587_v9 = vld [vmem:[#allocation2 + $0x68] sm:$0xff] }
 0x6a7   : > { %1756 = vadd.xlane.f32.xlu2 %v12055_v47  ;;  %v17852_v47 = vld [vmem:[#allocation51_spill] sm:$0xff] }
 0x6a8   : > { %v3578_v12 = vsel %vm17494_vm0, %v2586_v34, %v17852_v47  ;;  %v17865_v47 = vld [vmem:[#allocation240_spill] sm:$0xff] }
 0x6a9   : > { %v3611_v56 = vsel %vm3608_vm6, %v3578_v12, %v17853_v44  ;;  %v12387_v13 = vpop.f32.mrf.mxu0 }
 0x6aa   : > { %v3644_v7 = vsel %vm3641_vm7, %v3611_v56, %v17854_v33  ;;  %17857 = vst [vmem:[#allocation175_spill] sm:$0xff] %v12387_v13 }
 0x6ab   : > { %v3677_v16 = vsel %vm17499_vm8, %v3644_v7, %v17855_v8  ;;  %v17869_v7 = vld [vmem:[#allocation97_spill] sm:$0xff] }
 0x6ac   : > { %8572 = vmatmul.msk.f32.gmra.mxu0 %vm3791_vm10, %v3742_v52  ;;  %v3710_v27 = vsel %vm17497_vm9, %v3677_v16, %v17858_v4  ;;  %v2588_v52 = vld [vmem:[#allocation2 + $0x78] sm:$0xff]  ;;  %v12408_v44 = vpop.f32.mrf.mxu2 }
 0x6ad   : > { %8668 = vmatmul.msk.f32.gmra.mxu2 %vm17494_vm0, %v6362_v36  ;;  %v3743_v38 = vsel %vm17498_vm11, %v3710_v27, %v17859_v2  ;;  %v17864_v36 = vld [vmem:[#allocation210_spill] sm:$0xff]  ;;  %17866 = vst [vmem:[#allocation236_spill] sm:$0xff] %v12408_v44  ;;  %v17870_v16 = vld [vmem:[#allocation149_spill] sm:$0xff]  ;;  %v17871_v27 = vld [vmem:[#allocation176_spill] sm:$0xff] }
 0x6af   : > { %1765 = vadd.xlane.f32.xlu2 %v12130_v49  ;;  %v17860_v49 = vld [vmem:[#allocation48_spill] sm:$0xff] }
 0x6b0   : > { %v3579_v40 = vsel %vm17494_vm0, %v2587_v9, %v17860_v49  ;;  %v17872_v9 = vld [vmem:[#allocation203_spill] sm:$0xff]  ;;  %v17873_v49 = vld [vmem:[#allocation238_spill] sm:$0xff] }
 0x6b1   : > { %v3612_v10 = vsel %vm3608_vm6, %v3579_v40, %v17861_v35  ;;  %v12410_v56 = vpop.f32.mrf.mxu0 }
 0x6b2   : > { %v3645_v63 = vsel %vm3641_vm7, %v3612_v10, %v17862_v21  ;;  %17867 = vst [vmem:[#allocation51_spill] sm:$0xff] %v12410_v56  ;;  %v17876_v21 = vld [vmem:[#allocation55_spill] sm:$0xff] }
 0x6b3   : > { %v3678_v59 = vsel %vm17499_vm8, %v3645_v63, %v17863_v22  ;;  %v17877_v22 = vld [vmem:[#allocation105_spill] sm:$0xff] }
 0x6b4   : > { %8573 = vmatmul.msk.f32.gmra.mxu0 %vm3791_vm10, %v3743_v38  ;;  %v3711_v34 = vsel %vm17497_vm9, %v3678_v59, %v17864_v36  ;;  %v2589_v38 = vld [vmem:[#allocation2 + $0x80] sm:$0xff]  ;;  %v12429_v10 = vpop.f32.mrf.mxu2  ;;  %v17878_v36 = vld [vmem:[#allocation135_spill] sm:$0xff] }
 0x6b5   : > { %8669 = vmatmul.msk.f32.gmra.mxu2 %vm17494_vm0, %v6363_v54  ;;  %v3744_v12 = vsel %vm17498_vm11, %v3711_v34, %v17865_v47  ;;  %17875 = vst [vmem:[#allocation131_spill] sm:$0xff] %v12429_v10  ;;  %v3581_v63 = vsel %vm17494_vm0, %v2589_v38, %v17876_v21  ;;  %v17880_v47 = vld [vmem:[#allocation209_spill] sm:$0xff]  ;;  %v17887_v38 = vld [vmem:[#allocation178_spill] sm:$0xff]  ;;  %v5269_v10 = vld [vmem:[%s17345_s9 + $0x8] sm:$0xff] }
 0x6b6   : > { %v3614_v59 = vsel %vm3608_vm6, %v3581_v63, %v17877_v22  ;;  %v2591_v63 = vld [vmem:[#allocation2 + $0x98] sm:$0xff]  ;;  %v17889_v22 = vld [vmem:[#allocation243_spill] sm:$0xff] }
 0x6b7   : > { %1774 = vadd.xlane.f32.xlu2 %v12207_v43  ;;  %v17868_v43 = vld [vmem:[#allocation53_spill] sm:$0xff]  ;;  %v3647_v34 = vsel %vm3641_vm7, %v3614_v59, %v17878_v36 }
 0x6b8   : > { %v3580_v33 = vsel %vm17494_vm0, %v2588_v52, %v17868_v43  ;;  %v2590_v43 = vld [vmem:[#allocation2 + $0x90] sm:$0xff]  ;;  %v17891_v36 = vld [vmem:[#allocation57_spill] sm:$0xff] }
 0x6b9   : > { %v3613_v8 = vsel %vm3608_vm6, %v3580_v33, %v17869_v7  ;;  %v12426_v35 = vpop.f32.mrf.mxu0  ;;  %v17881_v33 = vld [vmem:[#allocation237_spill] sm:$0xff] }
 0x6ba   : > { %v3646_v4 = vsel %vm3641_vm7, %v3613_v8, %v17870_v16  ;;  %17874 = vst [vmem:[#allocation102_spill] sm:$0xff] %v12426_v35  ;;  %v17884_v16 = vld [vmem:[#allocation49_spill] sm:$0xff]  ;;  %v18054_v35 = vld [vmem:[#allocation87_spill] sm:$0xff] }
 0x6bb   : > { %v3679_v54 = vsel %vm17499_vm8, %v3646_v4, %v17871_v27  ;;  %v3582_v4 = vsel %vm17494_vm0, %v2590_v43, %v17884_v16  ;;  %v17885_v27 = vld [vmem:[#allocation106_spill] sm:$0xff] }
 0x6bc   : > { %8574 = vmatmul.msk.f32.gmra.mxu0 %vm3791_vm10, %v3744_v12  ;;  %v3712_v2 = vsel %vm17497_vm9, %v3679_v54, %v17872_v9  ;;  %v12448_v8 = vpop.f32.mrf.mxu2  ;;  %v3615_v54 = vsel %vm3608_vm6, %v3582_v4, %v17885_v27  ;;  %v17886_v9 = vld [vmem:[#allocation148_spill] sm:$0xff]  ;;  %v17894_v43 = vld [vmem:[#allocation182_spill] sm:$0xff]  ;;  %v2592_v4 = vld [vmem:[#allocation2 + $0xa8] sm:$0xff] }
 0x6bd   : > { %8670 = vmatmul.msk.f32.gmra.mxu2 %vm17494_vm0, %v6364_v6  ;;  %v3745_v40 = vsel %vm17498_vm11, %v3712_v2, %v17873_v49  ;;  %v17879_v6 = vld [vmem:[#allocation180_spill] sm:$0xff]  ;;  %17883 = vst [vmem:[#allocation207_spill] sm:$0xff] %v12448_v8  ;;  %v3648_v2 = vsel %vm3641_vm7, %v3615_v54, %v17886_v9  ;;  %v17896_v27 = vld [vmem:[#allocation241_spill] sm:$0xff] }
 0x6be   : > { %v3680_v52 = vsel %vm17499_vm8, %v3647_v34, %v17879_v6  ;;  %v3681_v49 = vsel %vm17499_vm8, %v3648_v2, %v17887_v38  ;;  %v3583_v34 = vsel %vm17494_vm0, %v2591_v63, %v17891_v36  ;;  %v17892_v6 = vld [vmem:[#allocation100_spill] sm:$0xff]  ;;  %v17898_v2 = vld [vmem:[#allocation61_spill] sm:$0xff] }
 0x6bf   : > { %v3713_v12 = vsel %vm17497_vm9, %v3680_v52, %v17880_v47  ;;  %v3616_v52 = vsel %vm3608_vm6, %v3583_v34, %v17892_v6  ;;  %v17893_v47 = vld [vmem:[#allocation153_spill] sm:$0xff]  ;;  %v3584_v38 = vsel %vm17494_vm0, %v2592_v4, %v17898_v2  ;;  %v2593_v6 = vld [vmem:[#allocation2 + $0xb0] sm:$0xff]  ;;  %v17907_v4 = vld [vmem:[#allocation151_spill] sm:$0xff] }
 0x6c0   : > { %v3746_v7 = vsel %vm17498_vm11, %v3713_v12, %v17881_v33  ;;  %v3649_v12 = vsel %vm3641_vm7, %v3616_v52, %v17893_v47  ;;  %v17902_v36 = vld [vmem:[#allocation213_spill] sm:$0xff]  ;;  %v17903_v52 = vld [vmem:[#allocation239_spill] sm:$0xff] }
 0x6c1   : > { %v3682_v33 = vsel %vm17499_vm8, %v3649_v12, %v17894_v43  ;;  %v17905_v43 = vld [vmem:[#allocation52_spill] sm:$0xff] }
 0x6c4   : > { %8575 = vmatmul.msk.f32.gmra.mxu0 %vm3791_vm10, %v3745_v40  ;;  %v17888_v40 = vld [vmem:[#allocation212_spill] sm:$0xff] }
 0x6c5   : > { %8671 = vmatmul.msk.f32.gmra.mxu2 %vm17494_vm0, %v12212_v23  ;;  %v12445_v23 = vpop.f32.mrf.mxu0  ;;  %v3714_v21 = vsel %vm17497_vm9, %v3681_v49, %v17888_v40  ;;  %v17899_v49 = vld [vmem:[#allocation108_spill] sm:$0xff] }
 0x6c6   : > { %17882 = vst [vmem:[#allocation177_spill] sm:$0xff] %v12445_v23  ;;  %v3747_v59 = vsel %vm17498_vm11, %v3714_v21, %v17889_v22  ;;  %v3617_v40 = vsel %vm3608_vm6, %v3584_v38, %v17899_v49  ;;  %v17900_v21 = vld [vmem:[#allocation140_spill] sm:$0xff]  ;;  %v17901_v22 = vld [vmem:[#allocation183_spill] sm:$0xff]  ;;  %v17909_v38 = vld [vmem:[#allocation214_spill] sm:$0xff] }
 0x6c7   : > { %v3650_v63 = vsel %vm3641_vm7, %v3617_v40, %v17900_v21  ;;  %v2594_v40 = vld [vmem:[#allocation2 + $0xc0] sm:$0xff] }
 0x6c8   : > { %v17910_v21 = vld [vmem:[#allocation246_spill] sm:$0xff] }
 0x6cc   : > { %8576 = vmatmul.msk.f32.gmra.mxu0 %vm3791_vm10, %v3746_v7  ;;  %v17895_v7 = vld [vmem:[#allocation206_spill] sm:$0xff] }
 0x6cd   : > { %8672 = vmatmul.msk.f32.gmra.mxu2 %vm17494_vm0, %v12214_v51  ;;  %v12465_v51 = vpop.f32.mrf.mxu0  ;;  %v3715_v16 = vsel %vm17497_vm9, %v3682_v33, %v17895_v7  ;;  %v3585_v33 = vsel %vm17494_vm0, %v2593_v6, %v17905_v43  ;;  %v17906_v7 = vld [vmem:[#allocation110_spill] sm:$0xff] }
 0x6ce   : > { %17890 = vst [vmem:[#allocation234_spill] sm:$0xff] %v12465_v51  ;;  %v3748_v54 = vsel %vm17498_vm11, %v3715_v16, %v17896_v27  ;;  %v3618_v16 = vsel %vm3608_vm6, %v3585_v33, %v17906_v7  ;;  %v17915_v43 = vld [vmem:[#allocation186_spill] sm:$0xff]  ;;  %v17916_v7 = vld [vmem:[#allocation208_spill] sm:$0xff] }
 0x6cf   : > { %v3651_v27 = vsel %vm3641_vm7, %v3618_v16, %v17907_v4  ;;  %v2595_v4 = vld [vmem:[#allocation2 + $0xc8] sm:$0xff] }
 0x6d4   : > { %8577 = vmatmul.msk.f32.gmra.mxu0 %vm3791_vm10, %v3747_v59  ;;  %v3683_v59 = vsel %vm17499_vm8, %v3650_v63, %v17901_v22  ;;  %v17911_v22 = vld [vmem:[#allocation63_spill] sm:$0xff] }
 0x6d5   : > { %v12480_v9 = vpop.f32.mrf.mxu0  ;;  %v3716_v34 = vsel %vm17497_vm9, %v3683_v59, %v17902_v36  ;;  %v3586_v59 = vsel %vm17494_vm0, %v2594_v40, %v17911_v22  ;;  %v17912_v36 = vld [vmem:[#allocation104_spill] sm:$0xff] }
 0x6d6   : > { %17897 = vst [vmem:[#allocation48_spill] sm:$0xff] %v12480_v9  ;;  %v3749_v47 = vsel %vm17498_vm11, %v3716_v34, %v17903_v52  ;;  %v3619_v34 = vsel %vm3608_vm6, %v3586_v59, %v17912_v36  ;;  %v17914_v52 = vld [vmem:[#allocation157_spill] sm:$0xff] }
 0x6d7   : > { %v17922_v59 = vld [vmem:[#allocation189_spill] sm:$0xff] }
 0x6dc   : > { %8578 = vmatmul.msk.f32.gmra.mxu0 %vm3791_vm10, %v3748_v54  ;;  %v17908_v54 = vld [vmem:[#allocation179_spill] sm:$0xff] }
 0x6dd   : > { %v12495_v12 = vpop.f32.mrf.mxu0  ;;  %v3684_v2 = vsel %vm17499_vm8, %v3651_v27, %v17908_v54  ;;  %v17917_v27 = vld [vmem:[#allocation244_spill] sm:$0xff] }
 0x6de   : > { %17904 = vst [vmem:[#allocation103_spill] sm:$0xff] %v12495_v12  ;;  %v3717_v49 = vsel %vm17497_vm9, %v3684_v2, %v17909_v38  ;;  %v17918_v2 = vld [vmem:[#allocation67_spill] sm:$0xff] }
 0x6df   : > { %v3750_v63 = vsel %vm17498_vm11, %v3717_v49, %v17910_v21  ;;  %v3587_v38 = vsel %vm17494_vm0, %v2595_v4, %v17918_v2  ;;  %v17919_v49 = vld [vmem:[#allocation111_spill] sm:$0xff]  ;;  %v17926_v4 = vld [vmem:[#allocation113_spill] sm:$0xff]  ;;  %v17928_v2 = vld [vmem:[#allocation156_spill] sm:$0xff] }
 0x6e0   : > { %v3620_v40 = vsel %vm3608_vm6, %v3587_v38, %v17919_v49  ;;  %v17929_v49 = vld [vmem:[#allocation181_spill] sm:$0xff] }
 0x6e4   : > { %8579 = vmatmul.msk.f32.gmra.mxu0 %vm3791_vm10, %v3749_v47  ;;  %v3652_v47 = vsel %vm3641_vm7, %v3619_v34, %v17914_v52  ;;  %v17923_v34 = vld [vmem:[#allocation216_spill] sm:$0xff] }
 0x6e5   : > { %v12514_v6 = vpop.f32.mrf.mxu0  ;;  %v3685_v33 = vsel %vm17499_vm8, %v3652_v47, %v17915_v43  ;;  %v2596_v47 = vld [vmem:[#allocation2 + $0xd8] sm:$0xff]  ;;  %v17924_v43 = vld [vmem:[#allocation242_spill] sm:$0xff] }
 0x6e6   : > { %17913 = vst [vmem:[#allocation145_spill] sm:$0xff] %v12514_v6  ;;  %v3718_v16 = vsel %vm17497_vm9, %v3685_v33, %v17916_v7  ;;  %v17925_v7 = vld [vmem:[#allocation56_spill] sm:$0xff] }
 0x6e7   : > { %v3751_v54 = vsel %vm17498_vm11, %v3718_v16, %v17917_v27  ;;  %v3588_v16 = vsel %vm17494_vm0, %v2596_v47, %v17925_v7  ;;  %v17934_v7 = vld [vmem:[#allocation160_spill] sm:$0xff] }
 0x6e8   : > { %v3621_v27 = vsel %vm3608_vm6, %v3588_v16, %v17926_v4  ;;  %v17935_v4 = vld [vmem:[#allocation188_spill] sm:$0xff] }
 0x6e9   : > { %v3654_v38 = vsel %vm3641_vm7, %v3621_v27, %v17928_v2 }
 0x6ec   : > { %8580 = vmatmul.msk.f32.gmra.mxu0 %vm3791_vm10, %v3750_v63  ;;  %v17921_v63 = vld [vmem:[#allocation143_spill] sm:$0xff] }
 0x6ed   : > { %v12529_v21 = vpop.f32.mrf.mxu0  ;;  %v3653_v22 = vsel %vm3641_vm7, %v3620_v40, %v17921_v63  ;;  %v3687_v40 = vsel %vm17499_vm8, %v3654_v38, %v17929_v49  ;;  %v17930_v63 = vld [vmem:[#allocation217_spill] sm:$0xff]  ;;  %v17937_v38 = vld [vmem:[#allocation211_spill] sm:$0xff] }
 0x6ee   : > { %17920 = vst [vmem:[#allocation174_spill] sm:$0xff] %v12529_v21  ;;  %v3686_v36 = vsel %vm17499_vm8, %v3653_v22, %v17922_v59  ;;  %v3720_v22 = vsel %vm17497_vm9, %v3687_v40, %v17930_v63  ;;  %v2597_v59 = vld [vmem:[#allocation2 + $0xe0] sm:$0xff]  ;;  %v2598_v40 = vld [vmem:[#allocation2 + $0xf0] sm:$0xff]  ;;  %v17938_v63 = vld [vmem:[#allocation247_spill] sm:$0xff] }
 0x6ef   : > { %v3719_v52 = vsel %vm17497_vm9, %v3686_v36, %v17923_v34  ;;  %v17931_v36 = vld [vmem:[#allocation249_spill] sm:$0xff]  ;;  %v17963_v21 = vld [vmem:[#allocation222_spill] sm:$0xff] }
 0x6f0   : > { %v3752_v33 = vsel %vm17498_vm11, %v3719_v52, %v17924_v43  ;;  %v3753_v34 = vsel %vm17498_vm11, %v3720_v22, %v17931_v36  ;;  %v17932_v52 = vld [vmem:[#allocation69_spill] sm:$0xff]  ;;  %v17933_v43 = vld [vmem:[#allocation107_spill] sm:$0xff] }
 0x6f1   : > { %v3589_v47 = vsel %vm17494_vm0, %v2597_v59, %v17932_v52  ;;  %v17939_v59 = vld [vmem:[#allocation71_spill] sm:$0xff] }
 0x6f2   : > { %v3590_v36 = vsel %vm17494_vm0, %v2598_v40, %v17939_v59  ;;  %v17946_v40 = vld [vmem:[#allocation62_spill] sm:$0xff]  ;;  %v17947_v59 = vld [vmem:[#allocation115_spill] sm:$0xff] }
 0x6f4   : > { %8581 = vmatmul.msk.f32.gmra.mxu0 %vm3791_vm10, %v3751_v54 }
 0x6f5   : > { %v12544_v54 = vpop.f32.mrf.mxu0 }
 0x6f6   : > { %17927 = vst [vmem:[#allocation210_spill] sm:$0xff] %v12544_v54 }
 0x6fc   : > { %8582 = vmatmul.msk.f32.gmra.mxu0 %vm3791_vm10, %v3752_v33  ;;  %v3622_v33 = vsel %vm3608_vm6, %v3589_v47, %v17933_v43  ;;  %v17941_v47 = vld [vmem:[#allocation147_spill] sm:$0xff] }
 0x6fd   : > { %v3655_v16 = vsel %vm3641_vm7, %v3622_v33, %v17934_v7  ;;  %v12563_v2 = vpop.f32.mrf.mxu0  ;;  %v17942_v33 = vld [vmem:[#allocation192_spill] sm:$0xff] }
 0x6fe   : > { %v3688_v27 = vsel %vm17499_vm8, %v3655_v16, %v17935_v4  ;;  %17936 = vst [vmem:[#allocation240_spill] sm:$0xff] %v12563_v2  ;;  %v17944_v4 = vld [vmem:[#allocation219_spill] sm:$0xff] }
 0x6ff   : > { %v3721_v49 = vsel %vm17497_vm9, %v3688_v27, %v17937_v38  ;;  %v2599_v38 = vld [vmem:[#allocation2 + $0xf8] sm:$0xff] }
 0x700   : > { %v3754_v22 = vsel %vm17498_vm11, %v3721_v49, %v17938_v63  ;;  %v17945_v49 = vld [vmem:[#allocation245_spill] sm:$0xff] }
 0x704   : > { %8583 = vmatmul.msk.f32.gmra.mxu0 %vm3791_vm10, %v3753_v34  ;;  %v17940_v34 = vld [vmem:[#allocation114_spill] sm:$0xff] }
 0x705   : > { %v3623_v52 = vsel %vm3608_vm6, %v3590_v36, %v17940_v34  ;;  %v12578_v16 = vpop.f32.mrf.mxu0  ;;  %v17948_v34 = vld [vmem:[#allocation159_spill] sm:$0xff] }
 0x706   : > { %v3656_v43 = vsel %vm3641_vm7, %v3623_v52, %v17941_v47  ;;  %17943 = vst [vmem:[#allocation53_spill] sm:$0xff] %v12578_v16  ;;  %v17949_v47 = vld [vmem:[#allocation184_spill] sm:$0xff]  ;;  %v18019_v16 = vld [vmem:[#allocation259_spill] sm:$0xff] }
 0x707   : > { %v3689_v7 = vsel %vm17499_vm8, %v3656_v43, %v17942_v33 }
 0x708   : > { %v3722_v27 = vsel %vm17497_vm9, %v3689_v7, %v17944_v4  ;;  %v17951_v7 = vld [vmem:[#allocation220_spill] sm:$0xff] }
 0x709   : > { %v3755_v63 = vsel %vm17498_vm11, %v3722_v27, %v17945_v49  ;;  %v2600_v27 = vld [vmem:[#allocation2 + $0x108] sm:$0xff]  ;;  %v17952_v49 = vld [vmem:[#allocation252_spill] sm:$0xff] }
 0x70c   : > { %8584 = vmatmul.msk.f32.gmra.mxu0 %vm3791_vm10, %v3754_v22  ;;  %v3591_v22 = vsel %vm17494_vm0, %v2599_v38, %v17946_v40  ;;  %v17953_v38 = vld [vmem:[#allocation73_spill] sm:$0xff] }
 0x70d   : > { %v3624_v36 = vsel %vm3608_vm6, %v3591_v22, %v17947_v59  ;;  %v3592_v40 = vsel %vm17494_vm0, %v2600_v27, %v17953_v38  ;;  %v12605_v22 = vld [vmem:[%s17344_s8] ss:$0 sm:$0xff]  ;;  %v17954_v59 = vld [vmem:[#allocation117_spill] sm:$0xff] }
 0x70e   : > { %v3657_v52 = vsel %vm3641_vm7, %v3624_v36, %v17948_v34  ;;  %v3625_v36 = vsel %vm3608_vm6, %v3592_v40, %v17954_v59  ;;  %v17955_v34 = vld [vmem:[#allocation163_spill] sm:$0xff]  ;;  %v17958_v38 = vld [vmem:[#allocation250_spill] sm:$0xff]  ;;  %v17959_v40 = vld [vmem:[#allocation76_spill] sm:$0xff] }
 0x70f   : > { %v3690_v43 = vsel %vm17499_vm8, %v3657_v52, %v17949_v47  ;;  %v3658_v52 = vsel %vm3641_vm7, %v3625_v36, %v17955_v34  ;;  %v17956_v47 = vld [vmem:[#allocation191_spill] sm:$0xff] }
 0x710   : > { %v3723_v4 = vsel %vm17497_vm9, %v3690_v43, %v17951_v7  ;;  %v3691_v43 = vsel %vm17499_vm8, %v3658_v52, %v17956_v47  ;;  %v17960_v36 = vld [vmem:[#allocation119_spill] sm:$0xff]  ;;  %v17961_v52 = vld [vmem:[#allocation150_spill] sm:$0xff] }
 0x714   : > { %8585 = vmatmul.msk.f32.gmra.mxu0 %vm3791_vm10, %v3755_v63  ;;  %v3756_v63 = vsel %vm17498_vm11, %v3723_v4, %v17952_v49  ;;  %v17957_v4 = vld [vmem:[#allocation215_spill] sm:$0xff] }
 0x715   : > { %v3724_v49 = vsel %vm17497_vm9, %v3691_v43, %v17957_v4  ;;  %v17962_v43 = vld [vmem:[#allocation195_spill] sm:$0xff] }
 0x716   : > { %v3757_v12 = vsel %vm17498_vm11, %v3724_v49, %v17958_v38  ;;  %v17964_v38 = vld [vmem:[#allocation248_spill] sm:$0xff] }
 0x719   : > { %v12593_v33 = vpop.f32.mrf.mxu0 }
 0x71a   : > { %17950 = vst [vmem:[#allocation97_spill] sm:$0xff] %v12593_v33 }
 0x71c   : > { %8586 = vmatmul.msk.f32.gmra.mxu0 %vm3791_vm10, %v3756_v63  ;;  %v2601_v63 = vld [vmem:[#allocation2 + $0x110] sm:$0xff] }
 0x71d   : > { %v3593_v59 = vsel %vm17494_vm0, %v2601_v63, %v17959_v40 }
 0x71e   : > { %v3626_v34 = vsel %vm3608_vm6, %v3593_v59, %v17960_v36  ;;  %v17965_v59 = vld [vmem:[#allocation68_spill] sm:$0xff] }
 0x71f   : > { %v3659_v47 = vsel %vm3641_vm7, %v3626_v34, %v17961_v52  ;;  %v17966_v34 = vld [vmem:[#allocation126_spill] sm:$0xff] }
 0x720   : > { %v17967_v52 = vld [vmem:[#allocation162_spill] sm:$0xff] }
 0x721   : > { %v3905_v7 = vpop.f32.mrf.mxu0 }
 0x722   : > { %v3906_v27 = vadd.f32 %v12605_v22, %v3905_v7  ;;  %v3692_v7 = vsel %vm17499_vm8, %v3659_v47, %v17962_v43  ;;  %v17968_v43 = vld [vmem:[#allocation185_spill] sm:$0xff] }
 0x723   : > { %v3725_v49 = vsel %vm17497_vm9, %v3692_v7, %v17963_v21 }
 0x724   : > { %v4001_v6 = vmax.f32 %v3906_v27, 0.0  ;;  %8587 = vmatmul.msk.f32.gmra.mxu0 %vm3791_vm10, %v3757_v12  ;;  %v2602_v27 = vld [vmem:[#allocation2 + $0x120] sm:$0xff]  ;;  %v3758_v63 = vsel %vm17498_vm11, %v3725_v49, %v17964_v38  ;;  %v17969_v49 = vld [vmem:[#allocation223_spill] sm:$0xff] }
 0x725   : > { %v3594_v36 = vsel %vm17494_vm0, %v2602_v27, %v17965_v59  ;;  %v2603_v27 = vld [vmem:[#allocation2 + $0x128] sm:$0xff] }
 0x726   : > { %4047 = vst.msk [vmem:[#allocation3 + $0x30] sm:$0xff] %vm17494_vm0, %v4001_v6  ;;  %v3627_v21 = vsel %vm3608_vm6, %v3594_v36, %v17966_v34  ;;  %v17971_v34 = vld [vmem:[#allocation78_spill] sm:$0xff] }
 0x727   : > { %v3660_v47 = vsel %vm3641_vm7, %v3627_v21, %v17967_v52  ;;  %v3595_v21 = vsel %vm17494_vm0, %v2603_v27, %v17971_v34  ;;  %v17973_v52 = vld [vmem:[#allocation118_spill] sm:$0xff] }
 0x728   : > { %v3693_v7 = vsel %vm17499_vm8, %v3660_v47, %v17968_v43  ;;  %v3628_v47 = vsel %vm3608_vm6, %v3595_v21, %v17973_v52  ;;  %v17974_v43 = vld [vmem:[#allocation165_spill] sm:$0xff]  ;;  %v17978_v52 = vld [vmem:[#allocation82_spill] sm:$0xff] }
 0x729   : > { %v3908_v4 = vpop.f32.mrf.mxu0 }
 0x72a   : > { %v3909_v12 = vadd.f32 %v12605_v22, %v3908_v4 }
 0x72c   : > { %v4002_v6 = vmax.f32 %v3909_v12, 0.0  ;;  %8588 = vmatmul.msk.f32.gmra.mxu0 %vm3791_vm10, %v3758_v63  ;;  %v3726_v12 = vsel %vm17497_vm9, %v3693_v7, %v17969_v49  ;;  %v17970_v63 = vld [vmem:[#allocation255_spill] sm:$0xff]  ;;  %v3661_v7 = vsel %vm3641_vm7, %v3628_v47, %v17974_v43  ;;  %v17979_v43 = vld [vmem:[#allocation121_spill] sm:$0xff] }
 0x72d   : > { %v4116_v40 = vld [vmem:[#allocation3 + $0x30] sm:$0xff] }
 0x72e   : > { %4048 = vst.msk [vmem:[#allocation3 + $0x38] sm:$0xff] %vm17494_vm0, %v4002_v6  ;;  %4348 = vrot.lane.b32.xlu1 %v4116_v40, %s17509_s19  ;;  %v3759_v6 = vsel %vm17498_vm11, %v3726_v12, %v17970_v63 }
 0x731   : > { %v3911_v4 = vpop.f32.mrf.mxu0 }
 0x732   : > { %v3912_v38 = vadd.f32 %v12605_v22, %v3911_v4  ;;  %v17975_v4 = vld [vmem:[#allocation193_spill] sm:$0xff] }
 0x733   : > { %v3694_v49 = vsel %vm17499_vm8, %v3661_v7, %v17975_v4  ;;  %v17980_v4 = vld [vmem:[#allocation154_spill] sm:$0xff] }
 0x734   : > { %v4003_v59 = vmax.f32 %v3912_v38, 0.0  ;;  %8589 = vmatmul.msk.f32.gmra.mxu0 %vm3791_vm10, %v3759_v6  ;;  %v17976_v38 = vld [vmem:[#allocation218_spill] sm:$0xff]  ;;  %v2604_v6 = vld [vmem:[#allocation2 + $0x138] sm:$0xff] }
 0x735   : > { %v4117_v36 = vld [vmem:[#allocation3 + $0x38] sm:$0xff]  ;;  %v3727_v63 = vsel %vm17497_vm9, %v3694_v49, %v17976_v38  ;;  %v3596_v47 = vsel %vm17494_vm0, %v2604_v6, %v17978_v52 }
 0x736   : > { %4049 = vst.msk [vmem:[#allocation3 + $0x40] sm:$0xff] %vm17494_vm0, %v4003_v59  ;;  %4350 = vrot.lane.b32.xlu0 %v4117_v36, %s17509_s19  ;;  %4472 = vrot.lane.b32.xlu1 %v4116_v40, %s17972_s14  ;;  %v17977_v59 = vld [vmem:[#allocation253_spill] sm:$0xff]  ;;  %v3629_v7 = vsel %vm3608_vm6, %v3596_v47, %v17979_v43  ;;  %v17984_v47 = vld [vmem:[#allocation72_spill] sm:$0xff] }
 0x737   : > { %v3760_v34 = vsel %vm17498_vm11, %v3727_v63, %v17977_v59  ;;  %v3662_v49 = vsel %vm3641_vm7, %v3629_v7, %v17980_v4  ;;  %v2605_v59 = vld [vmem:[#allocation2 + $0x140] sm:$0xff]  ;;  %v17985_v7 = vld [vmem:[#allocation128_spill] sm:$0xff] }
 0x738   : > { %v3597_v43 = vsel %vm17494_vm0, %v2605_v59, %v17984_v47  ;;  %v2606_v59 = vld [vmem:[#allocation2 + $0x150] sm:$0xff] }
 0x739   : > { %v3914_v12 = vpop.f32.mrf.mxu0  ;;  %v3630_v4 = vsel %vm3608_vm6, %v3597_v43, %v17985_v7  ;;  %v17990_v43 = vld [vmem:[#allocation84_spill] sm:$0xff] }
 0x73a   : > { %v3915_v27 = vadd.f32 %v12605_v22, %v3914_v12  ;;  %v17981_v12 = vld [vmem:[#allocation198_spill] sm:$0xff]  ;;  %v3598_v7 = vsel %vm17494_vm0, %v2606_v59, %v17990_v43 }
 0x73b   : > { %v3695_v38 = vsel %vm17499_vm8, %v3662_v49, %v17981_v12  ;;  %v17986_v49 = vld [vmem:[#allocation164_spill] sm:$0xff] }
 0x73c   : > { %v4004_v54 = vmax.f32 %v3915_v27, 0.0  ;;  %8590 = vmatmul.msk.f32.gmra.mxu0 %vm3791_vm10, %v3760_v34  ;;  %v17982_v27 = vld [vmem:[#allocation226_spill] sm:$0xff]  ;;  %v17983_v34 = vld [vmem:[#allocation251_spill] sm:$0xff]  ;;  %v3663_v12 = vsel %vm3641_vm7, %v3630_v4, %v17986_v49  ;;  %v17991_v4 = vld [vmem:[#allocation120_spill] sm:$0xff] }
 0x73d   : > { %v4118_v21 = vld [vmem:[#allocation3 + $0x40] sm:$0xff]  ;;  %v3728_v6 = vsel %vm17497_vm9, %v3695_v38, %v17982_v27  ;;  %v17987_v38 = vld [vmem:[#allocation187_spill] sm:$0xff]  ;;  %v3631_v49 = vsel %vm3608_vm6, %v3598_v7, %v17991_v4  ;;  %v17996_v7 = vld [vmem:[#allocation86_spill] sm:$0xff] }
 0x73e   : > { %4050 = vst.msk [vmem:[#allocation3 + $0x48] sm:$0xff] %vm17494_vm0, %v4004_v54  ;;  %4352 = vrot.lane.b32.xlu2 %v4118_v21, %s17509_s19  ;;  %4474 = vrot.lane.b32.xlu0 %v4117_v36, %s17972_s14  ;;  %v3761_v52 = vsel %vm17498_vm11, %v3728_v6, %v17983_v34  ;;  %v17988_v6 = vld [vmem:[#allocation225_spill] sm:$0xff]  ;;  %v17989_v34 = vld [vmem:[#allocation258_spill] sm:$0xff] }
 0x73f   : > { %4596 = vrot.lane.b32.xlu1 %v4116_v40, %s9895_s23 }
 0x741   : > { %v3917_v63 = vpop.f32.mrf.mxu0 }
 0x742   : > { %v3918_v54 = vadd.f32 %v12605_v22, %v3917_v63  ;;  %v3696_v63 = vsel %vm17499_vm8, %v3663_v12, %v17987_v38  ;;  %v17992_v12 = vld [vmem:[#allocation167_spill] sm:$0xff] }
 0x743   : > { %v3664_v38 = vsel %vm3641_vm7, %v3631_v49, %v17992_v12  ;;  %v17997_v49 = vld [vmem:[#allocation125_spill] sm:$0xff] }
 0x744   : > { %v4005_v33 = vmax.f32 %v3918_v54, 0.0  ;;  %8591 = vmatmul.msk.f32.gmra.mxu0 %vm3791_vm10, %v3761_v52  ;;  %v3729_v54 = vsel %vm17497_vm9, %v3696_v63, %v17988_v6  ;;  %v17993_v63 = vld [vmem:[#allocation196_spill] sm:$0xff] }
 0x745   : > { %v4119_v40 = vld [vmem:[#allocation3 + $0x48] sm:$0xff] }
 0x746   : > { %4051 = vst.msk [vmem:[#allocation3 + $0x50] sm:$0xff] %vm17494_vm0, %v4005_v33  ;;  %4476 = vrot.lane.b32.xlu2 %v4118_v21, %s17972_s14  ;;  %4598 = vrot.lane.b32.xlu0 %v4117_v36, %s9895_s23  ;;  %v3762_v36 = vsel %vm17498_vm11, %v3729_v54, %v17989_v34  ;;  %v17994_v54 = vld [vmem:[#allocation221_spill] sm:$0xff] }
 0x747   : > { %4354 = vrot.lane.b32.xlu1 %v4119_v40, %s17509_s19  ;;  %v2607_v34 = vld [vmem:[#allocation2 + $0x158] sm:$0xff] }
 0x748   : > { %v3599_v4 = vsel %vm17494_vm0, %v2607_v34, %v17996_v7  ;;  %v2608_v34 = vld [vmem:[#allocation2 + $0x168] sm:$0xff] }
 0x749   : > { %v3920_v27 = vpop.f32.mrf.mxu0  ;;  %v3632_v12 = vsel %vm3608_vm6, %v3599_v4, %v17997_v49  ;;  %v18002_v4 = vld [vmem:[#allocation77_spill] sm:$0xff] }
 0x74a   : > { %v3921_v33 = vadd.f32 %v12605_v22, %v3920_v27  ;;  %v3697_v27 = vsel %vm17499_vm8, %v3664_v38, %v17993_v63  ;;  %v17998_v38 = vld [vmem:[#allocation158_spill] sm:$0xff]  ;;  %v3600_v49 = vsel %vm17494_vm0, %v2608_v34, %v18002_v4  ;;  %v18008_v34 = vld [vmem:[#allocation227_spill] sm:$0xff]  ;;  %v2609_v4 = vld [vmem:[#allocation2 + $0x170] sm:$0xff] }
 0x74b   : > { %v3665_v63 = vsel %vm3641_vm7, %v3632_v12, %v17998_v38  ;;  %v18003_v12 = vld [vmem:[#allocation134_spill] sm:$0xff] }
 0x74c   : > { %v4006_v52 = vmax.f32 %v3921_v33, 0.0  ;;  %8592 = vmatmul.msk.f32.gmra.mxu0 %vm3791_vm10, %v3762_v36  ;;  %v3730_v33 = vsel %vm17497_vm9, %v3697_v27, %v17994_v54  ;;  %v17995_v36 = vld [vmem:[#allocation256_spill] sm:$0xff]  ;;  %v3633_v38 = vsel %vm3608_vm6, %v3600_v49, %v18003_v12  ;;  %v18010_v49 = vld [vmem:[#allocation261_spill] sm:$0xff] }
 0x74d   : > { %v12703_v47 = vld [vmem:[#allocation3 + $0x50] sm:$0xff]  ;;  %v17999_v27 = vld [vmem:[#allocation200_spill] sm:$0xff] }
 0x74e   : > { %4052 = vst.msk [vmem:[#allocation3 + $0x58] sm:$0xff] %vm17494_vm0, %v4006_v52  ;;  %4600 = vrot.lane.b32.xlu2 %v4118_v21, %s9895_s23  ;;  %4356 = vrot.lane.b32.xlu0 %v12703_v47, %s17509_s19  ;;  %v3763_v52 = vsel %vm17498_vm11, %v3730_v33, %v17995_v36  ;;  %v18000_v33 = vld [vmem:[#allocation229_spill] sm:$0xff]  ;;  %v18001_v36 = vld [vmem:[#allocation254_spill] sm:$0xff] }
 0x74f   : > { %4478 = vrot.lane.b32.xlu1 %v4119_v40, %s17972_s14 }
 0x751   : > { %v3923_v6 = vpop.f32.mrf.mxu0 }
 0x752   : > { %v3924_v59 = vadd.f32 %v12605_v22, %v3923_v6  ;;  %v3698_v6 = vsel %vm17499_vm8, %v3665_v63, %v17999_v27  ;;  %v12754_v63 = vpop.permute.xlu0 %9079  ;;  %v18005_v27 = vld [vmem:[#allocation166_spill] sm:$0xff] }
 0x753   : > { %18004 = vst [vmem:[#allocation149_spill] sm:$0xff] %v12754_v63 }
 0x754   : > { %v4007_v43 = vmax.f32 %v3924_v59, 0.0  ;;  %8593 = vmatmul.msk.f32.gmra.mxu0 %vm3791_vm10, %v3763_v52  ;;  %v3731_v59 = vsel %vm17497_vm9, %v3698_v6, %v18000_v33  ;;  %v3666_v6 = vsel %vm3641_vm7, %v3633_v38, %v18005_v27  ;;  %v18007_v33 = vld [vmem:[#allocation190_spill] sm:$0xff]  ;;  %v18011_v38 = vld [vmem:[#allocation88_spill] sm:$0xff] }
 0x755   : > { %v3764_v52 = vsel %vm17498_vm11, %v3731_v59, %v18001_v36  ;;  %v12743_v7 = vld [vmem:[#allocation3 + $0x58] sm:$0xff]  ;;  %v3699_v59 = vsel %vm17499_vm8, %v3666_v6, %v18007_v33  ;;  %v3601_v27 = vsel %vm17494_vm0, %v2609_v4, %v18011_v38  ;;  %v18012_v33 = vld [vmem:[#allocation122_spill] sm:$0xff] }
 0x756   : > { %4053 = vst.msk [vmem:[#allocation3 + $0x60] sm:$0xff] %vm17494_vm0, %v4007_v43  ;;  %4724 = vrot.lane.b32.xlu2 %v4118_v21, %s9896_s18  ;;  %4480 = vrot.lane.b32.xlu0 %v12703_v47, %s17972_s14  ;;  %v3732_v36 = vsel %vm17497_vm9, %v3699_v59, %v18008_v34  ;;  %v3634_v59 = vsel %vm3608_vm6, %v3601_v27, %v18012_v33  ;;  %v18014_v34 = vld [vmem:[#allocation170_spill] sm:$0xff] }
 0x757   : > { %4602 = vrot.lane.b32.xlu1 %v4119_v40, %s9895_s23  ;;  %v2610_v33 = vld [vmem:[#allocation2 + $0x180] sm:$0xff] }
 0x759   : > { %v3926_v54 = vpop.f32.mrf.mxu0 }
 0x75a   : > { %v3927_v21 = vadd.f32 %v12605_v22, %v3926_v54  ;;  %v12759_v54 = vpop.xlane.xlu2 %1738 }
 0x75b   : > { %18006 = vst [vmem:[#allocation176_spill] sm:$0xff] %v12759_v54 }
 0x75c   : > { %v4008_v43 = vmax.f32 %v3927_v21, 0.0  ;;  %8594 = vmatmul.msk.f32.gmra.mxu0 %vm3791_vm10, %v3764_v52  ;;  %v12765_v52 = vpop.xlane.xlu1 %1735 }
 0x75d   : > { %18009 = vst [vmem:[#allocation203_spill] sm:$0xff] %v12765_v52  ;;  %v12778_v6 = vld [vmem:[#allocation3 + $0x60] sm:$0xff] }
 0x75e   : > { %4054 = vst.msk [vmem:[#allocation3 + $0x68] sm:$0xff] %vm17494_vm0, %v4008_v43  ;;  %4358 = vrot.lane.b32.xlu2 %v12743_v7, %s17509_s19  ;;  %4604 = vrot.lane.b32.xlu0 %v12703_v47, %s9895_s23 }
 0x75f   : > { %4726 = vrot.lane.b32.xlu1 %v4119_v40, %s9896_s18  ;;  %v3765_v40 = vsel %vm17498_vm11, %v3732_v36, %v18010_v49  ;;  %v3667_v36 = vsel %vm3641_vm7, %v3634_v59, %v18014_v34  ;;  %v18020_v59 = vld [vmem:[#allocation92_spill] sm:$0xff] }
 0x760   : > { %v3602_v34 = vsel %vm17494_vm0, %v2610_v33, %v18020_v59 }
 0x761   : > { %v3929_v21 = vpop.f32.mrf.mxu0 }
 0x762   : > { %v3930_v43 = vadd.f32 %v12605_v22, %v3929_v21  ;;  %v12782_v21 = vpop.xlane.xlu0 %1732  ;;  %v12792_v38 = vpop.permute.xlu2 %9084 }
 0x763   : > { %18013 = vst [vmem:[#allocation238_spill] sm:$0xff] %v12782_v21 }
 0x764   : > { %v4009_v12 = vmax.f32 %v3930_v43, 0.0  ;;  %8595 = vmatmul.msk.f32.gmra.mxu0 %vm3791_vm10, %v3765_v40  ;;  %v18015_v43 = vld [vmem:[#allocation199_spill] sm:$0xff]  ;;  %v18016_v40 = vld [vmem:[#allocation224_spill] sm:$0xff]  ;;  %18017 = vst [vmem:[#allocation55_spill] sm:$0xff] %v12792_v38  ;;  %v12794_v52 = vpop.permute.xlu1 %9089 }
 0x765   : > { %v3700_v4 = vsel %vm17499_vm8, %v3667_v36, %v18015_v43  ;;  %18018 = vst [vmem:[#allocation105_spill] sm:$0xff] %v12794_v52  ;;  %v18021_v36 = vld [vmem:[#allocation132_spill] sm:$0xff]  ;;  %v5277_v38 = vld [vmem:[%s17345_s9 + $0x48] sm:$0xff] }
 0x766   : > { %4055 = vst.msk [vmem:[#allocation3 + $0x70] sm:$0xff] %vm17494_vm0, %v4009_v12  ;;  %4482 = vrot.lane.b32.xlu2 %v12743_v7, %s17972_s14  ;;  %4728 = vrot.lane.b32.xlu0 %v12703_v47, %s9896_s18  ;;  %v3733_v12 = vsel %vm17497_vm9, %v3700_v4, %v18016_v40  ;;  %v3635_v43 = vsel %vm3608_vm6, %v3602_v34, %v18021_v36  ;;  %v2611_v34 = vld [vmem:[#allocation2 + $0x188] sm:$0xff]  ;;  %v18028_v36 = vld [vmem:[#allocation257_spill] sm:$0xff] }
 0x767   : > { %4360 = vrot.lane.b32.xlu1 %v12778_v6, %s17509_s19  ;;  %v3766_v2 = vsel %vm17498_vm11, %v3733_v12, %v18019_v16  ;;  %v18025_v12 = vld [vmem:[#allocation232_spill] sm:$0xff] }
 0x769   : > { %v3932_v49 = vpop.f32.mrf.mxu0 }
 0x76a   : > { %v3933_v27 = vadd.f32 %v12605_v22, %v3932_v49  ;;  %v12809_v4 = vpop.permute.xlu0 %9094  ;;  %v18024_v49 = vld [vmem:[#allocation202_spill] sm:$0xff] }
 0x76b   : > { %18022 = vst [vmem:[#allocation135_spill] sm:$0xff] %v12809_v4  ;;  %v5280_v4 = vld [vmem:[%s17345_s9 + $0x60] sm:$0xff] }
 0x76c   : > { %v4010_v9 = vmax.f32 %v3933_v27, 0.0  ;;  %8596 = vmatmul.msk.f32.gmra.mxu0 %vm3791_vm10, %v3766_v2  ;;  %v18023_v2 = vld [vmem:[#allocation161_spill] sm:$0xff]  ;;  %v12819_v33 = vpop.xlane.xlu1 %1744  ;;  %5385 = vmatpush.msra.mxu3 %v5280_v4 }
 0x76d   : > { %v3668_v16 = vsel %vm3641_vm7, %v3635_v43, %v18023_v2  ;;  %18026 = vst [vmem:[#allocation180_spill] sm:$0xff] %v12819_v33  ;;  %v12827_v43 = vld [vmem:[#allocation3 + $0x68] sm:$0xff]  ;;  %v18029_v2 = vld [vmem:[#allocation83_spill] sm:$0xff]  ;;  %v18035_v33 = vld [vmem:[#allocation264_spill] sm:$0xff] }
 0x76e   : > { %4056 = vst.msk [vmem:[#allocation3 + $0x78] sm:$0xff] %vm17494_vm0, %v4010_v9  ;;  %4606 = vrot.lane.b32.xlu2 %v12743_v7, %s9895_s23  ;;  %4852 = vrot.lane.b32.xlu0 %v12703_v47, %s9897_s24  ;;  %v3701_v9 = vsel %vm17499_vm8, %v3668_v16, %v18024_v49  ;;  %v12821_v47 = vpop.xlane.xlu2 %1747  ;;  %v3603_v16 = vsel %vm17494_vm0, %v2611_v34, %v18029_v2  ;;  %v18030_v49 = vld [vmem:[#allocation138_spill] sm:$0xff] }
 0x76f   : > { %4484 = vrot.lane.b32.xlu1 %v12778_v6, %s17972_s14  ;;  %v3734_v27 = vsel %vm17497_vm9, %v3701_v9, %v18025_v12  ;;  %18027 = vst [vmem:[#allocation209_spill] sm:$0xff] %v12821_v47  ;;  %v3636_v9 = vsel %vm3608_vm6, %v3603_v16, %v18030_v49  ;;  %v18032_v12 = vld [vmem:[#allocation194_spill] sm:$0xff]  ;;  %v2612_v47 = vld [vmem:[#allocation2 + $0x198] sm:$0xff]  ;;  %5386 = vmatpush.msra.mxu3 %v5279_v50 }
 0x770   : > { %v3767_v54 = vsel %vm17498_vm11, %v3734_v27, %v18028_v36  ;;  %v18034_v34 = vld [vmem:[#allocation230_spill] sm:$0xff]  ;;  %v5275_v50 = vld [vmem:[%s17345_s9 + $0x38] sm:$0xff] }
 0x771   : > { %v3935_v40 = vpop.f32.mrf.mxu0 }
 0x772   : > { %v3936_v59 = vadd.f32 %v12605_v22, %v3935_v40 }
 0x774   : > { %v4011_v51 = vmax.f32 %v3936_v59, 0.0  ;;  %8597 = vmatmul.msk.f32.gmra.mxu0 %vm3791_vm10, %v3767_v54  ;;  %v18031_v54 = vld [vmem:[#allocation169_spill] sm:$0xff]  ;;  %v12844_v59 = vpop.xlane.xlu0 %1741  ;;  %v12851_v49 = vpop.xlane.xlu1 %1753 }
 0x775   : > { %v3669_v40 = vsel %vm3641_vm7, %v3636_v9, %v18031_v54  ;;  %18033 = vst [vmem:[#allocation237_spill] sm:$0xff] %v12844_v59  ;;  %v18038_v54 = vld [vmem:[#allocation95_spill] sm:$0xff] }
 0x776   : > { %4057 = vst.msk [vmem:[#allocation3 + $0x80] sm:$0xff] %vm17494_vm0, %v4011_v51  ;;  %4730 = vrot.lane.b32.xlu2 %v12743_v7, %s9896_s18  ;;  %4362 = vrot.lane.b32.xlu0 %v12827_v43, %s17509_s19  ;;  %v3702_v27 = vsel %vm17499_vm8, %v3669_v40, %v18032_v12  ;;  %v12853_v23 = vpop.xlane.xlu2 %1756  ;;  %v3604_v40 = vsel %vm17494_vm0, %v2612_v47, %v18038_v54  ;;  %v18039_v12 = vld [vmem:[#allocation127_spill] sm:$0xff]  ;;  %v18043_v54 = vld [vmem:[#allocation262_spill] sm:$0xff] }
 0x777   : > { %4608 = vrot.lane.b32.xlu1 %v12778_v6, %s9895_s23  ;;  %v3735_v36 = vsel %vm17497_vm9, %v3702_v27, %v18034_v34  ;;  %18036 = vst [vmem:[#allocation49_spill] sm:$0xff] %v12851_v49  ;;  %v18040_v27 = vld [vmem:[#allocation171_spill] sm:$0xff]  ;;  %v18041_v34 = vld [vmem:[#allocation201_spill] sm:$0xff]  ;;  %v12879_v49 = vld [vmem:[#allocation3 + $0x70] sm:$0xff] }
 0x778   : > { %v3768_v16 = vsel %vm17498_vm11, %v3735_v36, %v18035_v33  ;;  %18037 = vst [vmem:[#allocation106_spill] sm:$0xff] %v12853_v23  ;;  %v3637_v33 = vsel %vm3608_vm6, %v3604_v40, %v18039_v12 }
 0x779   : > { %v3938_v51 = vpop.f32.mrf.mxu0 }
 0x77a   : > { %v3939_v2 = vadd.f32 %v12605_v22, %v3938_v51  ;;  %v3670_v51 = vsel %vm3641_vm7, %v3637_v33, %v18040_v27  ;;  %v18045_v33 = vld [vmem:[#allocation96_spill] sm:$0xff] }
 0x77b   : > { %v3703_v47 = vsel %vm17499_vm8, %v3670_v51, %v18041_v34 }
 0x77c   : > { %v4012_v9 = vmax.f32 %v3939_v2, 0.0  ;;  %8598 = vmatmul.msk.f32.gmra.mxu0 %vm3791_vm10, %v3768_v16  ;;  %v18042_v2 = vld [vmem:[#allocation228_spill] sm:$0xff]  ;;  %v12876_v40 = vpop.xlane.xlu0 %1750  ;;  %v12883_v51 = vpop.xlane.xlu1 %1762 }
 0x77d   : > { %v3736_v16 = vsel %vm17497_vm9, %v3703_v47, %v18042_v2  ;;  %18044 = vst [vmem:[#allocation148_spill] sm:$0xff] %v12876_v40  ;;  %v18048_v47 = vld [vmem:[#allocation136_spill] sm:$0xff] }
 0x77e   : > { %4058 = vst.msk [vmem:[#allocation3 + $0x88] sm:$0xff] %vm17494_vm0, %v4012_v9  ;;  %4854 = vrot.lane.b32.xlu2 %v12743_v7, %s9897_s24  ;;  %4486 = vrot.lane.b32.xlu0 %v12827_v43, %s17972_s14  ;;  %v2613_v9 = vld [vmem:[#allocation2 + $0x1a0] sm:$0xff]  ;;  %v3769_v23 = vsel %vm17498_vm11, %v3736_v16, %v18043_v54  ;;  %v12885_v34 = vpop.xlane.xlu2 %1765  ;;  %v18050_v16 = vld [vmem:[#allocation205_spill] sm:$0xff]  ;;  %v18051_v54 = vld [vmem:[#allocation235_spill] sm:$0xff] }
 0x77f   : > { %4732 = vrot.lane.b32.xlu1 %v12778_v6, %s9896_s18  ;;  %v3605_v27 = vsel %vm17494_vm0, %v2613_v9, %v18045_v33  ;;  %18046 = vst [vmem:[#allocation178_spill] sm:$0xff] %v12883_v51  ;;  %v18052_v51 = vld [vmem:[#allocation260_spill] sm:$0xff] }
 0x780   : > { %18047 = vst [vmem:[#allocation212_spill] sm:$0xff] %v12885_v34  ;;  %v2614_v34 = vld [vmem:[#allocation2 + $0x1b0] sm:$0xff] }
 0x781   : > { %v3941_v36 = vpop.f32.mrf.mxu0 }
 0x782   : > { %v3942_v7 = vadd.f32 %v12605_v22, %v3941_v36  ;;  %v18049_v36 = vld [vmem:[#allocation168_spill] sm:$0xff] }
 0x784   : > { %v4013_v12 = vmax.f32 %v3942_v7, 0.0  ;;  %8599 = vmatmul.msk.f32.gmra.mxu0 %vm3791_vm10, %v3769_v23  ;;  %v3638_v23 = vsel %vm3608_vm6, %v3605_v27, %v18048_v47  ;;  %v12906_v47 = vpop.xlane.xlu0 %1759 }
 0x785   : > { %v3671_v2 = vsel %vm3641_vm7, %v3638_v23, %v18049_v36  ;;  %18053 = vst [vmem:[#allocation243_spill] sm:$0xff] %v12906_v47  ;;  %v3606_v23 = vsel %vm17494_vm0, %v2614_v34, %v18054_v35  ;;  %v18055_v36 = vld [vmem:[#allocation142_spill] sm:$0xff]  ;;  %v18060_v34 = vld [vmem:[#allocation197_spill] sm:$0xff] }
 0x786   : > { %4059 = vst.msk [vmem:[#allocation3 + $0x90] sm:$0xff] %vm17494_vm0, %v4013_v12  ;;  %4364 = vrot.lane.b32.xlu2 %v12879_v49, %s17509_s19  ;;  %4610 = vrot.lane.b32.xlu0 %v12827_v43, %s9895_s23  ;;  %v3704_v7 = vsel %vm17499_vm8, %v3671_v2, %v18050_v16  ;;  %v3639_v2 = vsel %vm3608_vm6, %v3606_v23, %v18055_v36  ;;  %v12921_v16 = vpop.xlane.xlu1 %1771  ;;  %v12923_v35 = vpop.xlane.xlu2 %1774  ;;  %v18062_v23 = vld [vmem:[#allocation267_spill] sm:$0xff] }
 0x787   : > { %4856 = vrot.lane.b32.xlu1 %v12778_v6, %s9897_s24  ;;  %v3737_v12 = vsel %vm17497_vm9, %v3704_v7, %v18051_v54  ;;  %18058 = vst [vmem:[#allocation57_spill] sm:$0xff] %v12921_v16  ;;  %v18061_v54 = vld [vmem:[#allocation233_spill] sm:$0xff] }
 0x788   : > { %v3770_v40 = vsel %vm17498_vm11, %v3737_v12, %v18052_v51  ;;  %18059 = vst [vmem:[#allocation100_spill] sm:$0xff] %v12923_v35 }
 0x789   : > { %v3944_v9 = vpop.f32.mrf.mxu0 }
 0x78a   : > { %v3945_v33 = vadd.f32 %v12605_v22, %v3944_v9 }
 0x78c   : > { %v4014_v27 = vmax.f32 %v3945_v33, 0.0  ;;  %8600 = vmatmul.msk.f32.gmra.mxu0 %vm3791_vm10, %v3770_v40  ;;  %v18057_v40 = vld [vmem:[#allocation172_spill] sm:$0xff] }
 0x78d   : > { %v3672_v51 = vsel %vm3641_vm7, %v3639_v2, %v18057_v40  ;;  %v18063_v2 = vld [vmem:[#allocation98_spill] sm:$0xff] }
 0x78e   : > { %4060 = vst.msk [vmem:[#allocation3 + $0x98] sm:$0xff] %vm17494_vm0, %v4014_v27  ;;  %4488 = vrot.lane.b32.xlu2 %v12879_v49, %s17972_s14  ;;  %4734 = vrot.lane.b32.xlu0 %v12827_v43, %s9896_s18  ;;  %v3705_v7 = vsel %vm17499_vm8, %v3672_v51, %v18060_v34  ;;  %v2615_v27 = vld [vmem:[#allocation2 + $0x1b8] sm:$0xff]  ;;  %v12940_v51 = vld [vmem:[#allocation3 + $0x78] sm:$0xff] }
 0x78f   : > { %4980 = vrot.lane.b32.xlu1 %v12778_v6, %s18056_s21  ;;  %v3738_v12 = vsel %vm17497_vm9, %v3705_v7, %v18061_v54  ;;  %v3607_v40 = vsel %vm17494_vm0, %v2615_v27, %v18063_v2  ;;  %v18064_v34 = vld [vmem:[#allocation129_spill] sm:$0xff]  ;;  %v18069_v2 = vld [vmem:[#allocation231_spill] sm:$0xff] }
 0x790   : > { %v3771_v6 = vsel %vm17498_vm11, %v3738_v12, %v18062_v23  ;;  %v3640_v7 = vsel %vm3608_vm6, %v3607_v40, %v18064_v34  ;;  %v18066_v54 = vld [vmem:[#allocation173_spill] sm:$0xff]  ;;  %v18068_v23 = vld [vmem:[#allocation204_spill] sm:$0xff] }
 0x791   : > { %v3947_v9 = vpop.f32.mrf.mxu0  ;;  %v3673_v12 = vsel %vm3641_vm7, %v3640_v7, %v18066_v54  ;;  %v18070_v34 = vld [vmem:[#allocation265_spill] sm:$0xff] }
 0x792   : > { %v3948_v33 = vadd.f32 %v12605_v22, %v3947_v9  ;;  %v12944_v9 = vpop.xlane.xlu0 %1768 }
 0x793   : > { %18065 = vst [vmem:[#allocation153_spill] sm:$0xff] %v12944_v9 }
 0x794   : > { %v4015_v36 = vmax.f32 %v3948_v33, 0.0  ;;  %8601 = vmatmul.msk.f32.gmra.mxu0 %vm3791_vm10, %v3771_v6  ;;  %v12950_v33 = vpop.xlane.xlu1 %1780  ;;  %v3706_v6 = vsel %vm17499_vm8, %v3673_v12, %v18068_v23 }
 0x795   : > { %18067 = vst [vmem:[#allocation182_spill] sm:$0xff] %v12950_v33  ;;  %v3739_v35 = vsel %vm17497_vm9, %v3706_v6, %v18069_v2  ;;  %v13081_v31 = vld [vmem:[#allocation3 + $0x98] sm:$0xff] }
 0x796   : > { %4061 = vst.msk [vmem:[#allocation3 + $0xa0] sm:$0xff] %vm17494_vm0, %v4015_v36  ;;  %4612 = vrot.lane.b32.xlu2 %v12879_v49, %s9895_s23  ;;  %4858 = vrot.lane.b32.xlu0 %v12827_v43, %s9897_s24  ;;  %v3772_v16 = vsel %vm17498_vm11, %v3739_v35, %v18070_v34 }
 0x797   : > { %4366 = vrot.lane.b32.xlu1 %v12940_v51, %s17509_s19 }
 0x798   : > { %v12952_v27 = vpop.permute.xlu2 %4352 }
 0x799   : > { %v3950_v36 = vpop.f32.mrf.mxu0 }
 0x79a   : > { %v3951_v40 = vadd.f32 %v12605_v22, %v3950_v36  ;;  %v12967_v7 = vpop.xlane.xlu0 %1777 }
 0x79b   : > { %18071 = vst [vmem:[#allocation206_spill] sm:$0xff] %v12967_v7 }
 0x79c   : > { %v4016_v9 = vmax.f32 %v3951_v40, 0.0  ;;  %8602 = vmatmul.msk.f32.gmra.mxu0 %vm3791_vm10, %v3772_v16 }
 0x79e   : > { %4062 = vst.msk [vmem:[#allocation3 + $0xa8] sm:$0xff] %vm17494_vm0, %v4016_v9  ;;  %4736 = vrot.lane.b32.xlu2 %v12879_v49, %s9896_s18  ;;  %4982 = vrot.lane.b32.xlu0 %v12827_v43, %s18056_s21  ;;  %v12976_v9 = vld [vmem:[#allocation3 + $0x80] sm:$0xff] }
 0x79f   : > { %4490 = vrot.lane.b32.xlu1 %v12940_v51, %s17972_s14 }
 0x7a0   : > { %v12971_v54 = vpop.permute.xlu2 %4476  ;;  %v12973_v12 = vpop.permute.xlu1 %4348 }
 0x7a1   : > { %v3953_v35 = vpop.f32.mrf.mxu0 }
 0x7a2   : > { %v3954_v16 = vadd.f32 %v12605_v22, %v3953_v35 }
 0x7a4   : > { %v4017_v23 = vmax.f32 %v3954_v16, 0.0 }
 0x7a6   : > { %4063 = vst.msk [vmem:[#allocation3 + $0xb0] sm:$0xff] %vm17494_vm0, %v4017_v23  ;;  %4860 = vrot.lane.b32.xlu2 %v12879_v49, %s9897_s24  ;;  %4368 = vrot.lane.b32.xlu0 %v12976_v9, %s17509_s19 }
 0x7a7   : > { %4614 = vrot.lane.b32.xlu1 %v12940_v51, %s9895_s23 }
 0x7a8   : > { %v12985_v43 = vpop.permute.xlu2 %4600  ;;  %v12987_v6 = vpop.permute.xlu0 %4350 }
 0x7a9   : > { %v12989_v36 = vpop.permute.xlu1 %4472  ;;  %v3956_v2 = vpop.f32.mrf.mxu0 }
 0x7aa   : > { %v3957_v40 = vadd.f32 %v12605_v22, %v3956_v2 }
 0x7ac   : > { %v4018_v34 = vmax.f32 %v3957_v40, 0.0 }
 0x7ae   : > { %4064 = vst.msk [vmem:[#allocation3 + $0xb8] sm:$0xff] %vm17494_vm0, %v4018_v34  ;;  %4984 = vrot.lane.b32.xlu2 %v12879_v49, %s18056_s21  ;;  %4492 = vrot.lane.b32.xlu0 %v12976_v9, %s17972_s14  ;;  %v13006_v34 = vld [vmem:[#allocation3 + $0x88] sm:$0xff] }
 0x7af   : > { %4738 = vrot.lane.b32.xlu1 %v12940_v51, %s9896_s18 }
 0x7b0   : > { %v12999_v35 = vpop.permute.xlu2 %4724  ;;  %v13001_v16 = vpop.permute.xlu0 %4474 }
 0x7b1   : > { %v13003_v23 = vpop.permute.xlu1 %4596  ;;  %v3959_v33 = vpop.f32.mrf.mxu0 }
 0x7b2   : > { %v3960_v2 = vadd.f32 %v12605_v22, %v3959_v33 }
 0x7b4   : > { %v4019_v40 = vmax.f32 %v3960_v2, 0.0 }
 0x7b6   : > { %4065 = vst.msk [vmem:[#allocation3 + $0xc0] sm:$0xff] %vm17494_vm0, %v4019_v40  ;;  %4370 = vrot.lane.b32.xlu2 %v13006_v34, %s17509_s19  ;;  %4616 = vrot.lane.b32.xlu0 %v12976_v9, %s9895_s23 }
 0x7b7   : > { %4862 = vrot.lane.b32.xlu1 %v12940_v51, %s9897_s24 }
 0x7b8   : > { %v13015_v7 = vpop.permute.xlu2 %4358  ;;  %v13017_v47 = vpop.permute.xlu0 %4598 }
 0x7b9   : > { %v13019_v56 = vpop.permute.xlu1 %4354  ;;  %v3962_v33 = vpop.f32.mrf.mxu0 }
 0x7ba   : > { %v3963_v2 = vadd.f32 %v12605_v22, %v3962_v33 }
 0x7bc   : > { %v4020_v59 = vmax.f32 %v3963_v2, 0.0 }
 0x7be   : > { %4066 = vst.msk [vmem:[#allocation3 + $0xc8] sm:$0xff] %vm17494_vm0, %v4020_v59  ;;  %4494 = vrot.lane.b32.xlu2 %v13006_v34, %s17972_s14  ;;  %4740 = vrot.lane.b32.xlu0 %v12976_v9, %s9896_s18  ;;  %v13041_v59 = vld [vmem:[#allocation3 + $0x90] sm:$0xff] }
 0x7bf   : > { %4986 = vrot.lane.b32.xlu1 %v12940_v51, %s18056_s21 }
 0x7c0   : > { %v13029_v40 = vpop.permute.xlu2 %4482  ;;  %v13031_v13 = vpop.permute.xlu0 %4356 }
 0x7c1   : > { %v13033_v21 = vpop.permute.xlu1 %4478  ;;  %v3965_v24 = vpop.f32.mrf.mxu0 }
 0x7c2   : > { %v3966_v33 = vadd.f32 %v12605_v22, %v3965_v24 }
 0x7c4   : > { %v4021_v2 = vmax.f32 %v3966_v33, 0.0 }
 0x7c6   : > { %4067 = vst.msk [vmem:[#allocation3 + $0xd0] sm:$0xff] %vm17494_vm0, %v4021_v2  ;;  %4618 = vrot.lane.b32.xlu2 %v13006_v34, %s9895_s23  ;;  %4864 = vrot.lane.b32.xlu0 %v12976_v9, %s9897_s24 }
 0x7c7   : > { %4372 = vrot.lane.b32.xlu1 %v13041_v59, %s17509_s19 }
 0x7c8   : > { %v13048_v55 = vpop.permute.xlu2 %4606  ;;  %v13050_v24 = vpop.permute.xlu0 %4480 }
 0x7c9   : > { %v13052_v33 = vpop.permute.xlu1 %4602  ;;  %v3968_v2 = vpop.f32.mrf.mxu0 }
 0x7ca   : > { %v3969_v58 = vadd.f32 %v12605_v22, %v3968_v2  ;;  %v5278_v2 = vld [vmem:[%s17345_s9 + $0x50] sm:$0xff] }
 0x7cb   : > { %5387 = vmatpush.msra.mxu3 %v5278_v2  ;;  %v5274_v2 = vld [vmem:[%s17345_s9 + $0x30] sm:$0xff] }
 0x7cc   : > { %v4022_v11 = vmax.f32 %v3969_v58, 0.0 }
 0x7cd   : > { %5388 = vmatpush.msra.mxu3 %v5277_v38 }
 0x7ce   : > { %4068 = vst.msk [vmem:[#allocation3 + $0xd8] sm:$0xff] %vm17494_vm0, %v4022_v11  ;;  %4742 = vrot.lane.b32.xlu2 %v13006_v34, %s9896_s18  ;;  %4988 = vrot.lane.b32.xlu0 %v12976_v9, %s18056_s21 }
 0x7cf   : > { %4496 = vrot.lane.b32.xlu1 %v13041_v59, %s17972_s14 }
 0x7d0   : > { %v13068_v58 = vpop.permute.xlu2 %4730  ;;  %v13070_v11 = vpop.permute.xlu0 %4604 }
 0x7d1   : > { %v13075_v1 = vpop.permute.xlu1 %4726  ;;  %v3971_v52 = vpop.f32.mrf.mxu0 }
 0x7d2   : > { %v3972_v46 = vadd.f32 %v12605_v22, %v3971_v52  ;;  %v5276_v52 = vld [vmem:[%s17345_s9 + $0x40] sm:$0xff] }
 0x7d3   : > { %5389 = vmatpush.msra.mxu3 %v5276_v52 }
 0x7d4   : > { %v4023_v4 = vmax.f32 %v3972_v46, 0.0 }
 0x7d5   : > { %5390 = vmatpush.msra.mxu3 %v5275_v50  ;;  %v5272_v50 = vld [vmem:[%s17345_s9 + $0x20] sm:$0xff] }
 0x7d6   : > { %4069 = vst.msk [vmem:[#allocation3 + $0xe0] sm:$0xff] %vm17494_vm0, %v4023_v4  ;;  %4866 = vrot.lane.b32.xlu2 %v13006_v34, %s9897_s24  ;;  %4374 = vrot.lane.b32.xlu0 %v13081_v31, %s17509_s19 }
 0x7d7   : > { %4620 = vrot.lane.b32.xlu1 %v13041_v59, %s9895_s23  ;;  %5391 = vmatpush.msra.mxu3 %v5274_v2  ;;  %v5270_v2 = vld [vmem:[%s17345_s9 + $0x10] sm:$0xff] }
 0x7d8   : > { %v13096_v46 = vpop.permute.xlu2 %4854  ;;  %v13098_v38 = vpop.permute.xlu0 %4728 }
 0x7d9   : > { %v13103_v4 = vpop.permute.xlu1 %4360  ;;  %v3974_v63 = vpop.f32.mrf.mxu0  ;;  %5392 = vmatpush.msra.mxu3 %v5273_v39 }
 0x7da   : > { %v3975_v48 = vadd.f32 %v12605_v22, %v3974_v63  ;;  %v5271_v63 = vld [vmem:[%s17345_s9 + $0x18] sm:$0xff] }
 0x7db   : > { %5393 = vmatpush.msra.mxu3 %v5272_v50  ;;  %v13133_v50 = vld [vmem:[#allocation3 + $0xa0] sm:$0xff] }
 0x7dc   : > { %v4024_v52 = vmax.f32 %v3975_v48, 0.0 }
 0x7dd   : > { %5394 = vmatpush.msra.mxu3 %v5271_v63 }
 0x7de   : > { %4070 = vst.msk [vmem:[#allocation3 + $0xe8] sm:$0xff] %vm17494_vm0, %v4024_v52  ;;  %4990 = vrot.lane.b32.xlu2 %v13006_v34, %s18056_s21  ;;  %4498 = vrot.lane.b32.xlu0 %v13081_v31, %s17972_s14 }
 0x7df   : > { %4744 = vrot.lane.b32.xlu1 %v13041_v59, %s9896_s18  ;;  %5395 = vmatpush.msra.mxu3 %v5270_v2 }
 0x7e0   : > { %v13122_v39 = vpop.permute.xlu2 %4364  ;;  %v4853_v48 = vpop.permute.xlu0 %4852 }
 0x7e1   : > { %v13127_v52 = vpop.permute.xlu1 %4484  ;;  %v3977_v8 = vpop.f32.mrf.mxu0  ;;  %5396 = vmatpush.msra.mxu3 %v5269_v10 }
 0x7e2   : > { %v3978_v57 = vadd.f32 %v12605_v22, %v3977_v8  ;;  %v5268_v8 = vld [vmem:[%s17345_s9] sm:$0xff] }
 0x7e3   : > { %5397 = vmatpush.msra.mxu3 %v5268_v8 }
 0x7e4   : > { %v4025_v30 = vmax.f32 %v3978_v57, 0.0 }
 0x7e6   : > { %4071 = vst.msk [vmem:[#allocation3 + $0xf0] sm:$0xff] %vm17494_vm0, %v4025_v30  ;;  %4376 = vrot.lane.b32.xlu2 %v13133_v50, %s17509_s19  ;;  %4622 = vrot.lane.b32.xlu0 %v13081_v31, %s9895_s23 }
 0x7e7   : > { %4868 = vrot.lane.b32.xlu1 %v13041_v59, %s9897_s24 }
 0x7e8   : > { %v13145_v57 = vpop.permute.xlu2 %4488  ;;  %v13147_v63 = vpop.permute.xlu0 %4362 }
 0x7e9   : > { %v13149_v10 = vpop.permute.xlu1 %4608  ;;  %v3980_v30 = vpop.f32.mrf.mxu0 }
 0x7ea   : > { %v3981_v2 = vadd.f32 %v12605_v22, %v3980_v30 }
 0x7ec   : > { %v4026_v41 = vmax.f32 %v3981_v2, 0.0 }
 0x7ee   : > { %4072 = vst.msk [vmem:[#allocation3 + $0xf8] sm:$0xff] %vm17494_vm0, %v4026_v41  ;;  %4500 = vrot.lane.b32.xlu2 %v13133_v50, %s17972_s14  ;;  %4746 = vrot.lane.b32.xlu0 %v13081_v31, %s9896_s18  ;;  %v13171_v41 = vld [vmem:[#allocation3 + $0xa8] sm:$0xff] }
 0x7ef   : > { %4992 = vrot.lane.b32.xlu1 %v13041_v59, %s18056_s21  ;;  %v4079_v59 = vld [vmem:[#allocation3] sm:$0xff] }
 0x7f0   : > { %v13159_v8 = vpop.permute.xlu2 %4612  ;;  %v13161_v44 = vpop.permute.xlu0 %4486  ;;  %v5076_v0 = vsel %vm17494_vm0, %v4079_v59, %v18072_v61 }
 0x7f1   : > { %v13163_v45 = vpop.permute.xlu1 %4732  ;;  %v3983_v20 = vpop.f32.mrf.mxu0  ;;  %v5108_v25 = vsel %vm3608_vm6, %v5076_v0, %v18073_v60 }
 0x7f2   : > { %v3984_v30 = vadd.f32 %v12605_v22, %v3983_v20  ;;  %v5140_v14 = vsel %vm3641_vm7, %v5108_v25, %v13003_v23 }
 0x7f3   : > { %v5172_v61 = vsel %vm17499_vm8, %v5140_v14, %v12999_v35  ;;  %v4080_v14 = vld [vmem:[#allocation3 + $0x8] sm:$0xff] }
 0x7f4   : > { %v4027_v2 = vmax.f32 %v3984_v30, 0.0  ;;  %v5204_v25 = vsel %vm17497_vm9, %v5172_v61, %v4853_v48 }
 0x7f6   : > { %4073 = vst.msk [vmem:[#allocation3 + $0x100] sm:$0xff] %vm17494_vm0, %v4027_v2  ;;  %4624 = vrot.lane.b32.xlu2 %v13133_v50, %s9895_s23  ;;  %4870 = vrot.lane.b32.xlu0 %v13081_v31, %s9897_s24 }
 0x7f7   : > { %4378 = vrot.lane.b32.xlu1 %v13171_v41, %s17509_s19 }
 0x7f8   : > { %v13175_v29 = vpop.permute.xlu2 %4736  ;;  %v13177_v32 = vpop.permute.xlu0 %4610 }
 0x7f9   : > { %v4857_v20 = vpop.permute.xlu1 %4856  ;;  %v3986_v30 = vpop.f32.mrf.mxu0 }
 0x7fa   : > { %v3987_v2 = vadd.f32 %v12605_v22, %v3986_v30 }
 0x7fc   : > { %v4028_v26 = vmax.f32 %v3987_v2, 0.0  ;;  %v13203_v2 = vld [vmem:[#allocation3 + $0xb0] sm:$0xff] }
 0x7fe   : > { %4074 = vst.msk [vmem:[#allocation3 + $0x108] sm:$0xff] %vm17494_vm0, %v4028_v26  ;;  %4748 = vrot.lane.b32.xlu2 %v13133_v50, %s9896_s18  ;;  %4994 = vrot.lane.b32.xlu0 %v13081_v31, %s18056_s21 }
 0x7ff   : > { %4502 = vrot.lane.b32.xlu1 %v13171_v41, %s17972_s14 }
 0x800   : > { %v13195_v59 = vpop.permute.xlu2 %4860  ;;  %v13197_v60 = vpop.permute.xlu0 %4734 }
 0x801   : > { %v4981_v0 = vpop.permute.xlu1 %4980  ;;  %v3989_v26 = vpop.f32.mrf.mxu0 }
 0x802   : > { %v5236_v23 = vsel %vm17498_vm11, %v5204_v25, %v4981_v0  ;;  %v3990_v30 = vadd.f32 %v12605_v22, %v3989_v26  ;;  %v18074_v0 = vld [vmem:[#allocation270_spill] sm:$0xff] }
 0x803   : > { %8603 = vmatmul.msk.f32.vlgmr.msra.gmra.mxu3 %vm3791_vm10, %v5236_v23  ;;  %v5077_v26 = vsel %vm17494_vm0, %v4080_v14, %v18074_v0 }
 0x804   : > { %v4029_v31 = vmax.f32 %v3990_v30, 0.0 }
 0x806   : > { %4075 = vst.msk [vmem:[#allocation3 + $0x110] sm:$0xff] %vm17494_vm0, %v4029_v31  ;;  %4872 = vrot.lane.b32.xlu2 %v13133_v50, %s9897_s24  ;;  %4380 = vrot.lane.b32.xlu0 %v13203_v2, %s17509_s19  ;;  %v18075_v31 = vld [vmem:[#allocation269_spill] sm:$0xff] }
 0x807   : > { %4626 = vrot.lane.b32.xlu1 %v13171_v41, %s9895_s23  ;;  %v5109_v17 = vsel %vm3608_vm6, %v5077_v26, %v18075_v31 }
 0x808   : > { %v4985_v35 = vpop.permute.xlu2 %4984  ;;  %v13212_v48 = vpop.permute.xlu0 %4858  ;;  %v5141_v42 = vsel %vm3641_vm7, %v5109_v17, %v13017_v47 }
 0x809   : > { %v13214_v61 = vpop.permute.xlu1 %4366  ;;  %v3992_v25 = vpop.f32.mrf.mxu0  ;;  %v5173_v14 = vsel %vm17499_vm8, %v5141_v42, %v13075_v1 }
 0x80a   : > { %v3993_v23 = vadd.f32 %v12605_v22, %v3992_v25  ;;  %v5205_v25 = vsel %vm17497_vm9, %v5173_v14, %v13096_v46  ;;  %v4133_v14 = vld [vmem:[#allocation3 + $0xb8] sm:$0xff] }
 0x80c   : > { %v4030_v30 = vmax.f32 %v3993_v23, 0.0  ;;  %v9765_v23 = vld [vmem:[#allocation3 + $0x10] sm:$0xff] }
 0x80e   : > { %4076 = vst.msk [vmem:[#allocation3 + $0x118] sm:$0xff] %vm17494_vm0, %v4030_v30  ;;  %4996 = vrot.lane.b32.xlu2 %v13133_v50, %s18056_s21  ;;  %4504 = vrot.lane.b32.xlu0 %v13203_v2, %s17972_s14  ;;  %v18076_v30 = vld [vmem:[#allocation268_spill] sm:$0xff] }
 0x80f   : > { %4750 = vrot.lane.b32.xlu1 %v13171_v41, %s9896_s18  ;;  %v5078_v31 = vsel %vm17494_vm0, %v9765_v23, %v18076_v30 }
 0x810   : > { %v13234_v0 = vpop.permute.xlu2 %4370  ;;  %v4983_v17 = vpop.permute.xlu0 %4982  ;;  %v5110_v42 = vsel %vm3608_vm6, %v5078_v31, %v12989_v36 }
 0x811   : > { %v5237_v47 = vsel %vm17498_vm11, %v5205_v25, %v4983_v17  ;;  %v13237_v26 = vpop.permute.xlu1 %4490  ;;  %v3995_v50 = vpop.f32.mrf.mxu0  ;;  %v5142_v62 = vsel %vm3641_vm7, %v5110_v42, %v12985_v43  ;;  %v9766_v42 = vld [vmem:[#allocation3 + $0x18] sm:$0xff] }
 0x812   : > { %v3996_v1 = vadd.f32 %v12605_v22, %v3995_v50  ;;  %8604 = vmatmul.msk.f32.gmra.mxu3 %vm3791_vm10, %v5237_v47  ;;  %v5174_v25 = vsel %vm17499_vm8, %v5142_v62, %v13098_v38 }
 0x813   : > { %v5206_v36 = vsel %vm17497_vm9, %v5174_v25, %v4857_v20 }
 0x814   : > { %v4031_v46 = vmax.f32 %v3996_v1, 0.0  ;;  %v5238_v43 = vsel %vm17498_vm11, %v5206_v36, %v4985_v35 }
 0x816   : > { %4077 = vst.msk [vmem:[#allocation3 + $0x120] sm:$0xff] %vm17494_vm0, %v4031_v46  ;;  %4382 = vrot.lane.b32.xlu2 %v4133_v14, %s17509_s19  ;;  %4628 = vrot.lane.b32.xlu0 %v13203_v2, %s9895_s23  ;;  %v18077_v46 = vld [vmem:[#allocation266_spill] sm:$0xff] }
 0x817   : > { %4874 = vrot.lane.b32.xlu1 %v13171_v41, %s9897_s24  ;;  %v5079_v25 = vsel %vm17494_vm0, %v9766_v42, %v18077_v46 }
 0x818   : > { %v13256_v17 = vpop.permute.xlu2 %4494  ;;  %v13258_v47 = vpop.permute.xlu0 %4368  ;;  %v5111_v36 = vsel %vm3608_vm6, %v5079_v25, %v13001_v16 }
 0x819   : > { %v13261_v50 = vpop.permute.xlu1 %4614  ;;  %v3998_v23 = vpop.f32.mrf.mxu0 }
 0x81a   : > { %v3999_v30 = vadd.f32 %v12605_v22, %v3998_v23  ;;  %8605 = vmatmul.msk.f32.gmra.mxu3 %vm3791_vm10, %v5238_v43  ;;  %v13280_v22 = vld [vmem:[#allocation3 + $0xc0] sm:$0xff]  ;;  %v5143_v43 = vsel %vm3641_vm7, %v5111_v36, %v13052_v33 }
 0x81b   : > { %v5175_v23 = vsel %vm17499_vm8, %v5143_v43, %v13068_v58  ;;  %v4083_v33 = vld [vmem:[#allocation3 + $0x20] sm:$0xff] }
 0x81c   : > { %v4032_v31 = vmax.f32 %v3999_v30, 0.0  ;;  %v5207_v16 = vsel %vm17497_vm9, %v5175_v23, %v13212_v48  ;;  %v5080_v48 = vsel %vm17494_vm0, %v4083_v33, %v12973_v12 }
 0x81d   : > { %v5112_v43 = vsel %vm3608_vm6, %v5080_v48, %v12971_v54  ;;  %v4084_v54 = vld [vmem:[#allocation3 + $0x28] sm:$0xff]  ;;  %v4136_v48 = vld [vmem:[#allocation3 + $0xd0] sm:$0xff] }
 0x81e   : > { %4078 = vst.msk [vmem:[#allocation3 + $0x128] sm:$0xff] %vm17494_vm0, %v4032_v31  ;;  %4506 = vrot.lane.b32.xlu2 %v4133_v14, %s17972_s14  ;;  %4752 = vrot.lane.b32.xlu0 %v13203_v2, %s9896_s18  ;;  %v5144_v23 = vsel %vm3641_vm7, %v5112_v43, %v13070_v11 }
 0x81f   : > { %4998 = vrot.lane.b32.xlu1 %v13171_v41, %s18056_s21 }
 0x820   : > { %v13271_v62 = vpop.permute.xlu2 %4618  ;;  %v13273_v38 = vpop.permute.xlu0 %4492 }
 0x821   : > { %v13275_v20 = vpop.permute.xlu1 %4738 }
 0x826   : > { %4630 = vrot.lane.b32.xlu2 %v4133_v14, %s9895_s23  ;;  %4876 = vrot.lane.b32.xlu0 %v13203_v2, %s9897_s24 }
 0x827   : > { %4384 = vrot.lane.b32.xlu1 %v13280_v22, %s17509_s19 }
 0x828   : > { %v13284_v35 = vpop.permute.xlu2 %4742  ;;  %v13286_v1 = vpop.permute.xlu0 %4616 }
 0x829   : > { %v4863_v41 = vpop.permute.xlu1 %4862 }
 0x82e   : > { %4754 = vrot.lane.b32.xlu2 %v4133_v14, %s9896_s18  ;;  %5000 = vrot.lane.b32.xlu0 %v13203_v2, %s18056_s21  ;;  %v4135_v2 = vld [vmem:[#allocation3 + $0xc8] sm:$0xff] }
 0x82f   : > { %4508 = vrot.lane.b32.xlu1 %v13280_v22, %s17972_s14 }
 0x830   : > { %v13301_v30 = vpop.permute.xlu2 %4866  ;;  %v13303_v31 = vpop.permute.xlu0 %4740 }
 0x831   : > { %v4987_v42 = vpop.permute.xlu1 %4986 }
 0x832   : > { %v5239_v46 = vsel %vm17498_vm11, %v5207_v16, %v4987_v42  ;;  %v5176_v16 = vsel %vm17499_vm8, %v5144_v23, %v13163_v45 }
 0x833   : > { %8606 = vmatmul.msk.f32.gmra.mxu3 %vm3791_vm10, %v5239_v46  ;;  %v5208_v42 = vsel %vm17497_vm9, %v5176_v16, %v13195_v59 }
 0x836   : > { %4878 = vrot.lane.b32.xlu2 %v4133_v14, %s9897_s24  ;;  %4386 = vrot.lane.b32.xlu0 %v4135_v2, %s17509_s19 }
 0x837   : > { %4632 = vrot.lane.b32.xlu1 %v13280_v22, %s9895_s23 }
 0x838   : > { %v4991_v58 = vpop.permute.xlu2 %4990  ;;  %v4865_v25 = vpop.permute.xlu0 %4864 }
 0x839   : > { %v13313_v36 = vpop.permute.xlu1 %4372 }
 0x83e   : > { %5002 = vrot.lane.b32.xlu2 %v4133_v14, %s18056_s21  ;;  %4510 = vrot.lane.b32.xlu0 %v4135_v2, %s17972_s14  ;;  %v5081_v14 = vsel %vm17494_vm0, %v4084_v54, %v12987_v6 }
 0x83f   : > { %4756 = vrot.lane.b32.xlu1 %v13280_v22, %s9896_s18  ;;  %v5113_v45 = vsel %vm3608_vm6, %v5081_v14, %v13033_v21  ;;  %v9767_v14 = vld [vmem:[#allocation3 + $0x30] sm:$0xff] }
 0x840   : > { %v13329_v12 = vpop.permute.xlu2 %4376  ;;  %v4989_v46 = vpop.permute.xlu0 %4988  ;;  %v5145_v59 = vsel %vm3641_vm7, %v5113_v45, %v13048_v55  ;;  %v5082_v45 = vsel %vm17494_vm0, %v9767_v14, %v12952_v27 }
 0x841   : > { %v5240_v33 = vsel %vm17498_vm11, %v5208_v42, %v4989_v46  ;;  %v13332_v11 = vpop.permute.xlu1 %4496  ;;  %v5177_v43 = vsel %vm17499_vm8, %v5145_v59, %v13197_v60  ;;  %v5114_v59 = vsel %vm3608_vm6, %v5082_v45, %v13050_v24 }
 0x842   : > { %8607 = vmatmul.msk.f32.gmra.mxu3 %vm3791_vm10, %v5240_v33  ;;  %v5209_v23 = vsel %vm17497_vm9, %v5177_v43, %v4863_v41  ;;  %v5146_v43 = vsel %vm3641_vm7, %v5114_v59, %v13149_v10 }
 0x843   : > { %v5241_v21 = vsel %vm17498_vm11, %v5209_v23, %v4991_v58  ;;  %v13368_v58 = vld [vmem:[#allocation3 + $0xd8] sm:$0xff]  ;;  %v5178_v23 = vsel %vm17499_vm8, %v5146_v43, %v13175_v29 }
 0x844   : > { %v5210_v27 = vsel %vm17497_vm9, %v5178_v23, %v4865_v25  ;;  %v9768_v25 = vld [vmem:[#allocation3 + $0x38] sm:$0xff] }
 0x845   : > { %v5083_v59 = vsel %vm17494_vm0, %v9768_v25, %v13019_v56 }
 0x846   : > { %4388 = vrot.lane.b32.xlu2 %v4136_v48, %s17509_s19  ;;  %4634 = vrot.lane.b32.xlu0 %v4135_v2, %s9895_s23  ;;  %v5115_v43 = vsel %vm3608_vm6, %v5083_v59, %v13029_v40  ;;  %v13429_v59 = vld [vmem:[#allocation3 + $0xe8] sm:$0xff] }
 0x847   : > { %4880 = vrot.lane.b32.xlu1 %v13280_v22, %s9897_s24  ;;  %v5147_v23 = vsel %vm3641_vm7, %v5115_v43, %v13177_v32 }
 0x848   : > { %v13348_v6 = vpop.permute.xlu2 %4500  ;;  %v13350_v16 = vpop.permute.xlu0 %4374 }
 0x849   : > { %v13353_v42 = vpop.permute.xlu1 %4620 }
 0x84a   : > { %8608 = vmatmul.msk.f32.gmra.mxu3 %vm3791_vm10, %v5241_v21 }
 0x84e   : > { %4512 = vrot.lane.b32.xlu2 %v4136_v48, %s17972_s14  ;;  %4758 = vrot.lane.b32.xlu0 %v4135_v2, %s9896_s18 }
 0x84f   : > { %5004 = vrot.lane.b32.xlu1 %v13280_v22, %s18056_s21 }
 0x850   : > { %v13360_v55 = vpop.permute.xlu2 %4624  ;;  %v13362_v60 = vpop.permute.xlu0 %4498 }
 0x851   : > { %v13364_v41 = vpop.permute.xlu1 %4744 }
 0x856   : > { %4636 = vrot.lane.b32.xlu2 %v4136_v48, %s9895_s23  ;;  %4882 = vrot.lane.b32.xlu0 %v4135_v2, %s9897_s24 }
 0x857   : > { %4390 = vrot.lane.b32.xlu1 %v13368_v58, %s17509_s19 }
 0x858   : > { %v13372_v46 = vpop.permute.xlu2 %4748  ;;  %v13374_v54 = vpop.permute.xlu0 %4622 }
 0x859   : > { %v4869_v33 = vpop.permute.xlu1 %4868 }
 0x85e   : > { %4760 = vrot.lane.b32.xlu2 %v4136_v48, %s9896_s18  ;;  %5006 = vrot.lane.b32.xlu0 %v4135_v2, %s18056_s21  ;;  %v13395_v2 = vld [vmem:[#allocation3 + $0xe0] sm:$0xff] }
 0x85f   : > { %4514 = vrot.lane.b32.xlu1 %v13368_v58, %s17972_s14 }
 0x860   : > { %v13388_v21 = vpop.permute.xlu2 %4872  ;;  %v13390_v15 = vpop.permute.xlu0 %4746 }
 0x861   : > { %v4993_v24 = vpop.permute.xlu1 %4992 }
 0x862   : > { %v5242_v14 = vsel %vm17498_vm11, %v5210_v27, %v4993_v24  ;;  %v5179_v27 = vsel %vm17499_vm8, %v5147_v23, %v13275_v20 }
 0x863   : > { %8609 = vmatmul.msk.f32.gmra.mxu3 %vm3791_vm10, %v5242_v14  ;;  %v5211_v56 = vsel %vm17497_vm9, %v5179_v27, %v13301_v30 }
 0x866   : > { %4884 = vrot.lane.b32.xlu2 %v4136_v48, %s9897_s24  ;;  %4392 = vrot.lane.b32.xlu0 %v13395_v2, %s17509_s19 }
 0x867   : > { %4638 = vrot.lane.b32.xlu1 %v13368_v58, %s9895_s23 }
 0x868   : > { %v4997_v29 = vpop.permute.xlu2 %4996  ;;  %v4871_v10 = vpop.permute.xlu0 %4870 }
 0x869   : > { %v13402_v45 = vpop.permute.xlu1 %4378 }
 0x86e   : > { %5008 = vrot.lane.b32.xlu2 %v4136_v48, %s18056_s21  ;;  %4516 = vrot.lane.b32.xlu0 %v13395_v2, %s17972_s14  ;;  %v9769_v48 = vld [vmem:[#allocation3 + $0x40] sm:$0xff] }
 0x86f   : > { %4762 = vrot.lane.b32.xlu1 %v13368_v58, %s9896_s18  ;;  %v5084_v25 = vsel %vm17494_vm0, %v9769_v48, %v13031_v13 }
 0x870   : > { %v13419_v24 = vpop.permute.xlu2 %4382  ;;  %v4995_v40 = vpop.permute.xlu0 %4994  ;;  %v5116_v20 = vsel %vm3608_vm6, %v5084_v25, %v13127_v52  ;;  %v9770_v25 = vld [vmem:[#allocation3 + $0x48] sm:$0xff] }
 0x871   : > { %18078 = vst [vmem:[#allocation241_spill] sm:$0xff] %v13419_v24  ;;  %v5243_v14 = vsel %vm17498_vm11, %v5211_v56, %v4995_v40  ;;  %v13422_v32 = vpop.permute.xlu1 %4502  ;;  %v5148_v30 = vsel %vm3641_vm7, %v5116_v20, %v13159_v8  ;;  %v5085_v20 = vsel %vm17494_vm0, %v9770_v25, %v13015_v7  ;;  %v13495_v24 = vld [vmem:[#allocation3 + $0xf8] sm:$0xff] }
 0x872   : > { %8610 = vmatmul.msk.f32.gmra.mxu3 %vm3791_vm10, %v5243_v14  ;;  %v5180_v43 = vsel %vm17499_vm8, %v5148_v30, %v13303_v31  ;;  %v5117_v30 = vsel %vm3608_vm6, %v5085_v20, %v13161_v44 }
 0x873   : > { %v5212_v13 = vsel %vm17497_vm9, %v5180_v43, %v4869_v33  ;;  %v5149_v43 = vsel %vm3641_vm7, %v5117_v30, %v13261_v50 }
 0x874   : > { %v5244_v8 = vsel %vm17498_vm11, %v5212_v13, %v4997_v29  ;;  %v13466_v29 = vld [vmem:[#allocation3 + $0xf0] sm:$0xff]  ;;  %v5181_v13 = vsel %vm17499_vm8, %v5149_v43, %v13284_v35 }
 0x875   : > { %v5213_v44 = vsel %vm17497_vm9, %v5181_v13, %v4871_v10  ;;  %v9771_v10 = vld [vmem:[#allocation3 + $0x50] sm:$0xff] }
 0x876   : > { %4394 = vrot.lane.b32.xlu2 %v13429_v59, %s17509_s19  ;;  %4640 = vrot.lane.b32.xlu0 %v13395_v2, %s9895_s23  ;;  %v5086_v43 = vsel %vm17494_vm0, %v9771_v10, %v13103_v4 }
 0x877   : > { %4886 = vrot.lane.b32.xlu1 %v13368_v58, %s9897_s24  ;;  %v5118_v13 = vsel %vm3608_vm6, %v5086_v43, %v13145_v57  ;;  %v9772_v43 = vld [vmem:[#allocation3 + $0x58] sm:$0xff] }
 0x878   : > { %v13442_v52 = vpop.permute.xlu2 %4506  ;;  %v13444_v23 = vpop.permute.xlu0 %4380 }
 0x879   : > { %v13447_v27 = vpop.permute.xlu1 %4626 }
 0x87a   : > { %8611 = vmatmul.msk.f32.gmra.mxu3 %vm3791_vm10, %v5244_v8 }
 0x87e   : > { %4518 = vrot.lane.b32.xlu2 %v13429_v59, %s17972_s14  ;;  %4764 = vrot.lane.b32.xlu0 %v13395_v2, %s9896_s18 }
 0x87f   : > { %5010 = vrot.lane.b32.xlu1 %v13368_v58, %s18056_s21 }
 0x880   : > { %v13456_v31 = vpop.permute.xlu2 %4630  ;;  %v13458_v33 = vpop.permute.xlu0 %4504 }
 0x881   : > { %v13460_v56 = vpop.permute.xlu1 %4750 }
 0x886   : > { %4642 = vrot.lane.b32.xlu2 %v13429_v59, %s9895_s23  ;;  %4888 = vrot.lane.b32.xlu0 %v13395_v2, %s9897_s24 }
 0x887   : > { %4396 = vrot.lane.b32.xlu1 %v13466_v29, %s17509_s19 }
 0x888   : > { %v13470_v40 = vpop.permute.xlu2 %4754  ;;  %v13472_v14 = vpop.permute.xlu0 %4628 }
 0x889   : > { %v4875_v48 = vpop.permute.xlu1 %4874 }
 0x88e   : > { %4766 = vrot.lane.b32.xlu2 %v13429_v59, %s9896_s18  ;;  %5012 = vrot.lane.b32.xlu0 %v13395_v2, %s18056_s21 }
 0x88f   : > { %4520 = vrot.lane.b32.xlu1 %v13466_v29, %s17972_s14 }
 0x890   : > { %v13488_v8 = vpop.permute.xlu2 %4878  ;;  %v13490_v7 = vpop.permute.xlu0 %4752 }
 0x891   : > { %v4999_v25 = vpop.permute.xlu1 %4998 }
 0x892   : > { %v5245_v20 = vsel %vm17498_vm11, %v5213_v44, %v4999_v25  ;;  %v5150_v44 = vsel %vm3641_vm7, %v5118_v13, %v13286_v1  ;;  %v5087_v13 = vsel %vm17494_vm0, %v9772_v43, %v13147_v63 }
 0x893   : > { %8612 = vmatmul.msk.f32.gmra.mxu3 %vm3791_vm10, %v5245_v20  ;;  %v5182_v25 = vsel %vm17499_vm8, %v5150_v44, %v13364_v41  ;;  %v5119_v41 = vsel %vm3608_vm6, %v5087_v13, %v13237_v26  ;;  %v4142_v44 = vld [vmem:[#allocation3 + $0x100] sm:$0xff] }
 0x894   : > { %v5214_v4 = vsel %vm17497_vm9, %v5182_v25, %v13388_v21  ;;  %v5151_v21 = vsel %vm3641_vm7, %v5119_v41, %v13271_v62 }
 0x895   : > { %v5183_v25 = vsel %vm17499_vm8, %v5151_v21, %v13390_v15  ;;  %v9773_v21 = vld [vmem:[#allocation3 + $0x60] sm:$0xff] }
 0x896   : > { %4890 = vrot.lane.b32.xlu2 %v13429_v59, %s9897_s24  ;;  %4398 = vrot.lane.b32.xlu0 %v13495_v24, %s17509_s19  ;;  %v5215_v63 = vsel %vm17497_vm9, %v5183_v25, %v4875_v48  ;;  %v5088_v25 = vsel %vm17494_vm0, %v9773_v21, %v13122_v39 }
 0x897   : > { %4644 = vrot.lane.b32.xlu1 %v13466_v29, %s9895_s23 }
 0x898   : > { %v5003_v50 = vpop.permute.xlu2 %5002  ;;  %v4877_v35 = vpop.permute.xlu0 %4876 }
 0x899   : > { %v13503_v30 = vpop.permute.xlu1 %4384 }
 0x89a   : > { %18079 = vst [vmem:[#allocation61_spill] sm:$0xff] %v13503_v30 }
 0x89e   : > { %5014 = vrot.lane.b32.xlu2 %v13429_v59, %s18056_s21  ;;  %4522 = vrot.lane.b32.xlu0 %v13495_v24, %s17972_s14 }
 0x89f   : > { %4768 = vrot.lane.b32.xlu1 %v13466_v29, %s9896_s18 }
 0x8a0   : > { %v13521_v20 = vpop.permute.xlu2 %4388  ;;  %v5001_v57 = vpop.permute.xlu0 %5000 }
 0x8a1   : > { %v5246_v1 = vsel %vm17498_vm11, %v5214_v4, %v5001_v57  ;;  %v13524_v10 = vpop.permute.xlu1 %4508  ;;  %v5247_v57 = vsel %vm17498_vm11, %v5215_v63, %v5003_v50  ;;  %v4143_v50 = vld [vmem:[#allocation3 + $0x108] sm:$0xff]  ;;  %v5120_v63 = vsel %vm3608_vm6, %v5088_v25, %v13273_v38  ;;  %v4175_v25 = vld [vmem:[#allocation3 + $0x110] sm:$0xff] }
 0x8a2   : > { %8613 = vmatmul.msk.f32.gmra.mxu3 %vm3791_vm10, %v5246_v1 }
 0x8a6   : > { %4400 = vrot.lane.b32.xlu2 %v4142_v44, %s17509_s19  ;;  %4646 = vrot.lane.b32.xlu0 %v13495_v24, %s9895_s23 }
 0x8a7   : > { %4892 = vrot.lane.b32.xlu1 %v13466_v29, %s9897_s24 }
 0x8a8   : > { %v13541_v4 = vpop.permute.xlu2 %4512  ;;  %v13543_v26 = vpop.permute.xlu0 %4386 }
 0x8a9   : > { %18080 = vst [vmem:[#allocation108_spill] sm:$0xff] %v13541_v4  ;;  %v13546_v62 = vpop.permute.xlu1 %4632 }
 0x8aa   : > { %18081 = vst [vmem:[#allocation140_spill] sm:$0xff] %v13543_v26  ;;  %8614 = vmatmul.msk.f32.gmra.mxu3 %vm3791_vm10, %v5247_v57  ;;  %v5152_v57 = vsel %vm3641_vm7, %v5120_v63, %v13353_v42 }
 0x8ab   : > { %v5184_v26 = vsel %vm17499_vm8, %v5152_v57, %v13372_v46  ;;  %v9774_v57 = vld [vmem:[#allocation3 + $0x68] sm:$0xff] }
 0x8ac   : > { %v5216_v39 = vsel %vm17497_vm9, %v5184_v26, %v4877_v35  ;;  %v5089_v35 = vsel %vm17494_vm0, %v9774_v57, %v13214_v61 }
 0x8ad   : > { %v5121_v26 = vsel %vm3608_vm6, %v5089_v35, %v13256_v17 }
 0x8ae   : > { %4524 = vrot.lane.b32.xlu2 %v4142_v44, %s17972_s14  ;;  %4770 = vrot.lane.b32.xlu0 %v13495_v24, %s9896_s18 }
 0x8af   : > { %5016 = vrot.lane.b32.xlu1 %v13466_v29, %s18056_s21 }
 0x8b0   : > { %v13554_v15 = vpop.permute.xlu2 %4636  ;;  %v13556_v48 = vpop.permute.xlu0 %4510 }
 0x8b1   : > { %18082 = vst [vmem:[#allocation183_spill] sm:$0xff] %v13556_v48  ;;  %v13558_v1 = vpop.permute.xlu1 %4756 }
 0x8b6   : > { %4648 = vrot.lane.b32.xlu2 %v4142_v44, %s9895_s23  ;;  %4894 = vrot.lane.b32.xlu0 %v13495_v24, %s9897_s24 }
 0x8b7   : > { %4402 = vrot.lane.b32.xlu1 %v4143_v50, %s17509_s19 }
 0x8b8   : > { %v13564_v43 = vpop.permute.xlu2 %4760  ;;  %v13566_v13 = vpop.permute.xlu0 %4634 }
 0x8b9   : > { %v4881_v41 = vpop.permute.xlu1 %4880 }
 0x8be   : > { %4772 = vrot.lane.b32.xlu2 %v4142_v44, %s9896_s18  ;;  %5018 = vrot.lane.b32.xlu0 %v13495_v24, %s18056_s21 }
 0x8bf   : > { %4526 = vrot.lane.b32.xlu1 %v4143_v50, %s17972_s14 }
 0x8c0   : > { %v13580_v4 = vpop.permute.xlu2 %4884  ;;  %v13582_v30 = vpop.permute.xlu0 %4758 }
 0x8c1   : > { %v5005_v38 = vpop.permute.xlu1 %5004 }
 0x8c2   : > { %v5248_v21 = vsel %vm17498_vm11, %v5216_v39, %v5005_v38  ;;  %v5153_v39 = vsel %vm3641_vm7, %v5121_v26, %v13374_v54  ;;  %v5090_v54 = vsel %vm17494_vm0, %v12879_v49, %v13258_v47 }
 0x8c3   : > { %8615 = vmatmul.msk.f32.gmra.mxu3 %vm3791_vm10, %v5248_v21  ;;  %v5185_v38 = vsel %vm17499_vm8, %v5153_v39, %v13460_v56  ;;  %v5122_v56 = vsel %vm3608_vm6, %v5090_v54, %v13332_v11  ;;  %v6241_v54 = vld [vmem:[#allocation2 + $0xb3] sm:$0xff] }
 0x8c4   : > { %v5217_v21 = vsel %vm17497_vm9, %v5185_v38, %v13488_v8  ;;  %v5154_v8 = vsel %vm3641_vm7, %v5122_v56, %v13360_v55  ;;  %v6209_v38 = vld [vmem:[#allocation2 + $0xb2] sm:$0xff] }
 0x8c5   : > { %v5186_v35 = vsel %vm17499_vm8, %v5154_v8, %v13490_v7 }
 0x8c6   : > { %4896 = vrot.lane.b32.xlu2 %v4142_v44, %s9897_s24  ;;  %4528 = vrot.lane.b32.xlu0 %v4175_v25, %s17972_s14  ;;  %v5218_v26 = vsel %vm17497_vm9, %v5186_v35, %v4881_v41  ;;  %v6208_v41 = vld [vmem:[#allocation2 + $0xaa] sm:$0xff] }
 0x8c7   : > { %4650 = vrot.lane.b32.xlu1 %v4143_v50, %s9895_s23 }
 0x8c8   : > { %v5009_v42 = vpop.permute.xlu2 %5008  ;;  %v13590_v46 = vpop.permute.xlu0 %4882 }
 0x8c9   : > { %v13592_v63 = vpop.permute.xlu1 %4390  ;;  %v5250_v47 = vsel %vm17498_vm11, %v5218_v26, %v5009_v42  ;;  %v9103_v42 = vpack.i.bf16 %v6209_v38, %v6208_v41 }
 0x8ce   : > { %5020 = vrot.lane.b32.xlu2 %v4142_v44, %s18056_s21  ;;  %4652 = vrot.lane.b32.xlu0 %v4175_v25, %s9895_s23  ;;  %v4176_v44 = vld [vmem:[#allocation3 + $0x118] sm:$0xff] }
 0x8cf   : > { %4774 = vrot.lane.b32.xlu1 %v4143_v50, %s9896_s18 }
 0x8d0   : > { %v13607_v48 = vpop.permute.xlu2 %4394  ;;  %v5007_v61 = vpop.permute.xlu0 %5006 }
 0x8d1   : > { %v5249_v17 = vsel %vm17498_vm11, %v5217_v21, %v5007_v61  ;;  %v13610_v57 = vpop.permute.xlu1 %4514  ;;  %v13643_v61 = vpop.f32.mrf.mxu2 }
 0x8d2   : > { %18083 = vst [vmem:[#allocation213_spill] sm:$0xff] %v13610_v57  ;;  %8616 = vmatmul.msk.f32.gmra.mxu3 %vm3791_vm10, %v5249_v17  ;;  %v6240_v17 = vld [vmem:[#allocation2 + $0xab] sm:$0xff] }
 0x8d3   : > { %18087 = vst [vmem:[#allocation151_spill] sm:$0xff] %v13643_v61  ;;  %v9108_v26 = vpack.i.bf16 %v6241_v54, %v6240_v17  ;;  %v6337_v54 = vld [vmem:[#allocation2 + $0xc3] sm:$0xff] }
 0x8d4   : > { %v18108_v61 = vld [vmem:[#allocation286_spill] sm:$0xff] }
 0x8d6   : > { %4530 = vrot.lane.b32.xlu2 %v4176_v44, %s17972_s14  ;;  %4776 = vrot.lane.b32.xlu0 %v4175_v25, %s9896_s18 }
 0x8d7   : > { %4898 = vrot.lane.b32.xlu1 %v4143_v50, %s9897_s24 }
 0x8d8   : > { %v13626_v39 = vpop.permute.xlu2 %4518  ;;  %v13628_v49 = vpop.permute.xlu0 %4392 }
 0x8d9   : > { %18084 = vst [vmem:[#allocation239_spill] sm:$0xff] %v13628_v49  ;;  %v13631_v11 = vpop.permute.xlu1 %4638  ;;  %v13658_v38 = vpop.f32.mrf.mxu2  ;;  %v6113_v49 = vld [vmem:[#allocation2 + $0x9a] sm:$0xff] }
 0x8da   : > { %18085 = vst [vmem:[#allocation52_spill] sm:$0xff] %v13631_v11  ;;  %8617 = vmatmul.msk.f32.gmra.mxu3 %vm3791_vm10, %v5250_v47  ;;  %v18090_v47 = vld [vmem:[#allocation116_spill] sm:$0xff] }
 0x8db   : > { %18091 = vst [vmem:[#allocation246_spill] sm:$0xff] %v13658_v38 }
 0x8de   : > { %4654 = vrot.lane.b32.xlu2 %v4176_v44, %s9895_s23  ;;  %4900 = vrot.lane.b32.xlu0 %v4175_v25, %s9897_s24 }
 0x8df   : > { %5022 = vrot.lane.b32.xlu1 %v4143_v50, %s18056_s21  ;;  %v685_v50 = vld [vmem:[%s17342_s6] sm:$0x1] }
 0x8e0   : > { %v13637_v55 = vpop.permute.xlu2 %4642  ;;  %v13639_v7 = vpop.permute.xlu0 %4516  ;;  %v712_v41 = vadd.f32 %v18090_v47, %v685_v50  ;;  %v6338_v50 = vld [vmem:[#allocation2 + $0xcb] sm:$0xff] }
 0x8e1   : > { %18086 = vst [vmem:[#allocation110_spill] sm:$0xff] %v13637_v55  ;;  %v13641_v21 = vpop.permute.xlu1 %4762  ;;  %v4207_v55 = vld [vmem:[#allocation3 + $0x120] sm:$0xff] }
 0x8e2   : > { %v8442_v57 = vmul.f32 -1.442695, %v712_v41 }
 0x8e4   : > { %9567 = vpow2.f32 %v8442_v57  ;;  %v6273_v57 = vld [vmem:[#allocation2 + $0xb4] sm:$0xff] }
 0x8e6   : > { %4778 = vrot.lane.b32.xlu2 %v4176_v44, %s9896_s18  ;;  %5024 = vrot.lane.b32.xlu0 %v4175_v25, %s18056_s21  ;;  %v5091_v25 = vsel %vm17494_vm0, %v12940_v51, %v13234_v0 }
 0x8e7   : > { %9104 = vrot.lane.b32.xlu1 %v9103_v42, %s9895_s23  ;;  %v5123_v42 = vsel %vm3608_vm6, %v5091_v25, %v13362_v60 }
 0x8e8   : > { %v13651_v56 = vpop.permute.xlu2 %4766  ;;  %v13653_v8 = vpop.permute.xlu0 %4640  ;;  %v5155_v17 = vsel %vm3641_vm7, %v5123_v42, %v13447_v27  ;;  %v6272_v27 = vld [vmem:[#allocation2 + $0xac] sm:$0xff] }
 0x8e9   : > { %18088 = vst [vmem:[#allocation179_spill] sm:$0xff] %v13651_v56  ;;  %v13655_v35 = vpop.permute.xlu1 %4886  ;;  %v5187_v47 = vsel %vm17499_vm8, %v5155_v17, %v13470_v40  ;;  %8673 = vmatmul.msk.f32.gmra.mxu2 %vm17494_vm0, %v6272_v27  ;;  %v13683_v42 = vpop.f32.mrf.mxu2 }
 0x8ea   : > { %18089 = vst [vmem:[#allocation214_spill] sm:$0xff] %v13653_v8  ;;  %v5219_v60 = vsel %vm17497_vm9, %v5187_v47, %v13590_v46  ;;  %v13679_v8 = vpack.i.bf16 %v6338_v50, %v6337_v54  ;;  %v9568_v17 = vpop.eup %9567  ;;  %v5092_v47 = vsel %vm17494_vm0, %v12976_v9, %v13313_v36 }
 0x8eb   : > { %18092 = vst [vmem:[#allocation63_spill] sm:$0xff] %v13683_v42  ;;  %v13693_v50 = vadd.f32 1.0, %v9568_v17  ;;  %v8911_v42 = vunpack.i.l.bf16 %v18108_v61 }
 0x8ed   : > { %9569 = vrcp.f32 %v13693_v50  ;;  %vm723_vm13 = vweird.f32 %v13693_v50 }
 0x8ee   : > { %4902 = vrot.lane.b32.xlu2 %v4176_v44, %s9897_s24  ;;  %9109 = vrot.lane.b32.xlu0 %v9108_v26, %s9896_s18 }
 0x8ef   : > { %4656 = vrot.lane.b32.xlu1 %v4207_v55, %s9895_s23 }
 0x8f0   : > { %v13672_v51 = vpop.permute.xlu2 %4890  ;;  %v13674_v0 = vpop.permute.xlu0 %4764 }
 0x8f1   : > { %v5011_v25 = vpop.permute.xlu1 %5010  ;;  %8674 = vmatmul.msk.f32.gmra.mxu2 %vm17494_vm0, %v6273_v57 }
 0x8f2   : > { %v5251_v41 = vsel %vm17498_vm11, %v5219_v60, %v5011_v25  ;;  %v4208_v60 = vld [vmem:[#allocation3 + $0x128] sm:$0xff] }
 0x8f3   : > { %8618 = vmatmul.msk.f32.gmra.mxu3 %vm3791_vm10, %v5251_v41  ;;  %v13705_v41 = vpop.f32.mrf.mxu2 }
 0x8f4   : > { %18094 = vst [vmem:[#allocation104_spill] sm:$0xff] %v13705_v41 }
 0x8f6   : > { %5026 = vrot.lane.b32.xlu2 %v4176_v44, %s18056_s21  ;;  %9124 = vrot.lane.b32.xlu0 %v13679_v8, %s18093_s17  ;;  %v5124_v44 = vsel %vm3608_vm6, %v5092_v47, %v13348_v6  ;;  %v9113_v47 = vpack.i.bf16 %v6273_v57, %v6272_v27 }
 0x8f7   : > { %4780 = vrot.lane.b32.xlu1 %v4207_v55, %s9896_s18  ;;  %v5156_v25 = vsel %vm3641_vm7, %v5124_v44, %v13472_v14 }
 0x8f8   : > { %v5015_v40 = vpop.permute.xlu2 %5014  ;;  %v13689_v46 = vpop.permute.xlu0 %4888  ;;  %v5188_v17 = vsel %vm17499_vm8, %v5156_v25, %v13558_v1  ;;  %v5093_v1 = vsel %vm17494_vm0, %v13006_v34, %v13350_v16  ;;  %v6210_v34 = vld [vmem:[#allocation2 + $0xc2] sm:$0xff]  ;;  %v6211_v16 = vld [vmem:[#allocation2 + $0xca] sm:$0xff] }
 0x8f9   : > { %v13691_v54 = vpop.permute.xlu1 %4396  ;;  %v5220_v9 = vsel %vm17497_vm9, %v5188_v17, %v13580_v4  ;;  %v5125_v44 = vsel %vm3608_vm6, %v5093_v1, %v13422_v32  ;;  %v13724_v25 = vpop.eup %9569  ;;  %v6307_v1 = vld [vmem:[#allocation2 + $0xda] sm:$0xff] }
 0x8fa   : > { %v5157_v4 = vsel %vm3641_vm7, %v5125_v44, %v13456_v31  ;;  %v719_v31 = vmul.f32 %v13724_v25, %v13693_v50  ;;  %vm724_vm12 = vweird.f32 %v13724_v25 }
 0x8fb   : > { %v13730_v17 = vpop.f32.mrf.mxu2  ;;  %v5189_v27 = vsel %vm17499_vm8, %v5157_v4, %v13582_v30  ;;  %v9128_v30 = vpack.i.bf16 %v6211_v16, %v6210_v34  ;;  %vm13779_vm14 = vmor %vm723_vm13, %vm724_vm12 }
 0x8fc   : > { %18096 = vst [vmem:[#allocation186_spill] sm:$0xff] %v13730_v17  ;;  %v5221_v32 = vsel %vm17497_vm9, %v5189_v27, %v13655_v35 }
 0x8fe   : > { %9099 = vrot.lane.b32.xlu2 %v9108_v26, %s18093_s17  ;;  %4658 = vrot.lane.b32.xlu0 %v4208_v60, %s9895_s23 }
 0x8ff   : > { %4904 = vrot.lane.b32.xlu1 %v4207_v55, %s9897_s24 }
 0x900   : > { %v13713_v36 = vpop.permute.xlu2 %4400  ;;  %v5013_v6 = vpop.permute.xlu0 %5012 }
 0x901   : > { %v5252_v14 = vsel %vm17498_vm11, %v5220_v9, %v5013_v6  ;;  %v13716_v26 = vpop.permute.xlu1 %4520  ;;  %v5253_v6 = vsel %vm17498_vm11, %v5221_v32, %v5015_v40  ;;  %v6308_v40 = vld [vmem:[#allocation2 + $0xe2] sm:$0xff]  ;;  %v6275_v32 = vld [vmem:[#allocation2 + $0xcc] sm:$0xff] }
 0x902   : > { %18095 = vst [vmem:[#allocation157_spill] sm:$0xff] %v13716_v26  ;;  %8619 = vmatmul.msk.f32.gmra.mxu3 %vm3791_vm10, %v5252_v14  ;;  %v13761_v16 = vpack.i.bf16 %v6308_v40, %v6307_v1  ;;  %v6244_v40 = vld [vmem:[#allocation2 + $0xdb] sm:$0xff]  ;;  %v6112_v26 = vld [vmem:[#allocation2 + $0x92] sm:$0xff] }
 0x903   : > { %v13751_v35 = vpop.f32.mrf.mxu2 }
 0x904   : > { %18098 = vst [vmem:[#allocation244_spill] sm:$0xff] %v13751_v35 }
 0x906   : > { %9114 = vrot.lane.b32.xlu2 %v9113_v47, %s9897_s24  ;;  %4782 = vrot.lane.b32.xlu0 %v4208_v60, %s9896_s18  ;;  %v13745_v47 = vld [vmem:[#allocation2 + $0xc4] sm:$0xff] }
 0x907   : > { %5028 = vrot.lane.b32.xlu1 %v4207_v55, %s18056_s21  ;;  %8675 = vmatmul.msk.f32.gmra.mxu2 %vm17494_vm0, %v13745_v47  ;;  %v720_v55 = vsub.f32 1.0, %v719_v31  ;;  %v729_v31 = vand.u32 2147483648, %v13693_v50 }
 0x908   : > { %v13737_v57 = vpop.permute.xlu2 %4524  ;;  %v13739_v9 = vpop.permute.xlu0 %4398 }
 0x909   : > { %18097 = vst [vmem:[#allocation208_spill] sm:$0xff] %v13737_v57  ;;  %v4645_v14 = vpop.permute.xlu1 %4644  ;;  %v721_v27 = vmul.f32 %v13724_v25, %v720_v55  ;;  %v727_v55 = vand.u32 2147483647, %v13693_v50 }
 0x90a   : > { %8620 = vmatmul.msk.f32.gmra.mxu3 %vm3791_vm10, %v5253_v6 }
 0x90b   : > { %v722_v6 = vadd.f32 %v13724_v25, %v721_v27  ;;  %v6245_v27 = vld [vmem:[#allocation2 + $0xe3] sm:$0xff]  ;;  %vm728_vm15 = vcmp.eq.f32.partialorder %v727_v55, 8.507059e+37 }
 0x90c   : > { %v18114_v55 = vld [vmem:[#allocation298_spill] sm:$0xff] }
 0x90d   : > { %9571 = vrcp.f32 %v18114_v55  ;;  %vm2109_vm2 = vweird.f32 %v18114_v55 }
 0x90e   : > { %9129 = vrot.lane.b32.xlu2 %v9128_v30, %s9895_s23  ;;  %4906 = vrot.lane.b32.xlu0 %v4208_v60, %s9897_s24 }
 0x90f   : > { %9119 = vrot.lane.b32.xlu1 %v9128_v30, %s18056_s21  ;;  %8676 = vmatmul.msk.f32.gmra.mxu2 %vm17494_vm0, %v6275_v32  ;;  %v5100_v30 = vsel %vm17494_vm0, %v13280_v22, %v13521_v20  ;;  %v730_v22 = vor.u32 1.1754944e-38, %v729_v31  ;;  %v18103_v20 = vld [vmem:[#allocation283_spill] sm:$0xff]  ;;  %v13793_v31 = vpop.f32.mrf.mxu2 }
 0x910   : > { %v13754_v44 = vpop.permute.xlu2 %4648  ;;  %v13756_v4 = vpop.permute.xlu0 %4522  ;;  %v5132_v1 = vsel %vm3608_vm6, %v5100_v30, %v13639_v7  ;;  %v8917_v35 = vunpack.i.h.bf16 %v18103_v20  ;;  %v726_v7 = vsel %vm13779_vm14, %v13724_v25, %v722_v6  ;;  %v6115_v30 = vld [vmem:[#allocation2 + $0xb2] sm:$0xff]  ;;  %18106 = vst [vmem:[#allocation189_spill] sm:$0xff] %v13793_v31  ;;  %v9158_v25 = vpack.i.bf16 %v6245_v27, %v6244_v40  ;;  %v6119_v40 = vld [vmem:[#allocation2 + $0xe2] sm:$0xff] }
 0x911   : > { %18099 = vst [vmem:[#allocation67_spill] sm:$0xff] %v13754_v44  ;;  %v13759_v34 = vpop.permute.xlu1 %4768  ;;  %v5164_v17 = vsel %vm3641_vm7, %v5132_v1, %v4645_v14  ;;  %v6120_v14 = vld [vmem:[#allocation2 + $0xf2] sm:$0xff]  ;;  %v6121_v1 = vld [vmem:[#allocation2 + $0xfa] sm:$0xff]  ;;  %v8912_v44 = vunpack.i.h.bf16 %v18108_v61  ;;  %v9138_v6 = vpack.i.bf16 %v6275_v32, %v13745_v47 }
 0x912   : > { %18100 = vst [vmem:[#allocation111_spill] sm:$0xff] %v13759_v34  ;;  %v18105_v34 = vld [vmem:[#allocation285_spill] sm:$0xff]  ;;  %v9775_v27 = vld [vmem:[#allocation3 + $0x90] sm:$0xff] }
 0x913   : > { %v8932_v56 = vunpack.i.h.bf16 %v18105_v34  ;;  %v8931_v11 = vunpack.i.l.bf16 %v18105_v34  ;;  %v18109_v34 = vld [vmem:[#allocation287_spill] sm:$0xff]  ;;  %v6118_v61 = vld [vmem:[#allocation2 + $0xda] sm:$0xff] }
 0x914   : > { %v8926_v31 = vunpack.i.l.bf16 %v18109_v34 }
 0x915   : > { %v13815_v47 = vsel %vm17494_vm0, %v6121_v1, %v8932_v56  ;;  %v13818_v32 = vsel %vm17494_vm0, %v6120_v14, %v8931_v11  ;;  %v13835_v11 = vadd.f32 %v12162_v37, %v12155_v3  ;;  %v18119_v14 = vld [vmem:[#allocation288_spill] sm:$0xff]  ;;  %v6277_v1 = vld [vmem:[#allocation2 + $0xe4] sm:$0xff] }
 0x916   : > { %9144 = vrot.lane.b32.xlu2 %v13761_v16, %s18056_s21  ;;  %5030 = vrot.lane.b32.xlu0 %v4208_v60, %s18056_s21  ;;  %v8916_v60 = vunpack.i.l.bf16 %v18103_v20  ;;  %18112 = vst [vmem:[#allocation113_spill] sm:$0xff] %v13815_v47  ;;  %v8947_v3 = vunpack.i.h.bf16 %v18119_v14 }
 0x917   : > { %9134 = vrot.lane.b32.xlu1 %v13679_v8, %s9896_s18  ;;  %v6114_v8 = vld [vmem:[#allocation2 + $0xaa] sm:$0xff]  ;;  %18113 = vst [vmem:[#allocation156_spill] sm:$0xff] %v13818_v32 }
 0x918   : > { %v4773_v50 = vpop.permute.xlu2 %4772  ;;  %v13786_v41 = vpop.permute.xlu0 %4646  ;;  %v13811_v57 = vsel %vm17494_vm0, %v6114_v8, %v8916_v60  ;;  %v13827_v60 = vsel %vm17494_vm0, %v6112_v26, %v8911_v42  ;;  %18115 = vst [vmem:[#allocation181_spill] sm:$0xff] %v13835_v11  ;;  %v6342_v26 = vld [vmem:[#allocation2 + $0xfb] sm:$0xff] }
 0x919   : > { %18104 = vst [vmem:[#allocation143_spill] sm:$0xff] %v13786_v41  ;;  %v13796_v38 = vsel %vm17499_vm8, %v5164_v17, %v4773_v50  ;;  %v13798_v20 = vpop.permute.xlu1 %4892  ;;  %v8927_v41 = vunpack.i.h.bf16 %v18109_v34  ;;  %v6276_v17 = vld [vmem:[#allocation2 + $0xdc] sm:$0xff]  ;;  %v13805_v50 = vsel %vm728_vm15, %v730_v22, %v726_v7  ;;  %v13824_v22 = vsel %vm17494_vm0, %v6113_v49, %v8912_v44 }
 0x91a   : > { %18107 = vst [vmem:[#allocation216_spill] sm:$0xff] %v13796_v38  ;;  %v13808_v38 = vsel %vm17494_vm0, %v6115_v30, %v8917_v35  ;;  %8677 = vmatmul.msk.f32.gmra.mxu2 %vm17494_vm0, %v6276_v17  ;;  %v5094_v35 = vsel %vm17494_vm0, %v9775_v27, %v13329_v12  ;;  %v13841_v12 = vsel %vm17494_vm0, %v6118_v61, %v8926_v31  ;;  %v18118_v44 = vld [vmem:[#allocation290_spill] sm:$0xff]  ;;  %v8946_v34 = vunpack.i.l.bf16 %v18119_v14  ;;  %v13858_v61 = vpop.f32.mrf.mxu2  ;;  %v18150_v11 = vld [vmem:[#allocation297_spill] sm:$0xff] }
 0x91b   : > { %18110 = vst [vmem:[#allocation242_spill] sm:$0xff] %v13805_v50  ;;  %v5126_v7 = vsel %vm3608_vm6, %v5094_v35, %v13458_v33  ;;  %v13838_v56 = vsel %vm17494_vm0, %v6119_v40, %v8927_v41  ;;  %v6341_v33 = vld [vmem:[#allocation2 + $0xf3] sm:$0xff]  ;;  %v8907_v8 = vunpack.i.h.bf16 %v18118_v44  ;;  %v8906_v30 = vunpack.i.l.bf16 %v18118_v44  ;;  %v6116_v42 = vld [vmem:[#allocation2 + $0xc2] sm:$0xff]  ;;  %v6117_v35 = vld [vmem:[#allocation2 + $0xca] sm:$0xff] }
 0x91c   : > { %18111 = vst [vmem:[#allocation56_spill] sm:$0xff] %v13811_v57  ;;  %v5158_v49 = vsel %vm3641_vm7, %v5126_v7, %v13546_v62  ;;  %v18122_v62 = vld [vmem:[#allocation292_spill] sm:$0xff]  ;;  %v6127_v7 = vld [vmem:[#allocation2 + $0x142] sm:$0xff]  ;;  %v13871_v14 = vadd.f32 %v12179_v18, %v12177_v19 }
 0x91d   : > { %18116 = vst [vmem:[#allocation217_spill] sm:$0xff] %v13838_v56  ;;  %v5190_v37 = vsel %vm17499_vm8, %v5158_v49, %v13564_v43  ;;  %v6126_v43 = vld [vmem:[#allocation2 + $0x13a] sm:$0xff]  ;;  %v13865_v56 = vpack.i.bf16 %v6342_v26, %v6341_v33  ;;  %v6124_v19 = vld [vmem:[#allocation2 + $0x122] sm:$0xff]  ;;  %v6125_v18 = vld [vmem:[#allocation2 + $0x12a] sm:$0xff] }
 0x91e   : > { %9159 = vrot.lane.b32.xlu2 %v9158_v25, %s9896_s18  ;;  %9139 = vrot.lane.b32.xlu0 %v9138_v6, %s9897_s24  ;;  %18117 = vst [vmem:[#allocation249_spill] sm:$0xff] %v13841_v12  ;;  %v8922_v6 = vunpack.i.h.bf16 %v18122_v62  ;;  %v5222_v40 = vsel %vm17497_vm9, %v5190_v37, %v13689_v46  ;;  %v18124_v49 = vld [vmem:[#allocation289_spill] sm:$0xff]  ;;  %v6132_v12 = vld [vmem:[#allocation2 + $0x182] sm:$0xff]  ;;  %v6133_v46 = vld [vmem:[#allocation2 + $0x18a] sm:$0xff] }
 0x91f   : > { %9149 = vrot.lane.b32.xlu1 %v9158_v25, %s18093_s17  ;;  %v8921_v25 = vunpack.i.l.bf16 %v18122_v62  ;;  %18123 = vst [vmem:[#allocation160_spill] sm:$0xff] %v13858_v61  ;;  %v8962_v44 = vunpack.i.h.bf16 %v18124_v49  ;;  %v8961_v47 = vunpack.i.l.bf16 %v18124_v49  ;;  %v13867_v62 = vpop.eup %9571  ;;  %v18126_v37 = vld [vmem:[#allocation291_spill] sm:$0xff]  ;;  %v9777_v26 = vld [vmem:[#allocation2 + $0x7a] sm:$0xff] }
 0x920   : > { %v13851_v41 = vpop.permute.xlu2 %4896  ;;  %v13853_v31 = vpop.permute.xlu0 %4770  ;;  %18125 = vst [vmem:[#allocation188_spill] sm:$0xff] %v13871_v14  ;;  %v8942_v61 = vunpack.i.h.bf16 %v18126_v37  ;;  %v8941_v50 = vunpack.i.l.bf16 %v18126_v37  ;;  %v9776_v49 = vld [vmem:[#allocation2 + $0x82] sm:$0xff]  ;;  %v6130_v37 = vld [vmem:[#allocation2 + $0x16a] sm:$0xff]  ;;  %vm2110_vm1 = vweird.f32 %v13867_v62 }
 0x921   : > { %18120 = vst [vmem:[#allocation69_spill] sm:$0xff] %v13851_v41  ;;  %v5017_v27 = vpop.permute.xlu1 %5016  ;;  %v13879_v33 = vsel %vm17494_vm0, %v9776_v49, %v8907_v8  ;;  %v13894_v8 = vsel %vm17494_vm0, %v6127_v7, %v8947_v3  ;;  %v6131_v49 = vld [vmem:[#allocation2 + $0x172] sm:$0xff]  ;;  %vm14065_vm3 = vmor %vm2109_vm2, %vm2110_vm1 }
 0x922   : > { %18121 = vst [vmem:[#allocation107_spill] sm:$0xff] %v13853_v31  ;;  %v5254_v32 = vsel %vm17498_vm11, %v5222_v40, %v5017_v27  ;;  %v13876_v31 = vpack.i.bf16 %v6277_v1, %v6276_v17  ;;  %v13882_v40 = vsel %vm17494_vm0, %v9777_v26, %v8906_v30  ;;  %v18127_v27 = vld [vmem:[#allocation293_spill] sm:$0xff]  ;;  %8678 = vmatmul.msk.f32.gmra.mxu2 %vm17494_vm0, %v6277_v1  ;;  %v18137_v7 = vld [vmem:[#allocation296_spill] sm:$0xff] }
 0x923   : > { %8621 = vmatmul.msk.f32.gmra.mxu3 %vm3791_vm10, %v5254_v32  ;;  %v8957_v41 = vunpack.i.h.bf16 %v18127_v27  ;;  %v8956_v14 = vunpack.i.l.bf16 %v18127_v27  ;;  %v13888_v32 = vsel %vm17494_vm0, %v6117_v35, %v8922_v6  ;;  %v13891_v17 = vsel %vm17494_vm0, %v6116_v42, %v8921_v25  ;;  %18128 = vst [vmem:[#allocation211_spill] sm:$0xff] %v13894_v8  ;;  %v18134_v6 = vld [vmem:[#allocation295_spill] sm:$0xff]  ;;  %v6128_v8 = vld [vmem:[#allocation2 + $0x152] sm:$0xff] }
 0x924   : > { %v13897_v30 = vsel %vm17494_vm0, %v6126_v43, %v8946_v34  ;;  %v13900_v26 = vsel %vm17494_vm0, %v6133_v46, %v8962_v44  ;;  %v13903_v27 = vsel %vm17494_vm0, %v6132_v12, %v8961_v47  ;;  %v2105_v1 = vmul.f32 %v13867_v62, %v18114_v55  ;;  %v6309_v12 = vld [vmem:[#allocation2 + $0xf2] sm:$0xff]  ;;  %v6310_v34 = vld [vmem:[#allocation2 + $0xfa] sm:$0xff] }
 0x925   : > { %18129 = vst [vmem:[#allocation247_spill] sm:$0xff] %v13897_v30  ;;  %v13912_v3 = vsel %vm17494_vm0, %v6125_v18, %v8942_v61  ;;  %v13915_v42 = vsel %vm17494_vm0, %v6124_v19, %v8941_v50  ;;  %v8937_v25 = vunpack.i.h.bf16 %v18134_v6  ;;  %v8936_v47 = vunpack.i.l.bf16 %v18134_v6  ;;  %v6122_v61 = vld [vmem:[#allocation2 + $0x10a] sm:$0xff]  ;;  %v6123_v43 = vld [vmem:[#allocation2 + $0x112] sm:$0xff]  ;;  %v6129_v6 = vld [vmem:[#allocation2 + $0x15a] sm:$0xff] }
 0x926   : > { %18130 = vst [vmem:[#allocation71_spill] sm:$0xff] %v13900_v26  ;;  %9174 = vrot.lane.b32.xlu2 %v13865_v56, %s18093_s17  ;;  %9154 = vrot.lane.b32.xlu0 %v13761_v16, %s9895_s23  ;;  %v13922_v35 = vsel %vm17494_vm0, %v6131_v49, %v8957_v41  ;;  %v13925_v16 = vsel %vm17494_vm0, %v6130_v37, %v8956_v14  ;;  %v8952_v50 = vunpack.i.h.bf16 %v18137_v7  ;;  %v18138_v44 = vld [vmem:[#allocation301_spill] sm:$0xff]  ;;  %v8951_v41 = vunpack.i.l.bf16 %v18137_v7  ;;  %v18141_v49 = vld [vmem:[#allocation294_spill] sm:$0xff]  ;;  %v13940_v26 = vpop.f32.mrf.mxu2 }
 0x927   : > { %18131 = vst [vmem:[#allocation114_spill] sm:$0xff] %v13903_v27  ;;  %9164 = vrot.lane.b32.xlu1 %v13876_v31, %s9897_s24  ;;  %9573 = vrcp.f32 %v18138_v44  ;;  %v13935_v18 = vadd.f32 %v12193_v5, %v12191_v53  ;;  %v8992_v14 = vunpack.i.h.bf16 %v18141_v49  ;;  %v18142_v37 = vld [vmem:[#allocation302_spill] sm:$0xff]  ;;  %v8991_v30 = vunpack.i.l.bf16 %v18141_v49  ;;  %v18146_v5 = vld [vmem:[#allocation315_spill] sm:$0xff] }
 0x928   : > { %18132 = vst [vmem:[#allocation147_spill] sm:$0xff] %v13912_v3  ;;  %v13929_v46 = vpop.permute.xlu2 %5020  ;;  %v13931_v19 = vpop.permute.xlu0 %4894  ;;  %9575 = vrcp.f32 %v18142_v37  ;;  %v2106_v3 = vsub.f32 1.0, %v2105_v1  ;;  %v13947_v53 = vpack.i.bf16 %v6310_v34, %v6309_v12  ;;  %v13965_v1 = vsel %vm17494_vm0, %v6129_v6, %v8952_v50  ;;  %v18158_v49 = vld [vmem:[#allocation318_spill] sm:$0xff] }
 0x929   : > { %18133 = vst [vmem:[#allocation192_spill] sm:$0xff] %v13915_v42  ;;  %v4403_v27 = vpop.permute.xlu1 %4402  ;;  %v18147_v42 = vld [vmem:[#allocation323_spill] sm:$0xff]  ;;  %v8987_v12 = vunpack.i.h.bf16 %v18150_v11  ;;  %v13976_v34 = vsel %vm3608_vm6, %v13824_v22, %v8992_v14  ;;  %v18159_v14 = vld [vmem:[#allocation332_spill] sm:$0xff]  ;;  %vm2124_vm5 = vweird.f32 %v18138_v44  ;;  %vm2154_vm15 = vweird.f32 %v18142_v37 }
 0x92a   : > { %18135 = vst [vmem:[#allocation219_spill] sm:$0xff] %v13922_v35  ;;  %v18144_v35 = vld [vmem:[#allocation320_spill] sm:$0xff]  ;;  %v13951_v7 = vadd.f32 %v18147_v42, %v18146_v5  ;;  %v9778_v42 = vld [vmem:[#allocation3 + $0x98] sm:$0xff]  ;;  %v2107_v22 = vmul.f32 %v13867_v62, %v2106_v3 }
 0x92b   : > { %18136 = vst [vmem:[#allocation245_spill] sm:$0xff] %v13925_v16  ;;  %v13944_v16 = vadd.f32 %v18144_v35, %v12197_v28  ;;  %v6278_v28 = vld [vmem:[#allocation2 + $0xf4] sm:$0xff]  ;;  %v14009_v3 = vsel %vm3608_vm6, %v13879_v33, %v8987_v12  ;;  %v6135_v5 = vld [vmem:[#allocation2 + $0x1a2] sm:$0xff] }
 0x92c   : > { %18139 = vst [vmem:[#allocation62_spill] sm:$0xff] %v13931_v19  ;;  %v13954_v19 = vsel %vm17494_vm0, %v6123_v43, %v8937_v25  ;;  %v18151_v35 = vld [vmem:[#allocation316_spill] sm:$0xff]  ;;  %v5095_v25 = vsel %vm17494_vm0, %v9778_v42, %v13402_v45  ;;  %8679 = vmatmul.msk.f32.gmra.mxu2 %vm17494_vm0, %v6278_v28  ;;  %v18156_v45 = vld [vmem:[#allocation305_spill] sm:$0xff] }
 0x92d   : > { %18140 = vst [vmem:[#allocation115_spill] sm:$0xff] %v13935_v18  ;;  %v8986_v18 = vunpack.i.l.bf16 %v18150_v11  ;;  %v13981_v43 = vpop.eup %9573  ;;  %v13985_v11 = vsel %vm3608_vm6, %v13827_v60, %v8991_v30  ;;  %v18157_v60 = vld [vmem:[#allocation299_spill] sm:$0xff] }
 0x92e   : > { %18143 = vst [vmem:[#allocation159_spill] sm:$0xff] %v13940_v26  ;;  %v13957_v26 = vsel %vm17494_vm0, %v6122_v61, %v8936_v47  ;;  %v13972_v47 = vsel %vm17494_vm0, %v6128_v8, %v8951_v41  ;;  %v5127_v61 = vsel %vm3608_vm6, %v5095_v25, %v13442_v52  ;;  %9189 = vrot.lane.b32.xlu2 %v13865_v56, %s9896_s18  ;;  %v13995_v52 = vpop.eup %9575  ;;  %v8967_v30 = vunpack.i.h.bf16 %v18157_v60  ;;  %v6343_v56 = vld [vmem:[#allocation2 + $0x10b] sm:$0xff]  ;;  %v6344_v41 = vld [vmem:[#allocation2 + $0x113] sm:$0xff]  ;;  %v6279_v25 = vld [vmem:[#allocation2 + $0xfc] sm:$0xff] }
 0x92f   : > { %18145 = vst [vmem:[#allocation184_spill] sm:$0xff] %v13944_v16  ;;  %v18152_v16 = vld [vmem:[#allocation325_spill] sm:$0xff]  ;;  %v5159_v8 = vsel %vm3641_vm7, %v5127_v61, %v13566_v13  ;;  %9169 = vrot.lane.b32.xlu0 %v13947_v53, %s18056_s21  ;;  %v13999_v50 = vsel %vm3608_vm6, %v13882_v40, %v8986_v18  ;;  %v8966_v6 = vunpack.i.l.bf16 %v18157_v60  ;;  %9179 = vrot.lane.b32.xlu1 %v13876_v31, %s17972_s14  ;;  %vm2125_vm12 = vweird.f32 %v13981_v43 }
 0x930   : > { %18148 = vst [vmem:[#allocation220_spill] sm:$0xff] %v13954_v19  ;;  %v13962_v57 = vadd.f32 %v18152_v16, %v18151_v35  ;;  %v18155_v16 = vld [vmem:[#allocation304_spill] sm:$0xff]  ;;  %v5191_v13 = vsel %vm17499_vm8, %v5159_v8, %v13641_v21  ;;  %v14013_v40 = vadd.f32 %v18159_v14, %v18158_v49  ;;  %v6134_v18 = vld [vmem:[#allocation2 + $0x19a] sm:$0xff]  ;;  %v5107_v21 = vsel %vm17494_vm0, %v13495_v24, %v4403_v27  ;;  %v4531_v42 = vpop.permute.xlu2 %4530  ;;  %v5019_v31 = vpop.permute.xlu0 %5018  ;;  %v18160_v49 = vld [vmem:[#allocation319_spill] sm:$0xff] }
 0x931   : > { %18149 = vst [vmem:[#allocation252_spill] sm:$0xff] %v13957_v26  ;;  %9577 = vrcp.f32 %v18155_v16  ;;  %v5223_v35 = vsel %vm17497_vm9, %v5191_v13, %v13672_v51  ;;  %v14020_v61 = vsel %vm3608_vm6, %v5107_v21, %v4531_v42  ;;  %v4527_v12 = vpop.permute.xlu1 %4526  ;;  %v2115_v8 = vand.u32 2147483648, %v18114_v55  ;;  %v18161_v14 = vld [vmem:[#allocation334_spill] sm:$0xff]  ;;  %vm14195_vm1 = vmor %vm2124_vm5, %vm2125_vm12 }
 0x932   : > { %18153 = vst [vmem:[#allocation73_spill] sm:$0xff] %v13965_v1  ;;  %9579 = vrcp.f32 %v18156_v45  ;;  %v5255_v33 = vsel %vm17498_vm11, %v5223_v35, %v5019_v31  ;;  %v2120_v60 = vmul.f32 %v13981_v43, %v18138_v44  ;;  %v2150_v51 = vmul.f32 %v13995_v52, %v18142_v37  ;;  %v14045_v31 = vpop.f32.mrf.mxu2  ;;  %v18241_v26 = vld [vmem:[#allocation314_spill] sm:$0xff] }
 0x933   : > { %18154 = vst [vmem:[#allocation117_spill] sm:$0xff] %v13972_v47  ;;  %8622 = vmatmul.msk.f32.gmra.mxu3 %vm3791_vm10, %v5255_v33  ;;  %v14030_v24 = vpack.i.bf16 %v6344_v41, %v6343_v56  ;;  %v2108_v27 = vadd.f32 %v13867_v62, %v2107_v22  ;;  %v14037_v35 = vadd.f32 %v18161_v14, %v18160_v49  ;;  %v18164_v41 = vld [vmem:[#allocation322_spill] sm:$0xff]  ;;  %v18166_v47 = vld [vmem:[#allocation300_spill] sm:$0xff]  ;;  %v2116_v14 = vor.u32 1.1754944e-38, %v2115_v8 }
 0x934   : > { %v14040_v21 = vsel %vm17494_vm0, %v6135_v5, %v8967_v30  ;;  %v14043_v42 = vsel %vm17494_vm0, %v6134_v18, %v8966_v6  ;;  %v14047_v1 = vpack.i.bf16 %v6279_v25, %v6278_v28  ;;  %v18165_v22 = vld [vmem:[#allocation50_spill] sm:$0xff]  ;;  %v9002_v19 = vunpack.i.h.bf16 %v18166_v47  ;;  %v9779_v49 = vld [vmem:[#allocation3 + $0xa0] sm:$0xff]  ;;  %8680 = vmatmul.msk.f32.gmra.mxu2 %vm17494_vm0, %v6279_v25 }
 0x935   : > { %18162 = vst [vmem:[#allocation163_spill] sm:$0xff] %v14040_v21  ;;  %v14053_v33 = vadd.f32 %v18165_v22, %v18164_v41  ;;  %v5096_v30 = vsel %vm17494_vm0, %v9779_v49, %v13444_v23  ;;  %v9001_v6 = vunpack.i.l.bf16 %v18166_v47  ;;  %v2113_v5 = vand.u32 2147483647, %v18114_v55  ;;  %v6280_v18 = vld [vmem:[#allocation2 + $0x10c] sm:$0xff] }
 0x936   : > { %18163 = vst [vmem:[#allocation191_spill] sm:$0xff] %v14043_v42  ;;  %v5128_v28 = vsel %vm3608_vm6, %v5096_v30, %v13524_v10  ;;  %v2121_v41 = vsub.f32 1.0, %v2120_v60  ;;  %v2151_v23 = vsub.f32 1.0, %v2150_v51  ;;  %9204 = vrot.lane.b32.xlu2 %v14030_v24, %s18093_s17  ;;  %v2112_v10 = vsel %vm14065_vm3, %v13867_v62, %v2108_v27  ;;  %v6312_v60 = vld [vmem:[#allocation2 + $0x112] sm:$0xff]  ;;  %v18238_v21 = vld [vmem:[#allocation135_spill] sm:$0xff] }
 0x937   : > { %v14033_v13 = vpop.eup %9577  ;;  %v5160_v25 = vsel %vm3641_vm7, %v5128_v28, %v13554_v15  ;;  %9184 = vrot.lane.b32.xlu0 %v13947_v53, %s9895_s23  ;;  %v5105_v8 = vsel %vm17494_vm0, %v13429_v59, %v13739_v9  ;;  %9194 = vrot.lane.b32.xlu1 %v14047_v1, %s9897_s24  ;;  %v6311_v53 = vld [vmem:[#allocation2 + $0x10a] sm:$0xff]  ;;  %v5103_v62 = vsel %vm17494_vm0, %v13368_v58, %v13607_v48  ;;  %vm2114_vm4 = vcmp.eq.f32.partialorder %v2113_v5, 8.507059e+37 }
 0x938   : > { %v14049_v56 = vpop.eup %9579  ;;  %v2135_v47 = vmul.f32 %v14033_v13, %v18155_v16  ;;  %v5192_v15 = vsel %vm17499_vm8, %v5160_v25, %v13674_v0  ;;  %v5106_v51 = vsel %vm17494_vm0, %v13466_v29, %v13713_v36  ;;  %v5137_v27 = vsel %vm3608_vm6, %v5105_v8, %v4527_v12  ;;  %v4655_v22 = vpop.permute.xlu2 %4654  ;;  %v18173_v8 = vld [vmem:[#allocation306_spill] sm:$0xff]  ;;  %v18179_v5 = vld [vmem:[#allocation303_spill] sm:$0xff] }
 0x939   : > { %v14083_v55 = vmul.f32 %v14049_v56, %v18156_v45  ;;  %v5224_v0 = vsel %vm17497_vm9, %v5192_v15, %v13798_v20  ;;  %v4529_v59 = vpop.permute.xlu0 %4528  ;;  %v5135_v9 = vsel %vm3608_vm6, %v5103_v62, %v13756_v4  ;;  %v14106_v30 = vsel %vm3641_vm7, %v5137_v27, %v4655_v22  ;;  %v4651_v29 = vpop.permute.xlu1 %4650  ;;  %v6346_v27 = vld [vmem:[#allocation2 + $0x12b] sm:$0xff] }
 0x93a   : > { %v5256_v49 = vsel %vm17498_vm11, %v5224_v0, %v13929_v46  ;;  %18169 = vst [vmem:[#allocation215_spill] sm:$0xff] %v14106_v30  ;;  %v14109_v58 = vsel %vm3608_vm6, %v5106_v51, %v4529_v59  ;;  %v5167_v48 = vsel %vm3641_vm7, %v5135_v9, %v4651_v29  ;;  %v14113_v36 = vpack.i.bf16 %v6312_v60, %v6311_v53  ;;  %v14125_v28 = vpop.f32.mrf.mxu2  ;;  %v18182_v9 = vld [vmem:[#allocation208_spill] sm:$0xff] }
 0x93b   : > { %8623 = vmatmul.msk.f32.gmra.mxu3 %vm3791_vm10, %v5256_v49  ;;  %v2122_v20 = vmul.f32 %v13981_v43, %v2121_v41  ;;  %v2130_v4 = vand.u32 2147483648, %v18138_v44  ;;  %v14119_v46 = vsel %vm3608_vm6, %v13891_v17, %v9001_v6  ;;  %v14123_v12 = vsel %vm3608_vm6, %v13888_v32, %v9002_v19  ;;  %18172 = vst [vmem:[#allocation119_spill] sm:$0xff] %v14125_v28  ;;  %v18175_v17 = vld [vmem:[#allocation324_spill] sm:$0xff]  ;;  %v18176_v6 = vld [vmem:[#allocation146_spill] sm:$0xff] }
 0x93c   : > { %18170 = vst [vmem:[#allocation250_spill] sm:$0xff] %v14119_v46  ;;  %v2128_v25 = vand.u32 2147483647, %v18138_v44  ;;  %v2136_v15 = vsub.f32 1.0, %v2135_v47  ;;  %9581 = vrcp.f32 %v18173_v8  ;;  %8681 = vmatmul.msk.f32.gmra.mxu2 %vm17494_vm0, %v6280_v18  ;;  %v2152_v41 = vmul.f32 %v13995_v52, %v2151_v23  ;;  %v18177_v32 = vld [vmem:[#allocation326_spill] sm:$0xff]  ;;  %v18178_v19 = vld [vmem:[#allocation236_spill] sm:$0xff] }
 0x93d   : > { %18171 = vst [vmem:[#allocation76_spill] sm:$0xff] %v14123_v12  ;;  %v14131_v53 = vsel %vm2114_vm4, %v2116_v14, %v2112_v10  ;;  %v14135_v60 = vadd.f32 %v18176_v6, %v18175_v17  ;;  %v14139_v62 = vadd.f32 %v18178_v19, %v18177_v32  ;;  %v2166_v51 = vsub.f32 1.0, %v14083_v55  ;;  %v9780_v10 = vld [vmem:[#allocation3 + $0xc8] sm:$0xff] }
 0x93e   : > { %18174 = vst [vmem:[#allocation150_spill] sm:$0xff] %v14131_v53  ;;  %v8997_v47 = vunpack.i.h.bf16 %v18179_v5  ;;  %9219 = vrot.lane.b32.xlu2 %v14030_v24, %s9896_s18  ;;  %v14149_v14 = vadd.f32 %v13981_v43, %v2122_v20  ;;  %v14152_v23 = vor.u32 1.1754944e-38, %v2130_v4  ;;  %v5101_v55 = vsel %vm17494_vm0, %v9780_v10, %v13592_v63  ;;  %v6345_v24 = vld [vmem:[#allocation2 + $0x123] sm:$0xff]  ;;  %v6281_v29 = vld [vmem:[#allocation2 + $0x114] sm:$0xff] }
 0x93f   : > { %9199 = vrot.lane.b32.xlu0 %v14113_v36, %s18056_s21  ;;  %v5104_v0 = vsel %vm17494_vm0, %v13395_v2, %v13691_v54  ;;  %9209 = vrot.lane.b32.xlu1 %v14047_v1, %s17972_s14  ;;  %vm2155_vm13 = vweird.f32 %v13995_v52  ;;  %v2160_v22 = vand.u32 2147483648, %v18142_v37  ;;  %vm14163_vm14 = vcmp.eq.f32.partialorder %v2128_v25, 8.507059e+37  ;;  %v18183_v4 = vld [vmem:[#allocation143_spill] sm:$0xff]  ;;  %v18242_v12 = vld [vmem:[#allocation69_spill] sm:$0xff] }
 0x940   : > { %v5133_v63 = vsel %vm3608_vm6, %v5101_v55, %v13626_v39  ;;  %v5136_v49 = vsel %vm3608_vm6, %v5104_v0, %v18182_v9  ;;  %v4779_v2 = vpop.permute.xlu2 %4778  ;;  %v2153_v1 = vadd.f32 %v13995_v52, %v2152_v41  ;;  %v2137_v20 = vmul.f32 %v14033_v13, %v2136_v15  ;;  %vm14205_vm2 = vmor %vm2154_vm15, %vm2155_vm13 }
 0x941   : > { %v4653_v54 = vpop.permute.xlu0 %4652  ;;  %v5165_v17 = vsel %vm3641_vm7, %v5133_v63, %v18183_v4  ;;  %v14176_v25 = vsel %vm17499_vm8, %v5167_v48, %v4779_v2  ;;  %v4775_v39 = vpop.permute.xlu1 %4774  ;;  %v2167_v32 = vmul.f32 %v14049_v56, %v2166_v51  ;;  %v8996_v10 = vunpack.i.l.bf16 %v18179_v5  ;;  %v18191_v63 = vld [vmem:[#allocation307_spill] sm:$0xff] }
 0x942   : > { %18184 = vst [vmem:[#allocation195_spill] sm:$0xff] %v14176_v25  ;;  %v14179_v6 = vsel %vm3641_vm7, %v5136_v49, %v4653_v54  ;;  %v14182_v19 = vpop.eup %9581  ;;  %v14186_v41 = vsel %vm17499_vm8, %v5165_v17, %v4775_v39  ;;  %v14188_v15 = vpack.i.bf16 %v6346_v27, %v6345_v24  ;;  %v14199_v51 = vpop.f32.mrf.mxu2  ;;  %v14201_v55 = vpack.i.bf16 %v6281_v29, %v6280_v18  ;;  %v18192_v49 = vld [vmem:[#allocation239_spill] sm:$0xff] }
 0x943   : > { %18185 = vst [vmem:[#allocation222_spill] sm:$0xff] %v14179_v6  ;;  %v2158_v24 = vand.u32 2147483647, %v18142_v37  ;;  %v2161_v27 = vor.u32 1.1754944e-38, %v2160_v22  ;;  %v2127_v44 = vsel %vm14195_vm1, %v13981_v43, %v14149_v14  ;;  %9583 = vrcp.f32 %v18191_v63  ;;  %v9781_v14 = vld [vmem:[#allocation3 + $0xd0] sm:$0xff]  ;;  %v6314_v4 = vld [vmem:[#allocation2 + $0x12a] sm:$0xff] }
 0x944   : > { %18188 = vst [vmem:[#allocation248_spill] sm:$0xff] %v14199_v51  ;;  %8682 = vmatmul.msk.f32.gmra.mxu2 %vm17494_vm0, %v6281_v29  ;;  %v2157_v18 = vsel %vm14205_vm2, %v13995_v52, %v2153_v1  ;;  %v2138_v9 = vadd.f32 %v14033_v13, %v2137_v20  ;;  %vm2140_vm3 = vweird.f32 %v14033_v13  ;;  %v2195_v37 = vmul.f32 %v14182_v19, %v18173_v8  ;;  %v18193_v29 = vld [vmem:[#allocation157_spill] sm:$0xff]  ;;  %v6313_v20 = vld [vmem:[#allocation2 + $0x122] sm:$0xff] }
 0x945   : > { %v2168_v22 = vadd.f32 %v14049_v56, %v2167_v32  ;;  %vm2170_vm4 = vweird.f32 %v14049_v56  ;;  %v2145_v43 = vand.u32 2147483648, %v18155_v16  ;;  %v5102_v2 = vsel %vm17494_vm0, %v9781_v14, %v18192_v49  ;;  %v18224_v51 = vld [vmem:[#allocation311_spill] sm:$0xff] }
 0x946   : > { %9234 = vrot.lane.b32.xlu2 %v14188_v15, %s18093_s17  ;;  %v2175_v52 = vand.u32 2147483648, %v18156_v45  ;;  %vm2139_vm5 = vweird.f32 %v18155_v16  ;;  %v2143_v54 = vand.u32 2147483647, %v18155_v16  ;;  %v5134_v1 = vsel %vm3608_vm6, %v5102_v2, %v18193_v29  ;;  %v18196_v16 = vld [vmem:[#allocation67_spill] sm:$0xff] }
 0x947   : > { %9214 = vrot.lane.b32.xlu0 %v14113_v36, %s9895_s23  ;;  %9224 = vrot.lane.b32.xlu1 %v14201_v55, %s9897_s24  ;;  %vm2159_vm12 = vcmp.eq.f32.partialorder %v2158_v24, 8.507059e+37  ;;  %vm2169_vm13 = vweird.f32 %v18156_v45  ;;  %v2173_v17 = vand.u32 2147483647, %v18156_v45  ;;  %vm14243_vm15 = vmor %vm2139_vm5, %vm2140_vm3  ;;  %v5166_v39 = vsel %vm3641_vm7, %v5134_v1, %v18196_v16  ;;  %v18204_v36 = vld [vmem:[#allocation131_spill] sm:$0xff]  ;;  %v18212_v24 = vld [vmem:[#allocation241_spill] sm:$0xff] }
 0x948   : > { %v14249_v32 = vpop.permute.xlu2 %4902  ;;  %v2162_v0 = vsel %vm2159_vm12, %v2161_v27, %v2157_v18  ;;  %vm14253_vm1 = vmor %vm2169_vm13, %vm2170_vm4  ;;  %v2142_v45 = vsel %vm14243_vm15, %v14033_v13, %v2138_v9  ;;  %v2132_v14 = vsel %vm14163_vm14, %v14152_v23, %v2127_v44  ;;  %v2196_v49 = vsub.f32 1.0, %v2195_v37  ;;  %v18200_v44 = vld [vmem:[#allocation56_spill] sm:$0xff] }
 0x949   : > { %v4777_v48 = vpop.permute.xlu0 %4776  ;;  %v14266_v29 = vpop.permute.xlu1 %4898  ;;  %v2172_v27 = vsel %vm14253_vm1, %v14049_v56, %v2168_v22  ;;  %v2146_v18 = vor.u32 1.1754944e-38, %v2145_v43  ;;  %v14277_v13 = vsel %vm3608_vm6, %v13808_v38, %v8997_v47  ;;  %v14279_v23 = vpack.i.bf16 %v6314_v4, %v6313_v20  ;;  %v18202_v37 = vld [vmem:[#allocation308_spill] sm:$0xff]  ;;  %v6282_v56 = vld [vmem:[#allocation2 + $0x124] sm:$0xff] }
 0x94a   : > { %v14264_v2 = vsel %vm17499_vm8, %v5166_v39, %v4777_v48  ;;  %v14271_v1 = vpop.eup %9583  ;;  %18199 = vst [vmem:[#allocation68_spill] sm:$0xff] %v14277_v13  ;;  %v2176_v59 = vor.u32 1.1754944e-38, %v2175_v52  ;;  %vm2144_vm14 = vcmp.eq.f32.partialorder %v2143_v54, 8.507059e+37  ;;  %v14283_v9 = vsel %vm3608_vm6, %v18200_v44, %v8996_v10  ;;  %v18203_v43 = vld [vmem:[#allocation327_spill] sm:$0xff]  ;;  %v18207_v54 = vld [vmem:[#allocation181_spill] sm:$0xff]  ;;  %v18209_v10 = vld [vmem:[#allocation328_spill] sm:$0xff]  ;;  %v14303_v39 = vpop.f32.mrf.mxu2 }
 0x94b   : > { %18201 = vst [vmem:[#allocation126_spill] sm:$0xff] %v14283_v9  ;;  %9585 = vrcp.f32 %v18202_v37  ;;  %vm2174_vm2 = vcmp.eq.f32.partialorder %v2173_v17, 8.507059e+37  ;;  %v2147_v22 = vsel %vm2144_vm14, %v2146_v18, %v2142_v45  ;;  %v14288_v5 = vadd.f32 %v18204_v36, %v18203_v43  ;;  %v18205_v38 = vld [vmem:[#allocation115_spill] sm:$0xff]  ;;  %v9782_v48 = vld [vmem:[#allocation3 + $0xa8] sm:$0xff]  ;;  %v18216_v36 = vld [vmem:[#allocation188_spill] sm:$0xff] }
 0x94c   : > { %8683 = vmatmul.msk.f32.gmra.mxu2 %vm17494_vm0, %v6282_v56  ;;  %v14292_v47 = vmul.f32 %v2162_v0, %v18205_v38  ;;  %v2177_v52 = vsel %vm2174_vm2, %v2176_v59, %v2172_v27  ;;  %v14295_v20 = vmul.f32 %v2132_v14, %v18207_v54  ;;  %v18210_v4 = vld [vmem:[#allocation207_spill] sm:$0xff]  ;;  %v2180_v17 = vmul.f32 %v14271_v1, %v18191_v63  ;;  %v18213_v18 = vld [vmem:[#allocation329_spill] sm:$0xff] }
 0x94d   : > { %v14299_v16 = vadd.f32 %v18210_v4, %v18209_v10  ;;  %18211 = vst [vmem:[#allocation223_spill] sm:$0xff] %v14303_v39  ;;  %v5097_v45 = vsel %vm17494_vm0, %v9782_v48, %v18212_v24  ;;  %v2197_v0 = vmul.f32 %v14182_v19, %v2196_v49  ;;  %v18214_v27 = vld [vmem:[#allocation151_spill] sm:$0xff]  ;;  %v2203_v43 = vand.u32 2147483647, %v18173_v8  ;;  %v18219_v49 = vld [vmem:[#allocation246_spill] sm:$0xff]  ;;  %v18220_v4 = vld [vmem:[#allocation149_spill] sm:$0xff] }
 0x94e   : > { %18206 = vst [vmem:[#allocation162_spill] sm:$0xff] %v14292_v47  ;;  %v14310_v59 = vadd.f32 %v18214_v27, %v18213_v18  ;;  %v18215_v14 = vld [vmem:[#allocation183_spill] sm:$0xff]  ;;  %9249 = vrot.lane.b32.xlu2 %v14188_v15, %s9896_s18  ;;  %v14320_v38 = vmul.f32 %v2147_v22, %v18216_v36  ;;  %v9081_v48 = vunpack.i.l.bf16 %v18220_v4  ;;  %v18221_v24 = vld [vmem:[#allocation52_spill] sm:$0xff]  ;;  %v6347_v15 = vld [vmem:[#allocation2 + $0x13b] sm:$0xff]  ;;  %9587 = vrcp.f32 %v18224_v51 }
 0x94f   : > { %18208 = vst [vmem:[#allocation185_spill] sm:$0xff] %v14295_v20  ;;  %v5129_v44 = vsel %vm3608_vm6, %v5097_v45, %v18215_v14  ;;  %9229 = vrot.lane.b32.xlu0 %v14279_v23, %s18056_s21  ;;  %v18218_v54 = vld [vmem:[#allocation331_spill] sm:$0xff]  ;;  %9239 = vrot.lane.b32.xlu1 %v14201_v55, %s17972_s14  ;;  %v18222_v27 = vld [vmem:[#allocation184_spill] sm:$0xff]  ;;  %v2181_v20 = vsub.f32 1.0, %v2180_v17  ;;  %v2198_v28 = vadd.f32 %v14182_v19, %v2197_v0  ;;  %vm2200_vm3 = vweird.f32 %v14182_v19 }
 0x950   : > { %18217 = vst [vmem:[#allocation255_spill] sm:$0xff] %v14320_v38  ;;  %v14324_v10 = vadd.f32 %v18219_v49, %v18218_v54  ;;  %v5161_v45 = vsel %vm3641_vm7, %v5129_v44, %v18221_v24  ;;  %v6348_v18 = vld [vmem:[#allocation2 + $0x143] sm:$0xff]  ;;  %v14332_v14 = vmul.f32 %v2177_v52, %v18222_v27  ;;  %v14338_v49 = vpop.permute.xlu2 %5026  ;;  %v6283_v44 = vld [vmem:[#allocation2 + $0x12c] sm:$0xff]  ;;  %v2205_v24 = vand.u32 2147483648, %v18173_v8 }
 0x951   : > { %v18225_v22 = vld [vmem:[#allocation55_spill] sm:$0xff]  ;;  %v14340_v53 = vpop.permute.xlu0 %4900  ;;  %v14343_v55 = vpop.eup %9585  ;;  %v18227_v38 = vld [vmem:[#allocation62_spill] sm:$0xff]  ;;  %vm2199_vm4 = vweird.f32 %v18173_v8  ;;  %vm14353_vm5 = vcmp.eq.f32.partialorder %v2203_v43, 8.507059e+37  ;;  %v7359_v17 = vsel %vm3641_vm7, %v13999_v50, %v9081_v48  ;;  %v14362_v0 = vpack.i.bf16 %v6283_v44, %v6282_v56 }
 0x952   : > { %18223 = vst [vmem:[#allocation78_spill] sm:$0xff] %v14332_v14  ;;  %v9086_v36 = vunpack.i.l.bf16 %v18225_v22  ;;  %v18226_v39 = vld [vmem:[#allocation179_spill] sm:$0xff]  ;;  %v5023_v27 = vpop.permute.xlu1 %5022  ;;  %v18230_v14 = vld [vmem:[#allocation312_spill] sm:$0xff]  ;;  %v9783_v43 = vld [vmem:[#allocation3 + $0xb0] sm:$0xff]  ;;  %v2206_v48 = vor.u32 1.1754944e-38, %v2205_v24  ;;  %v14376_v56 = vpop.f32.mrf.mxu2  ;;  %v9096_v42 = vunpack.i.l.bf16 %v18238_v21  ;;  %vm2185_vm13 = vweird.f32 %v14271_v1 }
 0x953   : > { %v5193_v54 = vsel %vm17499_vm8, %v5161_v45, %v18226_v39  ;;  %v14350_v45 = vpack.i.bf16 %v6348_v18, %v6347_v15  ;;  %9589 = vrcp.f32 %v18230_v14  ;;  %v2210_v15 = vmul.f32 %v14343_v55, %v18202_v37  ;;  %v18232_v18 = vld [vmem:[#allocation61_spill] sm:$0xff]  ;;  %vm14372_vm12 = vmor %vm2199_vm4, %vm2200_vm3  ;;  %18235 = vst [vmem:[#allocation118_spill] sm:$0xff] %v14376_v56  ;;  %v18239_v24 = vld [vmem:[#allocation214_spill] sm:$0xff] }
 0x954   : > { %v5225_v52 = vsel %vm17497_vm9, %v5193_v54, %v18227_v38  ;;  %v18231_v38 = vld [vmem:[#allocation105_spill] sm:$0xff]  ;;  %v7391_v8 = vsel %vm17499_vm8, %v7359_v17, %v9086_v36  ;;  %8684 = vmatmul.msk.f32.gmra.mxu2 %vm17494_vm0, %v6283_v44  ;;  %v2202_v36 = vsel %vm14372_vm12, %v14182_v19, %v2198_v28  ;;  %v2182_v17 = vmul.f32 %v14271_v1, %v2181_v20  ;;  %v18240_v20 = vld [vmem:[#allocation111_spill] sm:$0xff] }
 0x955   : > { %v5257_v39 = vsel %vm17498_vm11, %v5225_v52, %v5023_v27  ;;  %v9091_v54 = vunpack.i.l.bf16 %v18231_v38  ;;  %v5098_v52 = vsel %vm17494_vm0, %v9783_v43, %v18232_v18  ;;  %v18236_v27 = vld [vmem:[#allocation108_spill] sm:$0xff]  ;;  %v2188_v44 = vand.u32 2147483647, %v18191_v63  ;;  %v14385_v43 = vpop.eup %9587  ;;  %v18237_v18 = vld [vmem:[#allocation313_spill] sm:$0xff] }
 0x956   : > { %8624 = vmatmul.msk.f32.gmra.mxu3 %vm3791_vm10, %v5257_v39  ;;  %v5130_v39 = vsel %vm3608_vm6, %v5098_v52, %v18236_v27  ;;  %9591 = vrcp.f32 %v18237_v18  ;;  %9264 = vrot.lane.b32.xlu2 %v14350_v45, %s18093_s17  ;;  %v2190_v28 = vand.u32 2147483648, %v18191_v63  ;;  %v9082_v19 = vunpack.i.h.bf16 %v18220_v4  ;;  %v6315_v27 = vld [vmem:[#allocation2 + $0x13a] sm:$0xff] }
 0x957   : > { %v5162_v56 = vsel %vm3641_vm7, %v5130_v39, %v18239_v24  ;;  %9244 = vrot.lane.b32.xlu0 %v14279_v23, %s9895_s23  ;;  %9254 = vrot.lane.b32.xlu1 %v14362_v0, %s9897_s24  ;;  %v7423_v50 = vsel %vm17497_vm9, %v7391_v8, %v9091_v54  ;;  %v6316_v39 = vld [vmem:[#allocation2 + $0x142] sm:$0xff]  ;;  %v2211_v24 = vsub.f32 1.0, %v2210_v15  ;;  %9593 = vrcp.f32 %v18241_v26 }
 0x958   : > { %v5194_v52 = vsel %vm17499_vm8, %v5162_v56, %v18240_v20  ;;  %v9087_v23 = vunpack.i.h.bf16 %v18225_v22  ;;  %v14407_v30 = vpop.permute.xlu2 %9099  ;;  %v2240_v54 = vmul.f32 %v14385_v43, %v18224_v51  ;;  %v2183_v6 = vadd.f32 %v14271_v1, %v2182_v17  ;;  %v6284_v17 = vld [vmem:[#allocation2 + $0x13c] sm:$0xff] }
 0x959   : > { %v5226_v4 = vsel %vm17497_vm9, %v5194_v52, %v18242_v12  ;;  %v5025_v56 = vpop.permute.xlu0 %5024  ;;  %v14409_v20 = vpop.eup %9589  ;;  %v9101_v8 = vunpack.i.l.bf16 %v14407_v30  ;;  %v7455_v22 = vsel %vm17498_vm11, %v7423_v50, %v9096_v42  ;;  %v14419_v13 = vpack.i.bf16 %v6316_v39, %v6315_v27 }
 0x95a   : > { %v5258_v46 = vsel %vm17498_vm11, %v5226_v4, %v5025_v56  ;;  %v14415_v15 = vpop.permute.xlu1 %9104  ;;  %v14423_v12 = vsel %vm14353_vm5, %v2206_v48, %v2202_v36  ;;  %vm2184_vm15 = vweird.f32 %v18191_v63  ;;  %v7360_v52 = vsel %vm3641_vm7, %v14009_v3, %v9082_v19  ;;  %v14448_v36 = vpop.f32.mrf.mxu2  ;;  %v18248_v19 = vld [vmem:[#allocation140_spill] sm:$0xff]  ;;  %v18249_v56 = vld [vmem:[#allocation213_spill] sm:$0xff] }
 0x95b   : > { %v9092_v25 = vunpack.i.h.bf16 %v18231_v38  ;;  %v7487_v4 = vsel %vm3791_vm10, %v7455_v22, %v9101_v8  ;;  %vm14431_vm1 = vcmp.eq.f32.partialorder %v2188_v44, 8.507059e+37  ;;  %v2225_v47 = vmul.f32 %v14409_v20, %v18230_v14  ;;  %vm14444_vm14 = vmor %vm2184_vm15, %vm2185_vm13  ;;  %18247 = vst [vmem:[#allocation165_spill] sm:$0xff] %v14448_v36  ;;  %v9784_v44 = vld [vmem:[#allocation3 + $0xb8] sm:$0xff]  ;;  %v6349_v22 = vld [vmem:[#allocation2 + $0x153] sm:$0xff] }
 0x95c   : > { %v14435_v50 = vpop.eup %9591  ;;  %v7392_v63 = vsel %vm17499_vm8, %v7360_v52, %v9087_v23  ;;  %7665 = vmatmul.f32.gmra.mxu1 %v7487_v4  ;;  %8685 = vmatmul.msk.f32.gmra.mxu2 %vm17494_vm0, %v6284_v17  ;;  %v2212_v3 = vmul.f32 %v14343_v55, %v2211_v24  ;;  %v2191_v38 = vor.u32 1.1754944e-38, %v2190_v28  ;;  %v2241_v48 = vsub.f32 1.0, %v2240_v54  ;;  %v6350_v52 = vld [vmem:[#allocation2 + $0x15b] sm:$0xff] }
 0x95d   : > { %v5099_v27 = vsel %vm17494_vm0, %v9784_v44, %v18248_v19  ;;  %vm2214_vm2 = vweird.f32 %v18202_v37  ;;  %v2187_v39 = vsel %vm14444_vm14, %v14271_v1, %v2183_v6  ;;  %v14456_v24 = vpop.eup %9593  ;;  %v9097_v23 = vunpack.i.h.bf16 %v18238_v21  ;;  %v18250_v1 = vld [vmem:[#allocation110_spill] sm:$0xff]  ;;  %v18252_v44 = vld [vmem:[#allocation107_spill] sm:$0xff] }
 0x95e   : > { %8625 = vmatmul.msk.f32.gmra.mxu3 %vm3791_vm10, %v5258_v46  ;;  %v5131_v28 = vsel %vm3608_vm6, %v5099_v27, %v18249_v56  ;;  %9279 = vrot.lane.b32.xlu2 %v14350_v45, %s9896_s18  ;;  %vm2215_vm3 = vweird.f32 %v14343_v55  ;;  %v2218_v54 = vand.u32 2147483647, %v18202_v37  ;;  %v2255_v6 = vmul.f32 %v14435_v50, %v18237_v18  ;;  %v18251_v46 = vld [vmem:[#allocation317_spill] sm:$0xff] }
 0x95f   : > { %9259 = vrot.lane.b32.xlu0 %v14419_v13, %s18056_s21  ;;  %v5163_v8 = vsel %vm3641_vm7, %v5131_v28, %v18250_v1  ;;  %v9102_v21 = vunpack.i.h.bf16 %v14407_v30  ;;  %9269 = vrot.lane.b32.xlu1 %v14362_v0, %s17972_s14  ;;  %v7424_v45 = vsel %vm17497_vm9, %v7392_v63, %v9092_v25  ;;  %v2226_v4 = vsub.f32 1.0, %v2225_v47  ;;  %v6285_v28 = vld [vmem:[#allocation2 + $0x144] sm:$0xff]  ;;  %vm14506_vm4 = vmor %vm2214_vm2, %vm2215_vm3 }
 0x960   : > { %9595 = vrcp.f32 %v18251_v46  ;;  %v5195_v19 = vsel %vm17499_vm8, %v5163_v8, %v18252_v44  ;;  %v14478_v27 = vpop.permute.xlu2 %9114  ;;  %v2213_v30 = vadd.f32 %v14343_v55, %v2212_v3  ;;  %v2285_v0 = vmul.f32 %v14456_v24, %v18241_v26 }
 0x961   : > { %v14480_v56 = vpop.permute.xlu0 %9109  ;;  %v5227_v25 = vsel %vm17497_vm9, %v5195_v19, %v14266_v29  ;;  %v2242_v47 = vmul.f32 %v14385_v43, %v2241_v48  ;;  %v2220_v1 = vand.u32 2147483648, %v18202_v37  ;;  %v7456_v3 = vsel %vm17498_vm11, %v7424_v45, %v9097_v23  ;;  %v18255_v37 = vld [vmem:[#allocation321_spill] sm:$0xff] }
 0x962   : > { %v4657_v63 = vpop.permute.xlu1 %4656  ;;  %v5259_v8 = vsel %vm17498_vm11, %v5227_v25, %v14338_v49  ;;  %v14496_v36 = vpack.i.bf16 %v6350_v52, %v6349_v22  ;;  %v2256_v9 = vsub.f32 1.0, %v2255_v6  ;;  %v7488_v29 = vsel %vm3791_vm10, %v7456_v3, %v9102_v21  ;;  %v14543_v25 = vpop.f32.mrf.mxu2 }
 0x963   : > { %v14493_v44 = vsel %vm3641_vm7, %v14109_v58, %v4657_v63  ;;  %v14500_v19 = vpack.i.bf16 %v6285_v28, %v6284_v17  ;;  %v2192_v58 = vsel %vm14431_vm1, %v2191_v38, %v2187_v39  ;;  %v2248_v48 = vand.u32 2147483647, %v18224_v51  ;;  %v18256_v38 = vld [vmem:[#allocation335_spill] sm:$0xff]  ;;  %v18257_v39 = vld [vmem:[#allocation104_spill] sm:$0xff]  ;;  %18263 = vst [vmem:[#allocation82_spill] sm:$0xff] %v14543_v25  ;;  %v6287_v25 = vld [vmem:[#allocation2 + $0x15c] sm:$0xff] }
 0x964   : > { %7668 = vmatmul.f32.gmra.mxu1 %v7488_v29  ;;  %v2250_v23 = vand.u32 2147483648, %v18224_v51  ;;  %v2227_v6 = vmul.f32 %v14409_v20, %v2226_v4  ;;  %v2217_v17 = vsel %vm14506_vm4, %v14343_v55, %v2213_v30  ;;  %v2286_v21 = vsub.f32 1.0, %v2285_v0  ;;  %8686 = vmatmul.msk.f32.gmra.mxu2 %vm17494_vm0, %v6285_v28  ;;  %v18261_v28 = vld [vmem:[#allocation93_spill] sm:$0xff]  ;;  %v18262_v30 = vld [vmem:[#allocation186_spill] sm:$0xff] }
 0x965   : > { %9597 = vrcp.f32 %v18255_v37  ;;  %v2243_v45 = vadd.f32 %v14385_v43, %v2242_v47  ;;  %vm2245_vm5 = vweird.f32 %v14385_v43  ;;  %v14526_v22 = vadd.f32 %v18257_v39, %v18256_v38  ;;  %v6317_v63 = vld [vmem:[#allocation2 + $0x152] sm:$0xff]  ;;  %v6318_v47 = vld [vmem:[#allocation2 + $0x15a] sm:$0xff] }
 0x966   : > { %8626 = vmatmul.msk.f32.gmra.mxu3 %vm3791_vm10, %v5259_v8  ;;  %v14522_v42 = vpop.eup %9595  ;;  %9294 = vrot.lane.b32.xlu2 %v14496_v36, %s18093_s17  ;;  %v14534_v55 = vmul.f32 %v14423_v12, %v13962_v57  ;;  %v2221_v52 = vor.u32 1.1754944e-38, %v2220_v1  ;;  %v14537_v4 = vmul.f32 %v2192_v58, %v13951_v7  ;;  %v14541_v0 = vadd.f32 %v18262_v30, %v18261_v28  ;;  %v18269_v39 = vld [vmem:[#allocation330_spill] sm:$0xff] }
 0x967   : > { %18258 = vst [vmem:[#allocation193_spill] sm:$0xff] %v14526_v22  ;;  %9274 = vrot.lane.b32.xlu0 %v14419_v13, %s9895_s23  ;;  %9284 = vrot.lane.b32.xlu1 %v14500_v19, %s9897_s24  ;;  %vm2244_vm12 = vweird.f32 %v18224_v51  ;;  %v2257_v57 = vmul.f32 %v14435_v50, %v2256_v9  ;;  %vm2219_vm13 = vcmp.eq.f32.partialorder %v2218_v54, 8.507059e+37  ;;  %vm14559_vm1 = vcmp.eq.f32.partialorder %v2248_v48, 8.507059e+37  ;;  %v14567_v54 = vpop.f32.mrf.mxu3  ;;  %v18268_v48 = vld [vmem:[#allocation238_spill] sm:$0xff] }
 0x968   : > { %18259 = vst [vmem:[#allocation218_spill] sm:$0xff] %v14534_v55  ;;  %v14549_v13 = vpop.permute.xlu2 %9129  ;;  %vm14555_vm15 = vmor %vm2244_vm12, %vm2245_vm5  ;;  %v2228_v8 = vadd.f32 %v14409_v20, %v2227_v6  ;;  %vm2230_vm14 = vweird.f32 %v14409_v20  ;;  %v2222_v51 = vsel %vm2219_vm13, %v2221_v52, %v2217_v17  ;;  %v2270_v9 = vmul.f32 %v14522_v42, %v18251_v46 }
 0x969   : > { %18260 = vst [vmem:[#allocation253_spill] sm:$0xff] %v14537_v4  ;;  %v14551_v7 = vpop.permute.xlu0 %9124  ;;  %v2287_v29 = vmul.f32 %v14456_v24, %v2286_v21  ;;  %v2247_v49 = vsel %vm14555_vm15, %v14385_v43, %v2243_v45  ;;  %v2251_v58 = vor.u32 1.1754944e-38, %v2250_v23  ;;  %9599 = vrcp.f32 %v18268_v48  ;;  %v6286_v21 = vld [vmem:[#allocation2 + $0x154] sm:$0xff] }
 0x96a   : > { %v14569_v3 = vpop.permute.xlu1 %4780  ;;  %v14576_v6 = vpack.i.bf16 %v6318_v47, %v6317_v63  ;;  %vm2229_vm2 = vweird.f32 %v18230_v14  ;;  %v2235_v17 = vand.u32 2147483648, %v18230_v14  ;;  %9601 = vrcp.f32 %v18269_v39  ;;  %v7648_v63 = vpop.f32.mrf.mxu1 }
 0x96b   : > { %v14580_v38 = vpop.eup %9597  ;;  %v2258_v52 = vadd.f32 %v14435_v50, %v2257_v57  ;;  %vm2260_vm3 = vweird.f32 %v14435_v50  ;;  %vm14587_vm4 = vmor %vm2229_vm2, %vm2230_vm14  ;;  %v2233_v23 = vand.u32 2147483647, %v18230_v14  ;;  %v2252_v45 = vsel %vm14559_vm1, %v2251_v58, %v2247_v49 }
 0x96c   : > { %vm2259_vm5 = vweird.f32 %v18237_v18  ;;  %v2265_v28 = vand.u32 2147483648, %v18237_v18  ;;  %v2232_v30 = vsel %vm14587_vm4, %v14409_v20, %v2228_v8  ;;  %v2271_v47 = vsub.f32 1.0, %v2270_v9  ;;  %8687 = vmatmul.msk.f32.gmra.mxu2 %vm17494_vm0, %v6286_v21  ;;  %v14619_v9 = vpop.f32.mrf.mxu2 }
 0x96d   : > { %v2288_v57 = vadd.f32 %v14456_v24, %v2287_v29  ;;  %vm2290_vm12 = vweird.f32 %v14456_v24  ;;  %v2263_v14 = vand.u32 2147483647, %v18237_v18  ;;  %v2300_v12 = vmul.f32 %v14580_v38, %v18255_v37  ;;  %vm14612_vm13 = vmor %vm2259_vm5, %vm2260_vm3  ;;  %18275 = vst [vmem:[#allocation154_spill] sm:$0xff] %v14619_v9  ;;  %v6352_v29 = vld [vmem:[#allocation2 + $0x173] sm:$0xff] }
 0x96e   : > { %9309 = vrot.lane.b32.xlu2 %v14496_v36, %s9896_s18  ;;  %v2295_v20 = vand.u32 2147483648, %v18241_v26  ;;  %v2236_v8 = vor.u32 1.1754944e-38, %v2235_v17  ;;  %v14617_v18 = vmul.f32 %v2222_v51, %v14013_v40  ;;  %v6351_v36 = vld [vmem:[#allocation2 + $0x16b] sm:$0xff]  ;;  %vm2289_vm15 = vweird.f32 %v18241_v26 }
 0x96f   : > { %9289 = vrot.lane.b32.xlu0 %v14576_v6, %s18056_s21  ;;  %9299 = vrot.lane.b32.xlu1 %v14500_v19, %s17972_s14  ;;  %v2293_v49 = vand.u32 2147483647, %v18241_v26  ;;  %v2262_v58 = vsel %vm14612_vm13, %v14435_v50, %v2258_v52  ;;  %vm2234_vm1 = vcmp.eq.f32.partialorder %v2233_v23, 8.507059e+37  ;;  %v14628_v17 = vpop.eup %9599  ;;  %v18276_v40 = vld [vmem:[#allocation175_spill] sm:$0xff]  ;;  %v18277_v51 = vld [vmem:[#allocation244_spill] sm:$0xff]  ;;  %vm14638_vm14 = vmor %vm2289_vm15, %vm2290_vm12  ;;  %v14643_v26 = vmul.f32 %v2252_v45, %v14053_v33  ;;  %v14647_v1 = vpop.f32.mrf.mxu3 }
 0x970   : > { %18274 = vst [vmem:[#allocation121_spill] sm:$0xff] %v14617_v18  ;;  %v14632_v43 = vadd.f32 %v18277_v51, %v18276_v40  ;;  %v14634_v9 = vpop.permute.xlu2 %9144  ;;  %v2266_v50 = vor.u32 1.1754944e-38, %v2265_v28  ;;  %v2237_v52 = vsel %vm2234_vm1, %v2236_v8, %v2232_v30  ;;  %v14645_v23 = vpop.eup %9601  ;;  %v2292_v55 = vsel %vm14638_vm14, %v14456_v24, %v2288_v57  ;;  %v14664_v8 = vld [vmem:[%s17348_s12] ss:$0 sm:$0xff] }
 0x971   : > { %v4659_v19 = vpop.permute.xlu0 %4658  ;;  %18281 = vst [vmem:[#allocation226_spill] sm:$0xff] %v14643_v26  ;;  %v2272_v18 = vmul.f32 %v14522_v42, %v2271_v47  ;;  %vm2264_vm2 = vcmp.eq.f32.partialorder %v2263_v14, 8.507059e+37  ;;  %v2301_v33 = vsub.f32 1.0, %v2300_v12  ;;  %v14659_v45 = vpack.i.bf16 %v6352_v29, %v6351_v36  ;;  %v18284_v12 = vld [vmem:[#allocation51_spill] sm:$0xff] }
 0x972   : > { %18278 = vst [vmem:[#allocation198_spill] sm:$0xff] %v14632_v43  ;;  %v14651_v40 = vsel %vm3641_vm7, %v14020_v61, %v4659_v19  ;;  %v14653_v51 = vpop.permute.xlu1 %4904  ;;  %v2296_v28 = vor.u32 1.1754944e-38, %v2295_v20  ;;  %v2267_v30 = vsel %vm2264_vm2, %v2266_v50, %v2262_v58  ;;  %v2330_v61 = vmul.f32 %v14628_v17, %v18268_v48  ;;  %v18283_v19 = vld [vmem:[#allocation237_spill] sm:$0xff]  ;;  %v18291_v50 = vld [vmem:[#allocation160_spill] sm:$0xff] }
 0x973   : > { %18282 = vst [vmem:[#allocation251_spill] sm:$0xff] %v14651_v40  ;;  %9603 = vrcp.f32 %v18283_v19  ;;  %v14669_v4 = vpack.i.bf16 %v6287_v25, %v6286_v21  ;;  %vm2294_vm3 = vcmp.eq.f32.partialorder %v2293_v49, 8.507059e+37  ;;  %v2315_v24 = vmul.f32 %v14645_v23, %v18269_v39  ;;  %v18285_v20 = vld [vmem:[#allocation189_spill] sm:$0xff]  ;;  %v18288_v49 = vld [vmem:[#allocation242_spill] sm:$0xff] }
 0x974   : > { %v2297_v47 = vsel %vm2294_vm3, %v2296_v28, %v2292_v55  ;;  %v2278_v57 = vand.u32 2147483647, %v18251_v46  ;;  %v2280_v14 = vand.u32 2147483648, %v18251_v46  ;;  %v14677_v36 = vadd.f32 %v18285_v20, %v18284_v12  ;;  %8688 = vmatmul.msk.f32.gmra.mxu2 %vm17494_vm0, %v6287_v25  ;;  %v18290_v55 = vld [vmem:[#allocation102_spill] sm:$0xff]  ;;  %v6319_v20 = vld [vmem:[#allocation2 + $0x16a] sm:$0xff] }
 0x975   : > { %v2273_v29 = vadd.f32 %v14522_v42, %v2272_v18  ;;  %vm2275_vm4 = vweird.f32 %v14522_v42  ;;  %v14683_v21 = vmul.f32 %v2237_v52, %v14037_v35  ;;  %v14686_v58 = vperm.slane %v18288_v49, 0  ;;  %v7651_v52 = vpop.f32.mrf.mxu1  ;;  %v6320_v49 = vld [vmem:[#allocation2 + $0x172] sm:$0xff] }
 0x976   : > { %18286 = vst [vmem:[#allocation72_spill] sm:$0xff] %v14677_v36  ;;  %v14690_v28 = vadd.f32 %v18291_v50, %v18290_v55  ;;  %9324 = vrot.lane.b32.xlu2 %v14659_v45, %s18093_s17  ;;  %v2302_v25 = vmul.f32 %v14580_v38, %v2301_v33  ;;  %v14698_v18 = vmul.f32 %v2267_v30, %v14135_v60  ;;  %v2331_v12 = vsub.f32 1.0, %v2330_v61  ;;  %v18296_v33 = vld [vmem:[#allocation159_spill] sm:$0xff] }
 0x977   : > { %18287 = vst [vmem:[#allocation128_spill] sm:$0xff] %v14683_v21  ;;  %9304 = vrot.lane.b32.xlu0 %v14576_v6, %s9895_s23  ;;  %v14701_v35 = vadd.f32 %v14664_v8, %v7648_v63  ;;  %9314 = vrot.lane.b32.xlu1 %v14669_v4, %s9897_s24  ;;  %v14706_v55 = vmul.f32 %v2297_v47, %v14288_v5  ;;  %vm2274_vm5 = vweird.f32 %v18251_v46  ;;  %v18295_v6 = vld [vmem:[#allocation177_spill] sm:$0xff]  ;;  %v2316_v60 = vsub.f32 1.0, %v2315_v24  ;;  %v18303_v24 = vld [vmem:[#allocation216_spill] sm:$0xff] }
 0x978   : > { %18289 = vst [vmem:[#allocation164_spill] sm:$0xff] %v14686_v58  ;;  %v14711_v50 = vadd.f32 %v18296_v33, %v18295_v6  ;;  %v14713_v30 = vpop.permute.xlu2 %9159  ;;  %vm14719_vm12 = vmor %vm2274_vm5, %vm2275_vm4  ;;  %vm14723_vm13 = vcmp.eq.f32.partialorder %v2278_v57, 8.507059e+37  ;;  %v2281_v46 = vor.u32 1.1754944e-38, %v2280_v14  ;;  %v14729_v6 = vpop.f32.mrf.mxu2  ;;  %v5228_v33 = vsel %vm17497_vm9, %v18303_v24, %v14340_v53 }
 0x979   : > { %18292 = vst [vmem:[#allocation187_spill] sm:$0xff] %v14698_v18  ;;  %v14715_v63 = vpop.permute.xlu0 %4782  ;;  %v14727_v47 = vpop.eup %9603  ;;  %v2308_v21 = vand.u32 2147483647, %v18255_v37  ;;  %v2310_v26 = vand.u32 2147483648, %v18255_v37  ;;  %v2277_v57 = vsel %vm14719_vm12, %v14522_v42, %v2273_v29  ;;  %v14740_v14 = vpack.i.bf16 %v6320_v49, %v6319_v20  ;;  %v18305_v29 = vld [vmem:[#allocation148_spill] sm:$0xff]  ;;  %v18306_v20 = vld [vmem:[#allocation234_spill] sm:$0xff] }
 0x97a   : > { %18293 = vst [vmem:[#allocation225_spill] sm:$0xff] %v14701_v35  ;;  %v5029_v35 = vpop.permute.xlu1 %5028  ;;  %vm2305_vm15 = vweird.f32 %v14580_v38  ;;  %v14747_v53 = vadd.f32 %v14664_v8, %v7651_v52  ;;  %v2332_v24 = vmul.f32 %v14628_v17, %v2331_v12  ;;  %v9106_v58 = vunpack.i.l.bf16 %v14415_v15 }
 0x97b   : > { %18294 = vst [vmem:[#allocation258_spill] sm:$0xff] %v14706_v55  ;;  %v5260_v18 = vsel %vm17498_vm11, %v5228_v33, %v5029_v35  ;;  %v14743_v55 = vadd.f32 %v14580_v38, %v2302_v25  ;;  %vm2304_vm1 = vweird.f32 %v18255_v37  ;;  %v2375_v42 = vmul.f32 %v14727_v47, %v18283_v19  ;;  %v6288_v35 = vld [vmem:[#allocation2 + $0x16c] sm:$0xff] }
 0x97c   : > { %18297 = vst [vmem:[#allocation84_spill] sm:$0xff] %v14711_v50  ;;  %8627 = vmatmul.msk.f32.gmra.mxu3 %vm3791_vm10, %v5260_v18  ;;  %9605 = vrcp.f32 %v18305_v29  ;;  %v9111_v25 = vunpack.i.l.bf16 %v14480_v56  ;;  %v2317_v52 = vmul.f32 %v14645_v23, %v2316_v60  ;;  %v14762_v12 = vadd.f32 %v14045_v31, %v18306_v20  ;;  %8689 = vmatmul.msk.f32.gmra.mxu2 %vm17494_vm0, %v6288_v35  ;;  %vm14769_vm14 = vmor %vm2304_vm1, %vm2305_vm15  ;;  %v6354_v20 = vld [vmem:[#allocation2 + $0x18b] sm:$0xff] }
 0x97d   : > { %18302 = vst [vmem:[#allocation120_spill] sm:$0xff] %v14729_v6  ;;  %v14750_v6 = vpop.f32.mrf.mxu3  ;;  %v2340_v49 = vand.u32 2147483648, %v18268_v48  ;;  %v2338_v37 = vand.u32 2147483647, %v18268_v48  ;;  %v14775_v61 = vsel %vm14723_vm13, %v2281_v46, %v2277_v57  ;;  %vm2334_vm2 = vweird.f32 %v18268_v48  ;;  %v14791_v46 = vpop.f32.mrf.mxu1  ;;  %v6353_v57 = vld [vmem:[#allocation2 + $0x183] sm:$0xff] }
 0x97e   : > { %18304 = vst [vmem:[#allocation167_spill] sm:$0xff] %v14747_v53  ;;  %9339 = vrot.lane.b32.xlu2 %v14659_v45, %s9896_s18  ;;  %vm2335_vm3 = vweird.f32 %v14628_v17  ;;  %v2307_v31 = vsel %vm14769_vm14, %v14580_v38, %v14743_v55  ;;  %vm14787_vm4 = vcmp.eq.f32.partialorder %v2308_v21, 8.507059e+37  ;;  %v2311_v5 = vor.u32 1.1754944e-38, %v2310_v26  ;;  %v18312_v21 = vld [vmem:[#allocation176_spill] sm:$0xff] }
 0x97f   : > { %18307 = vst [vmem:[#allocation196_spill] sm:$0xff] %v14762_v12  ;;  %9319 = vrot.lane.b32.xlu0 %v14740_v14, %s18056_s21  ;;  %v7361_v45 = vsel %vm3641_vm7, %v13985_v11, %v9106_v58  ;;  %v9116_v33 = vunpack.i.l.bf16 %v14478_v27  ;;  %9329 = vrot.lane.b32.xlu1 %v14669_v4, %s17972_s14  ;;  %v2333_v18 = vadd.f32 %v14628_v17, %v2332_v24  ;;  %vm2320_vm5 = vweird.f32 %v14645_v23  ;;  %v6289_v11 = vld [vmem:[#allocation2 + $0x174] sm:$0xff]  ;;  %vm14822_vm15 = vmor %vm2334_vm2, %vm2335_vm3 }
 0x980   : > { %v2376_v38 = vsub.f32 1.0, %v2375_v42  ;;  %9607 = vrcp.f32 %v18312_v21  ;;  %v7393_v26 = vsel %vm17499_vm8, %v7361_v45, %v9111_v25  ;;  %v14802_v55 = vpop.permute.xlu2 %9174  ;;  %v2318_v58 = vadd.f32 %v14645_v23, %v2317_v52 }
 0x981   : > { %v14804_v12 = vpop.permute.xlu0 %4906  ;;  %v2341_v53 = vor.u32 1.1754944e-38, %v2340_v49  ;;  %v9107_v4 = vunpack.i.h.bf16 %v14415_v15  ;;  %vm14808_vm12 = vcmp.eq.f32.partialorder %v2338_v37, 8.507059e+37  ;;  %vm2319_vm13 = vweird.f32 %v18269_v39  ;;  %v14827_v49 = vpop.f32.mrf.mxu2 }
 0x982   : > { %v9120_v36 = vpop.permute.xlu1 %9119  ;;  %v14813_v42 = vpop.eup %9605  ;;  %v9112_v25 = vunpack.i.h.bf16 %v14480_v56  ;;  %v14816_v50 = vpack.i.bf16 %v6354_v20, %v6353_v57  ;;  %v2325_v52 = vand.u32 2147483648, %v18269_v39  ;;  %18317 = vst [vmem:[#allocation221_spill] sm:$0xff] %v14827_v49  ;;  %v9126_v40 = vunpack.i.l.bf16 %v14551_v7  ;;  %vm14837_vm1 = vmor %vm2319_vm13, %vm2320_vm5 }
 0x983   : > { %v9121_v45 = vunpack.i.l.bf16 %v9120_v36  ;;  %v7425_v56 = vsel %vm17497_vm9, %v7393_v26, %v9116_v33  ;;  %v14833_v57 = vpack.i.bf16 %v6289_v11, %v6288_v35  ;;  %v2323_v20 = vand.u32 2147483647, %v18269_v39 }
 0x984   : > { %v2337_v49 = vsel %vm14822_vm15, %v14628_v17, %v2333_v18  ;;  %v2322_v33 = vsel %vm14837_vm1, %v14645_v23, %v2318_v58  ;;  %v2377_v35 = vmul.f32 %v14727_v47, %v2376_v38  ;;  %v2420_v26 = vmul.f32 %v14813_v42, %v18305_v29  ;;  %8690 = vmatmul.msk.f32.gmra.mxu2 %vm17494_vm0, %v6289_v11  ;;  %v18320_v17 = vld [vmem:[#allocation243_spill] sm:$0xff] }
 0x985   : > { %v14829_v37 = vpop.f32.mrf.mxu3  ;;  %v7457_v43 = vsel %vm17498_vm11, %v7425_v56, %v9121_v45  ;;  %v7362_v22 = vsel %vm3641_vm7, %v13976_v34, %v9107_v4  ;;  %v9117_v39 = vunpack.i.h.bf16 %v14478_v27  ;;  %9609 = vrcp.f32 %v18320_v17  ;;  %v6322_v11 = vld [vmem:[#allocation2 + $0x18a] sm:$0xff]  ;;  %v7657_v60 = vpop.f32.mrf.mxu1 }
 0x986   : > { %v7489_v45 = vsel %vm3791_vm10, %v7457_v43, %v9126_v40  ;;  %v14857_v15 = vpop.eup %9607  ;;  %v7394_v23 = vsel %vm17499_vm8, %v7362_v22, %v9112_v25  ;;  %v9122_v18 = vunpack.i.h.bf16 %v9120_v36  ;;  %9354 = vrot.lane.b32.xlu2 %v14816_v50, %s18093_s17  ;;  %v2326_v38 = vor.u32 1.1754944e-38, %v2325_v52 }
 0x987   : > { %7671 = vmatmul.f32.gmra.mxu1 %v7489_v45  ;;  %9334 = vrot.lane.b32.xlu0 %v14740_v14, %s9895_s23  ;;  %v2342_v34 = vsel %vm14808_vm12, %v2341_v53, %v2337_v49  ;;  %vm2324_vm14 = vcmp.eq.f32.partialorder %v2323_v20, 8.507059e+37  ;;  %v2312_v27 = vsel %vm14787_vm4, %v2311_v5, %v2307_v31  ;;  %v14873_v22 = vmul.f32 %v14775_v61, %v14139_v62  ;;  %v6321_v14 = vld [vmem:[#allocation2 + $0x182] sm:$0xff] }
 0x988   : > { %9344 = vrot.lane.b32.xlu1 %v14833_v57, %s9897_s24  ;;  %v5229_v43 = vsel %vm17497_vm9, %v14186_v41, %v14249_v32  ;;  %v14878_v40 = vpop.permute.xlu2 %9189  ;;  %v2327_v58 = vsel %vm2324_vm14, %v2326_v38, %v2322_v33  ;;  %v2378_v53 = vadd.f32 %v14727_v47, %v2377_v35  ;;  %vm2380_vm2 = vweird.f32 %v14727_v47  ;;  %v6290_v33 = vld [vmem:[#allocation2 + $0x184] sm:$0xff] }
 0x989   : > { %v5031_v36 = vpop.permute.xlu0 %5030  ;;  %v2421_v31 = vsub.f32 1.0, %v2420_v26  ;;  %v2360_v62 = vmul.f32 %v14857_v15, %v18312_v21  ;;  %v7426_v41 = vsel %vm17497_vm9, %v7394_v23, %v9117_v39  ;;  %v14891_v4 = vmul.f32 %v2342_v34, %v14324_v10  ;;  %v14923_v39 = vpop.f32.mrf.mxu2  ;;  %v18325_v23 = vld [vmem:[#allocation180_spill] sm:$0xff] }
 0x98a   : > { %v5261_v61 = vsel %vm17498_vm11, %v5229_v43, %v5031_v36  ;;  %v14885_v5 = vpop.permute.xlu1 %9134  ;;  %v7458_v32 = vsel %vm17498_vm11, %v7426_v41, %v9122_v18  ;;  %v14894_v24 = vmul.f32 %v2312_v27, %v14299_v16  ;;  %v2385_v25 = vand.u32 2147483648, %v18283_v19  ;;  %18324 = vst [vmem:[#allocation86_spill] sm:$0xff] %v14923_v39  ;;  %v18326_v43 = vld [vmem:[#allocation49_spill] sm:$0xff] }
 0x98b   : > { %8628 = vmatmul.msk.f32.gmra.mxu3 %vm3791_vm10, %v5261_v61  ;;  %v9127_v49 = vunpack.i.h.bf16 %v14551_v7  ;;  %v14900_v56 = vpack.i.bf16 %v6322_v11, %v6321_v14  ;;  %vm2379_vm3 = vweird.f32 %v18283_v19  ;;  %v2383_v48 = vand.u32 2147483647, %v18283_v19  ;;  %v14904_v20 = vpop.eup %9609  ;;  %v6355_v36 = vld [vmem:[#allocation2 + $0x19b] sm:$0xff]  ;;  %v6291_v14 = vld [vmem:[#allocation2 + $0x18c] sm:$0xff] }
 0x98c   : > { %18321 = vst [vmem:[#allocation256_spill] sm:$0xff] %v14904_v20  ;;  %v14908_v10 = vadd.f32 %v14664_v8, %v14791_v46  ;;  %v14911_v16 = vadd.f32 %v14664_v8, %v7657_v60  ;;  %v14914_v35 = vmul.f32 %v2327_v58, %v14310_v59  ;;  %v2428_v7 = vand.u32 2147483647, %v18305_v29  ;;  %vm14919_vm4 = vmor %vm2379_vm3, %vm2380_vm2  ;;  %8691 = vmatmul.msk.f32.gmra.mxu2 %vm17494_vm0, %v6290_v33  ;;  %v15058_v61 = vld [vmem:[%s17346_s10] ss:$0 sm:$0xff] }
 0x98d   : > { %v14897_v52 = vpop.f32.mrf.mxu3  ;;  %v2361_v19 = vsub.f32 1.0, %v2360_v62  ;;  %v7490_v46 = vsel %vm3791_vm10, %v7458_v32, %v9127_v49  ;;  %v2422_v45 = vmul.f32 %v14813_v42, %v2421_v31  ;;  %v2382_v59 = vsel %vm14919_vm4, %v14727_v47, %v2378_v53  ;;  %v18327_v31 = vld [vmem:[#allocation281_spill] sm:$0xff]  ;;  %v18330_v32 = vld [vmem:[#allocation126_spill] sm:$0xff] }
 0x98e   : > { %9611 = vrcp.f32 %v18325_v23  ;;  %v9131_v18 = vunpack.i.l.bf16 %v14549_v13  ;;  %v5230_v38 = vsel %vm17497_vm9, %v14264_v2, %v14653_v51  ;;  %9369 = vrot.lane.b32.xlu2 %v14816_v50, %s9896_s18  ;;  %v2386_v34 = vor.u32 1.1754944e-38, %v2385_v25  ;;  %v6356_v2 = vld [vmem:[#allocation2 + $0x1a3] sm:$0xff] }
 0x98f   : > { %7674 = vmatmul.f32.gmra.mxu1 %v7490_v46  ;;  %v2465_v27 = vmul.f32 %v14904_v20, %v18320_v17  ;;  %9613 = vrcp.f32 %v18326_v43  ;;  %v9136_v47 = vunpack.i.l.bf16 %v14885_v5  ;;  %9349 = vrot.lane.b32.xlu0 %v14900_v56, %s18056_s21  ;;  %vm2384_vm5 = vcmp.eq.f32.partialorder %v2383_v48, 8.507059e+37 }
 0x990   : > { %9359 = vrot.lane.b32.xlu1 %v14833_v57, %s17972_s14  ;;  %v14946_v51 = vpop.permute.xlu2 %9204  ;;  %vm2424_vm12 = vweird.f32 %v18305_v29  ;;  %vm2425_vm13 = vweird.f32 %v14813_v42  ;;  %v2430_v11 = vand.u32 2147483648, %v18305_v29  ;;  %v2387_v58 = vsel %vm2384_vm5, %v2386_v34, %v2382_v59 }
 0x991   : > { %v9140_v50 = vpop.permute.xlu0 %9139  ;;  %v9146_v53 = vunpack.i.l.bf16 %v14634_v9  ;;  %v5262_v57 = vsel %vm17498_vm11, %v5230_v38, %v18327_v31  ;;  %v2423_v62 = vadd.f32 %v14813_v42, %v2422_v45  ;;  %vm14957_vm15 = vcmp.eq.f32.partialorder %v2428_v7, 8.507059e+37  ;;  %vm14997_vm1 = vmor %vm2424_vm12, %vm2425_vm13 }
 0x992   : > { %v14952_v60 = vpop.permute.xlu1 %9149  ;;  %v2362_v41 = vmul.f32 %v14857_v15, %v2361_v19  ;;  %v7363_v25 = vsel %vm3641_vm7, %v18330_v32, %v9131_v18  ;;  %v9141_v49 = vunpack.i.l.bf16 %v9140_v50  ;;  %v14966_v26 = vpack.i.bf16 %v6356_v2, %v6355_v36  ;;  %v18332_v2 = vld [vmem:[#allocation195_spill] sm:$0xff] }
 0x993   : > { %v9151_v48 = vunpack.i.l.bf16 %v14952_v60  ;;  %8629 = vmatmul.msk.f32.gmra.mxu3 %vm3791_vm10, %v5262_v57  ;;  %v2466_v46 = vsub.f32 1.0, %v2465_v27  ;;  %v9132_v59 = vunpack.i.h.bf16 %v14549_v13  ;;  %v7395_v7 = vsel %vm17499_vm8, %v7363_v25, %v9136_v47 }
 0x994   : > { %v14970_v45 = vpack.i.bf16 %v6291_v14, %v6290_v33  ;;  %v14972_v38 = vpop.eup %9611  ;;  %v2475_v19 = vand.u32 2147483648, %v18320_v17  ;;  %v9137_v18 = vunpack.i.h.bf16 %v14885_v5  ;;  %v7427_v34 = vsel %vm17497_vm9, %v7395_v7, %v9141_v49  ;;  %8692 = vmatmul.msk.f32.gmra.mxu2 %vm17494_vm0, %v6291_v14 }
 0x995   : > { %v2431_v31 = vor.u32 1.1754944e-38, %v2430_v11  ;;  %v14977_v32 = vpop.eup %9613  ;;  %v14979_v36 = vpop.f32.mrf.mxu3  ;;  %v9142_v27 = vunpack.i.h.bf16 %v9140_v50  ;;  %v7459_v13 = vsel %vm17498_vm11, %v7427_v34, %v9146_v53  ;;  %v14984_v33 = vmul.f32 %v2387_v58, %v14541_v0  ;;  %v18335_v58 = vld [vmem:[#allocation68_spill] sm:$0xff]  ;;  %v18340_v50 = vld [vmem:[#allocation222_spill] sm:$0xff] }
 0x996   : > { %v5231_v5 = vsel %vm17497_vm9, %v18332_v2, %v14804_v12  ;;  %9384 = vrot.lane.b32.xlu2 %v14966_v26, %s18093_s17  ;;  %v7491_v11 = vsel %vm3791_vm10, %v7459_v13, %v9151_v48  ;;  %v2363_v0 = vadd.f32 %v14857_v15, %v2362_v41  ;;  %vm2365_vm14 = vweird.f32 %v14857_v15  ;;  %v15004_v12 = vpop.f32.mrf.mxu2 }
 0x997   : > { %18331 = vst [vmem:[#allocation125_spill] sm:$0xff] %v14984_v33  ;;  %v2467_v14 = vmul.f32 %v14904_v20, %v2466_v46  ;;  %v7364_v53 = vsel %vm3641_vm7, %v18335_v58, %v9132_v59  ;;  %9364 = vrot.lane.b32.xlu0 %v14900_v56, %s9895_s23  ;;  %v2427_v29 = vsel %vm14997_vm1, %v14813_v42, %v2423_v62  ;;  %vm2364_vm2 = vweird.f32 %v18312_v21  ;;  %v6323_v46 = vld [vmem:[#allocation2 + $0x19a] sm:$0xff]  ;;  %v6324_v59 = vld [vmem:[#allocation2 + $0x1a2] sm:$0xff] }
 0x998   : > { %9374 = vrot.lane.b32.xlu1 %v14970_v45, %s9897_s24  ;;  %v2390_v57 = vmul.f32 %v14972_v38, %v18325_v23  ;;  %v2435_v41 = vmul.f32 %v14977_v32, %v18326_v43  ;;  %v9147_v25 = vunpack.i.h.bf16 %v14634_v9  ;;  %v7396_v49 = vsel %vm17499_vm8, %v7364_v53, %v9137_v18  ;;  %7677 = vmatmul.f32.gmra.mxu1 %v7491_v11  ;;  %v15022_v56 = vpop.permute.xlu2 %9219  ;;  %v18336_v62 = vld [vmem:[#allocation278_spill] sm:$0xff]  ;;  %vm15033_vm3 = vmor %vm2364_vm2, %vm2365_vm14  ;;  %v15213_v33 = vld [vmem:[#allocation2 + $0x1b4] sm:$0xff] }
 0x999   : > { %v15024_v48 = vpop.permute.xlu0 %9154  ;;  %v5263_v7 = vsel %vm17498_vm11, %v5231_v5, %v18336_v62  ;;  %v7428_v34 = vsel %vm17497_vm9, %v7396_v49, %v9142_v27  ;;  %v2368_v18 = vand.u32 2147483647, %v18312_v21  ;;  %v2370_v13 = vand.u32 2147483648, %v18312_v21 }
 0x99a   : > { %v15026_v42 = vpop.permute.xlu1 %9164  ;;  %v15039_v2 = vor.u32 1.1754944e-38, %v2475_v19  ;;  %v9156_v11 = vunpack.i.l.bf16 %v15024_v48  ;;  %v2432_v5 = vsel %vm14957_vm15, %v2431_v31, %v2427_v29  ;;  %v2367_v27 = vsel %vm15033_vm3, %v14857_v15, %v2363_v0  ;;  %v18341_v31 = vld [vmem:[#allocation250_spill] sm:$0xff] }
 0x99b   : > { %8630 = vmatmul.msk.f32.gmra.mxu3 %vm3791_vm10, %v5263_v7  ;;  %v5200_v58 = vsel %vm17499_vm8, %v18340_v50, %v14569_v3  ;;  %v9161_v53 = vunpack.i.l.bf16 %v14713_v30  ;;  %v9152_v21 = vunpack.i.h.bf16 %v14952_v60  ;;  %v15053_v19 = vpack.i.bf16 %v6324_v59, %v6323_v46  ;;  %v6292_v29 = vld [vmem:[#allocation2 + $0x19c] sm:$0xff]  ;;  %v18344_v59 = vld [vmem:[#allocation276_spill] sm:$0xff] }
 0x99c   : > { %18339 = vst [vmem:[#allocation158_spill] sm:$0xff] %v15039_v2  ;;  %v2391_v49 = vsub.f32 1.0, %v2390_v57  ;;  %v2436_v62 = vsub.f32 1.0, %v2435_v41  ;;  %v7365_v15 = vsel %vm3641_vm7, %v18341_v31, %v9156_v11  ;;  %v7460_v0 = vsel %vm17498_vm11, %v7428_v34, %v9147_v25  ;;  %8693 = vmatmul.msk.f32.gmra.mxu2 %vm17494_vm0, %v6292_v29  ;;  %v6358_v34 = vld [vmem:[#allocation2 + $0x1bb] sm:$0xff] }
 0x99d   : > { %v15063_v3 = vpop.f32.mrf.mxu3  ;;  %v15067_v60 = vmul.f32 %v2432_v5, %v14690_v28  ;;  %vm2369_vm4 = vcmp.eq.f32.partialorder %v2368_v18, 8.507059e+37  ;;  %v2371_v57 = vor.u32 1.1754944e-38, %v2370_v13  ;;  %v15070_v41 = vadd.f32 %v14904_v20, %v2467_v14  ;;  %v6357_v14 = vld [vmem:[#allocation2 + $0x1b3] sm:$0xff] }
 0x99e   : > { %vm2394_vm5 = vweird.f32 %v18325_v23  ;;  %v2400_v46 = vand.u32 2147483648, %v18325_v23  ;;  %v5232_v25 = vsel %vm17497_vm9, %v5200_v58, %v18344_v59  ;;  %v9166_v7 = vunpack.i.l.bf16 %v15026_v42  ;;  %9399 = vrot.lane.b32.xlu2 %v14966_v26, %s9896_s18  ;;  %v18345_v5 = vld [vmem:[#allocation209_spill] sm:$0xff] }
 0x99f   : > { %18342 = vst [vmem:[#allocation200_spill] sm:$0xff] %v15067_v60  ;;  %9379 = vrot.lane.b32.xlu0 %v15053_v19, %s18056_s21  ;;  %v7492_v28 = vsel %vm3791_vm10, %v7460_v0, %v9152_v21  ;;  %v7397_v9 = vsel %vm17499_vm8, %v7365_v15, %v9161_v53  ;;  %v2398_v18 = vand.u32 2147483647, %v18325_v23  ;;  %v15086_v13 = vsel %vm2369_vm4, %v2371_v57, %v2367_v27  ;;  %v6293_v21 = vld [vmem:[#allocation2 + $0x1a4] sm:$0xff]  ;;  %v15097_v53 = vpop.f32.mrf.mxu2  ;;  %v18346_v15 = vld [vmem:[#allocation277_spill] sm:$0xff]  ;;  %v18425_v60 = vld [vmem:[#allocation192_spill] sm:$0xff] }
 0x9a0   : > { %18343 = vst [vmem:[#allocation229_spill] sm:$0xff] %v15070_v41  ;;  %9389 = vrot.lane.b32.xlu1 %v14970_v45, %s17972_s14  ;;  %v2392_v11 = vmul.f32 %v14972_v38, %v2391_v49  ;;  %v2437_v26 = vmul.f32 %v14977_v32, %v2436_v62  ;;  %9615 = vrcp.f32 %v18345_v5  ;;  %v5400_v50 = vadd.f32 %v15058_v61, %v14567_v54  ;;  %v15093_v45 = vpop.permute.xlu2 %9234  ;;  %v6326_v23 = vld [vmem:[#allocation2 + $0x1ba] sm:$0xff]  ;;  %v18373_v41 = vld [vmem:[#allocation251_spill] sm:$0xff] }
 0x9a1   : > { %7680 = vmatmul.f32.gmra.mxu1 %v7492_v28  ;;  %v15095_v58 = vpop.permute.xlu0 %9169  ;;  %v9176_v27 = vunpack.i.l.bf16 %v14802_v55  ;;  %v9157_v31 = vunpack.i.h.bf16 %v15024_v48  ;;  %v5264_v0 = vsel %vm17498_vm11, %v5232_v25, %v18346_v15  ;;  %vm2470_vm12 = vweird.f32 %v14904_v20  ;;  %v18347_v48 = vld [vmem:[#allocation215_spill] sm:$0xff] }
 0x9a2   : > { %v9171_v49 = vunpack.i.l.bf16 %v15095_v58  ;;  %v15102_v62 = vpop.permute.xlu1 %9179  ;;  %v15107_v54 = vor.u32 1.1754944e-38, %v2400_v46  ;;  %v2445_v57 = vand.u32 2147483648, %v18326_v43  ;;  %v15111_v59 = vpack.i.bf16 %v6358_v34, %v6357_v14  ;;  %v18348_v34 = vld [vmem:[#allocation76_spill] sm:$0xff] }
 0x9a3   : > { %8631 = vmatmul.msk.f32.gmra.mxu3 %vm3791_vm10, %v5264_v0  ;;  %v7429_v28 = vsel %vm17497_vm9, %v7397_v9, %v9166_v7  ;;  %vm2469_vm13 = vweird.f32 %v18320_v17  ;;  %v5201_v47 = vsel %vm17499_vm8, %v18347_v48, %v14715_v63  ;;  %v15118_v2 = vpack.i.bf16 %v6293_v21, %v6292_v29  ;;  %v6325_v48 = vld [vmem:[#allocation2 + $0x1b2] sm:$0xff] }
 0x9a4   : > { %v7461_v25 = vsel %vm17498_vm11, %v7429_v28, %v9171_v49  ;;  %v2443_v46 = vand.u32 2147483647, %v18326_v43  ;;  %v9162_v15 = vunpack.i.h.bf16 %v14713_v30  ;;  %v2393_v0 = vadd.f32 %v14972_v38, %v2392_v11  ;;  %8694 = vmatmul.msk.f32.gmra.mxu2 %vm17494_vm0, %v6293_v21  ;;  %v18349_v30 = vld [vmem:[#allocation106_spill] sm:$0xff]  ;;  %v18350_v11 = vld [vmem:[#allocation275_spill] sm:$0xff] }
 0x9a5   : > { %vm2395_vm15 = vweird.f32 %v14972_v38  ;;  %vm2440_vm1 = vweird.f32 %v14977_v32  ;;  %v8635_v7 = vmul.f32 -1.442695, %v5400_v50  ;;  %v15126_v14 = vpop.f32.mrf.mxu3  ;;  %v7366_v63 = vsel %vm3641_vm7, %v18348_v34, %v9157_v31 }
 0x9a6   : > { %v7493_v29 = vsel %vm3791_vm10, %v7461_v25, %v9176_v27  ;;  %v2438_v9 = vadd.f32 %v14977_v32, %v2437_v26  ;;  %v15133_v49 = vpop.eup %9615  ;;  %vm2439_vm14 = vweird.f32 %v18326_v43  ;;  %9617 = vrcp.f32 %v18349_v30  ;;  %9414 = vrot.lane.b32.xlu2 %v15111_v59, %s18093_s17  ;;  %vm15155_vm3 = vmor %vm2394_vm5, %vm2395_vm15 }
 0x9a7   : > { %v5233_v50 = vsel %vm17497_vm9, %v5201_v47, %v18350_v11  ;;  %vm15141_vm2 = vcmp.eq.f32.partialorder %v2398_v18, 8.507059e+37  ;;  %v2446_v27 = vor.u32 1.1754944e-38, %v2445_v57  ;;  %v9167_v21 = vunpack.i.h.bf16 %v15026_v42  ;;  %9394 = vrot.lane.b32.xlu0 %v15053_v19, %s9895_s23  ;;  %vm15178_vm5 = vmor %vm2439_vm14, %vm2440_vm1  ;;  %v15199_v47 = vpop.f32.mrf.mxu2 }
 0x9a8   : > { %v9181_v26 = vunpack.i.l.bf16 %v15102_v62  ;;  %9404 = vrot.lane.b32.xlu1 %v15118_v2, %s9897_s24  ;;  %vm15159_vm4 = vcmp.eq.f32.partialorder %v2443_v46, 8.507059e+37  ;;  %v5403_v42 = vadd.f32 %v15058_v61, %v14647_v1  ;;  %v9172_v19 = vunpack.i.h.bf16 %v15095_v58  ;;  %v15166_v57 = vpop.permute.xlu2 %9249  ;;  %vm15219_vm15 = vmor %vm2469_vm13, %vm2470_vm12 }
 0x9a9   : > { %7683 = vmatmul.f32.gmra.mxu1 %v7493_v29  ;;  %v15168_v28 = vpop.permute.xlu0 %9184  ;;  %v7398_v25 = vsel %vm17499_vm8, %v7366_v63, %v9162_v15  ;;  %v2397_v46 = vsel %vm15155_vm3, %v14972_v38, %v2393_v0  ;;  %v2405_v58 = vmul.f32 %v15133_v49, %v18345_v5  ;;  %9619 = vpow2.f32 %v8635_v7  ;;  %v18359_v29 = vld [vmem:[#allocation284_spill] sm:$0xff]  ;;  %v18360_v0 = vld [vmem:[#allocation273_spill] sm:$0xff] }
 0x9aa   : > { %v15184_v34 = vpop.permute.xlu1 %9194  ;;  %v5265_v15 = vsel %vm17498_vm11, %v5233_v50, %v18359_v29  ;;  %v2442_v38 = vsel %vm15178_vm5, %v14977_v32, %v2438_v9  ;;  %v5409_v43 = vadd.f32 %v15058_v61, %v14829_v37  ;;  %v5202_v63 = vsel %vm17499_vm8, %v14493_v44, %v18360_v0  ;;  %v18361_v29 = vld [vmem:[#allocation249_spill] sm:$0xff] }
 0x9ab   : > { %v9177_v11 = vunpack.i.h.bf16 %v14802_v55  ;;  %v9186_v7 = vunpack.i.l.bf16 %v15168_v28  ;;  %8632 = vmatmul.msk.f32.gmra.mxu3 %vm3791_vm10, %v5265_v15  ;;  %v9191_v50 = vunpack.i.l.bf16 %v14878_v40  ;;  %v7335_v32 = vsel %vm3608_vm6, %v18361_v29, %v9181_v26 }
 0x9ac   : > { %v15204_v9 = vpack.i.bf16 %v6326_v23, %v6325_v48  ;;  %v7430_v37 = vsel %vm17497_vm9, %v7398_v25, %v9167_v21  ;;  %v15207_v1 = vpop.eup %9617  ;;  %v8636_v44 = vmul.f32 -1.442695, %v5403_v42  ;;  %v5406_v55 = vadd.f32 %v15058_v61, %v14750_v6  ;;  %8695 = vmatmul.msk.f32.gmra.mxu2 %vm17494_vm0, %v15213_v33  ;;  %v18365_v42 = vld [vmem:[#allocation193_spill] sm:$0xff] }
 0x9ad   : > { %v7367_v0 = vsel %vm3641_vm7, %v7335_v32, %v9186_v7  ;;  %v7462_v15 = vsel %vm17498_vm11, %v7430_v37, %v9172_v19  ;;  %v18362_v26 = vmov 0  ;;  %v2402_v6 = vsel %vm15141_vm2, %v15107_v54, %v2397_v46  ;;  %v18367_v54 = vld [vmem:[#allocation274_spill] sm:$0xff]  ;;  %v15245_v18 = vpop.f32.mrf.mxu3  ;;  %v7660_v37 = vpop.f32.mrf.mxu1 }
 0x9ae   : > { %v18363_v26 = vsel %vm15219_vm15, 4294967295, %v18362_v26  ;;  %v2447_v21 = vsel %vm15159_vm4, %v2446_v27, %v2442_v38  ;;  %v15232_v19 = vmul.f32 %v15086_v13, %v18365_v42  ;;  %v2406_v23 = vsub.f32 1.0, %v2405_v58  ;;  %9429 = vrot.lane.b32.xlu2 %v15111_v59, %s9896_s18  ;;  %s18808_s18 = sld [smem:[#allocation337_spill]] }
 0x9af   : > { %18364 = vst [vmem:[#allocation254_spill] sm:$0xff] %v18363_v26  ;;  %v8638_v25 = vmul.f32 -1.442695, %v5409_v43  ;;  %v9196_v7 = vunpack.i.l.bf16 %v15184_v34  ;;  %v5234_v31 = vsel %vm17497_vm9, %v5202_v63, %v18367_v54  ;;  %v9620_v27 = vpop.eup %9619  ;;  %v2450_v13 = vmul.f32 %v15207_v1, %v18349_v30  ;;  %9409 = vrot.lane.b32.xlu0 %v15204_v9, %s18056_s21  ;;  %v6359_v26 = vld [vmem:[#allocation2 + $0x1cb] sm:$0xff] }
 0x9b0   : > { %18366 = vst [vmem:[#allocation77_spill] sm:$0xff] %v15232_v19  ;;  %9419 = vrot.lane.b32.xlu1 %v15118_v2, %s17972_s14  ;;  %v7494_v46 = vsel %vm3791_vm10, %v7462_v15, %v9177_v11  ;;  %v7399_v58 = vsel %vm17499_vm8, %v7367_v0, %v9191_v50  ;;  %v2413_v59 = vand.u32 2147483647, %v18345_v5  ;;  %9621 = vpow2.f32 %v8636_v44  ;;  %v15255_v63 = vpop.permute.xlu2 %9264  ;;  %v18368_v44 = vld [vmem:[#allocation282_spill] sm:$0xff] }
 0x9b1   : > { %v8637_v38 = vmul.f32 -1.442695, %v5406_v55  ;;  %v9182_v43 = vunpack.i.h.bf16 %v15102_v62  ;;  %7686 = vmatmul.f32.gmra.mxu1 %v7494_v46  ;;  %v15257_v29 = vpop.permute.xlu0 %9199  ;;  %v2415_v32 = vand.u32 2147483648, %v18345_v5  ;;  %v9206_v2 = vunpack.i.l.bf16 %v14946_v51  ;;  %v18369_v15 = vld [vmem:[#allocation198_spill] sm:$0xff] }
 0x9b2   : > { %v9187_v11 = vunpack.i.h.bf16 %v15168_v28  ;;  %v9201_v50 = vunpack.i.l.bf16 %v15257_v29  ;;  %v15263_v0 = vpop.permute.xlu1 %9209  ;;  %v5266_v55 = vsel %vm17498_vm11, %v5234_v31, %v18368_v44  ;;  %9623 = vpow2.f32 %v8638_v25  ;;  %v18372_v28 = vld [vmem:[#allocation272_spill] sm:$0xff]  ;;  %v18374_v44 = vld [vmem:[#allocation217_spill] sm:$0xff] }
 0x9b3   : > { %8633 = vmatmul.msk.f32.gmra.mxu3 %vm3791_vm10, %v5266_v55  ;;  %v7431_v62 = vsel %vm17497_vm9, %v7399_v58, %v9196_v7  ;;  %v15270_v42 = vmul.f32 %v2402_v6, %v18369_v15  ;;  %v2407_v54 = vmul.f32 %v15133_v49, %v2406_v23  ;;  %v2451_v46 = vsub.f32 1.0, %v2450_v13  ;;  %v15282_v58 = vld [vmem:[#allocation2 + $0x1bc] sm:$0xff]  ;;  %v18375_v6 = vld [vmem:[#allocation84_spill] sm:$0xff] }
 0x9b4   : > { %v15273_v48 = vadd.f32 1.0, %v9620_v27  ;;  %v5203_v20 = vsel %vm17499_vm8, %v18373_v41, %v18372_v28  ;;  %v7463_v31 = vsel %vm17498_vm11, %v7431_v62, %v9201_v50  ;;  %v9192_v25 = vunpack.i.h.bf16 %v14878_v40  ;;  %v15288_v27 = vpop.f32.mrf.mxu2  ;;  %8696 = vmatmul.msk.f32.gmra.mxu2 %vm17494_vm0, %v15282_v58  ;;  %s8353_s14 = scalar_lea.hbm %s18808_s18, %s8743_s16  ;;  %s9839_s19 = scalar_lea.hbm %s18808_s18, 64 }
 0x9b5   : > { %18370 = vst [vmem:[#allocation134_spill] sm:$0xff] %v15270_v42  ;;  %v7336_v7 = vsel %vm3608_vm6, %v18374_v44, %v9182_v43  ;;  %vm2409_vm12 = vweird.f32 %v18345_v5  ;;  %v15286_v23 = vmul.f32 %v2447_v21, %v18375_v6  ;;  %9625 = vpow2.f32 %v8637_v38  ;;  %v18379_v21 = vld [vmem:[#allocation279_spill] sm:$0xff]  ;;  %v15307_v55 = vpop.f32.mrf.mxu3 }
 0x9b6   : > { %18371 = vst [vmem:[#allocation166_spill] sm:$0xff] %v15273_v48  ;;  %v7368_v41 = vsel %vm3641_vm7, %v7336_v7, %v9187_v11  ;;  %v7495_v13 = vsel %vm3791_vm10, %v7463_v31, %v9206_v2  ;;  %vm15294_vm13 = vcmp.eq.f32.partialorder %v2413_v59, 8.507059e+37  ;;  %v2416_v43 = vor.u32 1.1754944e-38, %v2415_v32  ;;  %v9622_v50 = vpop.eup %9621  ;;  %7253 = vrot.lane.b32.xlu2 %v6359_v26, %s18093_s17 }
 0x9b7   : > { %18376 = vst [vmem:[#allocation190_spill] sm:$0xff] %v15286_v23  ;;  %vm2454_vm1 = vweird.f32 %v18349_v30  ;;  %v5235_v38 = vsel %vm17497_vm9, %v5203_v20, %v18379_v21  ;;  %v2408_v11 = vadd.f32 %v15133_v49, %v2407_v54  ;;  %vm2410_vm14 = vweird.f32 %v15133_v49  ;;  %9424 = vrot.lane.b32.xlu0 %v15204_v9, %s9895_s23 }
 0x9b8   : > { %v2452_v2 = vmul.f32 %v15207_v1, %v2451_v46  ;;  %v2460_v59 = vand.u32 2147483648, %v18349_v30  ;;  %9627 = vrcp.f32 %v15273_v48  ;;  %v9197_v32 = vunpack.i.h.bf16 %v15184_v34  ;;  %6997 = vrot.lane.b32.xlu1 %v15213_v33, %s9897_s24  ;;  %v9624_v20 = vpop.eup %9623  ;;  %v15318_v54 = vpop.permute.xlu2 %9279  ;;  %vm15336_vm2 = vmor %vm2409_vm12, %vm2410_vm14 }
 0x9b9   : > { %v5415_v26 = vadd.f32 %v15058_v61, %v14979_v36  ;;  %v9202_v62 = vunpack.i.h.bf16 %v15257_v29  ;;  %v9211_v15 = vunpack.i.l.bf16 %v15263_v0  ;;  %7689 = vmatmul.f32.gmra.mxu1 %v7495_v13  ;;  %v15320_v46 = vpop.permute.xlu0 %9214  ;;  %v7400_v34 = vsel %vm17499_vm8, %v7368_v41, %v9192_v25  ;;  %v18381_v36 = vld [vmem:[#allocation280_spill] sm:$0xff]  ;;  %v7663_v41 = vpop.f32.mrf.mxu1 }
 0x9ba   : > { %v15323_v28 = vadd.f32 1.0, %v9622_v50  ;;  %v5412_v33 = vadd.f32 %v15058_v61, %v14897_v52  ;;  %v9216_v9 = vunpack.i.l.bf16 %v15320_v46  ;;  %v15328_v31 = vpop.permute.xlu1 %9224  ;;  %v5267_v29 = vsel %vm17498_vm11, %v5235_v38, %v18381_v36  ;;  %v6360_v50 = vld [vmem:[#allocation2 + $0x1d3] sm:$0xff] }
 0x9bb   : > { %v7661_v25 = vadd.f32 %v14664_v8, %v7660_v37  ;;  %8634 = vmatmul.msk.f32.gmra.mxu3 %vm3791_vm10, %v5267_v29  ;;  %v2412_v52 = vsel %vm15336_vm2, %v15133_v49, %v2408_v11  ;;  %vm2455_vm3 = vweird.f32 %v15207_v1  ;;  %v2458_v7 = vand.u32 2147483647, %v18349_v30  ;;  %v9626_v6 = vpop.eup %9625  ;;  %v18384_v29 = vld [vmem:[#allocation156_spill] sm:$0xff] }
 0x9bc   : > { %18380 = vst [vmem:[#allocation227_spill] sm:$0xff] %v15323_v28  ;;  %v15347_v13 = vadd.f32 1.0, %v9624_v20  ;;  %v9207_v5 = vunpack.i.h.bf16 %v14946_v51  ;;  %v7432_v21 = vsel %vm17497_vm9, %v7400_v34, %v9197_v32  ;;  %v2453_v37 = vadd.f32 %v15207_v1, %v2452_v2  ;;  %v6327_v11 = vld [vmem:[#allocation2 + $0x1ca] sm:$0xff]  ;;  %vm15384_vm5 = vmor %vm2454_vm1, %vm2455_vm3 }
 0x9bd   : > { %v8640_v38 = vmul.f32 -1.442695, %v5415_v26  ;;  %v9221_v36 = vunpack.i.l.bf16 %v15022_v56  ;;  %v7337_v49 = vsel %vm3608_vm6, %v18384_v29, %v9211_v15  ;;  %v7464_v44 = vsel %vm17498_vm11, %v7432_v21, %v9202_v62  ;;  %v15373_v62 = vpop.f32.mrf.mxu3  ;;  %v18400_v15 = vld [vmem:[#allocation58_spill] sm:$0xff] }
 0x9be   : > { %v15356_v19 = vpop.eup %9627  ;;  %v2461_v20 = vor.u32 1.1754944e-38, %v2460_v59  ;;  %9629 = vrcp.f32 %v15323_v28  ;;  %v8639_v51 = vmul.f32 -1.442695, %v5412_v33  ;;  %v7369_v17 = vsel %vm3641_vm7, %v7337_v49, %v9216_v9  ;;  %7255 = vrot.lane.b32.xlu2 %v6360_v50, %s18093_s17  ;;  %s8438_s17 = sshll.u32 %s10055_s30, 5 }
 0x9bf   : > { %18385 = vst [vmem:[#allocation261_spill] sm:$0xff] %v15356_v19  ;;  %v7664_v32 = vadd.f32 %v14664_v8, %v7663_v41  ;;  %v15361_v2 = vadd.f32 1.0, %v9626_v6  ;;  %v2417_v26 = vsel %vm15294_vm13, %v2416_v43, %v2412_v52  ;;  %vm15366_vm4 = vcmp.eq.f32.partialorder %v2458_v7, 8.507059e+37  ;;  %7125 = vrot.lane.b32.xlu0 %v6327_v11, %s18056_s21  ;;  %s460_s27 = scalar_lea.vmem [#allocation7], %s8438_s17 }
 0x9c0   : > { %9631 = vrcp.f32 %v15347_v13  ;;  %v5418_v59 = vadd.f32 %v15058_v61, %v15063_v3  ;;  %v9226_v8 = vunpack.i.l.bf16 %v15328_v31  ;;  %6999 = vrot.lane.b32.xlu1 %v15282_v58, %s9897_s24  ;;  %v7496_v40 = vsel %vm3791_vm10, %v7464_v44, %v9207_v5  ;;  %v15389_v34 = vpop.permute.xlu2 %9294 }
 0x9c1   : > { %18386 = vst [vmem:[#allocation88_spill] sm:$0xff] %v15361_v2  ;;  %9633 = vpow2.f32 %v8640_v38  ;;  %v9212_v3 = vunpack.i.h.bf16 %v15263_v0  ;;  %7692 = vmatmul.f32.gmra.mxu1 %v7496_v40  ;;  %v15391_v33 = vpop.permute.xlu0 %9229  ;;  %v7401_v58 = vsel %vm17499_vm8, %v7369_v17, %v9221_v36  ;;  %v2457_v9 = vsel %vm15384_vm5, %v15207_v1, %v2453_v37  ;;  %v18393_v1 = vld [vmem:[#allocation72_spill] sm:$0xff] }
 0x9c2   : > { %v5624_v30 = vmul.f32 %v15356_v19, %v15273_v48  ;;  %9635 = vpow2.f32 %v8639_v51  ;;  %v9236_v52 = vunpack.i.l.bf16 %v15093_v45  ;;  %v9217_v7 = vunpack.i.h.bf16 %v15320_v46  ;;  %v15401_v0 = vpop.permute.xlu1 %9239 }
 0x9c3   : > { %v15405_v6 = vadd.f32 %v15097_v53, %v14911_v16  ;;  %v15408_v17 = vadd.f32 %v15199_v47, %v7661_v25  ;;  %v9231_v41 = vunpack.i.l.bf16 %v15391_v33  ;;  %v15412_v5 = vmul.f32 %v2417_v26, %v18393_v1  ;;  %v18397_v53 = vld [vmem:[#allocation113_spill] sm:$0xff] }
 0x9c4   : > { %v15414_v50 = vpop.eup %9629  ;;  %v15417_v21 = vadd.f32 %v15288_v27, %v7664_v32  ;;  %9637 = vrcp.f32 %v15361_v2  ;;  %v8641_v46 = vmul.f32 -1.442695, %v5418_v59  ;;  %v7433_v37 = vsel %vm17497_vm9, %v7401_v58, %v9226_v8  ;;  %v6328_v25 = vld [vmem:[#allocation2 + $0x1d2] sm:$0xff] }
 0x9c5   : > { %18391 = vst [vmem:[#allocation122_spill] sm:$0xff] %v15405_v6  ;;  %v9222_v16 = vunpack.i.h.bf16 %v15022_v56  ;;  %v7338_v47 = vsel %vm3608_vm6, %v18397_v53, %v9212_v3  ;;  %v7465_v38 = vsel %vm17498_vm11, %v7433_v37, %v9231_v41  ;;  %v15427_v36 = vsel %vm15366_vm4, %v2461_v20, %v2457_v9  ;;  %v15475_v53 = vpop.f32.mrf.mxu3 }
 0x9c6   : > { %18392 = vst [vmem:[#allocation170_spill] sm:$0xff] %v15408_v17  ;;  %v15429_v29 = vpop.eup %9631  ;;  %v5625_v27 = vsub.f32 1.0, %v5624_v30  ;;  %v7370_v49 = vsel %vm3641_vm7, %v7338_v47, %v9217_v7  ;;  %v7497_v11 = vsel %vm3791_vm10, %v7465_v38, %v9236_v52  ;;  %v5634_v44 = vand.u32 2147483648, %v15273_v48  ;;  %8080 = vrot.lane.b32.xlu2 %v18400_v15, %s9897_s24  ;;  %v18404_v38 = vld [vmem:[#allocation252_spill] sm:$0xff] }
 0x9c7   : > { %18394 = vst [vmem:[#allocation199_spill] sm:$0xff] %v15412_v5  ;;  %v9634_v56 = vpop.eup %9633  ;;  %v15436_v51 = vadd.f32 %v15004_v12, %v14908_v10  ;;  %v5639_v20 = vmul.f32 %v15414_v50, %v15323_v28  ;;  %9639 = vpow2.f32 %v8641_v46  ;;  %v9227_v40 = vunpack.i.h.bf16 %v15328_v31  ;;  %7127 = vrot.lane.b32.xlu0 %v6328_v25, %s18056_s21  ;;  %v18401_v10 = vld [vmem:[#allocation91_spill] sm:$0xff]  ;;  %s8354_s21 = sshll.u32 %s460_s27, 4  ;;  %s8355_s21 = int_to_ptr.vmem [resolvable:$true] %s8354_s21 }
 0x9c8   : > { %18395 = vst [vmem:[#allocation224_spill] sm:$0xff] %v15414_v50  ;;  %v9636_v59 = vpop.eup %9635  ;;  %v9241_v43 = vunpack.i.l.bf16 %v15401_v0  ;;  %8112 = vrot.lane.b32.xlu1 %v18401_v10, %s9897_s24  ;;  %v5421_v12 = vadd.f32 %v15058_v61, %v15126_v14  ;;  %v9232_v3 = vunpack.i.h.bf16 %v15391_v33  ;;  %v15453_v58 = vpop.permute.xlu2 %9309  ;;  %v7402_v30 = vsel %vm17499_vm8, %v7370_v49, %v9222_v16  ;;  %v18420_v31 = vld [vmem:[#allocation59_spill] sm:$0xff] }
 0x9c9   : > { %18396 = vst [vmem:[#allocation259_spill] sm:$0xff] %v15417_v21  ;;  %7695 = vmatmul.f32.gmra.mxu1 %v7497_v11  ;;  %v15455_v9 = vpop.permute.xlu0 %9244  ;;  %v15461_v7 = vadd.f32 1.0, %v9634_v56  ;;  %v5424_v41 = vadd.f32 %v15058_v61, %v15245_v18  ;;  %v5626_v14 = vmul.f32 %v15356_v19, %v5625_v27  ;;  %vm5628_vm12 = vweird.f32 %v15273_v48  ;;  %v18430_v48 = vld [vmem:[#allocation147_spill] sm:$0xff] }
 0x9ca   : > { %18398 = vst [vmem:[#allocation92_spill] sm:$0xff] %v15427_v36  ;;  %v15459_v52 = vpop.eup %9637  ;;  %v15465_v1 = vpop.permute.xlu1 %9254  ;;  %v15469_v33 = vor.u32 1.1754944e-38, %v5634_v44  ;;  %v5640_v46 = vsub.f32 1.0, %v5639_v20  ;;  %v5669_v37 = vmul.f32 %v15429_v29, %v15347_v13  ;;  %v15473_v16 = vadd.f32 1.0, %v9636_v59 }
 0x9cb   : > { %18399 = vst [vmem:[#allocation132_spill] sm:$0xff] %v15436_v51  ;;  %v9246_v47 = vunpack.i.l.bf16 %v15455_v9  ;;  %v9237_v18 = vunpack.i.h.bf16 %v15093_v45  ;;  %v9251_v25 = vunpack.i.l.bf16 %v15166_v57  ;;  %v7339_v27 = vsel %vm3608_vm6, %v18404_v38, %v9241_v43  ;;  %v18406_v43 = vld [vmem:[#allocation75_spill] sm:$0xff] }
 0x9cc   : > { %18402 = vst [vmem:[#allocation161_spill] sm:$0xff] %v15459_v52  ;;  %v7434_v49 = vsel %vm17497_vm9, %v7402_v30, %v9227_v40  ;;  %v5654_v11 = vmul.f32 %v15459_v52, %v15361_v2  ;;  %v8642_v44 = vmul.f32 -1.442695, %v5421_v12  ;;  %9641 = vrcp.f32 %v15461_v7  ;;  %v18408_v30 = vld [vmem:[#allocation79_spill] sm:$0xff] }
 0x9cd   : > { %18403 = vst [vmem:[#allocation202_spill] sm:$0xff] %v15469_v33  ;;  %v7371_v56 = vsel %vm3641_vm7, %v7339_v27, %v9246_v47  ;;  %v7466_v20 = vsel %vm17498_vm11, %v7434_v49, %v9232_v3  ;;  %v9640_v15 = vpop.eup %9639  ;;  %v8643_v59 = vmul.f32 -1.442695, %v5424_v41  ;;  %v15489_v45 = vadd.f32 %v15356_v19, %v5626_v14  ;;  %v18407_v3 = vld [vmem:[#allocation94_spill] sm:$0xff] }
 0x9ce   : > { %vm5629_vm13 = vweird.f32 %v15356_v19  ;;  %9643 = vrcp.f32 %v15473_v16  ;;  %v9256_v40 = vunpack.i.l.bf16 %v15465_v1  ;;  %8106 = vrot.lane.b32.xlu2 %v18406_v43, %s9897_s24  ;;  %v5641_v10 = vmul.f32 %v15414_v50, %v5640_v46 }
 0x9cf   : > { %18405 = vst [vmem:[#allocation232_spill] sm:$0xff] %v15489_v45  ;;  %vm5643_vm1 = vweird.f32 %v15323_v28  ;;  %v5670_v12 = vsub.f32 1.0, %v5669_v37  ;;  %8110 = vrot.lane.b32.xlu0 %v18407_v3, %s9897_s24  ;;  %v7498_v41 = vsel %vm3791_vm10, %v7466_v20, %v9237_v18  ;;  %v7403_v14 = vsel %vm17499_vm8, %v7371_v56, %v9251_v25  ;;  %vm15529_vm2 = vmor %vm5628_vm12, %vm5629_vm13 }
 0x9d0   : > { %8108 = vrot.lane.b32.xlu1 %v18408_v30, %s9897_s24  ;;  %v5649_v47 = vand.u32 2147483648, %v15323_v28  ;;  %v5655_v38 = vsub.f32 1.0, %v5654_v11  ;;  %v15505_v27 = vadd.f32 1.0, %v9640_v15  ;;  %9645 = vpow2.f32 %v8642_v44  ;;  %v15508_v37 = vpop.permute.xlu2 %9324  ;;  %v15517_v11 = vpop.f32.mrf.mxu3 }
 0x9d1   : > { %v9242_v46 = vunpack.i.h.bf16 %v15401_v0  ;;  %7698 = vmatmul.f32.gmra.mxu1 %v7498_v41  ;;  %v15510_v49 = vpop.permute.xlu0 %9259  ;;  %9647 = vpow2.f32 %v8643_v59  ;;  %v9266_v43 = vunpack.i.l.bf16 %v15255_v63  ;;  %v9247_v18 = vunpack.i.h.bf16 %v15455_v9 }
 0x9d2   : > { %v9261_v25 = vunpack.i.l.bf16 %v15510_v49  ;;  %v15515_v56 = vpop.permute.xlu1 %9269  ;;  %v7435_v44 = vsel %vm17497_vm9, %v7403_v14, %v9256_v40  ;;  %v5664_v0 = vand.u32 2147483648, %v15361_v2  ;;  %v15522_v20 = vadd.f32 %v15414_v50, %v5641_v10  ;;  %v15533_v15 = vpop.eup %9641  ;;  %v18413_v14 = vld [vmem:[#allocation220_spill] sm:$0xff] }
 0x9d3   : > { %vm5644_vm14 = vweird.f32 %v15414_v50  ;;  %v18410_v9 = vmov 0  ;;  %v5671_v40 = vmul.f32 %v15429_v29, %v5670_v12  ;;  %v9252_v41 = vunpack.i.h.bf16 %v15166_v57  ;;  %v15978_v50 = vld [vmem:[%s17348_s12] ss:$0 sm:$0xff] }
 0x9d4   : > { %18409 = vst [vmem:[#allocation257_spill] sm:$0xff] %v15522_v20  ;;  %v18411_v9 = vsel %vm15529_vm2, 4294967295, %v18410_v9  ;;  %v7467_v59 = vsel %vm17498_vm11, %v7435_v44, %v9261_v25  ;;  %v15542_v30 = vpop.eup %9643  ;;  %v7340_v32 = vsel %vm3608_vm6, %v18413_v14, %v9242_v46  ;;  %v15548_v8 = vor.u32 1.1754944e-38, %v5649_v47  ;;  %vm15558_vm3 = vmor %vm5643_vm1, %vm5644_vm14  ;;  %v18418_v14 = vld [vmem:[#allocation155_spill] sm:$0xff]  ;;  %v18487_v20 = vld [vmem:[#allocation73_spill] sm:$0xff] }
 0x9d5   : > { %18412 = vst [vmem:[#allocation83_spill] sm:$0xff] %v18411_v9  ;;  %9649 = vrcp.f32 %v15505_v27  ;;  %v7372_v12 = vsel %vm3641_vm7, %v7340_v32, %v9247_v18  ;;  %v7499_v25 = vsel %vm3791_vm10, %v7467_v59, %v9266_v43  ;;  %v5656_v44 = vmul.f32 %v15459_v52, %v5655_v38 }
 0x9d6   : > { %18414 = vst [vmem:[#allocation138_spill] sm:$0xff] %v15548_v8  ;;  %v18415_v57 = vmov 0  ;;  %v9646_v46 = vpop.eup %9645  ;;  %v5699_v47 = vmul.f32 %v15533_v15, %v15461_v7  ;;  %8074 = vrot.lane.b32.xlu2 %v18418_v14, %s9897_s24  ;;  %v5679_v32 = vand.u32 2147483648, %v15347_v13  ;;  %v15567_v43 = vor.u32 1.1754944e-38, %v5664_v0  ;;  %v18421_v14 = vld [vmem:[#allocation152_spill] sm:$0xff] }
 0x9d7   : > { %v18416_v57 = vsel %vm15558_vm3, 4294967295, %v18415_v57  ;;  %v9648_v18 = vpop.eup %9647  ;;  %v5684_v59 = vmul.f32 %v15542_v30, %v15473_v16  ;;  %v9257_v10 = vunpack.i.h.bf16 %v15465_v1  ;;  %8078 = vrot.lane.b32.xlu0 %v18420_v31, %s9897_s24  ;;  %v15581_v0 = vadd.f32 %v15429_v29, %v5671_v40 }
 0x9d8   : > { %18417 = vst [vmem:[#allocation169_spill] sm:$0xff] %v18416_v57  ;;  %8076 = vrot.lane.b32.xlu1 %v18421_v14, %s9897_s24  ;;  %vm5674_vm4 = vweird.f32 %v15429_v29  ;;  %v5427_v38 = vadd.f32 %v15058_v61, %v15307_v55  ;;  %v9262_v3 = vunpack.i.h.bf16 %v15510_v49  ;;  %v9271_v26 = vunpack.i.l.bf16 %v15515_v56  ;;  %v15588_v1 = vpop.permute.xlu2 %9339 }
 0x9d9   : > { %18419 = vst [vmem:[#allocation194_spill] sm:$0xff] %v15567_v43  ;;  %7701 = vmatmul.f32.gmra.mxu1 %v7499_v25  ;;  %v15590_v36 = vpop.permute.xlu0 %9274  ;;  %v7404_v31 = vsel %vm17499_vm8, %v7372_v12, %v9252_v41  ;;  %v15593_v14 = vadd.f32 1.0, %v9646_v46  ;;  %vm5673_vm5 = vweird.f32 %v15347_v13  ;;  %v15600_v55 = vadd.f32 %v15459_v52, %v5656_v44  ;;  %v15604_v25 = vpop.f32.mrf.mxu3 }
 0x9da   : > { %v15595_v40 = vpop.permute.xlu1 %9284  ;;  %v5700_v49 = vsub.f32 1.0, %v5699_v47  ;;  %v15602_v6 = vadd.f32 1.0, %v9648_v18  ;;  %v9276_v51 = vunpack.i.l.bf16 %v15590_v36  ;;  %vm15609_vm12 = vmor %vm5673_vm5, %vm5674_vm4  ;;  %v15613_v12 = vor.u32 1.1754944e-38, %v5679_v32 }
 0x9db   : > { %18422 = vst [vmem:[#allocation230_spill] sm:$0xff] %v15600_v55  ;;  %v15615_v46 = vpop.eup %9649  ;;  %v5685_v23 = vsub.f32 1.0, %v5684_v59  ;;  %v9267_v44 = vunpack.i.h.bf16 %v15255_v63  ;;  %v7436_v47 = vsel %vm17497_vm9, %v7404_v31, %v9257_v10  ;;  %v8644_v39 = vmul.f32 -1.442695, %v5427_v38  ;;  %v18426_v38 = vld [vmem:[#allocation60_spill] sm:$0xff]  ;;  %v18428_v31 = vld [vmem:[#allocation81_spill] sm:$0xff] }
 0x9dc   : > { %v9281_v17 = vunpack.i.l.bf16 %v15318_v54  ;;  %v7341_v33 = vsel %vm3608_vm6, %v18425_v60, %v9271_v26  ;;  %v7468_v32 = vsel %vm17498_vm11, %v7436_v47, %v9262_v3  ;;  %9651 = vrcp.f32 %v15593_v14  ;;  %v18510_v55 = vld [vmem:[#allocation219_spill] sm:$0xff] }
 0x9dd   : > { %v7373_v59 = vsel %vm3641_vm7, %v7341_v33, %v9276_v51  ;;  %vm5688_vm13 = vweird.f32 %v15473_v16  ;;  %v5692_v63 = vand.u32 2147483647, %v15473_v16  ;;  %v5714_v10 = vmul.f32 %v15615_v46, %v15505_v27  ;;  %v18427_v33 = vld [vmem:[#allocation80_spill] sm:$0xff] }
 0x9de   : > { %9653 = vrcp.f32 %v15602_v6  ;;  %8100 = vrot.lane.b32.xlu2 %v18426_v38, %s9897_s24  ;;  %v5701_v60 = vmul.f32 %v15533_v15, %v5700_v49  ;;  %v5694_v26 = vand.u32 2147483648, %v15473_v16  ;;  %v5430_v3 = vadd.f32 %v15058_v61, %v15373_v62 }
 0x9df   : > { %v9286_v51 = vunpack.i.l.bf16 %v15595_v40  ;;  %8104 = vrot.lane.b32.xlu0 %v18427_v33, %s9897_s24  ;;  %v7500_v47 = vsel %vm3791_vm10, %v7468_v32, %v9267_v44  ;;  %v5686_v18 = vmul.f32 %v15542_v30, %v5685_v23  ;;  %9655 = vpow2.f32 %v8644_v39  ;;  %v15661_v44 = vpop.f32.mrf.mxu2 }
 0x9e0   : > { %8102 = vrot.lane.b32.xlu1 %v18428_v31, %s9897_s24  ;;  %v9272_v49 = vunpack.i.h.bf16 %v15515_v56  ;;  %v15648_v38 = vpop.permute.xlu2 %9354  ;;  %v7405_v62 = vsel %vm17499_vm8, %v7373_v59, %v9281_v17  ;;  %vm5689_vm1 = vweird.f32 %v15542_v30  ;;  %v9296_v33 = vunpack.i.l.bf16 %v15389_v34  ;;  %18429 = vst [vmem:[#allocation264_spill] sm:$0xff] %v15661_v44 }
 0x9e1   : > { %7704 = vmatmul.f32.gmra.mxu1 %v7500_v47  ;;  %v15650_v45 = vpop.permute.xlu0 %9289  ;;  %v9277_v31 = vunpack.i.h.bf16 %v15590_v36  ;;  %v5707_v23 = vand.u32 2147483647, %v15461_v7  ;;  %v5709_v39 = vand.u32 2147483648, %v15461_v7  ;;  %v5715_v56 = vsub.f32 1.0, %v5714_v10  ;;  %v15676_v5 = vpop.f32.mrf.mxu3 }
 0x9e2   : > { %v15656_v19 = vpop.permute.xlu1 %9299  ;;  %v9291_v32 = vunpack.i.l.bf16 %v15650_v45  ;;  %v5702_v17 = vadd.f32 %v15533_v15, %v5701_v60  ;;  %vm5704_vm4 = vweird.f32 %v15533_v15  ;;  %v15666_v59 = vpop.eup %9651  ;;  %v8645_v36 = vmul.f32 -1.442695, %v5430_v3 }
 0x9e3   : > { %v7437_v47 = vsel %vm17497_vm9, %v7405_v62, %v9286_v51  ;;  %vm5703_vm5 = vweird.f32 %v15461_v7  ;;  %v5687_v9 = vadd.f32 %v15542_v30, %v5686_v18  ;;  %v5433_v21 = vadd.f32 %v15058_v61, %v15475_v53  ;;  %v18459_v18 = vld [vmem:[#allocation164_spill] sm:$0xff] }
 0x9e4   : > { %v15672_v10 = vpop.eup %9653  ;;  %v9282_v60 = vunpack.i.h.bf16 %v15318_v54  ;;  %v7342_v3 = vsel %vm3608_vm6, %v18430_v48, %v9272_v49  ;;  %v7469_v51 = vsel %vm17498_vm11, %v7437_v47, %v9291_v32  ;;  %v18431_v7 = vand.u32 2147483647, %v15347_v13  ;;  %vm15696_vm9 = vmor %vm5703_vm5, %vm5704_vm4 }
 0x9e5   : > { %vm15688_vm0 = vcmp.eq.f32.partialorder %v5692_v63, 8.507059e+37  ;;  %v7374_v53 = vsel %vm3641_vm7, %v7342_v3, %v9277_v31  ;;  %v7501_v8 = vsel %vm3791_vm10, %v7469_v51, %v9296_v33  ;;  %vm15700_vm11 = vcmp.eq.f32.partialorder %v5707_v23, 8.507059e+37  ;;  %v9656_v49 = vpop.eup %9655  ;;  %v18440_v31 = vld [vmem:[#allocation139_spill] sm:$0xff]  ;;  %vm15716_vm4 = vmor %vm5688_vm13, %vm5689_vm1  ;;  %v18443_v51 = vld [vmem:[#allocation144_spill] sm:$0xff] }
 0x9e6   : > { %vm15684_vm14 = vcmp.eq.f32.partialorder %v18431_v7, 8.507059e+37  ;;  %v5695_v13 = vor.u32 1.1754944e-38, %v5694_v26  ;;  %v5729_v63 = vmul.f32 %v15666_v59, %v15593_v14  ;;  %v5716_v32 = vmul.f32 %v15615_v46, %v5715_v56  ;;  %8068 = vrot.lane.b32.xlu2 %v18440_v31, %s9897_s24 }
 0x9e7   : > { %v5706_v33 = vsel %vm15696_vm9, %v15533_v15, %v5702_v17  ;;  %v5710_v47 = vor.u32 1.1754944e-38, %v5709_v39  ;;  %v5744_v23 = vmul.f32 %v15672_v10, %v15602_v6  ;;  %v9287_v56 = vunpack.i.h.bf16 %v15595_v40  ;;  %8072 = vrot.lane.b32.xlu0 %v18443_v51, %s9897_s24  ;;  %v18444_v15 = vld [vmem:[#allocation141_spill] sm:$0xff] }
 0x9e8   : > { %v9301_v3 = vunpack.i.l.bf16 %v15656_v19  ;;  %8070 = vrot.lane.b32.xlu1 %v18444_v15, %s9897_s24  ;;  %v5691_v16 = vsel %vm15716_vm4, %v15542_v30, %v5687_v9  ;;  %9657 = vpow2.f32 %v8645_v36  ;;  %v8646_v39 = vmul.f32 -1.442695, %v5433_v21  ;;  %v15732_v7 = vpop.permute.xlu2 %9369 }
 0x9e9   : > { %v9292_v17 = vunpack.i.h.bf16 %v15650_v45  ;;  %7707 = vmatmul.f32.gmra.mxu1 %v7501_v8  ;;  %v15734_v40 = vpop.permute.xlu0 %9304  ;;  %v7406_v48 = vsel %vm17499_vm8, %v7374_v53, %v9282_v60  ;;  %v15737_v31 = vadd.f32 1.0, %v9656_v49  ;;  %vm5718_vm9 = vweird.f32 %v15505_v27  ;;  %v18445_v60 = vld [vmem:[#allocation247_spill] sm:$0xff]  ;;  %v15755_v54 = vpop.f32.mrf.mxu3 }
 0x9ea   : > { %v5724_v51 = vand.u32 2147483648, %v15505_v27  ;;  %v15741_v15 = vpop.permute.xlu1 %9314  ;;  %v5711_v21 = vsel %vm15700_vm11, %v5710_v47, %v5706_v33  ;;  %v5730_v9 = vsub.f32 1.0, %v5729_v63  ;;  %v15746_v8 = vadd.f32 %v15615_v46, %v5716_v32  ;;  %v15757_v63 = vpop.f32.mrf.mxu2 }
 0x9eb   : > { %vm5719_vm13 = vweird.f32 %v15615_v46  ;;  %v9306_v45 = vunpack.i.l.bf16 %v15734_v40  ;;  %v9297_v30 = vunpack.i.h.bf16 %v15389_v34  ;;  %v9311_v36 = vunpack.i.l.bf16 %v15453_v58  ;;  %18447 = vst [vmem:[#allocation95_spill] sm:$0xff] %v15757_v63 }
 0x9ec   : > { %v7343_v53 = vsel %vm3608_vm6, %v18445_v60, %v9301_v3  ;;  %vm18446_vm1 = vcmask 654336   ;;  %v5745_v26 = vsub.f32 1.0, %v5744_v23  ;;  %9659 = vpow2.f32 %v8646_v39 }
 0x9ed   : > { %v7438_v49 = vsel %vm18446_vm1, %v7406_v48, %v9287_v56  ;;  %v7375_v32 = vsel %vm3641_vm7, %v7343_v53, %v9306_v45  ;;  %vm18448_vm11 = vcmask 785408   ;;  %vm18449_vm5 = vweird.f32 %v15459_v52  ;;  %vm15772_vm1 = vmor %vm5718_vm9, %vm5719_vm13  ;;  %v18460_v48 = vld [vmem:[#allocation65_spill] sm:$0xff]  ;;  %v18461_v45 = vld [vmem:[#allocation66_spill] sm:$0xff] }
 0x9ee   : > { %v7470_v33 = vsel %vm18448_vm11, %v7438_v49, %v9292_v17  ;;  %vm18450_vm4 = vweird.f32 %v15361_v2  ;;  %v18451_v34 = vmov 0  ;;  %9661 = vrcp.f32 %v15737_v31  ;;  %v9658_v17 = vpop.eup %9657  ;;  %vm18465_vm13 = vmmov %vm18448_vm11 }
 0x9ef   : > { %vm15765_vm8 = vmor %vm18450_vm4, %vm18449_vm5  ;;  %v18456_v23 = vsel %vm15609_vm12, %v15429_v29, %v15581_v0  ;;  %v15788_v3 = vsel %vm15688_vm0, %v5695_v13, %v5691_v16  ;;  %v5721_v29 = vsel %vm15772_vm1, %v15615_v46, %v15746_v8  ;;  %v5722_v0 = vand.u32 2147483647, %v15505_v27  ;;  %8098 = vrot.lane.b32.xlu0 %v18460_v48, %s9897_s24 }
 0x9f0   : > { %v18452_v34 = vsel %vm15765_vm8, 4294967295, %v18451_v34  ;;  %v15784_v56 = vsel %vm15684_vm14, %v15613_v12, %v18456_v23  ;;  %v9316_v41 = vunpack.i.l.bf16 %v15741_v15  ;;  %v18458_v12 = vld [vmem:[#allocation85_spill] sm:$0xff]  ;;  %v15803_v62 = vadd.f32 %v18459_v18, %v5711_v21  ;;  %8096 = vrot.lane.b32.xlu1 %v18461_v45, %s9897_s24 }
 0x9f1   : > { %18453 = vst [vmem:[#allocation127_spill] sm:$0xff] %v18452_v34  ;;  %8094 = vrot.lane.b32.xlu2 %v18458_v12, %s9897_s24  ;;  %v5725_v13 = vor.u32 1.1754944e-38, %v5724_v51  ;;  %v5731_v16 = vmul.f32 %v15666_v59, %v5730_v9  ;;  %v7502_v46 = vsel %vm3791_vm10, %v7470_v33, %v9297_v30  ;;  %vm18462_vm0 = vcmask 523264   ;;  %v15815_v51 = vpop.permute.xlu2 %9384  ;;  %v15817_v9 = vpop.permute.xlu0 %9319 }
 0x9f2   : > { %18457 = vst [vmem:[#allocation171_spill] sm:$0xff] %v15784_v56  ;;  %v7407_v27 = vsel %vm18462_vm0, %v7375_v32, %v9311_v36  ;;  %v9302_v8 = vunpack.i.h.bf16 %v15656_v19  ;;  %vm5733_vm12 = vweird.f32 %v15593_v14  ;;  %v5737_v21 = vand.u32 2147483647, %v15593_v14  ;;  %7710 = vmatmul.f32.gmra.mxu1 %v7502_v46  ;;  %v15823_v30 = vpop.f32.mrf.mxu1  ;;  %v15827_v32 = vpop.permute.xlu1 %9329 }
 0x9f3   : > { %v5746_v60 = vmul.f32 %v15672_v10, %v5745_v26  ;;  %v15820_v53 = vadd.f32 1.0, %v9658_v17  ;;  %v9326_v49 = vunpack.i.l.bf16 %v15508_v37  ;;  %18463 = vst [vmem:[#allocation201_spill] sm:$0xff] %v15823_v30  ;;  %v9307_v36 = vunpack.i.h.bf16 %v15734_v40  ;;  %v9660_v33 = vpop.eup %9659  ;;  %v15840_v46 = vpop.f32.mrf.mxu3 }
 0x9f4   : > { %v9321_v19 = vunpack.i.l.bf16 %v15817_v9  ;;  %v5436_v47 = vadd.f32 %v15058_v61, %v15517_v11  ;;  %vm5734_vm14 = vweird.f32 %v15666_v59  ;;  %v5739_v26 = vand.u32 2147483648, %v15593_v14  ;;  %v15834_v17 = vpop.eup %9661  ;;  %v18466_v11 = vld [vmem:[#allocation211_spill] sm:$0xff]  ;;  %v18471_v14 = vld [vmem:[#allocation130_spill] sm:$0xff] }
 0x9f5   : > { %vm18464_vm9 = vcmask 654336   ;;  %v5732_v12 = vadd.f32 %v15666_v59, %v5731_v16  ;;  %v5752_v48 = vand.u32 2147483647, %v15602_v6  ;;  %v5754_v45 = vand.u32 2147483648, %v15602_v6  ;;  %vm15860_vm4 = vmor %vm5733_vm12, %vm5734_vm14 }
 0x9f6   : > { %v7439_v23 = vsel %vm18464_vm9, %v7407_v27, %v9316_v41  ;;  %v9312_v61 = vunpack.i.h.bf16 %v15453_v58  ;;  %v7344_v39 = vsel %vm3608_vm6, %v18466_v11, %v9302_v8  ;;  %v5747_v56 = vadd.f32 %v15672_v10, %v5746_v60  ;;  %v15847_v41 = vpop.f32.mrf.mxu2  ;;  %v18469_v60 = vld [vmem:[#allocation133_spill] sm:$0xff] }
 0x9f7   : > { %v7471_v40 = vsel %vm18465_vm13, %v7439_v23, %v9321_v19  ;;  %vm5749_vm11 = vweird.f32 %v15672_v10  ;;  %9663 = vrcp.f32 %v15820_v53  ;;  %v15850_v16 = vadd.f32 1.0, %v9660_v33  ;;  %v18470_v33 = vld [vmem:[#allocation137_spill] sm:$0xff] }
 0x9f8   : > { %v7376_v27 = vsel %vm3641_vm7, %v7344_v39, %v9307_v36  ;;  %v7503_v19 = vsel %vm3791_vm10, %v7471_v40, %v9326_v49  ;;  %v5759_v58 = vmul.f32 %v15834_v17, %v15737_v31  ;;  %v8647_v23 = vmul.f32 -1.442695, %v5436_v47  ;;  %8066 = vrot.lane.b32.xlu0 %v18470_v33, %s9897_s24  ;;  %8064 = vrot.lane.b32.xlu1 %v18471_v14, %s9897_s24 }
 0x9f9   : > { %vm5723_vm5 = vcmp.eq.f32.partialorder %v5722_v0, 8.507059e+37  ;;  %8062 = vrot.lane.b32.xlu2 %v18469_v60, %s9897_s24  ;;  %vm5748_vm1 = vweird.f32 %v15602_v6  ;;  %v5736_v49 = vsel %vm15860_vm4, %v15666_v59, %v5732_v12  ;;  %v5740_v36 = vor.u32 1.1754944e-38, %v5739_v26  ;;  %v15883_v59 = vpop.permute.xlu2 %9399  ;;  %v15890_v26 = vpop.permute.xlu0 %9334 }
 0x9fa   : > { %v5726_v39 = vsel %vm5723_vm5, %v5725_v13, %v5721_v29  ;;  %v9317_v0 = vunpack.i.h.bf16 %v15741_v15  ;;  %vm15877_vm0 = vmor %vm5748_vm1, %vm5749_vm11  ;;  %v9322_v6 = vunpack.i.h.bf16 %v15817_v9  ;;  %v9331_v29 = vunpack.i.l.bf16 %v15827_v32  ;;  %7713 = vmatmul.f32.gmra.mxu1 %v7503_v19  ;;  %v15892_v12 = vpop.permute.xlu1 %9344 }
 0x9fb   : > { %vm18474_vm12 = vcmask 523264   ;;  %v5751_v13 = vsel %vm15877_vm0, %v15672_v10, %v5747_v56  ;;  %9665 = vrcp.f32 %v15850_v16  ;;  %vm5738_vm14 = vcmp.eq.f32.partialorder %v5737_v21, 8.507059e+37  ;;  %v15900_v10 = vld [vmem:[%s17346_s10] ss:$0 sm:$0xff]  ;;  %v15928_v47 = vpop.f32.mrf.mxu3 }
 0x9fc   : > { %v7408_v15 = vsel %vm18474_vm12, %v7376_v27, %v9312_v61  ;;  %vm5753_vm9 = vcmp.eq.f32.partialorder %v5752_v48, 8.507059e+37  ;;  %v5755_v9 = vor.u32 1.1754944e-38, %v5754_v45  ;;  %v5760_v40 = vsub.f32 1.0, %v5759_v58  ;;  %v15905_v61 = vpop.f32.mrf.mxu1  ;;  %v18476_v58 = vld [vmem:[#allocation117_spill] sm:$0xff]  ;;  %vm18483_vm4 = vmmov %vm18474_vm12 }
 0x9fd   : > { %9667 = vpow2.f32 %v8647_v23  ;;  %v5741_v11 = vsel %vm5738_vm14, %v5740_v36, %v5736_v49  ;;  %v9336_v19 = vunpack.i.l.bf16 %v15890_v26  ;;  %v15895_v8 = vpop.eup %9663  ;;  %v5439_v56 = vadd.f32 %v15900_v10, %v15604_v25 }
 0x9fe   : > { %v9327_v21 = vunpack.i.h.bf16 %v15508_v37  ;;  %vm18475_vm13 = vcmask 654336   ;;  %v5756_v45 = vsel %vm5753_vm9, %v5755_v9, %v5751_v13  ;;  %v9341_v27 = vunpack.i.l.bf16 %v15588_v1  ;;  %v15913_v36 = vpop.f32.mrf.mxu2  ;;  %v18481_v9 = vld [vmem:[#allocation89_spill] sm:$0xff] }
 0x9ff   : > { %v7440_v48 = vsel %vm18475_vm13, %v7408_v15, %v9317_v0  ;;  %v7345_v23 = vsel %vm3608_vm6, %v18476_v58, %v9331_v29  ;;  %vm18477_vm11 = vcmask 785408   ;;  %v5767_v49 = vand.u32 2147483647, %v15737_v31  ;;  %vm18486_vm12 = vmmov %vm18475_vm13 }
 0xa00   : > { %v7472_v60 = vsel %vm18477_vm11, %v7440_v48, %v9322_v6  ;;  %v15916_v25 = vadd.f32 %v18459_v18, %v5726_v39  ;;  %v7377_v37 = vsel %vm3641_vm7, %v7345_v23, %v9336_v19  ;;  %v15920_v33 = vadd.f32 1.0, %v15803_v62  ;;  %v18480_v39 = vld [vmem:[#allocation70_spill] sm:$0xff]  ;;  %8092 = vrot.lane.b32.xlu0 %v18481_v9, %s9897_s24  ;;  %vm18488_vm14 = vmmov %vm18477_vm11 }
 0xa01   : > { %v15924_v0 = vadd.f32 %v18459_v18, %v15788_v3  ;;  %v5774_v14 = vmul.f32 %v15895_v8, %v15820_v53  ;;  %v15931_v6 = vadd.f32 %v18459_v18, %v5741_v11  ;;  %8088 = vrot.lane.b32.xlu2 %v18480_v39, %s9897_s24  ;;  %v15936_v29 = vadd.f32 %v18459_v18, %v5756_v45  ;;  %v15939_v15 = vpop.eup %9665  ;;  %v18482_v19 = vld [vmem:[#allocation90_spill] sm:$0xff]  ;;  %v9350_v9 = vpop.permute.xlu0 %9349  ;;  %vm18495_vm11 = vmmov %vm18483_vm4 }
 0xa02   : > { %18478 = vst [vmem:[#allocation228_spill] sm:$0xff] %v15920_v33  ;;  %v5761_v62 = vmul.f32 %v15834_v17, %v5760_v40  ;;  %v8648_v3 = vmul.f32 -1.442695, %v5439_v56  ;;  %v9346_v13 = vunpack.i.l.bf16 %v15892_v12  ;;  %8090 = vrot.lane.b32.xlu1 %v18482_v19, %s9897_s24  ;;  %v7504_v11 = vsel %vm3791_vm10, %v7472_v60, %v9327_v21  ;;  %v15949_v40 = vpop.permute.xlu2 %9414 }
 0xa03   : > { %18479 = vst [vmem:[#allocation262_spill] sm:$0xff] %v15924_v0  ;;  %vm5763_vm5 = vweird.f32 %v15737_v31  ;;  %v9668_v48 = vpop.eup %9667  ;;  %v9332_v45 = vunpack.i.h.bf16 %v15827_v32  ;;  %7716 = vmatmul.f32.gmra.mxu1 %v7504_v11  ;;  %v7409_v56 = vsel %vm18483_vm4, %v7377_v37, %v9341_v27  ;;  %vm15952_vm1 = vcmp.eq.f32.partialorder %v5767_v49, 8.507059e+37  ;;  %v15961_v32 = vpop.permute.xlu1 %9359  ;;  %vm18496_vm4 = vmmov %vm18486_vm12 }
 0xa04   : > { %v5769_v23 = vand.u32 2147483648, %v15737_v31  ;;  %v5442_v39 = vadd.f32 %v15900_v10, %v15676_v5  ;;  %v9356_v21 = vunpack.i.l.bf16 %v15648_v38  ;;  %v9337_v60 = vunpack.i.h.bf16 %v15890_v26  ;;  %v7672_v33 = vpop.f32.mrf.mxu1 }
 0xa05   : > { %vm5764_vm0 = vweird.f32 %v15834_v17  ;;  %v5775_v19 = vsub.f32 1.0, %v5774_v14  ;;  %v5789_v27 = vmul.f32 %v15939_v15, %v15850_v16  ;;  %v9351_v49 = vunpack.i.l.bf16 %v9350_v9 }
 0xa06   : > { %v5762_v37 = vadd.f32 %v15834_v17, %v5761_v62  ;;  %v15967_v11 = vadd.f32 1.0, %v9668_v48  ;;  %9669 = vpow2.f32 %v8648_v3  ;;  %v5445_v5 = vadd.f32 %v15900_v10, %v15755_v54  ;;  %vm15990_vm9 = vmor %vm5763_vm5, %vm5764_vm0 }
 0xa07   : > { %v7441_v26 = vsel %vm18486_vm12, %v7409_v56, %v9346_v13  ;;  %v9342_v0 = vunpack.i.h.bf16 %v15588_v1  ;;  %v7346_v14 = vsel %vm3608_vm6, %v18487_v20, %v9332_v45  ;;  %v7673_v62 = vadd.f32 %v15978_v50, %v7672_v33  ;;  %v15994_v45 = vpop.f32.mrf.mxu2  ;;  %v15996_v33 = vpop.f32.mrf.mxu3 }
 0xa08   : > { %v7473_v3 = vsel %vm18488_vm14, %v7441_v26, %v9351_v49  ;;  %v8649_v48 = vmul.f32 -1.442695, %v5442_v39  ;;  %v5448_v54 = vadd.f32 %v15900_v10, %v15840_v46  ;;  %v7378_v13 = vsel %vm3641_vm7, %v7346_v14, %v9337_v60  ;;  %v18492_v46 = vld [vmem:[#allocation112_spill] sm:$0xff] }
 0xa09   : > { %v7505_v1 = vsel %vm3791_vm10, %v7473_v3, %v9356_v21  ;;  %v15999_v56 = vadd.f32 %v15847_v41, %v7673_v62  ;;  %8056 = vrot.lane.b32.xlu2 %v18492_v46, %s9897_s24  ;;  %v5766_v39 = vsel %vm15990_vm9, %v15834_v17, %v5762_v37  ;;  %v5770_v21 = vor.u32 1.1754944e-38, %v5769_v23  ;;  %v18493_v14 = vld [vmem:[#allocation124_spill] sm:$0xff]  ;;  %v18494_v41 = vld [vmem:[#allocation123_spill] sm:$0xff]  ;;  %v16018_v37 = vpop.permute.xlu0 %9364 }
 0xa0a   : > { %v5776_v31 = vmul.f32 %v15895_v8, %v5775_v19  ;;  %v5790_v60 = vsub.f32 1.0, %v5789_v27  ;;  %v8650_v49 = vmul.f32 -1.442695, %v5445_v5  ;;  %v9347_v26 = vunpack.i.h.bf16 %v15892_v12  ;;  %8060 = vrot.lane.b32.xlu0 %v18493_v14, %s9897_s24  ;;  %8058 = vrot.lane.b32.xlu1 %v18494_v41, %s9897_s24  ;;  %v16015_v23 = vpop.permute.xlu2 %9429 }
 0xa0b   : > { %18491 = vst [vmem:[#allocation96_spill] sm:$0xff] %v15999_v56  ;;  %vm5778_vm13 = vweird.f32 %v15820_v53  ;;  %9671 = vrcp.f32 %v15967_v11  ;;  %v9352_v62 = vunpack.i.h.bf16 %v9350_v9  ;;  %v9361_v17 = vunpack.i.l.bf16 %v15961_v32  ;;  %7719 = vmatmul.f32.gmra.mxu1 %v7505_v1  ;;  %v16020_v5 = vpop.permute.xlu1 %9374 }
 0xa0c   : > { %v7410_v19 = vsel %vm18495_vm11, %v7378_v13, %v9342_v0  ;;  %v9670_v27 = vpop.eup %9669  ;;  %9673 = vpow2.f32 %v8649_v48  ;;  %v8651_v12 = vmul.f32 -1.442695, %v5448_v54  ;;  %v5771_v3 = vsel %vm15952_vm1, %v5770_v21, %v5766_v39  ;;  %v7675_v54 = vpop.f32.mrf.mxu1  ;;  %v18497_v39 = vld [vmem:[#allocation245_spill] sm:$0xff]  ;;  %vm18498_vm1 = vmmov %vm18488_vm14 }
 0xa0d   : > { %v5782_v20 = vand.u32 2147483647, %v15820_v53  ;;  %v9366_v9 = vunpack.i.l.bf16 %v16018_v37  ;;  %v5777_v1 = vadd.f32 %v15895_v8, %v5776_v31  ;;  %vm5779_vm5 = vweird.f32 %v15895_v8  ;;  %vm18506_vm14 = vmmov %vm18495_vm11 }
 0xa0e   : > { %v5784_v0 = vand.u32 2147483648, %v15820_v53  ;;  %9675 = vpow2.f32 %v8650_v49  ;;  %v9357_v48 = vunpack.i.h.bf16 %v15648_v38  ;;  %v7442_v13 = vsel %vm18496_vm4, %v7410_v19, %v9347_v26  ;;  %vm16056_vm0 = vmor %vm5778_vm13, %vm5779_vm5  ;;  %v18505_v53 = vld [vmem:[#allocation64_spill] sm:$0xff] }
 0xa0f   : > { %v5791_v46 = vmul.f32 %v15939_v15, %v5790_v60  ;;  %v9371_v58 = vunpack.i.l.bf16 %v15732_v7  ;;  %v7347_v21 = vsel %vm3608_vm6, %v18497_v39, %v9361_v17  ;;  %v7676_v14 = vadd.f32 %v15978_v50, %v7675_v54  ;;  %v16041_v57 = vpop.f32.mrf.mxu2  ;;  %v16045_v60 = vpop.f32.mrf.mxu3  ;;  %v18499_v17 = vld [vmem:[#allocation54_spill] sm:$0xff]  ;;  %vm18507_vm11 = vmmov %vm18496_vm4 }
 0xa10   : > { %v7474_v31 = vsel %vm18498_vm1, %v7442_v13, %v9352_v62  ;;  %v16037_v41 = vadd.f32 1.0, %v9670_v27  ;;  %9677 = vpow2.f32 %v8651_v12  ;;  %v7379_v49 = vsel %vm3641_vm7, %v7347_v21, %v9366_v9  ;;  %v18504_v13 = vld [vmem:[#allocation74_spill] sm:$0xff]  ;;  %vm18511_vm4 = vmmov %vm18498_vm1 }
 0xa11   : > { %v7899_v38 = vadd.f32 %v18459_v18, %v5771_v3  ;;  %v16043_v26 = vpop.eup %9671  ;;  %v16048_v19 = vadd.f32 %v15913_v36, %v7676_v14  ;;  %8082 = vrot.lane.b32.xlu2 %v18499_v17, %s9897_s24  ;;  %vm16060_vm12 = vcmp.eq.f32.partialorder %v5782_v20, 8.507059e+37  ;;  %v5785_v12 = vor.u32 1.1754944e-38, %v5784_v0 }
 0xa12   : > { %v5799_v3 = vand.u32 2147483648, %v15850_v16  ;;  %v9674_v36 = vpop.eup %9673  ;;  %v5451_v9 = vadd.f32 %v15900_v10, %v15928_v47  ;;  %v9376_v54 = vunpack.i.l.bf16 %v16020_v5  ;;  %8086 = vrot.lane.b32.xlu0 %v18504_v13, %s9897_s24  ;;  %8084 = vrot.lane.b32.xlu1 %v18505_v53, %s9897_s24  ;;  %v7506_v20 = vsel %vm3791_vm10, %v7474_v31, %v9357_v48  ;;  %v16077_v21 = vpop.permute.xlu2 %7253 }
 0xa13   : > { %v5781_v0 = vsel %vm16056_vm0, %v15895_v8, %v5777_v1  ;;  %v9362_v39 = vunpack.i.h.bf16 %v15961_v32  ;;  %7722 = vmatmul.f32.gmra.mxu1 %v7506_v20  ;;  %v7411_v47 = vsel %vm18506_vm14, %v7379_v49, %v9371_v58  ;;  %v5792_v14 = vadd.f32 %v15939_v15, %v5791_v46  ;;  %v9380_v32 = vpop.permute.xlu0 %9379  ;;  %v16087_v1 = vpop.permute.xlu1 %9389  ;;  %vm18516_vm0 = vmmov %vm18506_vm14 }
 0xa14   : > { %vm5794_vm9 = vweird.f32 %v15939_v15  ;;  %v9676_v17 = vpop.eup %9675  ;;  %v5804_v13 = vmul.f32 %v16043_v26, %v15967_v11  ;;  %9679 = vrcp.f32 %v16037_v41  ;;  %v9386_v48 = vunpack.i.l.bf16 %v15815_v51  ;;  %vm18521_vm14 = vmmov %vm18511_vm4 }
 0xa15   : > { %v9367_v8 = vunpack.i.h.bf16 %v16018_v37  ;;  %v16089_v31 = vadd.f32 1.0, %v9674_v36  ;;  %v9381_v58 = vunpack.i.l.bf16 %v9380_v32  ;;  %vm5793_vm13 = vweird.f32 %v15850_v16 }
 0xa16   : > { %v5797_v46 = vand.u32 2147483647, %v15850_v16  ;;  %v9678_v49 = vpop.eup %9677  ;;  %v8652_v62 = vmul.f32 -1.442695, %v5451_v9  ;;  %v5786_v53 = vsel %vm16060_vm12, %v5785_v12, %v5781_v0  ;;  %v7443_v20 = vsel %vm18507_vm11, %v7411_v47, %v9376_v54  ;;  %vm16098_vm5 = vmor %vm5793_vm13, %vm5794_vm9  ;;  %v16112_v0 = vpop.f32.mrf.mxu1 }
 0xa17   : > { %v5800_v36 = vor.u32 1.1754944e-38, %v5799_v3  ;;  %v9372_v43 = vunpack.i.h.bf16 %v15732_v7  ;;  %v7348_v52 = vsel %vm3608_vm6, %v18510_v55, %v9362_v39  ;;  %v7475_v16 = vsel %vm18511_vm4, %v7443_v20, %v9381_v58  ;;  %v16121_v39 = vpop.f32.mrf.mxu2  ;;  %vm18518_vm12 = vmmov %vm18507_vm11 }
 0xa18   : > { %v5796_v27 = vsel %vm16098_vm5, %v15939_v15, %v5792_v14  ;;  %v5805_v12 = vsub.f32 1.0, %v5804_v13  ;;  %v16109_v9 = vadd.f32 1.0, %v9676_v17  ;;  %v7380_v54 = vsel %vm3641_vm7, %v7348_v52, %v9367_v8  ;;  %v18514_v14 = vld [vmem:[#allocation109_spill] sm:$0xff]  ;;  %v18515_v17 = vld [vmem:[#allocation99_spill] sm:$0xff] }
 0xa19   : > { %v7507_v3 = vsel %vm3791_vm10, %v7475_v16, %v9386_v48  ;;  %9681 = vrcp.f32 %v16089_v31  ;;  %v16116_v7 = vadd.f32 1.0, %v9678_v49  ;;  %v16119_v55 = vadd.f32 1.0, %v15916_v25  ;;  %v16133_v25 = vpop.f32.mrf.mxu3 }
 0xa1a   : > { %vm5798_vm1 = vcmp.eq.f32.partialorder %v5797_v46, 8.507059e+37  ;;  %v16123_v15 = vpop.eup %9679  ;;  %9683 = vpow2.f32 %v8652_v62  ;;  %v16126_v47 = vadd.f32 1.0, %v15931_v6  ;;  %v9377_v52 = vunpack.i.h.bf16 %v16020_v5  ;;  %8054 = vrot.lane.b32.xlu0 %v18514_v14, %s9897_s24  ;;  %8052 = vrot.lane.b32.xlu1 %v18515_v17, %s9897_s24  ;;  %v16136_v46 = vpop.permute.xlu2 %7255 }
 0xa1b   : > { %18512 = vst [vmem:[#allocation136_spill] sm:$0xff] %v16119_v55  ;;  %v5801_v13 = vsel %vm5798_vm1, %v5800_v36, %v5796_v27  ;;  %v7931_v48 = vadd.f32 1.0, %v7899_v38  ;;  %v9382_v8 = vunpack.i.h.bf16 %v9380_v32  ;;  %v7900_v58 = vadd.f32 %v18459_v18, %v5786_v53  ;;  %7725 = vmatmul.f32.gmra.mxu1 %v7507_v3  ;;  %v16144_v62 = vpop.permute.xlu0 %9394  ;;  %v16146_v20 = vpop.permute.xlu1 %9404  ;;  %vm18528_vm1 = vmmov %vm18516_vm0 }
 0xa1c   : > { %18513 = vst [vmem:[#allocation168_spill] sm:$0xff] %v16126_v47  ;;  %v7412_v6 = vsel %vm18516_vm0, %v7380_v54, %v9372_v43  ;;  %9685 = vrcp.f32 %v16109_v9  ;;  %v16141_v5 = vadd.f32 1.0, %v15936_v29  ;;  %v9391_v49 = vunpack.i.l.bf16 %v16087_v1 }
 0xa1d   : > { %v5806_v38 = vmul.f32 %v16043_v26, %v5805_v12  ;;  %v5819_v32 = vmul.f32 %v16123_v15, %v16037_v41  ;;  %9687 = vrcp.f32 %v16116_v7  ;;  %v9396_v43 = vunpack.i.l.bf16 %v16144_v62  ;;  %v18519_v12 = vld [vmem:[#allocation27_spill] sm:$0xff] }
 0xa1e   : > { %18517 = vst [vmem:[#allocation205_spill] sm:$0xff] %v16141_v5  ;;  %v7901_v53 = vadd.f32 %v18459_v18, %v5801_v13  ;;  %v9387_v29 = vunpack.i.h.bf16 %v15815_v51  ;;  %v7444_v37 = vsel %vm18518_vm12, %v7412_v6, %v9377_v52  ;;  %v5812_v36 = vand.u32 2147483647, %v15967_v11  ;;  %v18522_v13 = vld [vmem:[#allocation114_spill] sm:$0xff]  ;;  %v16172_v34 = vpop.f32.mrf.mxu1 }
 0xa1f   : > { %v5814_v16 = vand.u32 2147483648, %v15967_v11  ;;  %v16158_v27 = vpop.eup %9681  ;;  %v16161_v54 = vmul.f32 %v7931_v48, %v18519_v12  ;;  %v16163_v3 = vadd.f32 1.0, %v7900_v58  ;;  %v7476_v14 = vsel %vm18521_vm14, %v7444_v37, %v9382_v8  ;;  %v16179_v8 = vpop.f32.mrf.mxu2 }
 0xa20   : > { %vm5809_vm9 = vweird.f32 %v16043_v26  ;;  %v9684_v17 = vpop.eup %9683  ;;  %v5454_v51 = vadd.f32 %v15900_v10, %v15996_v33  ;;  %v9401_v52 = vunpack.i.l.bf16 %v15883_v59  ;;  %v7349_v6 = vsel %vm3608_vm6, %v18522_v13, %v9391_v49  ;;  %v18523_v49 = vld [vmem:[#allocation101_spill] sm:$0xff] }
 0xa21   : > { %18520 = vst [vmem:[#allocation235_spill] sm:$0xff] %v16161_v54  ;;  %v5807_v48 = vadd.f32 %v16043_v26, %v5806_v38  ;;  %v5820_v12 = vsub.f32 1.0, %v5819_v32  ;;  %v7381_v58 = vsel %vm3641_vm7, %v7349_v6, %v9396_v43  ;;  %v16176_v42 = vadd.f32 1.0, %v7901_v53  ;;  %v16196_v6 = vpop.f32.mrf.mxu3 }
 0xa22   : > { %vm5808_vm13 = vweird.f32 %v15967_v11  ;;  %v16181_v37 = vpop.eup %9685  ;;  %v5834_v33 = vmul.f32 %v16158_v27, %v16089_v31  ;;  %8050 = vrot.lane.b32.xlu0 %v18523_v49, %s9897_s24  ;;  %v7508_v13 = vsel %vm3791_vm10, %v7476_v14, %v9387_v29  ;;  %vm16188_vm11 = vcmp.eq.f32.partialorder %v5812_v36, 8.507059e+37  ;;  %v16200_v44 = vpop.permute.xlu2 %8080  ;;  %s8356_s24 = sshll.u32 %s8353_s14, 4  ;;  %s8357_s24 = int_to_ptr.hbm [resolvable:$true] %s8356_s24 }
 0xa23   : > { %v5815_v32 = vor.u32 1.1754944e-38, %v5814_v16  ;;  %v16192_v43 = vpop.eup %9687  ;;  %v16194_v53 = vadd.f32 1.0, %v9684_v17  ;;  %v9392_v47 = vunpack.i.h.bf16 %v16087_v1  ;;  %v9406_v55 = vunpack.i.l.bf16 %v16146_v20  ;;  %7728 = vmatmul.f32.gmra.mxu1 %v7508_v13  ;;  %vm16206_vm5 = vmor %vm5808_vm13, %vm5809_vm9  ;;  %v9410_v14 = vpop.permute.xlu0 %9409  ;;  %v6391_v13 = vld [vmem:[#allocation2 + $0x1cc] sm:$0xff]  ;;  %s9833_s25 = sshra.s32 %s8357_s24, 4  ;;  %s9834_s25 = int_to_ptr.hbm [resolvable:$true] %s9833_s25 }
 0xa24   : > { %vm5823_vm4 = vweird.f32 %v16037_v41  ;;  %v8653_v36 = vmul.f32 -1.442695, %v5454_v51  ;;  %v9397_v16 = vunpack.i.h.bf16 %v16144_v62  ;;  %v16212_v1 = vpop.permute.xlu1 %9419  ;;  %v5811_v17 = vsel %vm16206_vm5, %v16043_v26, %v5807_v48  ;;  %v18530_v48 = vld [vmem:[#allocation71_spill] sm:$0xff]  ;;  %vm18533_vm5 = vmmov %vm18528_vm1  ;;  %s9835_s22 = scalar_lea.hbm %s9834_s25, 32  ;;  %p9840_p0 = scmp.lt.s32.totalorder %s9834_s25, %s18808_s18 }
 0xa25   : > { %v7413_v49 = vsel %vm18528_vm1, %v7381_v58, %v9401_v52  ;;  %v5849_v11 = vmul.f32 %v16181_v37, %v16109_v9  ;;  %v9416_v28 = vunpack.i.l.bf16 %v15949_v40  ;;  %v5821_v2 = vmul.f32 %v16123_v15, %v5820_v12  ;;  %p9836_p6 = scmp.ne.s32.totalorder %s9834_s25, %s9835_s22  ;;  %p9841_p1 = scmp.lt.s32.totalorder %s9839_s19, %s9835_s22 }
 0xa26   : > { %v5827_v51 = vand.u32 2147483647, %v16037_v41  ;;  %vm18529_vm0 = vcmask 130048   ;;  %v5835_v62 = vsub.f32 1.0, %v5834_v33  ;;  %v5864_v5 = vmul.f32 %v16192_v43, %v16116_v7  ;;  %v16235_v56 = vpop.f32.mrf.mxu1 }
 0xa27   : > { %8697 = vmatmul.msk.f32.gmra.mxu2 %vm18529_vm0, %v6391_v13  ;;  %v9411_v29 = vunpack.i.l.bf16 %v9410_v14  ;;  %v5829_v26 = vand.u32 2147483648, %v16037_v41  ;;  %9689 = vrcp.f32 %v16194_v53  ;;  %v9402_v52 = vunpack.i.h.bf16 %v15883_v59  ;;  %p9837_p9 = pnand %p9836_p6, %p10019_p11  ;;  %p9842_p3 = por %p9841_p1, %p9840_p0 }
 0xa28   : > { %v7350_v58 = vsel %vm3608_vm6, %v18530_v48, %v9392_v47  ;;  %v7445_v12 = vsel %vm18518_vm12, %v7413_v49, %v9406_v55  ;;  %9691 = vpow2.f32 %v8653_v36  ;;  %v5457_v13 = vadd.f32 %v15900_v10, %v16045_v60  ;;  %v16241_v47 = vpop.f32.mrf.mxu2 }
 0xa29   : > { %v7382_v33 = vsel %vm3641_vm7, %v7350_v58, %v9397_v16  ;;  %v7477_v63 = vsel %vm18521_vm14, %v7445_v12, %v9411_v29  ;;  %v5850_v30 = vsub.f32 1.0, %v5849_v11  ;;  %v5822_v59 = vadd.f32 %v16123_v15, %v5821_v2  ;;  %p9838_p13 = pneg %p9837_p9 }
 0xa2a   : > { %v7509_v54 = vsel %vm3791_vm10, %v7477_v63, %v9416_v28  ;;  %vm5824_vm9 = vweird.f32 %v16123_v15  ;;  %v9407_v55 = vunpack.i.h.bf16 %v16146_v20  ;;  %v16246_v60 = vsel %vm16188_vm11, %v5815_v32, %v5811_v17 }
 0xa2b   : > { %vm16248_vm13 = vcmp.eq.f32.partialorder %v5827_v51, 8.507059e+37  ;;  %v5836_v16 = vmul.f32 %v16158_v27, %v5835_v62  ;;  %v9412_v49 = vunpack.i.h.bf16 %v9410_v14  ;;  %v9421_v28 = vunpack.i.l.bf16 %v16212_v1  ;;  %7731 = vmatmul.f32.gmra.mxu1 %v7509_v54  ;;  %v16255_v20 = vpop.permute.xlu0 %9424  ;;  %vm16261_vm11 = vmor %vm5823_vm4, %vm5824_vm9  ;;  %v6392_v14 = vld [vmem:[#allocation2 + $0x1d4] sm:$0xff]  ;;  %p9843_p4 = pnand %p9842_p3, %p9838_p13 }
 0xa2c   : > { %v5830_v2 = vor.u32 1.1754944e-38, %v5829_v26  ;;  %v7414_v63 = vsel %vm18533_vm5, %v7382_v33, %v9402_v52  ;;  %v5865_v11 = vsub.f32 1.0, %v5864_v5  ;;  %v8654_v29 = vmul.f32 -1.442695, %v5457_v13  ;;  %v6998_v38 = vpop.permute.xlu1 %6997  ;;  %v16269_v5 = vpop.permute.xlu2 %8106  ;;  %v18538_v33 = vld [vmem:[#allocation191_spill] sm:$0xff] }
 0xa2d   : > { %vm5838_vm1 = vweird.f32 %v16089_v31  ;;  %v5842_v54 = vand.u32 2147483647, %v16089_v31  ;;  %v16267_v17 = vpop.eup %9689  ;;  %18536 = vst [vmem:[#allocation260_spill] sm:$0xff] %v16269_v5  ;;  %v5826_v51 = vsel %vm16261_vm11, %v16123_v15, %v5822_v59  ;;  %vm5839_vm0 = vweird.f32 %v16158_v27  ;;  %v16278_v52 = vpop.f32.mrf.mxu3 }
 0xa2e   : > { %v5844_v41 = vand.u32 2147483648, %v16089_v31  ;;  %vm18537_vm4 = vcmask 130048   ;;  %v5851_v62 = vmul.f32 %v16181_v37, %v5850_v30  ;;  %v9692_v26 = vpop.eup %9691  ;;  %v9417_v48 = vunpack.i.h.bf16 %v15949_v40  ;;  %v16292_v5 = vpop.f32.mrf.mxu1  ;;  %vm16310_vm5 = vmor %vm5838_vm1, %vm5839_vm0 }
 0xa2f   : > { %8698 = vmatmul.msk.f32.gmra.mxu2 %vm18537_vm4, %v6392_v14  ;;  %v9426_v58 = vunpack.i.l.bf16 %v16255_v20  ;;  %v7446_v12 = vsel %vm18518_vm12, %v7414_v63, %v9407_v55  ;;  %v5837_v13 = vadd.f32 %v16158_v27, %v5836_v16  ;;  %v9431_v15 = vunpack.i.l.bf16 %v16015_v23 }
 0xa30   : > { %v7351_v59 = vsel %vm3608_vm6, %v18538_v33, %v9421_v28  ;;  %v7478_v32 = vsel %vm18521_vm14, %v7446_v12, %v9412_v49  ;;  %v5859_v30 = vand.u32 2147483648, %v16109_v9  ;;  %9693 = vpow2.f32 %v8654_v29  ;;  %v16301_v49 = vpop.f32.mrf.mxu2 }
 0xa31   : > { %v5460_v14 = vadd.f32 %v15900_v10, %v16133_v25  ;;  %v7383_v40 = vsel %vm3641_vm7, %v7351_v59, %v9426_v58  ;;  %v5866_v55 = vmul.f32 %v16192_v43, %v5865_v11  ;;  %v5879_v16 = vmul.f32 %v16267_v17, %v16194_v53  ;;  %v18549_v11 = vld [vmem:[#allocation163_spill] sm:$0xff] }
 0xa32   : > { %v16297_v63 = vadd.f32 1.0, %v9692_v26  ;;  %v5852_v28 = vadd.f32 %v16181_v37, %v5851_v62  ;;  %vm5854_vm9 = vweird.f32 %v16181_v37  ;;  %v5831_v25 = vsel %vm16248_vm13, %v5830_v2, %v5826_v51 }
 0xa33   : > { %v7510_v29 = vsel %vm3791_vm10, %v7478_v32, %v9417_v48  ;;  %vm16314_vm11 = vcmp.eq.f32.partialorder %v5842_v54, 8.507059e+37  ;;  %v5845_v62 = vor.u32 1.1754944e-38, %v5844_v41  ;;  %vm18543_vm4 = vcmask 523264   ;;  %v7126_v51 = vpop.permute.xlu0 %7125 }
 0xa34   : > { %v7415_v58 = vsel %vm18543_vm4, %v7383_v40, %v9431_v15  ;;  %7734 = vmatmul.f32.gmra.mxu1 %v7510_v29  ;;  %v5841_v36 = vsel %vm16310_vm5, %v16158_v27, %v5837_v13  ;;  %vm5853_vm13 = vweird.f32 %v16109_v9  ;;  %v5857_v31 = vand.u32 2147483647, %v16109_v9  ;;  %v7000_v48 = vpop.permute.xlu1 %6999 }
 0xa35   : > { %v8655_v2 = vmul.f32 -1.442695, %v5460_v14  ;;  %vm16326_vm1 = vmor %vm5853_vm13, %vm5854_vm9  ;;  %v5860_v41 = vor.u32 1.1754944e-38, %v5859_v30  ;;  %v5867_v12 = vadd.f32 %v16192_v43, %v5866_v55  ;;  %vm5869_vm0 = vweird.f32 %v16192_v43  ;;  %v16343_v14 = vpop.permute.xlu2 %8074 }
 0xa36   : > { %v5880_v15 = vsub.f32 1.0, %v5879_v16  ;;  %9695 = vrcp.f32 %v16297_v63  ;;  %v9422_v27 = vunpack.i.h.bf16 %v16212_v1  ;;  %v5856_v9 = vsel %vm16326_vm1, %v16181_v37, %v5852_v28  ;;  %v9694_v13 = vpop.eup %9693  ;;  %vm18551_vm1 = vmmov %vm18518_vm12 }
 0xa37   : > { %v9427_v33 = vunpack.i.h.bf16 %v16255_v20  ;;  %v7447_v59 = vsel %vm18518_vm12, %v7415_v58, %v6998_v38  ;;  %vm5868_vm14 = vweird.f32 %v16116_v7  ;;  %v5874_v32 = vand.u32 2147483648, %v16116_v7  ;;  %v16351_v20 = vpop.f32.mrf.mxu3  ;;  %v7690_v38 = vpop.f32.mrf.mxu1 }
 0xa38   : > { %v5463_v30 = vadd.f32 %v15900_v10, %v16196_v6  ;;  %vm18546_vm9 = vcmask 785408   ;;  %vm5858_vm5 = vcmp.eq.f32.partialorder %v5857_v31, 8.507059e+37  ;;  %vm16346_vm4 = vmor %vm5868_vm14, %vm5869_vm0  ;;  %v5872_v37 = vand.u32 2147483647, %v16116_v7  ;;  %v16363_v7 = vpop.f32.mrf.mxu2 }
 0xa39   : > { %v7479_v1 = vsel %vm18546_vm9, %v7447_v59, %v7126_v51  ;;  %9697 = vpow2.f32 %v8655_v2  ;;  %v5846_v55 = vsel %vm16314_vm11, %v5845_v62, %v5841_v36  ;;  %v5861_v16 = vsel %vm5858_vm5, %v5860_v41, %v5856_v9  ;;  %vm18552_vm0 = vmmov %vm18546_vm9 }
 0xa3a   : > { %v5871_v6 = vsel %vm16346_vm4, %v16192_v43, %v5867_v12  ;;  %v16358_v28 = vadd.f32 1.0, %v9694_v13  ;;  %v9432_v29 = vunpack.i.h.bf16 %v16015_v23  ;;  %v7352_v58 = vsel %vm3608_vm6, %v18549_v11, %v9422_v27 }
 0xa3b   : > { %v5881_v31 = vmul.f32 %v16267_v17, %v5880_v15  ;;  %v7902_v26 = vadd.f32 %v18459_v18, %v16246_v60  ;;  %v7384_v62 = vsel %vm3641_vm7, %v7352_v58, %v9427_v33  ;;  %v7511_v36 = vsel %vm3791_vm10, %v7479_v1, %v16077_v21  ;;  %v7128_v12 = vpop.permute.xlu0 %7127 }
 0xa3c   : > { %v5875_v43 = vor.u32 1.1754944e-38, %v5874_v32  ;;  %v16371_v2 = vpop.eup %9695  ;;  %v8656_v51 = vmul.f32 -1.442695, %v5463_v30  ;;  %v7903_v23 = vadd.f32 %v18459_v18, %v5831_v25  ;;  %v7691_v54 = vadd.f32 %v15978_v50, %v7690_v38  ;;  %7737 = vmatmul.f32.gmra.mxu1 %v7511_v36  ;;  %v16376_v15 = vpop.permute.xlu1 %8112 }
 0xa3d   : > { %vm5873_vm6 = vcmp.eq.f32.partialorder %v5872_v37, 8.507059e+37  ;;  %v7904_v41 = vadd.f32 %v18459_v18, %v5846_v55  ;;  %v7905_v60 = vadd.f32 %v18459_v18, %v5861_v16  ;;  %vm5883_vm7 = vweird.f32 %v16194_v53 }
 0xa3e   : > { %v5876_v27 = vsel %vm5873_vm6, %v5875_v43, %v5871_v6  ;;  %9699 = vrcp.f32 %v16358_v28  ;;  %vm18550_vm11 = vcmask 523264   ;;  %v5882_v25 = vadd.f32 %v16267_v17, %v5881_v31 }
 0xa3f   : > { %v7416_v21 = vsel %vm18550_vm11, %v7384_v62, %v9432_v29  ;;  %vm5884_vm13 = vweird.f32 %v16267_v17  ;;  %v9698_v9 = vpop.eup %9697  ;;  %v5894_v13 = vmul.f32 %v16371_v2, %v16297_v63  ;;  %v5887_v59 = vand.u32 2147483647, %v16194_v53  ;;  %v16394_v38 = vpop.f32.mrf.mxu3 }
 0xa40   : > { %v7448_v33 = vsel %vm18551_vm1, %v7416_v21, %v7000_v48  ;;  %v5889_v32 = vand.u32 2147483648, %v16194_v53  ;;  %9701 = vpow2.f32 %v8656_v51  ;;  %v7804_v30 = vadd.f32 %v16241_v47, %v7691_v54  ;;  %v7693_v6 = vpop.f32.mrf.mxu1  ;;  %vm16400_vm12 = vmor %vm5883_vm7, %vm5884_vm13 }
 0xa41   : > { %v7480_v1 = vsel %vm18552_vm0, %v7448_v33, %v7128_v12  ;;  %v7906_v40 = vadd.f32 %v18459_v18, %v5876_v27  ;;  %v5466_v37 = vadd.f32 %v15900_v10, %v16278_v52  ;;  %v7934_v55 = vadd.f32 1.0, %v7902_v26  ;;  %v16408_v52 = vpop.permute.xlu2 %8100  ;;  %v16414_v26 = vpop.f32.mrf.mxu2 }
 0xa42   : > { %v7936_v16 = vadd.f32 1.0, %v7904_v41  ;;  %v7937_v48 = vadd.f32 1.0, %v7905_v60  ;;  %v16404_v47 = vadd.f32 1.0, %v9698_v9  ;;  %v7688_v11 = vadd.f32 %v15978_v50, %v16292_v5  ;;  %18555 = vst [vmem:[#allocation87_spill] sm:$0xff] %v16408_v52  ;;  %v18556_v60 = vld [vmem:[#allocation22_spill] sm:$0xff] }
 0xa43   : > { %v7694_v58 = vadd.f32 %v15978_v50, %v7693_v6  ;;  %v5886_v31 = vsel %vm16400_vm12, %v16267_v17, %v5882_v25  ;;  %v5895_v53 = vsub.f32 1.0, %v5894_v13  ;;  %v7935_v62 = vadd.f32 1.0, %v7903_v23  ;;  %v18557_v17 = vld [vmem:[#allocation28_spill] sm:$0xff]  ;;  %v16423_v25 = vpop.permute.xlu0 %8110 }
 0xa44   : > { %v7512_v36 = vsel %vm3791_vm10, %v7480_v1, %v16136_v46  ;;  %v5890_v43 = vor.u32 1.1754944e-38, %v5889_v32  ;;  %v16418_v51 = vpop.eup %9699  ;;  %v7871_v54 = vmax.f32 %v7804_v30, 0.0  ;;  %v7938_v41 = vadd.f32 1.0, %v7906_v40  ;;  %v16425_v23 = vpop.permute.xlu1 %8108  ;;  %v18559_v32 = vld [vmem:[#allocation31_spill] sm:$0xff]  ;;  %v18560_v1 = vld [vmem:[#allocation32_spill] sm:$0xff] }
 0xa45   : > { %v7807_v5 = vadd.f32 %v16301_v49, %v7694_v58  ;;  %7740 = vmatmul.f32.gmra.mxu1 %v7512_v36  ;;  %vm5888_vm14 = vcmp.eq.f32.partialorder %v5887_v59, 8.507059e+37  ;;  %v8657_v12 = vmul.f32 -1.442695, %v5466_v37  ;;  %v7968_v27 = vmul.f32 %v7936_v16, %v18556_v60  ;;  %18558 = vst [vmem:[#allocation142_spill] sm:$0xff] %v16425_v23  ;;  %v18561_v16 = vld [vmem:[#allocation33_spill] sm:$0xff]  ;;  %v18562_v58 = vld [vmem:[#allocation34_spill] sm:$0xff] }
 0xa46   : > { %v7969_v21 = vmul.f32 %v7937_v48, %v18557_v17  ;;  %v5891_v9 = vsel %vm5888_vm14, %v5890_v43, %v5886_v31  ;;  %v9702_v46 = vpop.eup %9701  ;;  %9703 = vrcp.f32 %v16404_v47  ;;  %v7685_v13 = vadd.f32 %v15978_v50, %v16235_v56 }
 0xa47   : > { %v7801_v49 = vadd.f32 %v16179_v8, %v7688_v11  ;;  %v7872_v33 = vmax.f32 %v7807_v5, 0.0  ;;  %v5909_v59 = vmul.f32 %v16418_v51, %v16358_v28  ;;  %v16435_v30 = vmul.f32 %v16176_v42, %v18559_v32  ;;  %v16446_v36 = vpop.f32.mrf.mxu3 }
 0xa48   : > { %v7966_v40 = vmul.f32 %v7934_v55, %v18560_v1  ;;  %v5896_v37 = vmul.f32 %v16371_v2, %v5895_v53  ;;  %v7967_v6 = vmul.f32 %v7935_v62, %v18561_v16  ;;  %v8000_v48 = vadd.f32 %v7968_v27, %v7871_v54  ;;  %v7696_v11 = vpop.f32.mrf.mxu1 }
 0xa49   : > { %v8001_v29 = vadd.f32 %v7969_v21, %v7872_v33  ;;  %v7970_v56 = vmul.f32 %v7938_v41, %v18562_v58  ;;  %v16441_v31 = vadd.f32 1.0, %v9702_v46  ;;  %9705 = vpow2.f32 %v8657_v12  ;;  %v16451_v54 = vpop.f32.mrf.mxu2  ;;  %v16461_v27 = vpop.permute.xlu2 %8068 }
 0xa4a   : > { %v5469_v8 = vadd.f32 %v15900_v10, %v16351_v20  ;;  %v7907_v42 = vadd.f32 %v18459_v18, %v5891_v9  ;;  %v7798_v55 = vadd.f32 %v16121_v39, %v7685_v13  ;;  %v7870_v53 = vmax.f32 %v7801_v49, 0.0 }
 0xa4b   : > { %v8033_v62 = vadd.f32 %v8001_v29, %v14891_v4  ;;  %v7697_v43 = vadd.f32 %v15978_v50, %v7696_v11  ;;  %v5910_v5 = vsub.f32 1.0, %v5909_v59  ;;  %v5897_v41 = vadd.f32 %v16371_v2, %v5896_v37  ;;  %v8079_v9 = vpop.permute.xlu0 %8078 }
 0xa4c   : > { %vm5899_vm10 = vweird.f32 %v16371_v2  ;;  %v5904_v20 = vand.u32 2147483648, %v16297_v63  ;;  %v16456_v12 = vpop.eup %9703  ;;  %v7682_v60 = vadd.f32 %v15978_v50, %v16172_v34  ;;  %v8032_v17 = vadd.f32 %v8000_v48, %v14914_v35  ;;  %v8077_v46 = vpop.permute.xlu1 %8076 }
 0xa4d   : > { %v8161_v39 = vadd.f32 %v16200_v44, %v8033_v62  ;;  %v7810_v4 = vadd.f32 %v16363_v7, %v7697_v43  ;;  %9707 = vrcp.f32 %v16441_v31  ;;  %v8658_v21 = vmul.f32 -1.442695, %v5469_v8 }
 0xa4e   : > { %vm5898_vm9 = vweird.f32 %v16297_v63  ;;  %v5902_v13 = vand.u32 2147483647, %v16297_v63  ;;  %v7869_v49 = vmax.f32 %v7798_v55, 0.0  ;;  %v7999_v33 = vadd.f32 %v7967_v6, %v7870_v53 }
 0xa4f   : > { %v7873_v34 = vmax.f32 %v7810_v4, 0.0  ;;  %v8160_v59 = vadd.f32 %v8079_v9, %v8032_v17  ;;  %vm18563_vm5 = vcmask 130048   ;;  %vm16471_vm4 = vmor %vm5898_vm9, %vm5899_vm10  ;;  %v9706_v35 = vpop.eup %9705  ;;  %v5924_v7 = vmul.f32 %v16456_v12, %v16404_v47  ;;  %v16500_v62 = vpop.f32.mrf.mxu3 }
 0xa50   : > { %8701 = vmatpush.xpose.msk.msra.mxu0 %vm18563_vm5, %v8161_v39  ;;  %v7939_v32 = vadd.f32 1.0, %v7907_v42  ;;  %v5901_v63 = vsel %vm16471_vm4, %v16371_v2, %v5897_v41  ;;  %v5911_v1 = vmul.f32 %v16418_v51, %v5910_v5  ;;  %v7679_v37 = vadd.f32 %v15978_v50, %v16112_v0  ;;  %v7699_v58 = vpop.f32.mrf.mxu1  ;;  %vm18567_vm7 = vmmov %vm18563_vm5 }
 0xa51   : > { %v7795_v16 = vadd.f32 %v16041_v57, %v7682_v60  ;;  %v16484_v6 = vadd.f32 %v7970_v56, %v7873_v34  ;;  %v5905_v48 = vor.u32 1.1754944e-38, %v5904_v20  ;;  %9709 = vpow2.f32 %v8658_v21  ;;  %v16492_v57 = vpop.f32.mrf.mxu2  ;;  %v18568_v20 = vld [vmem:[#allocation36_spill] sm:$0xff]  ;;  %v18571_v21 = vld [vmem:[#allocation258_spill] sm:$0xff]  ;;  %vm18572_vm1 = vmmov %vm18563_vm5 }
 0xa52   : > { %v5472_v29 = vadd.f32 %v15900_v10, %v16394_v38  ;;  %vm5903_vm6 = vcmp.eq.f32.partialorder %v5902_v13, 8.507059e+37  ;;  %v5919_v8 = vand.u32 2147483648, %v16358_v28  ;;  %v7998_v11 = vadd.f32 %v7966_v40, %v7869_v49  ;;  %vm18576_vm14 = vmmov %vm18572_vm1 }
 0xa53   : > { %18566 = vst [vmem:[#allocation172_spill] sm:$0xff] %v16484_v6  ;;  %v8031_v2 = vadd.f32 %v7999_v33, %v14894_v24  ;;  %v7700_v42 = vadd.f32 %v15978_v50, %v7699_v58  ;;  %v5906_v0 = vsel %vm5903_vm6, %v5905_v48, %v5901_v63  ;;  %v16494_v56 = vpop.eup %9707  ;;  %v5925_v55 = vsub.f32 1.0, %v5924_v7  ;;  %v16505_v39 = vpop.permute.xlu0 %8104  ;;  %vm18582_vm4 = vmmov %vm18572_vm1 }
 0xa54   : > { %8702 = vmatpush.xpose.msk.msra.mxu0 %vm18567_vm7, %v8160_v59  ;;  %v16496_v53 = vadd.f32 1.0, %v9706_v35  ;;  %v5912_v38 = vadd.f32 %v16418_v51, %v5911_v1  ;;  %vm5914_vm11 = vweird.f32 %v16418_v51  ;;  %v7792_v24 = vadd.f32 %v15994_v45, %v7679_v37  ;;  %18569 = vst [vmem:[#allocation197_spill] sm:$0xff] %v16505_v39  ;;  %v16507_v4 = vpop.permute.xlu1 %8102  ;;  %v18575_v1 = vld [vmem:[#allocation30_spill] sm:$0xff] }
 0xa55   : > { %v7868_v40 = vmax.f32 %v7795_v16, 0.0  ;;  %v8159_v43 = vadd.f32 %v8077_v46, %v8031_v2  ;;  %v7813_v5 = vadd.f32 %v16414_v26, %v7700_v42  ;;  %v8659_v41 = vmul.f32 -1.442695, %v5472_v29  ;;  %18570 = vst [vmem:[#allocation233_spill] sm:$0xff] %v16507_v4 }
 0xa56   : > { %v7971_v60 = vmul.f32 %v7939_v32, %v18568_v20  ;;  %vm5913_vm13 = vweird.f32 %v16358_v28  ;;  %v5917_v17 = vand.u32 2147483647, %v16358_v28  ;;  %v8030_v9 = vadd.f32 %v7998_v11, %v18571_v21  ;;  %v16523_v28 = vpop.permute.xlu2 %8094 }
 0xa57   : > { %v7874_v13 = vmax.f32 %v7813_v5, 0.0  ;;  %v7908_v45 = vadd.f32 %v18459_v18, %v5906_v0  ;;  %vm16516_vm0 = vmor %vm5913_vm13, %vm5914_vm11  ;;  %v5920_v46 = vor.u32 1.1754944e-38, %v5919_v8  ;;  %v9710_v49 = vpop.eup %9709  ;;  %v5939_v33 = vmul.f32 %v16494_v56, %v16441_v31  ;;  %v18577_v5 = vld [vmem:[#allocation38_spill] sm:$0xff] }
 0xa58   : > { %8703 = vmatpush.xpose.msk.msra.mxu0 %vm18572_vm1, %v8159_v43  ;;  %9711 = vrcp.f32 %v16496_v53  ;;  %v5916_v34 = vsel %vm16516_vm0, %v16418_v51, %v5912_v38  ;;  %v5926_v59 = vmul.f32 %v16456_v12, %v5925_v55  ;;  %v7867_v44 = vmax.f32 %v7792_v24, 0.0  ;;  %v7702_v16 = vpop.f32.mrf.mxu1  ;;  %v16555_v43 = vpop.f32.mrf.mxu3  ;;  %vm18587_vm11 = vmmov %vm18572_vm1 }
 0xa59   : > { %v7997_v35 = vadd.f32 %v16435_v30, %v7868_v40  ;;  %v8158_v7 = vadd.f32 %v16343_v14, %v8030_v9  ;;  %v16531_v32 = vadd.f32 %v7971_v60, %v7874_v13  ;;  %9713 = vpow2.f32 %v8659_v41  ;;  %v16541_v14 = vpop.f32.mrf.mxu2  ;;  %v18580_v13 = vld [vmem:[#allocation235_spill] sm:$0xff] }
 0xa5a   : > { %v5475_v63 = vadd.f32 %v15900_v10, %v16446_v36  ;;  %v7964_v37 = vmul.f32 %v16163_v3, %v18575_v1  ;;  %vm5918_vm12 = vcmp.eq.f32.partialorder %v5917_v17, 8.507059e+37  ;;  %v16537_v48 = vadd.f32 1.0, %v9710_v49 }
 0xa5b   : > { %v7703_v51 = vadd.f32 %v15978_v50, %v7702_v16  ;;  %v7940_v30 = vadd.f32 1.0, %v7908_v45  ;;  %v5921_v29 = vsel %vm5918_vm12, %v5920_v46, %v5916_v34  ;;  %v5940_v58 = vsub.f32 1.0, %v5939_v33  ;;  %v8073_v55 = vpop.permute.xlu0 %8072  ;;  %v18581_v46 = vld [vmem:[#allocation187_spill] sm:$0xff]  ;;  %v18583_v33 = vld [vmem:[#allocation201_spill] sm:$0xff] }
 0xa5c   : > { %8704 = vmatpush.xpose.msk.msra.mxu0 %vm18576_vm14, %v8158_v7  ;;  %v5927_v8 = vadd.f32 %v16456_v12, %v5926_v59  ;;  %vm5929_vm10 = vweird.f32 %v16456_v12  ;;  %v5934_v10 = vand.u32 2147483648, %v16404_v47  ;;  %v7866_v3 = vmax.f32 %v16048_v19, 0.0  ;;  %v8071_v38 = vpop.permute.xlu1 %8070  ;;  %vm18602_vm14 = vmmov %vm18582_vm4 }
 0xa5d   : > { %v7996_v36 = vadd.f32 %v7964_v37, %v7867_v44  ;;  %v7816_v11 = vadd.f32 %v16451_v54, %v7703_v51  ;;  %v8029_v2 = vadd.f32 %v7997_v35, %v14873_v22  ;;  %v8660_v0 = vmul.f32 -1.442695, %v5475_v63  ;;  %v18584_v37 = vld [vmem:[#allocation95_spill] sm:$0xff]  ;;  %v18593_v22 = vld [vmem:[#allocation88_spill] sm:$0xff] }
 0xa5e   : > { %v16549_v42 = vpop.eup %9711  ;;  %v7909_v24 = vadd.f32 %v18459_v18, %v5921_v29  ;;  %vm5928_vm9 = vweird.f32 %v16404_v47  ;;  %v5932_v40 = vand.u32 2147483647, %v16404_v47  ;;  %9715 = vrcp.f32 %v16537_v48  ;;  %v16579_v34 = vpop.permute.xlu2 %8062 }
 0xa5f   : > { %v7875_v19 = vmax.f32 %v7816_v11, 0.0  ;;  %v7972_v54 = vmul.f32 %v7940_v30, %v18577_v5  ;;  %v8157_v41 = vadd.f32 %v8073_v55, %v8029_v2  ;;  %vm16560_vm5 = vmor %vm5928_vm9, %vm5929_vm10  ;;  %v9714_v20 = vpop.eup %9713  ;;  %v7670_v60 = vadd.f32 %v15978_v50, %v15905_v61  ;;  %v18588_v11 = vld [vmem:[#allocation26_spill] sm:$0xff]  ;;  %v18589_v2 = vld [vmem:[#allocation205_spill] sm:$0xff] }
 0xa60   : > { %v5931_v47 = vsel %vm16560_vm5, %v16456_v12, %v5927_v8  ;;  %v5935_v17 = vor.u32 1.1754944e-38, %v5934_v10  ;;  %v5941_v21 = vmul.f32 %v16494_v56, %v5940_v58  ;;  %v5954_v9 = vmul.f32 %v16549_v42, %v16496_v53  ;;  %v7705_v12 = vpop.f32.mrf.mxu1  ;;  %v18585_v8 = vld [vmem:[#allocation96_spill] sm:$0xff] }
 0xa61   : > { %v7995_v45 = vadd.f32 %v18580_v13, %v7866_v3  ;;  %v16573_v26 = vadd.f32 %v7972_v54, %v7875_v19  ;;  %v8028_v49 = vadd.f32 %v7996_v36, %v18581_v46  ;;  %8705 = vmatpush.xpose.msk.msra.mxu0 %vm18582_vm4, %v8157_v41  ;;  %v7667_v61 = vadd.f32 %v15978_v50, %v18583_v33  ;;  %v16584_v1 = vpop.f32.mrf.mxu2  ;;  %v18586_v3 = vld [vmem:[#allocation226_spill] sm:$0xff]  ;;  %v18590_v5 = vld [vmem:[#allocation40_spill] sm:$0xff]  ;;  %v16632_v33 = vpop.f32.mrf.mxu3 }
 0xa62   : > { %9717 = vpow2.f32 %v8660_v0  ;;  %v7941_v59 = vadd.f32 1.0, %v7909_v24  ;;  %vm5933_vm6 = vcmp.eq.f32.partialorder %v5932_v40, 8.507059e+37  ;;  %v16581_v44 = vadd.f32 1.0, %v9714_v20 }
 0xa63   : > { %v8156_v35 = vadd.f32 %v8071_v38, %v8028_v49  ;;  %v7706_v7 = vadd.f32 %v15978_v50, %v7705_v12  ;;  %v5936_v63 = vsel %vm5933_vm6, %v5935_v17, %v5931_v47  ;;  %v7783_v16 = vadd.f32 %v18584_v37, %v7670_v60  ;;  %v16598_v55 = vpop.permute.xlu0 %8098  ;;  %v18605_v37 = vld [vmem:[#allocation25_spill] sm:$0xff] }
 0xa64   : > { %v5942_v51 = vadd.f32 %v16494_v56, %v5941_v21  ;;  %vm5944_vm7 = vweird.f32 %v16494_v56  ;;  %v5949_v30 = vand.u32 2147483648, %v16441_v31  ;;  %v16590_v29 = vpop.eup %9715  ;;  %v5955_v58 = vsub.f32 1.0, %v5954_v9  ;;  %v16600_v38 = vpop.permute.xlu1 %8096  ;;  %v18601_v21 = vld [vmem:[#allocation264_spill] sm:$0xff] }
 0xa65   : > { %v7865_v10 = vmax.f32 %v18585_v8, 0.0  ;;  %v8027_v36 = vadd.f32 %v7995_v45, %v18586_v3  ;;  %v7819_v50 = vadd.f32 %v16492_v57, %v7706_v7  ;;  %8706 = vmatpush.xpose.msk.msra.mxu0 %vm18587_vm11, %v8156_v35  ;;  %v7962_v0 = vmul.f32 %v18589_v2, %v18588_v11  ;;  %v18603_v7 = vld [vmem:[#allocation24_spill] sm:$0xff] }
 0xa66   : > { %v7910_v24 = vadd.f32 %v18459_v18, %v5936_v63  ;;  %vm5943_vm13 = vweird.f32 %v16441_v31  ;;  %v5947_v40 = vand.u32 2147483647, %v16441_v31  ;;  %9719 = vrcp.f32 %v16581_v44  ;;  %v18597_v31 = vld [vmem:[#allocation227_spill] sm:$0xff]  ;;  %v18604_v63 = vld [vmem:[#allocation136_spill] sm:$0xff] }
 0xa67   : > { %v8155_v19 = vadd.f32 %v16461_v27, %v8027_v36  ;;  %v7876_v57 = vmax.f32 %v7819_v50, 0.0  ;;  %v7973_v54 = vmul.f32 %v7941_v59, %v18590_v5  ;;  %vm16610_vm1 = vmor %vm5943_vm13, %vm5944_vm7  ;;  %v18594_v20 = vand.u32 2147483647, %v18593_v22 }
 0xa68   : > { %v18598_v47 = vand.u32 2147483647, %v18597_v31  ;;  %v9718_v27 = vpop.eup %9717  ;;  %v7780_v9 = vadd.f32 %v18601_v21, %v7667_v61  ;;  %v7864_v13 = vmax.f32 %v7783_v16, 0.0  ;;  %v5969_v45 = vmul.f32 %v16590_v29, %v16537_v48  ;;  %v18606_v16 = vld [vmem:[#allocation168_spill] sm:$0xff]  ;;  %v7708_v3 = vpop.f32.mrf.mxu1 }
 0xa69   : > { %vm16616_vm0 = vcmp.eq.f32.partialorder %v18594_v20, 8.507059e+37  ;;  %v5946_v46 = vsel %vm16610_vm1, %v16494_v56, %v5942_v51  ;;  %v7994_v49 = vadd.f32 %v7962_v0, %v7865_v10  ;;  %v8005_v12 = vadd.f32 %v7973_v54, %v7876_v57  ;;  %8707 = vmatpush.xpose.msk.msra.mxu0 %vm18602_vm14, %v8155_v19  ;;  %v18607_v56 = vld [vmem:[#allocation134_spill] sm:$0xff]  ;;  %v16649_v11 = vpop.f32.mrf.mxu2  ;;  %v8089_v57 = vpop.permute.xlu2 %8088  ;;  %v18609_v54 = vld [vmem:[#allocation128_spill] sm:$0xff]  ;;  %v18610_v20 = vld [vmem:[#allocation41_spill] sm:$0xff] }
 0xa6a   : > { %vm16622_vm12 = vcmp.eq.f32.partialorder %v18598_v47, 8.507059e+37  ;;  %v5950_v59 = vor.u32 1.1754944e-38, %v5949_v30  ;;  %v5956_v35 = vmul.f32 %v16549_v42, %v5955_v58  ;;  %v7960_v61 = vmul.f32 %v18604_v63, %v18603_v7  ;;  %v16646_v10 = vld [vmem:[%s17348_s12] ss:$0 sm:$0xff] }
 0xa6b   : > { %v7961_v8 = vmul.f32 %v18606_v16, %v18605_v37  ;;  %v7942_v36 = vadd.f32 1.0, %v7910_v24  ;;  %vm5948_vm10 = vcmp.eq.f32.partialorder %v5947_v40, 8.507059e+37  ;;  %v16640_v50 = vadd.f32 1.0, %v9718_v27  ;;  %v8067_v47 = vpop.permute.xlu0 %8066  ;;  %v18615_v7 = vld [vmem:[#allocation230_spill] sm:$0xff] }
 0xa6c   : > { %v8037_v51 = vadd.f32 %v8005_v12, %v18607_v56  ;;  %v7709_v30 = vadd.f32 %v16646_v10, %v7708_v3  ;;  %v5951_v58 = vsel %vm5948_vm10, %v5950_v59, %v5946_v46  ;;  %v7863_v2 = vmax.f32 %v7780_v9, 0.0  ;;  %v16652_v24 = vpop.eup %9719  ;;  %v8065_v27 = vpop.permute.xlu1 %8064  ;;  %v18617_v37 = vld [vmem:[#allocation194_spill] sm:$0xff]  ;;  %v18620_v3 = vld [vmem:[#allocation257_spill] sm:$0xff] }
 0xa6d   : > { %v7993_v0 = vadd.f32 %v7961_v8, %v7864_v13  ;;  %v5970_v19 = vsub.f32 1.0, %v5969_v45  ;;  %vm5959_vm9 = vweird.f32 %v16549_v42  ;;  %v8026_v41 = vadd.f32 %v7994_v49, %v18609_v54  ;;  %v18619_v8 = vld [vmem:[#allocation224_spill] sm:$0xff]  ;;  %v18622_v56 = vld [vmem:[#allocation138_spill] sm:$0xff]  ;;  %v18627_v54 = vld [vmem:[#allocation121_spill] sm:$0xff] }
 0xa6e   : > { %v16654_v40 = vadd.f32 %v8089_v57, %v8037_v51  ;;  %v7822_v5 = vadd.f32 %v16541_v14, %v7709_v30  ;;  %v5957_v22 = vadd.f32 %v16549_v42, %v5956_v35  ;;  %v7974_v31 = vmul.f32 %v7942_v36, %v18610_v20  ;;  %v18614_v35 = vld [vmem:[#allocation161_spill] sm:$0xff]  ;;  %v18623_v30 = vld [vmem:[#allocation166_spill] sm:$0xff]  ;;  %v18629_v20 = vld [vmem:[#allocation171_spill] sm:$0xff] }
 0xa6f   : > { %v7911_v21 = vadd.f32 %v18459_v18, %v5951_v58  ;;  %vm5958_vm5 = vweird.f32 %v16496_v53  ;;  %v5964_v9 = vand.u32 2147483648, %v16496_v53  ;;  %9721 = vrcp.f32 %v16640_v50 }
 0xa70   : > { %18608 = vst [vmem:[#allocation267_spill] sm:$0xff] %v16654_v40  ;;  %v7877_v13 = vmax.f32 %v7822_v5, 0.0  ;;  %v8154_v45 = vadd.f32 %v8067_v47, %v8026_v41  ;;  %v5962_v14 = vand.u32 2147483647, %v16496_v53  ;;  %v5984_v46 = vmul.f32 %v16652_v24, %v16581_v44  ;;  %vm16669_vm4 = vmor %vm5958_vm5, %vm5959_vm9  ;;  %v7711_v47 = vpop.f32.mrf.mxu1 }
 0xa71   : > { %v5971_v12 = vmul.f32 %v16590_v29, %v5970_v19  ;;  %v18616_v63 = vsel %vm15765_vm8, %v18614_v35, %v18615_v7  ;;  %v18621_v36 = vsel %vm15558_vm3, %v18619_v8, %v18620_v3  ;;  %v18624_v58 = vand.u32 2147483647, %v18623_v30  ;;  %vm18628_vm8 = vmmov %vm18587_vm11  ;;  %v18630_v7 = vld [vmem:[#allocation262_spill] sm:$0xff] }
 0xa72   : > { %v5666_v53 = vsel %vm16616_vm0, %v18617_v37, %v18616_v63  ;;  %v5651_v51 = vsel %vm16622_vm12, %v18622_v56, %v18621_v36  ;;  %v7992_v57 = vadd.f32 %v7960_v61, %v7863_v2  ;;  %v8006_v5 = vadd.f32 %v7974_v31, %v7877_v13  ;;  %8708 = vmatpush.xpose.msk.msra.mxu0 %vm18628_vm8, %v8154_v45  ;;  %v16704_v37 = vpop.f32.mrf.mxu3  ;;  %v18632_v31 = vld [vmem:[#allocation228_spill] sm:$0xff]  ;;  %v16709_v45 = vpop.f32.mrf.mxu2  ;;  %vm18634_vm11 = vmmov %vm18628_vm8  ;;  %v18636_v56 = vld [vmem:[#allocation42_spill] sm:$0xff] }
 0xa73   : > { %vm16692_vm6 = vcmp.eq.f32.partialorder %v18624_v58, 8.507059e+37  ;;  %v8025_v60 = vadd.f32 %v7993_v0, %v18627_v54  ;;  %v5961_v41 = vsel %vm16669_vm4, %v16549_v42, %v5957_v22  ;;  %v7893_v17 = vadd.f32 %v18459_v18, %v18629_v20  ;;  %v18631_v0 = vld [vmem:[#allocation21_spill] sm:$0xff]  ;;  %v8093_v30 = vpop.permute.xlu0 %8092  ;;  %v18640_v20 = vld [vmem:[#allocation20_spill] sm:$0xff]  ;;  %vm18641_vm0 = vmmov %vm18628_vm8 }
 0xa74   : > { %v7943_v59 = vadd.f32 1.0, %v7911_v21  ;;  %v5965_v35 = vor.u32 1.1754944e-38, %v5964_v9  ;;  %v7926_v63 = vadd.f32 1.0, %v18630_v7  ;;  %v7712_v2 = vadd.f32 %v16646_v10, %v7711_v47  ;;  %v18633_v9 = vld [vmem:[#allocation218_spill] sm:$0xff]  ;;  %v8091_v58 = vpop.permute.xlu1 %8090  ;;  %vm18664_vm9 = vmmov %vm18641_vm0 }
 0xa75   : > { %v8153_v61 = vadd.f32 %v8065_v27, %v8025_v60  ;;  %vm5963_vm3 = vcmp.eq.f32.partialorder %v5962_v14, 8.507059e+37  ;;  %v7959_v13 = vmul.f32 %v18632_v31, %v18631_v0  ;;  %v5985_v42 = vsub.f32 1.0, %v5984_v46  ;;  %v16713_v21 = vpop.eup %9721  ;;  %v18635_v14 = vld [vmem:[#allocation199_spill] sm:$0xff]  ;;  %v18645_v0 = vld [vmem:[#allocation261_spill] sm:$0xff]  ;;  %v18646_v31 = vld [vmem:[#allocation232_spill] sm:$0xff] }
 0xa76   : > { %v5966_v22 = vsel %vm5963_vm3, %v5965_v35, %v5961_v41  ;;  %v5972_v49 = vadd.f32 %v16590_v29, %v5971_v12  ;;  %vm5974_vm7 = vweird.f32 %v16590_v29  ;;  %v8024_v16 = vadd.f32 %v7992_v57, %v18633_v9  ;;  %v18648_v9 = vld [vmem:[#allocation202_spill] sm:$0xff]  ;;  %vm18673_vm8 = vmmov %vm18641_vm0 }
 0xa77   : > { %v7825_v27 = vadd.f32 %v16584_v1, %v7712_v2  ;;  %8709 = vmatpush.xpose.msk.msra.mxu0 %vm18634_vm11, %v8153_v61  ;;  %v8038_v8 = vadd.f32 %v8006_v5, %v18635_v14  ;;  %v5979_v3 = vand.u32 2147483648, %v16537_v48  ;;  %v7925_v36 = vadd.f32 1.0, %v7893_v17  ;;  %v18650_v14 = vld [vmem:[#allocation200_spill] sm:$0xff]  ;;  %v18654_v5 = vld [vmem:[#allocation253_spill] sm:$0xff]  ;;  %vm18685_vm11 = vmmov %vm18641_vm0 }
 0xa78   : > { %v7975_v46 = vmul.f32 %v7943_v59, %v18636_v56  ;;  %vm5973_vm13 = vweird.f32 %v16537_v48  ;;  %v5977_v12 = vand.u32 2147483647, %v16537_v48  ;;  %v8152_v54 = vadd.f32 %v16579_v34, %v8024_v16  ;;  %v18642_v59 = vld [vmem:[#allocation259_spill] sm:$0xff]  ;;  %v18657_v2 = vld [vmem:[#allocation44_spill] sm:$0xff] }
 0xa79   : > { %v7878_v57 = vmax.f32 %v7825_v27, 0.0  ;;  %v16724_v60 = vadd.f32 %v8091_v58, %v8038_v8  ;;  %v7912_v1 = vadd.f32 %v18459_v18, %v5966_v22  ;;  %vm16729_vm1 = vmor %vm5973_vm13, %vm5974_vm7  ;;  %v5999_v41 = vmul.f32 %v16713_v21, %v16640_v50  ;;  %v18649_v16 = vld [vmem:[#allocation19_spill] sm:$0xff] }
 0xa7a   : > { %v7958_v17 = vmul.f32 %v7926_v63, %v18640_v20  ;;  %v5976_v48 = vsel %vm16729_vm1, %v16590_v29, %v5972_v49  ;;  %v5986_v34 = vmul.f32 %v16652_v24, %v5985_v42  ;;  %v18643_v35 = vmax.f32 %v18642_v59, 0.0  ;;  %v7714_v49 = vpop.f32.mrf.mxu1  ;;  %v18655_v59 = vld [vmem:[#allocation167_spill] sm:$0xff]  ;;  %vm18707_vm1 = vmmov %vm18641_vm0 }
 0xa7b   : > { %18637 = vst [vmem:[#allocation98_spill] sm:$0xff] %v16724_v60  ;;  %v8007_v47 = vadd.f32 %v7975_v46, %v7878_v57  ;;  %8710 = vmatpush.xpose.msk.msra.mxu0 %vm18641_vm0, %v8152_v54  ;;  %v5980_v61 = vor.u32 1.1754944e-38, %v5979_v3  ;;  %v18647_v22 = vsel %vm15529_vm2, %v18645_v0, %v18646_v31  ;;  %v7957_v29 = vmul.f32 %v7925_v36, %v18649_v16  ;;  %v16756_v46 = vpop.f32.mrf.mxu2  ;;  %v18651_v54 = vld [vmem:[#allocation170_spill] sm:$0xff]  ;;  %v18660_v31 = vld [vmem:[#allocation132_spill] sm:$0xff] }
 0xa7c   : > { %v7991_v7 = vadd.f32 %v7959_v13, %v18643_v35  ;;  %v5636_v63 = vsel %vm16692_vm6, %v18648_v9, %v18647_v22  ;;  %vm5978_vm12 = vcmp.eq.f32.partialorder %v5977_v12, 8.507059e+37  ;;  %v7892_v42 = vadd.f32 %v18459_v18, %v5666_v53  ;;  %v16762_v12 = vpop.f32.mrf.mxu3  ;;  %v18656_v35 = vld [vmem:[#allocation86_spill] sm:$0xff] }
 0xa7d   : > { %v7891_v27 = vadd.f32 %v18459_v18, %v5651_v51  ;;  %v8039_v13 = vadd.f32 %v8007_v47, %v18650_v14  ;;  %v7715_v8 = vadd.f32 %v16646_v10, %v7714_v49  ;;  %v7944_v3 = vadd.f32 1.0, %v7912_v1  ;;  %v8059_v47 = vpop.permute.xlu1 %8058  ;;  %v18661_v9 = vld [vmem:[#allocation122_spill] sm:$0xff] }
 0xa7e   : > { %v5981_v56 = vsel %vm5978_vm12, %v5980_v61, %v5976_v48  ;;  %v6000_v58 = vsub.f32 1.0, %v5999_v41  ;;  %v18652_v19 = vmax.f32 %v18651_v54, 0.0  ;;  %v5987_v36 = vadd.f32 %v16652_v24, %v5986_v34  ;;  %v8061_v48 = vpop.permute.xlu0 %8060 }
 0xa7f   : > { %vm5989_vm2 = vweird.f32 %v16652_v24  ;;  %v16764_v53 = vadd.f32 %v8093_v30, %v8039_v13  ;;  %v7828_v51 = vadd.f32 %v16649_v11, %v7715_v8  ;;  %v8023_v20 = vadd.f32 %v7991_v7, %v18654_v5  ;;  %v18663_v13 = vld [vmem:[#allocation78_spill] sm:$0xff] }
 0xa80   : > { %v7990_v57 = vadd.f32 %v7958_v17, %v18652_v19  ;;  %v5994_v1 = vand.u32 2147483648, %v16581_v44  ;;  %v7913_v41 = vadd.f32 %v18459_v18, %v5981_v56  ;;  %vm5988_vm14 = vweird.f32 %v16581_v44 }
 0xa81   : > { %18653 = vst [vmem:[#allocation129_spill] sm:$0xff] %v16764_v53  ;;  %v5992_v17 = vand.u32 2147483647, %v16581_v44  ;;  %v7924_v34 = vadd.f32 1.0, %v7892_v42  ;;  %v16774_v61 = vadd.f32 %v18656_v35, %v18655_v59  ;;  %v7879_v30 = vmax.f32 %v7828_v51, 0.0  ;;  %vm16779_vm10 = vmor %vm5988_vm14, %vm5989_vm2  ;;  %v18665_v51 = vld [vmem:[#allocation18_spill] sm:$0xff]  ;;  %v8057_v35 = vpop.permute.xlu2 %8056 }
 0xa82   : > { %v7976_v11 = vmul.f32 %v7944_v3, %v18657_v2  ;;  %v8151_v0 = vadd.f32 %v8061_v48, %v8023_v20  ;;  %v7859_v22 = vmax.f32 %v18660_v31, 0.0  ;;  %v18662_v16 = vmax.f32 %v18661_v9, 0.0  ;;  %v7717_v54 = vpop.f32.mrf.mxu1  ;;  %v18666_v20 = vld [vmem:[#allocation190_spill] sm:$0xff]  ;;  %v18676_v31 = vld [vmem:[#allocation23_spill] sm:$0xff] }
 0xa83   : > { %v5991_v49 = vsel %vm16779_vm10, %v16652_v24, %v5987_v36  ;;  %v6001_v42 = vmul.f32 %v16713_v21, %v6000_v58  ;;  %v8022_v8 = vadd.f32 %v7990_v57, %v18663_v13  ;;  %v5995_v3 = vor.u32 1.1754944e-38, %v5994_v1  ;;  %v18667_v58 = vld [vmem:[#allocation243_spill] sm:$0xff]  ;;  %v16815_v7 = vpop.f32.mrf.mxu2  ;;  %v18681_v13 = vld [vmem:[#allocation225_spill] sm:$0xff] }
 0xa84   : > { %v7989_v44 = vadd.f32 %v7957_v29, %v18662_v16  ;;  %v8008_v14 = vadd.f32 %v7976_v11, %v7879_v30  ;;  %8711 = vmatpush.xpose.msk.msra.mxu0 %vm18664_vm9, %v8151_v0  ;;  %v7890_v56 = vadd.f32 %v18459_v18, %v5636_v63  ;;  %v7945_v19 = vadd.f32 1.0, %v7913_v41  ;;  %v18671_v63 = vld [vmem:[#allocation162_spill] sm:$0xff]  ;;  %v18675_v11 = vld [vmem:[#allocation77_spill] sm:$0xff] }
 0xa85   : > { %vm5993_vm5 = vcmp.eq.f32.partialorder %v5992_v17, 8.507059e+37  ;;  %v7956_v5 = vmul.f32 %v7924_v34, %v18665_v51  ;;  %v7923_v29 = vadd.f32 1.0, %v7891_v27  ;;  %v8150_v59 = vadd.f32 %v8059_v47, %v8022_v8  ;;  %v18674_v34 = vld [vmem:[#allocation125_spill] sm:$0xff]  ;;  %v18684_v51 = vld [vmem:[#allocation92_spill] sm:$0xff] }
 0xa86   : > { %v8040_v48 = vadd.f32 %v8008_v14, %v18666_v20  ;;  %v7718_v24 = vadd.f32 %v16646_v10, %v7717_v54  ;;  %v18668_v36 = vand.u32 2147483647, %v18667_v58  ;;  %v5996_v1 = vsel %vm5993_vm5, %v5995_v3, %v5991_v49  ;;  %v8087_v16 = vpop.permute.xlu0 %8086  ;;  %v18682_v8 = vld [vmem:[#allocation221_spill] sm:$0xff]  ;;  %v5492_v54 = vpop.f32.mrf.mxu3 }
 0xa87   : > { %v8021_v30 = vadd.f32 %v7989_v44, %v18671_v63  ;;  %v6002_v41 = vadd.f32 %v16713_v21, %v6001_v42  ;;  %vm6004_vm6 = vweird.f32 %v16713_v21  ;;  %v6009_v27 = vand.u32 2147483648, %v16640_v50  ;;  %v8085_v44 = vpop.permute.xlu1 %8084  ;;  %v18686_v58 = vld [vmem:[#allocation17_spill] sm:$0xff]  ;;  %v9788_v63 = vld [vmem:[%s17346_s10] ss:$0 sm:$0xff] }
 0xa88   : > { %vm16798_vm4 = vcmp.eq.f32.partialorder %v18668_v36, 8.507059e+37  ;;  %v16807_v47 = vadd.f32 %v16523_v28, %v8040_v48  ;;  %v7831_v17 = vadd.f32 %v16709_v45, %v7718_v24  ;;  %8712 = vmatpush.xpose.msk.msra.mxu0 %vm18673_vm8, %v8150_v59  ;;  %v8036_v2 = vadd.f32 %v16573_v26, %v18674_v34 }
 0xa89   : > { %v8035_v0 = vadd.f32 %v16531_v32, %v18675_v11  ;;  %v7977_v9 = vmul.f32 %v7945_v19, %v18676_v31  ;;  %v7914_v49 = vadd.f32 %v18459_v18, %v5996_v1  ;;  %vm6003_vm3 = vweird.f32 %v16640_v50  ;;  %v18683_v19 = vld [vmem:[#allocation196_spill] sm:$0xff] }
 0xa8a   : > { %18672 = vst [vmem:[#allocation173_spill] sm:$0xff] %v16807_v47  ;;  %v6007_v28 = vand.u32 2147483647, %v16640_v50  ;;  %v8149_v45 = vadd.f32 %v8057_v35, %v8021_v30  ;;  %v7880_v42 = vmax.f32 %v7831_v17, 0.0  ;;  %v16821_v14 = vadd.f32 %v8087_v16, %v8036_v2  ;;  %vm16827_vm7 = vmor %vm6003_vm3, %vm6004_vm6  ;;  %v7720_v17 = vpop.f32.mrf.mxu1  ;;  %v18691_v11 = vld [vmem:[#allocation256_spill] sm:$0xff] }
 0xa8b   : > { %v16823_v26 = vadd.f32 %v8085_v44, %v8035_v0  ;;  %v7762_v3 = vadd.f32 %v18682_v8, %v18681_v13  ;;  %v2463_v20 = vmul.f32 %v18684_v51, %v18683_v19  ;;  %v6006_v50 = vsel %vm16827_vm7, %v16713_v21, %v6002_v41  ;;  %v18692_v0 = vld [vmem:[#allocation229_spill] sm:$0xff]  ;;  %v18695_v16 = vld [vmem:[#allocation16_spill] sm:$0xff] }
 0xa8c   : > { %18677 = vst [vmem:[#allocation204_spill] sm:$0xff] %v16821_v14  ;;  %v7922_v48 = vadd.f32 1.0, %v7890_v56  ;;  %v8009_v59 = vadd.f32 %v7977_v9, %v7880_v42  ;;  %8713 = vmatpush.xpose.msk.msra.mxu0 %vm18685_vm11, %v8149_v45  ;;  %v7988_v24 = vadd.f32 %v7956_v5, %v7859_v22  ;;  %v7955_v36 = vmul.f32 %v7923_v29, %v18686_v58  ;;  %v18687_v22 = vld [vmem:[#allocation48_spill] sm:$0xff]  ;;  %v18688_v5 = vld [vmem:[#allocation119_spill] sm:$0xff]  ;;  %v18694_v9 = vld [vmem:[#allocation158_spill] sm:$0xff] }
 0xa8d   : > { %18678 = vst [vmem:[#allocation231_spill] sm:$0xff] %v16823_v26  ;;  %v6010_v1 = vor.u32 1.1754944e-38, %v6009_v27  ;;  %v7858_v35 = vmax.f32 %v16774_v61, 0.0  ;;  %v5490_v30 = vadd.f32 %v9788_v63, %v16762_v12  ;;  %v7946_v34 = vadd.f32 1.0, %v7914_v49  ;;  %v18689_v27 = vld [vmem:[#allocation206_spill] sm:$0xff]  ;;  %v18697_v45 = vld [vmem:[#allocation255_spill] sm:$0xff] }
 0xa8e   : > { %vm6008_vm13 = vcmp.eq.f32.partialorder %v6007_v28, 8.507059e+37  ;;  %v5493_v21 = vadd.f32 %v9788_v63, %v5492_v54  ;;  %v8041_v56 = vadd.f32 %v8009_v59, %v2463_v20  ;;  %v7721_v41 = vadd.f32 %v16646_v10, %v7720_v17  ;;  %v8055_v19 = vpop.permute.xlu0 %8054  ;;  %v18699_v58 = vld [vmem:[#allocation309_spill] sm:$0xff] }
 0xa8f   : > { %v6011_v2 = vsel %vm6008_vm13, %v6010_v1, %v6006_v50  ;;  %v2081_v29 = vadd.f32 %v18688_v5, %v18687_v22  ;;  %9723 = vrcp.f32 %v18689_v27  ;;  %v18693_v31 = vsel %vm15219_vm15, %v18691_v11, %v18692_v0  ;;  %v18698_v50 = vld [vmem:[#allocation29_spill] sm:$0xff]  ;;  %vm18703_vm15 = vmmov %vm18641_vm0  ;;  %v18704_v22 = vld [vmem:[#allocation150_spill] sm:$0xff] }
 0xa90   : > { %v2477_v12 = vsel %vm16798_vm4, %v18694_v9, %v18693_v31  ;;  %v7954_v44 = vmul.f32 %v7922_v48, %v18695_v16  ;;  %v16859_v49 = vadd.f32 %v16600_v38, %v8041_v56  ;;  %v7834_v28 = vadd.f32 %v16756_v46, %v7721_v41  ;;  %v18700_v38 = vld [vmem:[#allocation310_spill] sm:$0xff]  ;;  %v18701_v17 = vld [vmem:[#allocation153_spill] sm:$0xff]  ;;  %v8053_v46 = vpop.permute.xlu1 %8052 }
 0xa91   : > { %v8020_v42 = vadd.f32 %v7988_v24, %v18697_v45  ;;  %v7987_v32 = vadd.f32 %v7955_v36, %v7858_v35  ;;  %v7857_v13 = vmax.f32 %v7762_v3, 0.0  ;;  %v5487_v8 = vadd.f32 %v9788_v63, %v16704_v37  ;;  %v16869_v36 = vpop.f32.mrf.mxu2  ;;  %v18724_v14 = vld [vmem:[#allocation97_spill] sm:$0xff] }
 0xa92   : > { %18696 = vst [vmem:[#allocation265_spill] sm:$0xff] %v16859_v49  ;;  %v8665_v54 = vmul.f32 -1.442695, %v5490_v30  ;;  %v7915_v51 = vadd.f32 %v18459_v18, %v6011_v2  ;;  %v8666_v20 = vmul.f32 -1.442695, %v5493_v21  ;;  %v7881_v57 = vmax.f32 %v7834_v28, 0.0  ;;  %v7723_v41 = vpop.f32.mrf.mxu1 }
 0xa93   : > { %v7978_v59 = vmul.f32 %v7946_v34, %v18698_v50  ;;  %v8148_v48 = vadd.f32 %v8055_v19, %v8020_v42  ;;  %v2009_v1 = vadd.f32 %v18700_v38, %v18699_v58  ;;  %9725 = vrcp.f32 %v18701_v17  ;;  %v18702_v30 = vld [vmem:[#allocation185_spill] sm:$0xff] }
 0xa94   : > { %v7986_v24 = vadd.f32 %v7954_v44, %v7857_v13  ;;  %v5484_v37 = vadd.f32 %v9788_v63, %v16632_v33  ;;  %v2478_v3 = vmul.f32 %v2477_v12, %v2081_v29  ;;  %v8019_v56 = vadd.f32 %v7987_v32, %v18702_v30  ;;  %v18705_v33 = vld [vmem:[#allocation182_spill] sm:$0xff]  ;;  %v18708_v32 = vld [vmem:[#allocation35_spill] sm:$0xff] }
 0xa95   : > { %v8010_v35 = vadd.f32 %v7978_v59, %v7881_v57  ;;  %8714 = vmatpush.xpose.msk.msra.mxu0 %vm18703_vm15, %v8148_v48  ;;  %v16874_v21 = vpop.eup %9723  ;;  %v8664_v34 = vmul.f32 -1.442695, %v5487_v8  ;;  %9727 = vpow2.f32 %v8665_v54  ;;  %v7947_v2 = vadd.f32 1.0, %v7915_v51 }
 0xa96   : > { %v2118_v5 = vmul.f32 %v18704_v22, %v2009_v1  ;;  %9729 = vpow2.f32 %v8666_v20  ;;  %v8147_v11 = vadd.f32 %v8053_v46, %v8019_v56  ;;  %v7724_v0 = vadd.f32 %v16646_v10, %v7723_v41  ;;  %v8051_v45 = vpop.permute.xlu0 %8050 }
 0xa97   : > { %v8042_v61 = vadd.f32 %v8010_v35, %v2478_v3  ;;  %9731 = vrcp.f32 %v18705_v33  ;;  %v5478_v31 = vadd.f32 %v9788_v63, %v16500_v62  ;;  %v8663_v9 = vmul.f32 -1.442695, %v5484_v37 }
 0xa98   : > { %v8018_v29 = vadd.f32 %v7986_v24, %v2118_v5  ;;  %v7837_v16 = vadd.f32 %v16815_v7, %v7724_v0  ;;  %v5481_v28 = vadd.f32 %v9788_v63, %v16555_v43  ;;  %9733 = vpow2.f32 %v8664_v34  ;;  %v18711_v5 = vld [vmem:[#allocation178_spill] sm:$0xff] }
 0xa99   : > { %v16881_v12 = vadd.f32 %v16598_v55, %v8042_v61  ;;  %8715 = vmatpush.xpose.msk.msra.mxu0 %vm18707_vm1, %v8147_v11  ;;  %v16885_v44 = vpop.eup %9725  ;;  %v7979_v13 = vmul.f32 %v7947_v2, %v18708_v32  ;;  %v2555_v62 = vmul.f32 %v16874_v21, %v18689_v27  ;;  %v18709_v55 = vld [vmem:[#allocation57_spill] sm:$0xff]  ;;  %v8661_v7 = vmul.f32 -1.442695, %v5478_v31  ;;  %v16899_v57 = vpop.f32.mrf.mxu2 }
 0xa9a   : > { %v7882_v42 = vmax.f32 %v7837_v16, 0.0  ;;  %v8146_v8 = vadd.f32 %v8051_v45, %v8018_v29  ;;  %9735 = vrcp.f32 %v18709_v55  ;;  %v8662_v63 = vmul.f32 -1.442695, %v5481_v28  ;;  %v16897_v20 = vpop.f32.mrf.mxu1  ;;  %v18712_v16 = vld [vmem:[#allocation212_spill] sm:$0xff] }
 0xa9b   : > { %18706 = vst [vmem:[#allocation263_spill] sm:$0xff] %v16881_v12  ;;  %v9728_v54 = vpop.eup %9727  ;;  %9737 = vpow2.f32 %v8663_v9  ;;  %v2510_v59 = vmul.f32 %v16885_v44, %v18701_v17  ;;  %v2556_v48 = vsub.f32 1.0, %v2555_v62  ;;  %v2520_v22 = vand.u32 2147483648, %v18701_v17 }
 0xa9c   : > { %v9730_v19 = vpop.eup %9729  ;;  %v16892_v51 = vadd.f32 %v7979_v13, %v7882_v42  ;;  %v16901_v50 = vadd.f32 1.0, %v9728_v54  ;;  %9739 = vpow2.f32 %v8661_v7  ;;  %vm2560_vm12 = vweird.f32 %v16874_v21  ;;  %v18715_v54 = vld [vmem:[#allocation100_spill] sm:$0xff] }
 0xa9d   : > { %8716 = vmatpush.xpose.msk.msra.mxu0 %vm18641_vm0, %v8146_v8  ;;  %v16895_v43 = vpop.eup %9731  ;;  %v16905_v58 = vadd.f32 1.0, %v9730_v19  ;;  %9741 = vpow2.f32 %v8662_v63  ;;  %v2511_v37 = vsub.f32 1.0, %v2510_v59  ;;  %v2557_v3 = vmul.f32 %v16874_v21, %v2556_v48 }
 0xa9e   : > { %18710 = vst [vmem:[#allocation271_spill] sm:$0xff] %v16892_v51  ;;  %v9734_v38 = vpop.eup %9733  ;;  %v2570_v1 = vmul.f32 %v16895_v43, %v18705_v33  ;;  %9743 = vrcp.f32 %v16901_v50  ;;  %vm2514_vm2 = vweird.f32 %v18701_v17  ;;  %vm2559_vm14 = vweird.f32 %v18689_v27 }
 0xa9f   : > { %v16913_v35 = vadd.f32 1.0, %v9734_v38  ;;  %9745 = vrcp.f32 %v16905_v58  ;;  %v2512_v11 = vmul.f32 %v16885_v44, %v2511_v37  ;;  %v2558_v0 = vadd.f32 %v16874_v21, %v2557_v3  ;;  %vm16942_vm10 = vmor %vm2559_vm14, %vm2560_vm12 }
 0xaa0   : > { %v16909_v46 = vpop.eup %9735  ;;  %v2571_v30 = vsub.f32 1.0, %v2570_v1  ;;  %9747 = vrcp.f32 %v18711_v5  ;;  %v2565_v45 = vand.u32 2147483648, %v18689_v27  ;;  %v2563_v8 = vand.u32 2147483647, %v18689_v27 }
 0xaa1   : > { %v9738_v24 = vpop.eup %9737  ;;  %v2525_v56 = vmul.f32 %v16909_v46, %v18709_v55  ;;  %9749 = vrcp.f32 %v16913_v35  ;;  %v16928_v29 = vpop.f32.mrf.mxu2  ;;  %v16951_v7 = vor.u32 1.1754944e-38, %v2520_v22  ;;  %v2562_v63 = vsel %vm16942_vm10, %v16874_v21, %v2558_v0  ;;  %v18719_v0 = vld [vmem:[#allocation82_spill] sm:$0xff] }
 0xaa2   : > { %v16918_v34 = vadd.f32 1.0, %v9738_v24  ;;  %v16920_v41 = vpop.f32.mrf.mxu1  ;;  %v9740_v2 = vpop.eup %9739  ;;  %v2572_v9 = vmul.f32 %v16895_v43, %v2571_v30  ;;  %9751 = vrcp.f32 %v18712_v16  ;;  %v16957_v59 = vadd.f32 %v16885_v44, %v2512_v11  ;;  %v18718_v11 = vld [vmem:[#allocation240_spill] sm:$0xff]  ;;  %v18763_v22 = vld [vmem:[#allocation174_spill] sm:$0xff] }
 0xaa3   : > { %v9742_v61 = vpop.eup %9741  ;;  %v2526_v42 = vsub.f32 1.0, %v2525_v56  ;;  %v16939_v32 = vadd.f32 1.0, %v9740_v2  ;;  %vm2515_vm9 = vweird.f32 %v16885_v44  ;;  %vm2575_vm5 = vweird.f32 %v16895_v43 }
 0xaa4   : > { %v16930_v31 = vpop.eup %9743  ;;  %9753 = vrcp.f32 %v16918_v34  ;;  %v16948_v62 = vadd.f32 1.0, %v9742_v61  ;;  %v2573_v27 = vadd.f32 %v16895_v43, %v2572_v9  ;;  %v2566_v21 = vor.u32 1.1754944e-38, %v2565_v45  ;;  %vm16984_vm8 = vmor %vm2514_vm2, %vm2515_vm9  ;;  %v18720_v45 = vld [vmem:[#allocation53_spill] sm:$0xff] }
 0xaa5   : > { %v16936_v28 = vpop.eup %9745  ;;  %9755 = vrcp.f32 %v18715_v54  ;;  %v6074_v38 = vmul.f32 %v16930_v31, %v16901_v50  ;;  %v2527_v37 = vmul.f32 %v16909_v46, %v2526_v42  ;;  %v2580_v3 = vand.u32 2147483648, %v18705_v33  ;;  %v18721_v42 = vld [vmem:[#allocation154_spill] sm:$0xff] }
 0xaa6   : > { %v16960_v48 = vpop.eup %9747  ;;  %v6089_v1 = vmul.f32 %v16936_v28, %v16905_v58  ;;  %9757 = vrcp.f32 %v16939_v32  ;;  %vm2564_vm4 = vcmp.eq.f32.partialorder %v2563_v8, 8.507059e+37  ;;  %vm2574_vm6 = vweird.f32 %v18705_v33  ;;  %v18725_v8 = vld [vmem:[#allocation120_spill] sm:$0xff] }
 0xaa7   : > { %v16968_v24 = vpop.eup %9749  ;;  %v2578_v2 = vand.u32 2147483647, %v18705_v33  ;;  %9759 = vrcp.f32 %v16948_v62  ;;  %v16992_v9 = vadd.f32 %v18719_v0, %v18718_v11  ;;  %v2099_v13 = vadd.f32 %v18721_v42, %v18720_v45  ;;  %vm16998_vm3 = vmor %vm2574_vm6, %vm2575_vm5 }
 0xaa8   : > { %v16975_v56 = vpop.eup %9751  ;;  %v2567_v33 = vsel %vm2564_vm4, %v2566_v21, %v2562_v63  ;;  %v2577_v11 = vsel %vm16998_vm3, %v16895_v43, %v2573_v27  ;;  %v6059_v63 = vmul.f32 %v16968_v24, %v16913_v35  ;;  %v6075_v21 = vsub.f32 1.0, %v6074_v38 }
 0xaa9   : > { %v6090_v0 = vsub.f32 1.0, %v6089_v1  ;;  %v17015_v45 = vmul.f32 %v16960_v48, %v18711_v5  ;;  %v2581_v42 = vor.u32 1.1754944e-38, %v2580_v3  ;;  %v17018_v6 = vadd.f32 %v16909_v46, %v2527_v37  ;;  %v17021_v19 = vpop.f32.mrf.mxu2 }
 0xaaa   : > { %v16973_v30 = vpop.f32.mrf.mxu1  ;;  %v16988_v61 = vpop.eup %9753  ;;  %vm2530_vm7 = vweird.f32 %v16909_v46  ;;  %v2102_v43 = vadd.f32 %v18725_v8, %v18724_v14  ;;  %vm2579_vm11 = vcmp.eq.f32.partialorder %v2578_v2, 8.507059e+37  ;;  %v17027_v27 = vmul.f32 %v16975_v56, %v18712_v16 }
 0xaab   : > { %v17006_v26 = vpop.eup %9755  ;;  %v6044_v38 = vmul.f32 %v16988_v61, %v16918_v34  ;;  %v17033_v3 = vmul.f32 %v2567_v33, %v2099_v13  ;;  %vm2529_vm13 = vweird.f32 %v18709_v55  ;;  %v2582_v37 = vsel %vm2579_vm11, %v2581_v42, %v2577_v11 }
 0xaac   : > { %v17031_v1 = vpop.eup %9757  ;;  %v2540_v40 = vmul.f32 %v17006_v26, %v18715_v54  ;;  %v6060_v2 = vsub.f32 1.0, %v6059_v63  ;;  %vm17041_vm15 = vmor %vm2529_vm13, %vm2530_vm7  ;;  %v6076_v53 = vmul.f32 %v16930_v31, %v6075_v21  ;;  %v6091_v13 = vmul.f32 %v16936_v28, %v6090_v0 }
 0xaad   : > { %v17038_v60 = vpop.eup %9759  ;;  %v2550_v11 = vand.u32 2147483648, %v18715_v54  ;;  %v17056_v47 = vmul.f32 %v2582_v37, %v2102_v43  ;;  %v6045_v21 = vsub.f32 1.0, %v6044_v38  ;;  %v6014_v33 = vmul.f32 %v17031_v1, %v16939_v32 }
 0xaae   : > { %v2541_v12 = vsub.f32 1.0, %v2540_v40  ;;  %v6029_v52 = vmul.f32 %v17038_v60, %v16948_v62  ;;  %vm6079_vm1 = vweird.f32 %v16930_v31  ;;  %v6061_v42 = vmul.f32 %v16968_v24, %v6060_v2 }
 0xaaf   : > { %v6077_v14 = vadd.f32 %v16930_v31, %v6076_v53  ;;  %v6092_v43 = vadd.f32 %v16936_v28, %v6091_v13  ;;  %vm6094_vm0 = vweird.f32 %v16936_v28  ;;  %v17069_v38 = vor.u32 1.1754944e-38, %v2550_v11 }
 0xab0   : > { %vm6078_vm12 = vweird.f32 %v16901_v50  ;;  %v6084_v40 = vand.u32 2147483648, %v16901_v50  ;;  %v6099_v37 = vand.u32 2147483648, %v16905_v58  ;;  %v6046_v0 = vmul.f32 %v16988_v61, %v6045_v21 }
 0xab1   : > { %vm17075_vm2 = vmor %vm6078_vm12, %vm6079_vm1  ;;  %v6082_v53 = vand.u32 2147483647, %v16901_v50  ;;  %vm6093_vm14 = vweird.f32 %v16905_v58  ;;  %v6097_v2 = vand.u32 2147483647, %v16905_v58  ;;  %v2542_v13 = vmul.f32 %v17006_v26, %v2541_v12  ;;  %v7851_v51 = vpop.f32.mrf.mxu2 }
 0xab2   : > { %v17054_v63 = vpop.f32.mrf.mxu1  ;;  %v6015_v11 = vsub.f32 1.0, %v6014_v33  ;;  %v6030_v4 = vsub.f32 1.0, %v6029_v52  ;;  %vm6049_vm10 = vweird.f32 %v16988_v61  ;;  %vm17086_vm9 = vmor %vm6093_vm14, %vm6094_vm0  ;;  %v6062_v39 = vadd.f32 %v16968_v24, %v6061_v42 }
 0xab3   : > { %vm6064_vm5 = vweird.f32 %v16968_v24  ;;  %v6081_v50 = vsel %vm17075_vm2, %v16930_v31, %v6077_v14  ;;  %v6096_v52 = vsel %vm17086_vm9, %v16936_v28, %v6092_v43  ;;  %vm6063_vm4 = vweird.f32 %v16913_v35 }
 0xab4   : > { %v6069_v12 = vand.u32 2147483648, %v16913_v35  ;;  %v6085_v33 = vor.u32 1.1754944e-38, %v6084_v40  ;;  %v6100_v5 = vor.u32 1.1754944e-38, %v6099_v37  ;;  %v6047_v23 = vadd.f32 %v16988_v61, %v6046_v0  ;;  %vm17104_vm7 = vmor %vm6063_vm4, %vm6064_vm5 }
 0xab5   : > { %v6067_v42 = vand.u32 2147483647, %v16913_v35  ;;  %vm6083_vm6 = vcmp.eq.f32.partialorder %v6082_v53, 8.507059e+37  ;;  %vm6098_vm3 = vcmp.eq.f32.partialorder %v6097_v2, 8.507059e+37  ;;  %v6031_v49 = vmul.f32 %v17038_v60, %v6030_v4 }
 0xab6   : > { %v6054_v31 = vand.u32 2147483648, %v16918_v34  ;;  %v6086_v28 = vsel %vm6083_vm6, %v6085_v33, %v6081_v50  ;;  %v6101_v43 = vsel %vm6098_vm3, %v6100_v5, %v6096_v52  ;;  %vm2544_vm11 = vweird.f32 %v18715_v54 }
 0xab7   : > { %vm6048_vm13 = vweird.f32 %v16918_v34  ;;  %v6052_v0 = vand.u32 2147483647, %v16918_v34  ;;  %v6066_v35 = vsel %vm17104_vm7, %v16968_v24, %v6062_v39  ;;  %v6016_v40 = vmul.f32 %v17031_v1, %v6015_v11 }
 0xab8   : > { %vm17118_vm1 = vmor %vm6048_vm13, %vm6049_vm10  ;;  %v17123_v5 = vadd.f32 %v17006_v26, %v2542_v13  ;;  %vm2545_vm0 = vweird.f32 %v17006_v26  ;;  %v6070_v34 = vor.u32 1.1754944e-38, %v6069_v12  ;;  %vm6068_vm12 = vcmp.eq.f32.partialorder %v6067_v42, 8.507059e+37 }
 0xab9   : > { %v6051_v39 = vsel %vm17118_vm1, %v16988_v61, %v6047_v23  ;;  %v7920_v24 = vadd.f32 %v18459_v18, %v6086_v28  ;;  %v7921_v53 = vadd.f32 %v18459_v18, %v6101_v43  ;;  %v6032_v2 = vadd.f32 %v17038_v60, %v6031_v49  ;;  %vm17160_vm3 = vmor %vm2544_vm11, %vm2545_vm0 }
 0xaba   : > { %v7738_v58 = vpop.f32.mrf.mxu1  ;;  %vm6034_vm2 = vweird.f32 %v17038_v60  ;;  %v6055_v11 = vor.u32 1.1754944e-38, %v6054_v31  ;;  %v6071_v21 = vsel %vm6068_vm12, %v6070_v34, %v6066_v35  ;;  %vm6018_vm14 = vweird.f32 %v16939_v32 }
 0xabb   : > { %v7739_v4 = vadd.f32 %v16646_v10, %v7738_v58  ;;  %vm6053_vm10 = vcmp.eq.f32.partialorder %v6052_v0, 8.507059e+37  ;;  %v7736_v13 = vadd.f32 %v16646_v10, %v17054_v63  ;;  %vm6033_vm9 = vweird.f32 %v16948_v62  ;;  %v7854_v58 = vpop.f32.mrf.mxu2 }
 0xabc   : > { %v6037_v23 = vand.u32 2147483647, %v16948_v62  ;;  %v6039_v61 = vand.u32 2147483648, %v16948_v62  ;;  %v6056_v52 = vsel %vm6053_vm10, %v6055_v11, %v6051_v39  ;;  %vm17139_vm5 = vmor %vm6033_vm9, %vm6034_vm2  ;;  %v7919_v42 = vadd.f32 %v18459_v18, %v6071_v21 }
 0xabd   : > { %v7852_v50 = vadd.f32 %v7851_v51, %v7739_v4  ;;  %v7952_v49 = vadd.f32 1.0, %v7920_v24  ;;  %v7953_v63 = vadd.f32 1.0, %v7921_v53  ;;  %v6017_v51 = vadd.f32 %v17031_v1, %v6016_v40  ;;  %v18743_v53 = vld [vmem:[#allocation47_spill] sm:$0xff] }
 0xabe   : > { %vm6019_vm4 = vweird.f32 %v17031_v1  ;;  %v6022_v14 = vand.u32 2147483647, %v16939_v32  ;;  %v6036_v62 = vsel %vm17139_vm5, %v17038_v60, %v6032_v2  ;;  %v7733_v28 = vadd.f32 %v16646_v10, %v16973_v30  ;;  %v18742_v30 = vld [vmem:[#allocation46_spill] sm:$0xff] }
 0xabf   : > { %v7849_v43 = vadd.f32 %v17021_v19, %v7736_v13  ;;  %v7887_v0 = vmax.f32 %v7852_v50, 0.0  ;;  %v6024_v4 = vand.u32 2147483648, %v16939_v32  ;;  %vm6038_vm6 = vcmp.eq.f32.partialorder %v6037_v23, 8.507059e+37  ;;  %vm17166_vm7 = vmor %vm6018_vm14, %vm6019_vm4  ;;  %v18766_v23 = vld [vmem:[#allocation178_spill] sm:$0xff] }
 0xac0   : > { %v6040_v37 = vor.u32 1.1754944e-38, %v6039_v61  ;;  %v7918_v40 = vadd.f32 %v18459_v18, %v6056_v52  ;;  %v7951_v19 = vadd.f32 1.0, %v7919_v42  ;;  %v7984_v39 = vmul.f32 %v7952_v49, %v18742_v30 }
 0xac1   : > { %v7985_v2 = vmul.f32 %v7953_v63, %v18743_v53  ;;  %v6021_v11 = vsel %vm17166_vm7, %v17031_v1, %v6017_v51  ;;  %v7730_v21 = vadd.f32 %v16646_v10, %v16920_v41  ;;  %v2547_v32 = vsel %vm17160_vm3, %v17006_v26, %v17123_v5  ;;  %v18749_v5 = vld [vmem:[#allocation45_spill] sm:$0xff] }
 0xac2   : > { %v7741_v12 = vpop.f32.mrf.mxu1  ;;  %v6041_v13 = vsel %vm6038_vm6, %v6040_v37, %v6036_v62  ;;  %v18744_v50 = vand.u32 2147483647, %v18701_v17  ;;  %v7846_v61 = vadd.f32 %v16928_v29, %v7733_v28  ;;  %v7886_v52 = vmax.f32 %v7849_v43, 0.0  ;;  %v18750_v43 = vld [vmem:[#allocation210_spill] sm:$0xff] }
 0xac3   : > { %v7742_v31 = vadd.f32 %v16646_v10, %v7741_v12  ;;  %v8016_v12 = vadd.f32 %v7984_v39, %v7887_v0  ;;  %vm6023_vm13 = vcmp.eq.f32.partialorder %v6022_v14, 8.507059e+37  ;;  %v6025_v33 = vor.u32 1.1754944e-38, %v6024_v4  ;;  %v18751_v0 = vld [vmem:[#allocation165_spill] sm:$0xff] }
 0xac4   : > { %vm17183_vm11 = vcmp.eq.f32.partialorder %v18744_v50, 8.507059e+37  ;;  %v18748_v42 = vand.u32 2147483647, %v18715_v54  ;;  %v7917_v26 = vadd.f32 %v18459_v18, %v6041_v13  ;;  %v7950_v17 = vadd.f32 1.0, %v7918_v40  ;;  %v18755_v40 = vld [vmem:[#allocation43_spill] sm:$0xff] }
 0xac5   : > { %v7855_v35 = vadd.f32 %v7854_v58, %v7742_v31  ;;  %v18747_v58 = vsub.f32 1.0, %v17027_v27  ;;  %v7983_v49 = vmul.f32 %v7951_v19, %v18749_v5  ;;  %v7727_v29 = vadd.f32 %v16646_v10, %v16897_v20 }
 0xac6   : > { %vm2549_vm1 = vcmp.eq.f32.partialorder %v18748_v42, 8.507059e+37  ;;  %v6026_v63 = vsel %vm6023_vm13, %v6025_v33, %v6021_v11  ;;  %v7843_v27 = vadd.f32 %v16899_v57, %v7730_v21  ;;  %v7885_v14 = vmax.f32 %v7846_v61, 0.0  ;;  %v18764_v11 = vld [vmem:[#allocation118_spill] sm:$0xff]  ;;  %v18769_v33 = vld [vmem:[#allocation145_spill] sm:$0xff] }
 0xac7   : > { %v7888_v24 = vmax.f32 %v7855_v35, 0.0  ;;  %v2497_v41 = vmul.f32 %v16975_v56, %v18747_v58  ;;  %v2552_v51 = vsel %vm2549_vm1, %v17069_v38, %v2547_v32  ;;  %v8015_v62 = vadd.f32 %v7983_v49, %v7886_v52  ;;  %v18765_v32 = vld [vmem:[#allocation142_spill] sm:$0xff]  ;;  %v18767_v58 = vld [vmem:[#allocation37_spill] sm:$0xff] }
 0xac8   : > { %v8048_v54 = vadd.f32 %v8016_v12, %v17033_v3  ;;  %v2093_v35 = vadd.f32 %v18751_v0, %v18750_v43  ;;  %v18752_v4 = vsub.f32 1.0, %v17015_v45  ;;  %v18753_v10 = vand.u32 2147483648, %v18709_v55  ;;  %v18775_v43 = vld [vmem:[#allocation197_spill] sm:$0xff] }
 0xac9   : > { %v8017_v1 = vadd.f32 %v7985_v2, %v7888_v24  ;;  %v18754_v57 = vand.u32 2147483647, %v18709_v55  ;;  %v7916_v38 = vadd.f32 %v18459_v18, %v6026_v63  ;;  %v7949_v37 = vadd.f32 1.0, %v7917_v26  ;;  %v18761_v24 = vld [vmem:[#allocation39_spill] sm:$0xff] }
 0xaca   : > { %v2536_v20 = vor.u32 1.1754944e-38, %v18753_v10  ;;  %v7982_v3 = vmul.f32 %v7950_v17, %v18755_v40  ;;  %vm18756_vm12 = vcmask 130048   ;;  %v2498_v34 = vadd.f32 %v16975_v56, %v2497_v41 }
 0xacb   : > { %v8049_v31 = vadd.f32 %v8017_v1, %v17056_v47  ;;  %v2482_v47 = vmul.f32 %v16960_v48, %v18752_v4  ;;  %vm2534_vm0 = vcmp.eq.f32.partialorder %v18754_v57, 8.507059e+37  ;;  %vm2500_vm2 = vweird.f32 %v16975_v56  ;;  %vm18762_vm10 = vmmov %vm18756_vm12 }
 0xacc   : > { %v7840_v45 = vadd.f32 %v16869_v36, %v7727_v29  ;;  %v18757_v55 = vsel %vm17041_vm15, %v16909_v46, %v17018_v6  ;;  %v7884_v18 = vmax.f32 %v7843_v27, 0.0  ;;  %v8014_v19 = vadd.f32 %v7982_v3, %v7885_v14  ;;  %vm18768_vm4 = vmmov %vm18762_vm10  ;;  %v18773_v14 = vld [vmem:[#allocation103_spill] sm:$0xff] }
 0xacd   : > { %v8177_v28 = vadd.f32 %v16376_v15, %v8049_v31  ;;  %v2553_v15 = vmul.f32 %v2552_v51, %v16992_v9  ;;  %v2537_v60 = vsel %vm2534_vm0, %v2536_v20, %v18757_v55  ;;  %v8176_v39 = vadd.f32 %v16423_v25, %v8048_v54  ;;  %v18771_v31 = vld [vmem:[#allocation260_spill] sm:$0xff]  ;;  %vm18772_vm7 = vmmov %vm18768_vm4  ;;  %v18780_v20 = vld [vmem:[#allocation87_spill] sm:$0xff] }
 0xace   : > { %vm2499_vm14 = vweird.f32 %v18712_v16  ;;  %v2505_v9 = vand.u32 2147483648, %v18712_v16  ;;  %v18758_v36 = vsel %vm16984_vm8, %v16885_v44, %v16957_v59  ;;  %v2503_v46 = vand.u32 2147483647, %v18712_v16  ;;  %vm18779_vm13 = vmmov %vm18768_vm4  ;;  %v18785_v55 = vld [vmem:[#allocation265_spill] sm:$0xff] }
 0xacf   : > { %8719 = vmatpush.xpose.msk.msrb.mxu3 %vm18756_vm12, %v8177_v28  ;;  %v8047_v30 = vadd.f32 %v8015_v62, %v2553_v15  ;;  %v2522_v8 = vsel %vm17183_vm11, %v16951_v7, %v18758_v36  ;;  %vm17234_vm15 = vmor %vm2499_vm14, %vm2500_vm2  ;;  %v7948_v25 = vadd.f32 1.0, %v7916_v38  ;;  %v7981_v53 = vmul.f32 %v7949_v37, %v18761_v24  ;;  %v18774_v62 = vld [vmem:[#allocation248_spill] sm:$0xff]  ;;  %v18781_v38 = vld [vmem:[#allocation203_spill] sm:$0xff] }
 0xad0   : > { %v2538_v2 = vmul.f32 %v2537_v60, %v2093_v35  ;;  %v2090_v21 = vadd.f32 %v18764_v11, %v18763_v22  ;;  %v2483_v44 = vadd.f32 %v16960_v48, %v2482_v47  ;;  %vm2485_vm8 = vweird.f32 %v16960_v48  ;;  %vm18776_vm11 = vmmov %vm18768_vm4  ;;  %v18778_v47 = vld [vmem:[#allocation233_spill] sm:$0xff]  ;;  %v18783_v37 = vld [vmem:[#allocation263_spill] sm:$0xff] }
 0xad1   : > { %v2502_v7 = vsel %vm17234_vm15, %v16975_v56, %v2498_v34  ;;  %v7883_v59 = vmax.f32 %v7840_v45, 0.0  ;;  %v8013_v13 = vadd.f32 %v7981_v53, %v7884_v18  ;;  %v8175_v50 = vadd.f32 %v18765_v32, %v8047_v30  ;;  %v18770_v56 = vld [vmem:[#allocation223_spill] sm:$0xff]  ;;  %vm18782_vm1 = vmmov %vm18768_vm4  ;;  %v18791_v36 = vld [vmem:[#allocation129_spill] sm:$0xff] }
 0xad2   : > { %v8046_v16 = vadd.f32 %v8014_v19, %v2538_v2  ;;  %v2490_v61 = vand.u32 2147483648, %v18766_v23  ;;  %v2506_v52 = vor.u32 1.1754944e-38, %v2505_v9  ;;  %v2523_v12 = vmul.f32 %v2522_v8, %v2090_v21  ;;  %vm18784_vm0 = vmmov %vm18782_vm1  ;;  %v18796_v2 = vld [vmem:[#allocation267_spill] sm:$0xff]  ;;  %v18798_v21 = vld [vmem:[#allocation333_spill] sm:$0xff] }
 0xad3   : > { %8720 = vmatpush.xpose.msk.msrb.mxu3 %vm18762_vm10, %v8176_v39  ;;  %vm2484_vm9 = vweird.f32 %v18766_v23  ;;  %v2488_v1 = vand.u32 2147483647, %v18766_v23  ;;  %vm2504_vm5 = vcmp.eq.f32.partialorder %v2503_v46, 8.507059e+37  ;;  %v7980_v41 = vmul.f32 %v7948_v25, %v18767_v58  ;;  %vm18786_vm12 = vmmov %vm18784_vm0  ;;  %v18789_v39 = vld [vmem:[#allocation173_spill] sm:$0xff]  ;;  %v18794_v46 = vld [vmem:[#allocation98_spill] sm:$0xff] }
 0xad4   : > { %v2087_v42 = vadd.f32 %v18770_v56, %v18769_v33  ;;  %vm2486_vm6 = vmor %vm2484_vm9, %vm2485_vm8  ;;  %v2507_v26 = vsel %vm2504_vm5, %v2506_v52, %v2502_v7  ;;  %v8045_v49 = vadd.f32 %v8013_v13, %v2523_v12  ;;  %v8174_v29 = vadd.f32 %v18771_v31, %v8046_v16  ;;  %v8083_v16 = vpop.permute.xlu2 %8082  ;;  %v18802_v32 = vld [vmem:[#allocation172_spill] sm:$0xff]  ;;  %v18803_v23 = vld [vmem:[#allocation231_spill] sm:$0xff] }
 0xad5   : > { %v2487_v17 = vsel %vm2486_vm6, %v16960_v48, %v2483_v44  ;;  %v8012_v5 = vadd.f32 %v7980_v41, %v7883_v59  ;;  %v2491_v63 = vor.u32 1.1754944e-38, %v2490_v61  ;;  %vm2489_vm3 = vcmp.eq.f32.partialorder %v2488_v1, 8.507059e+37  ;;  %v18777_v48 = vld [vmem:[#allocation271_spill] sm:$0xff]  ;;  %vm18788_vm14 = vmmov %vm18784_vm0  ;;  %v18800_v59 = vld [vmem:[#allocation204_spill] sm:$0xff] }
 0xad6   : > { %v2508_v27 = vmul.f32 %v2507_v26, %v2087_v42  ;;  %v2084_v54 = vadd.f32 %v18774_v62, %v18773_v14  ;;  %v8173_v0 = vadd.f32 %v18775_v43, %v8045_v49  ;;  %9761 = vrcp.f32 %v18781_v38  ;;  %vm18790_vm15 = vmmov %vm18784_vm0  ;;  %v18799_v44 = vld [vmem:[#allocation63_spill] sm:$0xff] }
 0xad7   : > { %8721 = vmatpush.xpose.msk.msrb.mxu3 %vm18768_vm4, %v8175_v50  ;;  %v2492_v51 = vsel %vm2489_vm3, %v2491_v63, %v2487_v17  ;;  %v8178_v40 = vlaneseq  ;;  %v18787_v60 = vmov 0.0   ;;  %vm18792_vm8 = vmmov %vm18784_vm0  ;;  %v2355_v25 = vand.u32 2147483648, %v18781_v38 }
 0xad8   : > { %v8044_v28 = vadd.f32 %v8012_v5, %v2508_v27  ;;  %v2493_v35 = vmul.f32 %v2492_v51, %v2084_v54  ;;  %vm18793_vm9 = vmmov %vm18784_vm0  ;;  %vm2349_vm6 = vweird.f32 %v18781_v38  ;;  %v2353_v24 = vand.u32 2147483647, %v18781_v38 }
 0xad9   : > { %v8179_v15 = vshrl.u32 %v8178_v40, 7  ;;  %v8182_v34 = vand.u32 127, %v8178_v40  ;;  %vm18795_vm4 = vmmov %vm18784_vm0  ;;  %v2356_v22 = vor.u32 1.1754944e-38, %v2355_v25  ;;  %v2057_v7 = vadd.f32 %v18799_v44, %v18798_v21 }
 0xada   : > { %v8043_v4 = vadd.f32 %v18777_v48, %v2493_v35  ;;  %v8172_v10 = vadd.f32 %v18778_v47, %v8044_v28 }
 0xadb   : > { %8722 = vmatpush.xpose.msk.msrb.mxu3 %vm18772_vm7, %v8174_v29  ;;  %vm8183_vm2 = vcmp.eq.s32.totalorder %v8179_v15, %v8182_v34  ;;  %v8180_v19 = vadd.s32 8, %v8179_v15  ;;  %vm18797_vm7 = vmmov %vm18784_vm0 }
 0xadc   : > { %v8171_v57 = vadd.f32 %v18780_v20, %v8043_v4  ;;  %v9762_v3 = vpop.eup %9761  ;;  %v8699_v18 = vsel %vm8183_vm2, 1.0, %v18787_v60  ;;  %vm18806_vm2 = vmmov %vm18784_vm0 }
 0xadd   : > { %v2345_v45 = vmul.f32 %v9762_v3, %v18781_v38  ;;  %8717 = vmatmul.msk.f32.vlgmr.msra.gmra.mxu0 %vm18788_vm14, %v8699_v18  ;;  %vm8184_vm10 = vcmp.eq.s32.totalorder %v8180_v19, %v8182_v34  ;;  %vm2350_vm5 = vweird.f32 %v9762_v3 }
 0xade   : > { %v8700_v8 = vsel %vm8184_vm10, 1.0, %v18787_v60  ;;  %vm2351_vm3 = vmor %vm2349_vm6, %vm2350_vm5 }
 0xadf   : > { %8723 = vmatpush.xpose.msk.msrb.mxu3 %vm18776_vm11, %v8173_v0  ;;  %v2346_v30 = vsub.f32 1.0, %v2345_v45  ;;  %vm2354_vm11 = vcmp.eq.f32.partialorder %v2353_v24, 8.507059e+37 }
 0xae1   : > { %v2347_v9 = vmul.f32 %v9762_v3, %v2346_v30 }
 0xae3   : > { %8724 = vmatpush.xpose.msk.msrb.mxu3 %vm18779_vm13, %v8172_v10  ;;  %v2348_v6 = vadd.f32 %v9762_v3, %v2347_v9  ;;  %vm18801_vm13 = vmmov %vm18784_vm0 }
 0xae5   : > { %8718 = vmatmul.msk.f32.gmra.mxu0 %vm18793_vm9, %v8700_v8  ;;  %v2352_v53 = vsel %vm2351_vm3, %v9762_v3, %v2348_v6 }
 0xae6   : > { %v2357_v11 = vsel %vm2354_vm11, %v2356_v22, %v2352_v53 }
 0xae7   : > { %8725 = vmatpush.xpose.msk.msrb.mxu3 %vm18782_vm1, %v8171_v57  ;;  %v2358_v13 = vmul.f32 %v2357_v11, %v2057_v7  ;;  %vm18804_vm1 = vmmov %vm18784_vm0 }
 0xae9   : > { %v8034_v50 = vadd.f32 %v18802_v32, %v2358_v13 }
 0xaeb   : > { %8726 = vmatpush.xpose.msk.msrb.mxu3 %vm18784_vm0, %v18783_v37  ;;  %v8162_v61 = vadd.f32 %v8083_v16, %v8034_v50 }
 0xaef   : > { %8727 = vmatpush.xpose.msk.msrb.mxu3 %vm18786_vm12, %v18785_v55  ;;  %vm18805_vm12 = vmmov %vm18784_vm0 }
 0xaf3   : > { %8728 = vmatpush.xpose.msk.msrb.mxu3 %vm18790_vm15, %v18789_v39 }
 0xaf7   : > { %8729 = vmatpush.xpose.msk.msrb.mxu3 %vm18792_vm8, %v18791_v36 }
 0xafb   : > { %8730 = vmatpush.xpose.msk.msrb.mxu3 %vm18795_vm4, %v18794_v46 }
 0xaff   : > { %8731 = vmatpush.xpose.msk.msrb.mxu3 %vm18797_vm7, %v18796_v2 }
 0xb03   : > { %8732 = vmatpush.xpose.msk.msrb.mxu3 %vm18801_vm13, %v18800_v59 }
 0xb07   : > { %8733 = vmatpush.xpose.msk.msrb.mxu3 %vm18804_vm1, %v18803_v23 }
 0xb0b   : > { %8734 = vmatpush.xpose.msk.msrb.mxu3 %vm18784_vm0, %v8162_v61 }
 0xb0e   : > { %8735 = vmatmul.msk.f32.vlgmr.msrb.gmra.mxu3 %vm18805_vm12, %v8699_v18 }
 0xb16   : > { %8736 = vmatmul.msk.f32.gmra.mxu3 %vm18806_vm2, %v8700_v8 }
 0xb5a   : > { %v8308_v52 = vpop.f32.mrf.mxu0 }
 0xb5b   : > { %8337 = vst [vmem:[%s460_s27] sm:$0xff] %v8308_v52 }
 0xb62   : > { %v8311_v12 = vpop.f32.mrf.mxu0 }
 0xb63   : > { %8339 = vst [vmem:[%s460_s27 + $0x10] sm:$0xff] %v8311_v12 }
 0xb91   : > { %v8331_v1 = vpop.f32.mrf.mxu3 }
 0xb92   : > { %8338 = vst [vmem:[%s460_s27 + $0x8] sm:$0xff] %v8331_v1 }
 0xb99   : > { %v8334_v58 = vpop.f32.mrf.mxu3 }
 0xb9a   : > { %8340 = vst [vmem:[%s460_s27 + $0x18] sm:$0xff] %v8334_v58 }
 0xb9b   : > { %9846 = shalt.err (!%p9843_p4)
}
 0xb9c   : > { %s9898_s30 = smov 256   ;;  %s18809_s27 = smov 16  }
 0xb9d   : > { %8752 = dma.vmem_to_hbm [thread:$0]  (%p10019_p11), %s8355_s21, 512, %s8357_s24, %s8342_s13, %s9898_s30, %s9898_s30, %s18809_s27  }
 0xb9e PF: > { %s18810_s23 = sld [smem:[#allocation10_spill]]  ;;  %p18812_p7 = scmp.ge.s32.totalorder %s9885_s28, 2 }
 0xba0   : > { %p8759_p5 = pnand %p18812_p7, %p10023_p12 }
 0xba2   : > { %p8760_p8 = pneg %p8759_p5 }
 0xba4   : > { %s8371_s0 = sand.u32 1, %s18810_s23  }
 0xba5   : > { %s8372_s29 = scalar_lea.sflag [#allocation6], %s8371_s0 }
 0xba6   : > { %9868 = dma.done.wait (%p8760_p8), %s8372_s29, 512  }
 0xba7   : > { %9870 = vsyncadd (%p8760_p8), %s8372_s29, 4294966784  ;;  %s18813_s28 = sld [smem:[#allocation12_spill]]  ;;  %s18816_s25 = smov %s9877_s26 }
 0xba8   : > { %s18814_s19 = sld [smem:[#allocation11_spill]] }
 0xba9   : > { %s18815_s27 = sld [smem:[#allocation13_spill]] }
 0xbad   : > { %p26_p10 = scmp.ge.s32.totalorder %s18813_s28, 4  }
 0xbae   : > { %s18817_s26 = smov %s18814_s19 }
 0xbaf   :  { %28 = sbr.rel (!%p26_p10) target bundleno = 8 (0x8), region = 128 }
 0xbb4   :  { %8378 = vsyncpa [#allocation5], 1 }
 0xbb5   :  { %8380 = vsyncpa [#allocation5 + $0x1], 1 }
 0xbb6   :  { %8381 = vsyncpa [#allocation6], 1 }
 0xbb7   :  { %8383 = vsyncpa [#allocation6 + $0x1], 1 }

</bundles_post_ra>
